<compile_context>
chip_gen: v7x
topology: tpu7x:2x2x1
jax: 0.10.0
libtpu: 0.0.40
codegen_flags: <defaults>
</compile_context>

<pallas_src>
import jax
import jax.numpy as jnp
from jax import lax
from jax.experimental import pallas as pl
from jax.experimental.pallas import tpu as pltpu


# ---------------------------------------------------------------------------
# Conv GEMM kernel: out = relu(x @ w + b).  Full-K / full-N blocks.
# ---------------------------------------------------------------------------
def _gemm_bias_relu_kernel(x_ref, w_ref, b_ref, o_ref):
    acc = jnp.dot(x_ref[...], w_ref[...], preferred_element_type=jnp.float32)
    o_ref[...] = jnp.maximum(acc + b_ref[...], 0.0).astype(o_ref.dtype)


def gemm_bias_relu(x, w, b2d, *, tm_max=2048, tm_tile=512):
    """relu(x @ w + b) with small K, N.

    Small M (padded only to a multiple of 8) -> single full-extent block.
    Large M -> tiled over M at tm_tile with "parallel" semantics (megacore).
    """
    M, K = x.shape
    K2, N = w.shape
    assert K == K2, (K, K2)

    Mp = 8 * pl.cdiv(M, 8)
    if Mp <= tm_max:
        tm, grid_m = Mp, 1
    else:
        tm = tm_tile
        Mp = tm * pl.cdiv(M, tm)
        grid_m = Mp // tm
    if Mp != M:
        x = jnp.zeros((Mp, K), x.dtype).at[:M].set(x)

    out = pl.pallas_call(
        _gemm_bias_relu_kernel,
        out_shape=jax.ShapeDtypeStruct((Mp, N), jnp.float32),
        grid_spec=pltpu.PrefetchScalarGridSpec(
            num_scalar_prefetch=0,
            grid=(grid_m,),
            in_specs=[
                pl.BlockSpec((tm, K), lambda i: (i, 0)),
                pl.BlockSpec((K, N), lambda i: (0, 0)),   # whole weight, fetched once
                pl.BlockSpec((1, N), lambda i: (0, 0)),
            ],
            out_specs=pl.BlockSpec((tm, N), lambda i: (i, 0)),
        ),
        compiler_params=pltpu.CompilerParams(
            dimension_semantics=(("parallel",) if grid_m > 1 else ("arbitrary",)),
        ),
    )(x, w, b2d)
    return out if Mp == M else out[:M]


# ---------------------------------------------------------------------------
# Final Linear kernel: out = x @ w + b with tiny M (=batch) and N (=10).
# K is chunked on a short grid; the output block is the resident accumulator.
# ---------------------------------------------------------------------------
def _fc_kernel(x_ref, w_ref, b_ref, o_ref):
    @pl.when(pl.program_id(0) == 0)
    def _():
        o_ref[...] = jnp.broadcast_to(b_ref[...], o_ref.shape)

    o_ref[...] += jnp.dot(
        x_ref[...], w_ref[...], preferred_element_type=jnp.float32
    )


def fc_bias(x, w, b2d, *, tk=2816):
    """x @ w + b.  M padded only to the f32 sublane minimum (8); N unpadded;
    K reduced over Kp//tk grid steps (tk must be a multiple of 128)."""
    assert tk % 128 == 0
    M, K = x.shape
    K2, N = w.shape
    assert K == K2, (K, K2)

    Mp = 8 * pl.cdiv(M, 8)             # 8, not 128
    Kp = tk * pl.cdiv(K, tk)
    if (Mp, Kp) != (M, K):
        x = jnp.zeros((Mp, Kp), x.dtype).at[:M, :K].set(x)
    if Kp != K:                        # not hit for this model (30976 % 2816 == 0)
        w = jnp.zeros((Kp, N), w.dtype).at[:K].set(w)

    out = pl.pallas_call(
        _fc_kernel,
        out_shape=jax.ShapeDtypeStruct((Mp, N), jnp.float32),
        grid_spec=pltpu.PrefetchScalarGridSpec(
            num_scalar_prefetch=0,
            grid=(Kp // tk,),
            in_specs=[
                pl.BlockSpec((Mp, tk), lambda k: (0, k)),
                pl.BlockSpec((tk, N), lambda k: (k, 0)),
                pl.BlockSpec((1, N), lambda k: (0, 0)),
            ],
            out_specs=pl.BlockSpec((Mp, N), lambda k: (0, 0)),  # resident accumulator
        ),
        compiler_params=pltpu.CompilerParams(
            dimension_semantics=("arbitrary",),
        ),
    )(x, w, b2d)
    return out[:M]


# ---------------------------------------------------------------------------
# Conv2d (valid padding, stride 1) via im2col + fused Pallas GEMM
# ---------------------------------------------------------------------------
def conv2d_relu(x_nhwc, wm, b2d, *, kh=3, kw=3):
    N, H, W, C = x_nhwc.shape
    K, Cout = wm.shape
    assert K == kh * kw * C, (K, kh, kw, C)
    Ho, Wo = H - kh + 1, W - kw + 1

    # im2col glue: tap index = i*kw + j, matching the (KH, KW, Cin) flatten of wm.
    patches = jnp.stack(
        [x_nhwc[:, i:i + Ho, j:j + Wo, :] for i in range(kh) for j in range(kw)],
        axis=3,
    )
    pm = patches.reshape(N * Ho * Wo, K)
    out = gemm_bias_relu(pm, wm, b2d)
    return out.reshape(N, Ho, Wo, Cout)


# ---------------------------------------------------------------------------
# Param preparation (one-time, outside the jitted forward)
# ---------------------------------------------------------------------------
def prepare_params(params):
    """Convert PyTorch-layout params to kernel layout once at init."""
    H = W = 22
    C = 64
    # FC weight rows are in PyTorch NCHW-flatten order (c, h, w); permute them
    # to NHWC-flatten order (h, w, c) so the forward never transposes the
    # activation before the Linear.
    w_fc = (params["w_fc"].reshape(C, H, W, 10)
            .transpose(1, 2, 0, 3).reshape(H * W * C, 10))
    return {
        "w1": params["w1"].reshape(-1, 32), "b1": params["b1"].reshape(1, -1),
        "w2": params["w2"].reshape(-1, 64), "b2": params["b2"].reshape(1, -1),
        "w3": params["w3"].reshape(-1, 64), "b3": params["b3"].reshape(1, -1),
        "w_fc": w_fc, "b_fc": params["b_fc"].reshape(1, -1),
    }


# ---------------------------------------------------------------------------
# Full ImageClassifier forward (expects prepared params)
# ---------------------------------------------------------------------------
def image_classifier_forward(x_nchw, kp):
    x = jnp.transpose(x_nchw, (0, 2, 3, 1)).astype(jnp.float32)  # NCHW -> NHWC
    x = conv2d_relu(x, kp["w1"], kp["b1"])   # (N, 26, 26, 32)
    x = conv2d_relu(x, kp["w2"], kp["b2"])   # (N, 24, 24, 64)
    x = conv2d_relu(x, kp["w3"], kp["b3"])   # (N, 22, 22, 64)
    # Flatten directly in NHWC order; FC weight rows were pre-permuted to match
    # PyTorch's NCHW flatten semantics.
    x = x.reshape(x.shape[0], -1)            # (N, 30976)
    return fc_bias(x, kp["w_fc"], kp["b_fc"])  # (N, 10)


# Pure-JAX reference (XLA conv, PyTorch-layout params) for correctness check.
def reference_forward(x_nchw, params):
    x = jnp.transpose(x_nchw, (0, 2, 3, 1)).astype(jnp.float32)
    for w, b in ((params["w1"], params["b1"]),
                 (params["w2"], params["b2"]),
                 (params["w3"], params["b3"])):
        x = lax.conv_general_dilated(
            x, w, (1, 1), "VALID",
            dimension_numbers=("NHWC", "HWIO", "NHWC"))
        x = jnp.maximum(x + b, 0.0)
    x = jnp.transpose(x, (0, 3, 1, 2)).reshape(x.shape[0], -1)   # NCHW flatten
    return x @ params["w_fc"] + params["b_fc"]


def init_params(key):
    ks = jax.random.split(key, 8)
    return {
        "w1": jax.random.normal(ks[0], (3, 3, 1, 32), jnp.float32) * 0.05,
        "b1": jax.random.normal(ks[1], (32,), jnp.float32) * 0.05,
        "w2": jax.random.normal(ks[2], (3, 3, 32, 64), jnp.float32) * 0.05,
        "b2": jax.random.normal(ks[3], (64,), jnp.float32) * 0.05,
        "w3": jax.random.normal(ks[4], (3, 3, 64, 64), jnp.float32) * 0.05,
        "b3": jax.random.normal(ks[5], (64,), jnp.float32) * 0.05,
        # PyTorch Linear weight is (10, 30976); stored pre-transposed, rows in
        # PyTorch NCHW-flatten order.
        "w_fc": jax.random.normal(ks[6], (64 * 22 * 22, 10), jnp.float32) * 0.01,
        "b_fc": jax.random.normal(ks[7], (10,), jnp.float32) * 0.01,
    }


if __name__ == "__main__":
    key = jax.random.PRNGKey(0)
    pkey, xkey = jax.random.split(key)
    params = init_params(pkey)
    kparams = prepare_params(params)   # one-time layout prep, outside jit

    # Module dictates 1x28x28 input (Linear expects 64*22*22); batch = 2.
    x = jax.random.normal(xkey, (2, 1, 28, 28), jnp.float32)

    fwd = jax.jit(image_classifier_forward)
    logits = fwd(x, kparams)
    jax.block_until_ready(logits)

    assert logits.shape == (2, 10), logits.shape

    ref = reference_forward(x, params)
    assert jnp.allclose(logits, ref, rtol=1e-3, atol=1e-3), (
        "mismatch vs reference", float(jnp.max(jnp.abs(logits - ref))))

    print("KERNEL_OK")
</pallas_src>

<mosaic_0001>
module attributes {stable_mosaic.version = 11 : i64} {
  func.func @_gemm_bias_relu_kernel(%arg0: i32, %arg1: memref<1352x9xf32, #tpu.memory_space<vmem>>, %arg2: memref<9x32xf32, #tpu.memory_space<vmem>>, %arg3: memref<1x32xf32, #tpu.memory_space<vmem>>, %arg4: memref<1352x32xf32, #tpu.memory_space<vmem>>) attributes {dimension_semantics = [#tpu.dimension_semantics<arbitrary>], iteration_bounds = array<i64: 1>, scalar_prefetch = 0 : i64, scratch_operands = 0 : i64, tpu.core_type = #tpu.core_type<tc>, window_params = [{transform_indices = @transform_0, window_bounds = array<i64: 1352, 9>}, {pipeline_mode = #tpu.pipeline_mode<synchronous>, transform_indices = @transform_1, window_bounds = array<i64: 9, 32>}, {pipeline_mode = #tpu.pipeline_mode<synchronous>, transform_indices = @transform_2, window_bounds = array<i64: 1, 32>}, {transform_indices = @transform_3, window_bounds = array<i64: 1352, 32>}]} {
    %c0 = arith.constant 0 : index
    %c0_0 = arith.constant 0 : index
    %0 = vector.load %arg1[%c0, %c0_0] : memref<1352x9xf32, #tpu.memory_space<vmem>>, vector<1352x9xf32>
    %c0_1 = arith.constant 0 : index
    %c0_2 = arith.constant 0 : index
    %1 = vector.load %arg2[%c0_1, %c0_2] : memref<9x32xf32, #tpu.memory_space<vmem>>, vector<9x32xf32>
    %cst = arith.constant dense<0.000000e+00> : vector<1352x32xf32>
    %2 = tpu.matmul %0, %1, %cst {dimension_numbers = #tpu.dot_dimension_numbers<[1], [0], [0], [1], [0, 0, 1, 1], [], []>} : vector<1352x9xf32>, vector<9x32xf32>, vector<1352x32xf32> -> vector<1352x32xf32>
    %c0_3 = arith.constant 0 : index
    %c0_4 = arith.constant 0 : index
    %3 = vector.load %arg3[%c0_3, %c0_4] : memref<1x32xf32, #tpu.memory_space<vmem>>, vector<1x32xf32>
    %4 = vector.broadcast %3 : vector<1x32xf32> to vector<1352x32xf32>
    %5 = arith.addf %2, %4 : vector<1352x32xf32>
    %cst_5 = arith.constant 0.000000e+00 : f32
    %6 = vector.broadcast %cst_5 : f32 to vector<1352x32xf32>
    %7 = arith.maximumf %5, %6 : vector<1352x32xf32>
    %c0_6 = arith.constant 0 : index
    %c0_7 = arith.constant 0 : index
    %8 = vector.load %arg4[%c0_6, %c0_7] : memref<1352x32xf32, #tpu.memory_space<vmem>>, vector<1352x32xf32>
    tpu.vector_store %arg4[%c0_6, %c0_7], %7 {strides = array<i32>} : memref<1352x32xf32, #tpu.memory_space<vmem>>, vector<1352x32xf32>,
    return
  }
  func.func @transform_0(%arg0: i32) -> (i32, i32) {
    %c0_i32 = arith.constant 0 : i32
    %c0_i32_0 = arith.constant 0 : i32
    return %arg0, %c0_i32 : i32, i32
  }
  func.func @transform_1(%arg0: i32) -> (i32, i32) {
    %c0_i32 = arith.constant 0 : i32
    %c0_i32_0 = arith.constant 0 : i32
    %c0_i32_1 = arith.constant 0 : i32
    return %c0_i32, %c0_i32_0 : i32, i32
  }
  func.func @transform_2(%arg0: i32) -> (i32, i32) {
    %c0_i32 = arith.constant 0 : i32
    %c0_i32_0 = arith.constant 0 : i32
    %c0_i32_1 = arith.constant 0 : i32
    return %c0_i32, %c0_i32_0 : i32, i32
  }
  func.func @transform_3(%arg0: i32) -> (i32, i32) {
    %c0_i32 = arith.constant 0 : i32
    %c0_i32_0 = arith.constant 0 : i32
    return %arg0, %c0_i32 : i32, i32
  }
}

module attributes {stable_mosaic.version = 11 : i64} {
  func.func @_gemm_bias_relu_kernel(%arg0: i32, %arg1: memref<1152x288xf32, #tpu.memory_space<vmem>>, %arg2: memref<288x64xf32, #tpu.memory_space<vmem>>, %arg3: memref<1x64xf32, #tpu.memory_space<vmem>>, %arg4: memref<1152x64xf32, #tpu.memory_space<vmem>>) attributes {dimension_semantics = [#tpu.dimension_semantics<arbitrary>], iteration_bounds = array<i64: 1>, scalar_prefetch = 0 : i64, scratch_operands = 0 : i64, tpu.core_type = #tpu.core_type<tc>, window_params = [{transform_indices = @transform_0, window_bounds = array<i64: 1152, 288>}, {pipeline_mode = #tpu.pipeline_mode<synchronous>, transform_indices = @transform_1, window_bounds = array<i64: 288, 64>}, {pipeline_mode = #tpu.pipeline_mode<synchronous>, transform_indices = @transform_2, window_bounds = array<i64: 1, 64>}, {transform_indices = @transform_3, window_bounds = array<i64: 1152, 64>}]} {
    %c0 = arith.constant 0 : index
    %c0_0 = arith.constant 0 : index
    %0 = vector.load %arg1[%c0, %c0_0] : memref<1152x288xf32, #tpu.memory_space<vmem>>, vector<1152x288xf32>
    %c0_1 = arith.constant 0 : index
    %c0_2 = arith.constant 0 : index
    %1 = vector.load %arg2[%c0_1, %c0_2] : memref<288x64xf32, #tpu.memory_space<vmem>>, vector<288x64xf32>
    %cst = arith.constant dense<0.000000e+00> : vector<1152x64xf32>
    %2 = tpu.matmul %0, %1, %cst {dimension_numbers = #tpu.dot_dimension_numbers<[1], [0], [0], [1], [0, 0, 1, 1], [], []>} : vector<1152x288xf32>, vector<288x64xf32>, vector<1152x64xf32> -> vector<1152x64xf32>
    %c0_3 = arith.constant 0 : index
    %c0_4 = arith.constant 0 : index
    %3 = vector.load %arg3[%c0_3, %c0_4] : memref<1x64xf32, #tpu.memory_space<vmem>>, vector<1x64xf32>
    %4 = vector.broadcast %3 : vector<1x64xf32> to vector<1152x64xf32>
    %5 = arith.addf %2, %4 : vector<1152x64xf32>
    %cst_5 = arith.constant 0.000000e+00 : f32
    %6 = vector.broadcast %cst_5 : f32 to vector<1152x64xf32>
    %7 = arith.maximumf %5, %6 : vector<1152x64xf32>
    %c0_6 = arith.constant 0 : index
    %c0_7 = arith.constant 0 : index
    %8 = vector.load %arg4[%c0_6, %c0_7] : memref<1152x64xf32, #tpu.memory_space<vmem>>, vector<1152x64xf32>
    tpu.vector_store %arg4[%c0_6, %c0_7], %7 {strides = array<i32>} : memref<1152x64xf32, #tpu.memory_space<vmem>>, vector<1152x64xf32>,
    return
  }
  func.func @transform_0(%arg0: i32) -> (i32, i32) {
    %c0_i32 = arith.constant 0 : i32
    %c0_i32_0 = arith.constant 0 : i32
    return %arg0, %c0_i32 : i32, i32
  }
  func.func @transform_1(%arg0: i32) -> (i32, i32) {
    %c0_i32 = arith.constant 0 : i32
    %c0_i32_0 = arith.constant 0 : i32
    %c0_i32_1 = arith.constant 0 : i32
    return %c0_i32, %c0_i32_0 : i32, i32
  }
  func.func @transform_2(%arg0: i32) -> (i32, i32) {
    %c0_i32 = arith.constant 0 : i32
    %c0_i32_0 = arith.constant 0 : i32
    %c0_i32_1 = arith.constant 0 : i32
    return %c0_i32, %c0_i32_0 : i32, i32
  }
  func.func @transform_3(%arg0: i32) -> (i32, i32) {
    %c0_i32 = arith.constant 0 : i32
    %c0_i32_0 = arith.constant 0 : i32
    return %arg0, %c0_i32 : i32, i32
  }
}

module attributes {stable_mosaic.version = 11 : i64} {
  func.func @_gemm_bias_relu_kernel(%arg0: i32, %arg1: memref<968x576xf32, #tpu.memory_space<vmem>>, %arg2: memref<576x64xf32, #tpu.memory_space<vmem>>, %arg3: memref<1x64xf32, #tpu.memory_space<vmem>>, %arg4: memref<968x64xf32, #tpu.memory_space<vmem>>) attributes {dimension_semantics = [#tpu.dimension_semantics<arbitrary>], iteration_bounds = array<i64: 1>, scalar_prefetch = 0 : i64, scratch_operands = 0 : i64, tpu.core_type = #tpu.core_type<tc>, window_params = [{transform_indices = @transform_0, window_bounds = array<i64: 968, 576>}, {pipeline_mode = #tpu.pipeline_mode<synchronous>, transform_indices = @transform_1, window_bounds = array<i64: 576, 64>}, {pipeline_mode = #tpu.pipeline_mode<synchronous>, transform_indices = @transform_2, window_bounds = array<i64: 1, 64>}, {transform_indices = @transform_3, window_bounds = array<i64: 968, 64>}]} {
    %c0 = arith.constant 0 : index
    %c0_0 = arith.constant 0 : index
    %0 = vector.load %arg1[%c0, %c0_0] : memref<968x576xf32, #tpu.memory_space<vmem>>, vector<968x576xf32>
    %c0_1 = arith.constant 0 : index
    %c0_2 = arith.constant 0 : index
    %1 = vector.load %arg2[%c0_1, %c0_2] : memref<576x64xf32, #tpu.memory_space<vmem>>, vector<576x64xf32>
    %cst = arith.constant dense<0.000000e+00> : vector<968x64xf32>
    %2 = tpu.matmul %0, %1, %cst {dimension_numbers = #tpu.dot_dimension_numbers<[1], [0], [0], [1], [0, 0, 1, 1], [], []>} : vector<968x576xf32>, vector<576x64xf32>, vector<968x64xf32> -> vector<968x64xf32>
    %c0_3 = arith.constant 0 : index
    %c0_4 = arith.constant 0 : index
    %3 = vector.load %arg3[%c0_3, %c0_4] : memref<1x64xf32, #tpu.memory_space<vmem>>, vector<1x64xf32>
    %4 = vector.broadcast %3 : vector<1x64xf32> to vector<968x64xf32>
    %5 = arith.addf %2, %4 : vector<968x64xf32>
    %cst_5 = arith.constant 0.000000e+00 : f32
    %6 = vector.broadcast %cst_5 : f32 to vector<968x64xf32>
    %7 = arith.maximumf %5, %6 : vector<968x64xf32>
    %c0_6 = arith.constant 0 : index
    %c0_7 = arith.constant 0 : index
    %8 = vector.load %arg4[%c0_6, %c0_7] : memref<968x64xf32, #tpu.memory_space<vmem>>, vector<968x64xf32>
    tpu.vector_store %arg4[%c0_6, %c0_7], %7 {strides = array<i32>} : memref<968x64xf32, #tpu.memory_space<vmem>>, vector<968x64xf32>,
    return
  }
  func.func @transform_0(%arg0: i32) -> (i32, i32) {
    %c0_i32 = arith.constant 0 : i32
    %c0_i32_0 = arith.constant 0 : i32
    return %arg0, %c0_i32 : i32, i32
  }
  func.func @transform_1(%arg0: i32) -> (i32, i32) {
    %c0_i32 = arith.constant 0 : i32
    %c0_i32_0 = arith.constant 0 : i32
    %c0_i32_1 = arith.constant 0 : i32
    return %c0_i32, %c0_i32_0 : i32, i32
  }
  func.func @transform_2(%arg0: i32) -> (i32, i32) {
    %c0_i32 = arith.constant 0 : i32
    %c0_i32_0 = arith.constant 0 : i32
    %c0_i32_1 = arith.constant 0 : i32
    return %c0_i32, %c0_i32_0 : i32, i32
  }
  func.func @transform_3(%arg0: i32) -> (i32, i32) {
    %c0_i32 = arith.constant 0 : i32
    %c0_i32_0 = arith.constant 0 : i32
    return %arg0, %c0_i32 : i32, i32
  }
}

module attributes {stable_mosaic.version = 11 : i64} {
  func.func @_fc_kernel(%arg0: i32, %arg1: memref<8x2816xf32, #tpu.memory_space<vmem>>, %arg2: memref<2816x10xf32, #tpu.memory_space<vmem>>, %arg3: memref<1x10xf32, #tpu.memory_space<vmem>>, %arg4: memref<8x10xf32, #tpu.memory_space<vmem>>) attributes {dimension_semantics = [#tpu.dimension_semantics<arbitrary>], iteration_bounds = array<i64: 11>, scalar_prefetch = 0 : i64, scratch_operands = 0 : i64, tpu.core_type = #tpu.core_type<tc>, window_params = [{transform_indices = @transform_0, window_bounds = array<i64: 8, 2816>}, {transform_indices = @transform_1, window_bounds = array<i64: 2816, 10>}, {pipeline_mode = #tpu.pipeline_mode<synchronous>, transform_indices = @transform_2, window_bounds = array<i64: 1, 10>}, {pipeline_mode = #tpu.pipeline_mode<synchronous>, transform_indices = @transform_3, window_bounds = array<i64: 8, 10>}]} {
    %c0_i32 = arith.constant 0 : i32
    %0 = arith.cmpi eq, %arg0, %c0_i32 : i32
    %1 = arith.extui %0 : i1 to i32
    %c0_i32_0 = arith.constant 0 : i32
    %2 = arith.cmpi ne, %1, %c0_i32_0 : i32
    scf.if %2 {
      %c0_8 = arith.constant 0 : index
      %c0_9 = arith.constant 0 : index
      %9 = vector.load %arg3[%c0_8, %c0_9] : memref<1x10xf32, #tpu.memory_space<vmem>>, vector<1x10xf32>
      %10 = vector.shape_cast %9 : vector<1x10xf32> to vector<1x10xf32>
      %11 = vector.broadcast %10 : vector<1x10xf32> to vector<8x10xf32>
      %c0_10 = arith.constant 0 : index
      %c0_11 = arith.constant 0 : index
      %12 = vector.load %arg4[%c0_10, %c0_11] : memref<8x10xf32, #tpu.memory_space<vmem>>, vector<8x10xf32>
      tpu.vector_store %arg4[%c0_10, %c0_11], %11 {strides = array<i32>} : memref<8x10xf32, #tpu.memory_space<vmem>>, vector<8x10xf32>,
    } else {
    }
    %c0 = arith.constant 0 : index
    %c0_1 = arith.constant 0 : index
    %3 = vector.load %arg4[%c0, %c0_1] : memref<8x10xf32, #tpu.memory_space<vmem>>, vector<8x10xf32>
    %c0_2 = arith.constant 0 : index
    %c0_3 = arith.constant 0 : index
    %4 = vector.load %arg1[%c0_2, %c0_3] : memref<8x2816xf32, #tpu.memory_space<vmem>>, vector<8x2816xf32>
    %c0_4 = arith.constant 0 : index
    %c0_5 = arith.constant 0 : index
    %5 = vector.load %arg2[%c0_4, %c0_5] : memref<2816x10xf32, #tpu.memory_space<vmem>>, vector<2816x10xf32>
    %cst = arith.constant dense<0.000000e+00> : vector<8x10xf32>
    %6 = tpu.matmul %4, %5, %cst {dimension_numbers = #tpu.dot_dimension_numbers<[1], [0], [0], [1], [0, 0, 1, 1], [], []>} : vector<8x2816xf32>, vector<2816x10xf32>, vector<8x10xf32> -> vector<8x10xf32>
    %7 = arith.addf %3, %6 : vector<8x10xf32>
    %c0_6 = arith.constant 0 : index
    %c0_7 = arith.constant 0 : index
    %8 = vector.load %arg4[%c0_6, %c0_7] : memref<8x10xf32, #tpu.memory_space<vmem>>, vector<8x10xf32>
    tpu.vector_store %arg4[%c0_6, %c0_7], %7 {strides = array<i32>} : memref<8x10xf32, #tpu.memory_space<vmem>>, vector<8x10xf32>,
    return
  }
  func.func @transform_0(%arg0: i32) -> (i32, i32) {
    %c0_i32 = arith.constant 0 : i32
    %c0_i32_0 = arith.constant 0 : i32
    return %c0_i32, %arg0 : i32, i32
  }
  func.func @transform_1(%arg0: i32) -> (i32, i32) {
    %c0_i32 = arith.constant 0 : i32
    %c0_i32_0 = arith.constant 0 : i32
    return %arg0, %c0_i32 : i32, i32
  }
  func.func @transform_2(%arg0: i32) -> (i32, i32) {
    %c0_i32 = arith.constant 0 : i32
    %c0_i32_0 = arith.constant 0 : i32
    %c0_i32_1 = arith.constant 0 : i32
    return %c0_i32, %c0_i32_0 : i32, i32
  }
  func.func @transform_3(%arg0: i32) -> (i32, i32) {
    %c0_i32 = arith.constant 0 : i32
    %c0_i32_0 = arith.constant 0 : i32
    %c0_i32_1 = arith.constant 0 : i32
    return %c0_i32, %c0_i32_0 : i32, i32
  }
}

</mosaic_0001>

<bundles_post_ra>
// kernel: image_classifier_forward.4
= control target key start
LH: loop header
LB: loop body
LE: loop exit
PB: predicated region body
PF: predicated region fallthrough
CT: control target
= control target key end

     0   :  { %8 = vsyncpa [#allocation3], 0  ;;  %s4815_s0 = inlined_call_operand.vmem [shape: f32[1352,9], index: 0, kind: input, shape index: {}]   ;;  %s4816_s1 = inlined_call_operand.hbm [shape: f32[9,32], index: 1, kind: input, shape index: {}]   ;;  %s4817_s2 = inlined_call_operand.hbm [shape: f32[1,32], index: 2, kind: input, shape index: {}]   ;;  %s4818_s3 = inlined_call_operand.vmem [shape: f32[1352,32], index: 3, kind: output, shape index: {}]  }
   0x1   :  { %9 = vsyncpa [#allocation5], 0  ;;  %s2902_s12 = smov [#allocation2]   ;;  %s2854_s16 = scalar_lea.hbm %s4816_s1, 256 }
   0x2   :  { %s17_s13 = sshll.u32 %s2902_s12, 4  ;;  %p2855_p0 = scmp.ne.s32.totalorder %s4816_s1, %s2854_s16  ;;  %s18_s13 = int_to_ptr.vmem [resolvable:$true] %s17_s13 }
   0x3   :  { %p2858_p1 = scmp.lt.u32.totalorder %s2854_s16, %s4816_s1 }
   0x5   :  { %p2860_p2 = pnand %p2858_p1, %p2855_p0 }
   0x7   :  { %2863 = shalt.err (!%p2860_p2)
}
   0x8   :  { %s2864_s21 = scalar_lea.vmem %s18_s13, 256  ;;  %p2869_p4 = scmp.lt.s32.totalorder %s18_s13, %s18_s13 }
   0x9   :  { %p2865_p3 = scmp.ne.s32.totalorder %s18_s13, %s2864_s21  ;;  %p2870_p5 = scmp.lt.s32.totalorder %s2864_s21, %s2864_s21 }
   0xb   :  { %p2871_p6 = por %p2870_p5, %p2869_p4 }
   0xd   :  { %p2872_p7 = pnand %p2871_p6, %p2865_p3 }
   0xf   :  { %2875 = shalt.err (!%p2872_p7)
}
  0x10   :  { %s2903_s22 = smov 128   ;;  %s2904_s23 = smov 8  }
  0x11   :  { %23 = dma.hbm_to_vmem [thread:$0]  %s4816_s1, 256, %s18_s13, [#allocation3], %s2903_s22, %s2903_s22, %s2904_s23  }
  0x12   :  { %s2905_s26 = smov [#allocation4]   ;;  %s2876_s30 = scalar_lea.hbm %s4817_s2, 16 }
  0x13   :  { %s30_s27 = sshll.u32 %s2905_s26, 4  ;;  %p2877_p8 = scmp.ne.s32.totalorder %s4817_s2, %s2876_s30  ;;  %s31_s27 = int_to_ptr.vmem [resolvable:$true] %s30_s27 }
  0x14   :  { %p2880_p9 = scmp.lt.u32.totalorder %s2876_s30, %s4817_s2 }
  0x16   :  { %p2882_p10 = pnand %p2880_p9, %p2877_p8 }
  0x18   :  { %2885 = shalt.err (!%p2882_p10)
}
  0x19   :  { %s2886_s8 = scalar_lea.vmem %s31_s27, 16  ;;  %s2890_s1 = scalar_lea.vmem %s31_s27, 32 }
  0x1a   :  { %p2887_p11 = scmp.ne.s32.totalorder %s31_s27, %s2886_s8  ;;  %p2891_p12 = scmp.lt.s32.totalorder %s31_s27, %s31_s27 }
  0x1b   :  { %p2892_p13 = scmp.lt.s32.totalorder %s2890_s1, %s2886_s8 }
  0x1d   :  { %p2893_p0 = por %p2892_p13, %p2891_p12 }
  0x1f   :  { %p2894_p1 = pnand %p2893_p0, %p2887_p11 }
  0x21   :  { %2897 = shalt.err (!%p2894_p1)
}
  0x22   :  { %33 = dma.hbm_to_vmem [thread:$0]  %s4817_s2, 16, %s31_s27, [#allocation5]  }
  0x23   :  { %2898 = dma.done.wait [#allocation3], 256  }
  0x24   :  { %2899 = vsyncadd [#allocation3], 4294967040 }
  0x25   :  { %2900 = dma.done.wait [#allocation5], 16  }
  0x26   :  { %2901 = vsyncadd [#allocation5], 4294967280  ;;  %v2906_v0 = vmov 0.0|0.0   ;;  %vm2907_vm0 = vmmov 0   ;;  %v2908_v1 = vmov 0.0   ;;  %vm726_vm1 = vcmask 1040384  }
  0x27   :  { %2838 = vmatprep.subr.bf16.mxu0 %v2906_v0  ;;  %2842 = vmatprep.subr.bf16.mxu1 %v2906_v0  ;;  %v209_v2 = vld [vmem:[#allocation2] sm:$0xff]  ;;  %v210_v3 = vld [vmem:[#allocation2 + $0x8] sm:$0x1]  ;;  %vm2909_vm2 = vmmov 1   ;;  %vm218_vm4 = vcmask 72704   ;;  %v126_v8 = vld [vmem:[%s4815_s0 + $0x2b0] sm:$0xff] }
  0x28   :  { %2331 = vmatprep.mubr.msk.f32.mxu0 %vm2907_vm0, %v2908_v1  ;;  %2586 = vmatprep.mubr.msk.f32.mxu1 %vm2907_vm0, %v2908_v1  ;;  %vm2840_vm3 = vmpackc.low %vm726_vm1, %vm2909_vm2  ;;  %v2839_v4 = vpack.c.bf16 %v210_v3, %v209_v2  ;;  %v40_v5 = vld [vmem:[%s4815_s0] sm:$0xff]  ;;  %v125_v6 = vld [vmem:[%s4815_s0 + $0x2a8] sm:$0xff]  ;;  %vm1809_vm5 = vcmask 261120  }
  0x29   :  { %v41_v7 = vld [vmem:[%s4815_s0 + $0x8] sm:$0xff]  ;;  %v42_v9 = vld [vmem:[%s4815_s0 + $0x10] sm:$0xff]  ;;  %v127_v10 = vld [vmem:[%s4815_s0 + $0x2b8] sm:$0xff] }
  0x2a   :  { %2841 = vmatpush3.bf16.msk.msra.mxu0 %vm2840_vm3, %v2839_v4  ;;  %2843 = vmatpush3.bf16.msk.msra.mxu1 %vm2840_vm3, %v2839_v4  ;;  %v43_v11 = vld [vmem:[%s4815_s0 + $0x18] sm:$0xff]  ;;  %v128_v12 = vld [vmem:[%s4815_s0 + $0x2c0] sm:$0xff]  ;;  %v129_v14 = vld [vmem:[%s4815_s0 + $0x2c8] sm:$0xff] }
  0x2b   :  { %v44_v13 = vld [vmem:[%s4815_s0 + $0x20] sm:$0xff]  ;;  %v45_v15 = vld [vmem:[%s4815_s0 + $0x28] sm:$0xff]  ;;  %v130_v16 = vld [vmem:[%s4815_s0 + $0x2d0] sm:$0xff] }
  0x2c   :  { %v46_v17 = vld [vmem:[%s4815_s0 + $0x30] sm:$0xff]  ;;  %v131_v18 = vld [vmem:[%s4815_s0 + $0x2d8] sm:$0xff]  ;;  %v132_v20 = vld [vmem:[%s4815_s0 + $0x2e0] sm:$0xff] }
  0x2d   :  { %2332 = vmatmul.mubr.msk.f32.vlgmr.msra.gmra.mrb[0].mxu0 %vm218_vm4, %v40_v5  ;;  %2587 = vmatmul.mubr.msk.f32.vlgmr.msra.gmra.mrb[0].mxu1 %vm218_vm4, %v125_v6  ;;  %v47_v19 = vld [vmem:[%s4815_s0 + $0x38] sm:$0xff]  ;;  %v48_v21 = vld [vmem:[%s4815_s0 + $0x40] sm:$0xff]  ;;  %v133_v22 = vld [vmem:[%s4815_s0 + $0x2e8] sm:$0xff] }
  0x2e   :  { %2334 = vmatprep.mubr.msk.f32.mxu0 %vm2907_vm0, %v2908_v1  ;;  %2589 = vmatprep.mubr.msk.f32.mxu1 %vm2907_vm0, %v2908_v1  ;;  %v49_v23 = vld [vmem:[%s4815_s0 + $0x48] sm:$0xff]  ;;  %v134_v24 = vld [vmem:[%s4815_s0 + $0x2f0] sm:$0xff]  ;;  %v135_v26 = vld [vmem:[%s4815_s0 + $0x2f8] sm:$0xff] }
  0x2f   :  { %v50_v25 = vld [vmem:[%s4815_s0 + $0x50] sm:$0xff]  ;;  %v51_v27 = vld [vmem:[%s4815_s0 + $0x58] sm:$0xff]  ;;  %v136_v28 = vld [vmem:[%s4815_s0 + $0x300] sm:$0xff] }
  0x30   :  { %v52_v29 = vld [vmem:[%s4815_s0 + $0x60] sm:$0xff]  ;;  %v137_v30 = vld [vmem:[%s4815_s0 + $0x308] sm:$0xff]  ;;  %v138_v32 = vld [vmem:[%s4815_s0 + $0x310] sm:$0xff] }
  0x31   :  { %2335 = vmatmul.mubr.msk.f32.gmra.mrb[2].mxu0 %vm218_vm4, %v41_v7  ;;  %2590 = vmatmul.mubr.msk.f32.gmra.mrb[2].mxu1 %vm218_vm4, %v126_v8  ;;  %v53_v31 = vld [vmem:[%s4815_s0 + $0x68] sm:$0xff]  ;;  %v54_v33 = vld [vmem:[%s4815_s0 + $0x70] sm:$0xff]  ;;  %v139_v34 = vld [vmem:[%s4815_s0 + $0x318] sm:$0xff] }
  0x32   :  { %2337 = vmatprep.mubr.msk.f32.mxu0 %vm2907_vm0, %v2908_v1  ;;  %2592 = vmatprep.mubr.msk.f32.mxu1 %vm2907_vm0, %v2908_v1  ;;  %v55_v35 = vld [vmem:[%s4815_s0 + $0x78] sm:$0xff]  ;;  %v140_v36 = vld [vmem:[%s4815_s0 + $0x320] sm:$0xff]  ;;  %v141_v38 = vld [vmem:[%s4815_s0 + $0x328] sm:$0xff] }
  0x33   :  { %v56_v37 = vld [vmem:[%s4815_s0 + $0x80] sm:$0xff]  ;;  %v57_v39 = vld [vmem:[%s4815_s0 + $0x88] sm:$0xff]  ;;  %v142_v40 = vld [vmem:[%s4815_s0 + $0x330] sm:$0xff] }
  0x34   :  { %v58_v41 = vld [vmem:[%s4815_s0 + $0x90] sm:$0xff]  ;;  %v143_v42 = vld [vmem:[%s4815_s0 + $0x338] sm:$0xff]  ;;  %v144_v44 = vld [vmem:[%s4815_s0 + $0x340] sm:$0xff] }
  0x35   :  { %2338 = vmatmul.mubr.msk.f32.gmra.mrb[4].mxu0 %vm218_vm4, %v42_v9  ;;  %2593 = vmatmul.mubr.msk.f32.gmra.mrb[4].mxu1 %vm218_vm4, %v127_v10  ;;  %v59_v43 = vld [vmem:[%s4815_s0 + $0x98] sm:$0xff]  ;;  %v60_v45 = vld [vmem:[%s4815_s0 + $0xa0] sm:$0xff]  ;;  %v145_v46 = vld [vmem:[%s4815_s0 + $0x348] sm:$0xff] }
  0x36   :  { %2340 = vmatprep.mubr.msk.f32.mxu0 %vm2907_vm0, %v2908_v1  ;;  %2595 = vmatprep.mubr.msk.f32.mxu1 %vm2907_vm0, %v2908_v1  ;;  %v61_v47 = vld [vmem:[%s4815_s0 + $0xa8] sm:$0xff]  ;;  %v146_v48 = vld [vmem:[%s4815_s0 + $0x350] sm:$0xff]  ;;  %v147_v50 = vld [vmem:[%s4815_s0 + $0x358] sm:$0xff] }
  0x37   :  { %v62_v49 = vld [vmem:[%s4815_s0 + $0xb0] sm:$0xff]  ;;  %v63_v51 = vld [vmem:[%s4815_s0 + $0xb8] sm:$0xff]  ;;  %v148_v52 = vld [vmem:[%s4815_s0 + $0x360] sm:$0xff] }
  0x38   :  { %v64_v53 = vld [vmem:[%s4815_s0 + $0xc0] sm:$0xff]  ;;  %v149_v54 = vld [vmem:[%s4815_s0 + $0x368] sm:$0xff]  ;;  %v150_v56 = vld [vmem:[%s4815_s0 + $0x370] sm:$0xff] }
  0x39   :  { %2341 = vmatmul.mubr.msk.f32.gmra.mrb[6].mxu0 %vm218_vm4, %v43_v11  ;;  %2596 = vmatmul.mubr.msk.f32.gmra.mrb[6].mxu1 %vm218_vm4, %v128_v12  ;;  %v65_v55 = vld [vmem:[%s4815_s0 + $0xc8] sm:$0xff]  ;;  %v66_v57 = vld [vmem:[%s4815_s0 + $0xd0] sm:$0xff]  ;;  %v151_v58 = vld [vmem:[%s4815_s0 + $0x378] sm:$0xff] }
  0x3a   :  { %2343 = vmatprep.mubr.msk.f32.mxu0 %vm2907_vm0, %v2908_v1  ;;  %2598 = vmatprep.mubr.msk.f32.mxu1 %vm2907_vm0, %v2908_v1  ;;  %v67_v59 = vld [vmem:[%s4815_s0 + $0xd8] sm:$0xff]  ;;  %v152_v60 = vld [vmem:[%s4815_s0 + $0x380] sm:$0xff]  ;;  %v153_v62 = vld [vmem:[%s4815_s0 + $0x388] sm:$0xff] }
  0x3b   :  { %v68_v61 = vld [vmem:[%s4815_s0 + $0xe0] sm:$0xff]  ;;  %v69_v63 = vld [vmem:[%s4815_s0 + $0xe8] sm:$0xff]  ;;  %v154_v0 = vld [vmem:[%s4815_s0 + $0x390] sm:$0xff] }
  0x3c   :  { %v70_v2 = vld [vmem:[%s4815_s0 + $0xf0] sm:$0xff]  ;;  %v155_v3 = vld [vmem:[%s4815_s0 + $0x398] sm:$0xff]  ;;  %v156_v5 = vld [vmem:[%s4815_s0 + $0x3a0] sm:$0xff] }
  0x3d   :  { %2344 = vmatmul.mubr.msk.f32.gmra.mrb[8].mxu0 %vm218_vm4, %v44_v13  ;;  %2599 = vmatmul.mubr.msk.f32.gmra.mrb[8].mxu1 %vm218_vm4, %v129_v14  ;;  %v71_v4 = vld [vmem:[%s4815_s0 + $0xf8] sm:$0xff]  ;;  %v72_v6 = vld [vmem:[%s4815_s0 + $0x100] sm:$0xff]  ;;  %v157_v7 = vld [vmem:[%s4815_s0 + $0x3a8] sm:$0xff] }
  0x3e   :  { %2346 = vmatprep.mubr.msk.f32.mxu0 %vm2907_vm0, %v2908_v1  ;;  %2601 = vmatprep.mubr.msk.f32.mxu1 %vm2907_vm0, %v2908_v1  ;;  %v73_v8 = vld [vmem:[%s4815_s0 + $0x108] sm:$0xff]  ;;  %v158_v9 = vld [vmem:[%s4815_s0 + $0x3b0] sm:$0xff]  ;;  %v159_v11 = vld [vmem:[%s4815_s0 + $0x3b8] sm:$0xff] }
  0x3f   :  { %v74_v10 = vld [vmem:[%s4815_s0 + $0x110] sm:$0xff]  ;;  %v75_v12 = vld [vmem:[%s4815_s0 + $0x118] sm:$0xff]  ;;  %v160_v13 = vld [vmem:[%s4815_s0 + $0x3c0] sm:$0xff] }
  0x40   :  { %v76_v14 = vld [vmem:[%s4815_s0 + $0x120] sm:$0xff] }
  0x41   :  { %2347 = vmatmul.mubr.msk.f32.gmra.mrb[10].mxu0 %vm218_vm4, %v45_v15  ;;  %2602 = vmatmul.mubr.msk.f32.gmra.mrb[10].mxu1 %vm218_vm4, %v130_v16  ;;  %v161_v15 = vld [vmem:[%s4815_s0 + $0x3c8] sm:$0xff] }
  0x42   :  { %2349 = vmatprep.mubr.msk.f32.mxu0 %vm2907_vm0, %v2908_v1  ;;  %2604 = vmatprep.mubr.msk.f32.mxu1 %vm2907_vm0, %v2908_v1  ;;  %v77_v16 = vld [vmem:[%s4815_s0 + $0x128] sm:$0xff] }
  0x45   :  { %2350 = vmatmul.mubr.msk.f32.gmra.mrb[12].mxu0 %vm218_vm4, %v46_v17  ;;  %2605 = vmatmul.mubr.msk.f32.gmra.mrb[12].mxu1 %vm218_vm4, %v131_v18  ;;  %v162_v17 = vld [vmem:[%s4815_s0 + $0x3d0] sm:$0xff] }
  0x46   :  { %2352 = vmatprep.mubr.msk.f32.mxu0 %vm2907_vm0, %v2908_v1  ;;  %2607 = vmatprep.mubr.msk.f32.mxu1 %vm2907_vm0, %v2908_v1  ;;  %v78_v18 = vld [vmem:[%s4815_s0 + $0x130] sm:$0xff] }
  0x49   :  { %2353 = vmatmul.mubr.msk.f32.gmra.mrb[14].mxu0 %vm218_vm4, %v47_v19  ;;  %2608 = vmatmul.mubr.msk.f32.gmra.mrb[14].mxu1 %vm218_vm4, %v132_v20  ;;  %v163_v19 = vld [vmem:[%s4815_s0 + $0x3d8] sm:$0xff] }
  0x4a   :  { %2355 = vmatprep.mubr.msk.f32.mxu0 %vm2907_vm0, %v2908_v1  ;;  %2610 = vmatprep.mubr.msk.f32.mxu1 %vm2907_vm0, %v2908_v1  ;;  %v79_v20 = vld [vmem:[%s4815_s0 + $0x138] sm:$0xff] }
  0x4d   :  { %2356 = vmatmul.mubr.msk.f32.gmra.mrb[16].mxu0 %vm218_vm4, %v48_v21  ;;  %2611 = vmatmul.mubr.msk.f32.gmra.mrb[16].mxu1 %vm218_vm4, %v133_v22  ;;  %v164_v21 = vld [vmem:[%s4815_s0 + $0x3e0] sm:$0xff] }
  0x4e   :  { %2358 = vmatprep.mubr.msk.f32.mxu0 %vm2907_vm0, %v2908_v1  ;;  %2613 = vmatprep.mubr.msk.f32.mxu1 %vm2907_vm0, %v2908_v1  ;;  %v80_v22 = vld [vmem:[%s4815_s0 + $0x140] sm:$0xff] }
  0x51   :  { %2359 = vmatmul.mubr.msk.f32.gmra.mrb[18].mxu0 %vm218_vm4, %v49_v23  ;;  %2614 = vmatmul.mubr.msk.f32.gmra.mrb[18].mxu1 %vm218_vm4, %v134_v24  ;;  %v165_v23 = vld [vmem:[%s4815_s0 + $0x3e8] sm:$0xff] }
  0x52   :  { %2361 = vmatprep.mubr.msk.f32.mxu0 %vm2907_vm0, %v2908_v1  ;;  %2616 = vmatprep.mubr.msk.f32.mxu1 %vm2907_vm0, %v2908_v1  ;;  %v81_v24 = vld [vmem:[%s4815_s0 + $0x148] sm:$0xff] }
  0x55   :  { %2362 = vmatmul.mubr.msk.f32.gmra.mrb[20].mxu0 %vm218_vm4, %v50_v25  ;;  %2617 = vmatmul.mubr.msk.f32.gmra.mrb[20].mxu1 %vm218_vm4, %v135_v26  ;;  %v166_v25 = vld [vmem:[%s4815_s0 + $0x3f0] sm:$0xff] }
  0x56   :  { %2364 = vmatprep.mubr.msk.f32.mxu0 %vm2907_vm0, %v2908_v1  ;;  %2619 = vmatprep.mubr.msk.f32.mxu1 %vm2907_vm0, %v2908_v1  ;;  %v82_v26 = vld [vmem:[%s4815_s0 + $0x150] sm:$0xff] }
  0x59   :  { %2365 = vmatmul.mubr.msk.f32.gmra.mrb[22].mxu0 %vm218_vm4, %v51_v27  ;;  %2620 = vmatmul.mubr.msk.f32.gmra.mrb[22].mxu1 %vm218_vm4, %v136_v28  ;;  %v167_v27 = vld [vmem:[%s4815_s0 + $0x3f8] sm:$0xff] }
  0x5a   :  { %2367 = vmatprep.mubr.msk.f32.mxu0 %vm2907_vm0, %v2908_v1  ;;  %2622 = vmatprep.mubr.msk.f32.mxu1 %vm2907_vm0, %v2908_v1  ;;  %v83_v28 = vld [vmem:[%s4815_s0 + $0x158] sm:$0xff] }
  0x5d   :  { %2368 = vmatmul.mubr.msk.f32.gmra.mrb[24].mxu0 %vm218_vm4, %v52_v29  ;;  %2623 = vmatmul.mubr.msk.f32.gmra.mrb[24].mxu1 %vm218_vm4, %v137_v30  ;;  %v168_v29 = vld [vmem:[%s4815_s0 + $0x400] sm:$0xff] }
  0x5e   :  { %2370 = vmatprep.mubr.msk.f32.mxu0 %vm2907_vm0, %v2908_v1  ;;  %2625 = vmatprep.mubr.msk.f32.mxu1 %vm2907_vm0, %v2908_v1  ;;  %v84_v30 = vld [vmem:[%s4815_s0 + $0x160] sm:$0xff] }
  0x61   :  { %2371 = vmatmul.mubr.msk.f32.gmra.mrb[26].mxu0 %vm218_vm4, %v53_v31  ;;  %2626 = vmatmul.mubr.msk.f32.gmra.mrb[26].mxu1 %vm218_vm4, %v138_v32  ;;  %v169_v31 = vld [vmem:[%s4815_s0 + $0x408] sm:$0xff] }
  0x62   :  { %2373 = vmatprep.mubr.msk.f32.mxu0 %vm2907_vm0, %v2908_v1  ;;  %2628 = vmatprep.mubr.msk.f32.mxu1 %vm2907_vm0, %v2908_v1  ;;  %v85_v32 = vld [vmem:[%s4815_s0 + $0x168] sm:$0xff] }
  0x65   :  { %2374 = vmatmul.mubr.msk.f32.gmra.mrb[28].mxu0 %vm218_vm4, %v54_v33  ;;  %2629 = vmatmul.mubr.msk.f32.gmra.mrb[28].mxu1 %vm218_vm4, %v139_v34  ;;  %v170_v33 = vld [vmem:[%s4815_s0 + $0x410] sm:$0xff] }
  0x66   :  { %2376 = vmatprep.mubr.msk.f32.mxu0 %vm2907_vm0, %v2908_v1  ;;  %2631 = vmatprep.mubr.msk.f32.mxu1 %vm2907_vm0, %v2908_v1  ;;  %v86_v34 = vld [vmem:[%s4815_s0 + $0x170] sm:$0xff] }
  0x69   :  { %2377 = vmatmul.mubr.msk.f32.gmra.mrb[30].mxu0 %vm218_vm4, %v55_v35  ;;  %2632 = vmatmul.mubr.msk.f32.gmra.mrb[30].mxu1 %vm218_vm4, %v140_v36  ;;  %v171_v35 = vld [vmem:[%s4815_s0 + $0x418] sm:$0xff] }
  0x6a   :  { %2379 = vmatprep.mubr.msk.f32.mxu0 %vm2907_vm0, %v2908_v1  ;;  %2634 = vmatprep.mubr.msk.f32.mxu1 %vm2907_vm0, %v2908_v1  ;;  %v87_v36 = vld [vmem:[%s4815_s0 + $0x178] sm:$0xff] }
  0x6d   :  { %2380 = vmatmul.mubr.msk.f32.gmra.mrb[32].mxu0 %vm218_vm4, %v56_v37  ;;  %2635 = vmatmul.mubr.msk.f32.gmra.mrb[32].mxu1 %vm218_vm4, %v141_v38  ;;  %v172_v37 = vld [vmem:[%s4815_s0 + $0x420] sm:$0xff] }
  0x6e   :  { %2382 = vmatprep.mubr.msk.f32.mxu0 %vm2907_vm0, %v2908_v1  ;;  %2637 = vmatprep.mubr.msk.f32.mxu1 %vm2907_vm0, %v2908_v1  ;;  %v88_v38 = vld [vmem:[%s4815_s0 + $0x180] sm:$0xff] }
  0x71   :  { %2383 = vmatmul.mubr.msk.f32.gmra.mrb[34].mxu0 %vm218_vm4, %v57_v39  ;;  %2638 = vmatmul.mubr.msk.f32.gmra.mrb[34].mxu1 %vm218_vm4, %v142_v40  ;;  %v173_v39 = vld [vmem:[%s4815_s0 + $0x428] sm:$0xff] }
  0x72   :  { %2385 = vmatprep.mubr.msk.f32.mxu0 %vm2907_vm0, %v2908_v1  ;;  %2640 = vmatprep.mubr.msk.f32.mxu1 %vm2907_vm0, %v2908_v1  ;;  %v89_v40 = vld [vmem:[%s4815_s0 + $0x188] sm:$0xff] }
  0x75   :  { %2386 = vmatmul.mubr.msk.f32.gmra.mrb[36].mxu0 %vm218_vm4, %v58_v41  ;;  %2641 = vmatmul.mubr.msk.f32.gmra.mrb[36].mxu1 %vm218_vm4, %v143_v42  ;;  %v174_v41 = vld [vmem:[%s4815_s0 + $0x430] sm:$0xff] }
  0x76   :  { %2388 = vmatprep.mubr.msk.f32.mxu0 %vm2907_vm0, %v2908_v1  ;;  %2643 = vmatprep.mubr.msk.f32.mxu1 %vm2907_vm0, %v2908_v1  ;;  %v90_v42 = vld [vmem:[%s4815_s0 + $0x190] sm:$0xff] }
  0x79   :  { %2389 = vmatmul.mubr.msk.f32.gmra.mrb[38].mxu0 %vm218_vm4, %v59_v43  ;;  %2644 = vmatmul.mubr.msk.f32.gmra.mrb[38].mxu1 %vm218_vm4, %v144_v44  ;;  %v175_v43 = vld [vmem:[%s4815_s0 + $0x438] sm:$0xff] }
  0x7a   :  { %2391 = vmatprep.mubr.msk.f32.mxu0 %vm2907_vm0, %v2908_v1  ;;  %2646 = vmatprep.mubr.msk.f32.mxu1 %vm2907_vm0, %v2908_v1  ;;  %v91_v44 = vld [vmem:[%s4815_s0 + $0x198] sm:$0xff] }
  0x7d   :  { %2392 = vmatmul.mubr.msk.f32.gmra.mrb[40].mxu0 %vm218_vm4, %v60_v45  ;;  %2647 = vmatmul.mubr.msk.f32.gmra.mrb[40].mxu1 %vm218_vm4, %v145_v46  ;;  %v176_v45 = vld [vmem:[%s4815_s0 + $0x440] sm:$0xff] }
  0x7e   :  { %2394 = vmatprep.mubr.msk.f32.mxu0 %vm2907_vm0, %v2908_v1  ;;  %2649 = vmatprep.mubr.msk.f32.mxu1 %vm2907_vm0, %v2908_v1  ;;  %v92_v46 = vld [vmem:[%s4815_s0 + $0x1a0] sm:$0xff] }
  0x81   :  { %2395 = vmatmul.mubr.msk.f32.gmra.mrb[42].mxu0 %vm218_vm4, %v61_v47  ;;  %2650 = vmatmul.mubr.msk.f32.gmra.mrb[42].mxu1 %vm218_vm4, %v146_v48  ;;  %v177_v47 = vld [vmem:[%s4815_s0 + $0x448] sm:$0xff]  ;;  %v3590_v48 = vld [vmem:[#allocation4] ss:$0 sm:$0xff] }
  0x82   :  { %2397 = vmatprep.mubr.msk.f32.mxu0 %vm2907_vm0, %v2908_v1  ;;  %2652 = vmatprep.mubr.msk.f32.mxu1 %vm2907_vm0, %v2908_v1 }
  0x85   :  { %2398 = vmatmul.mubr.msk.f32.gmra.mrb[44].mxu0 %vm218_vm4, %v62_v49  ;;  %2653 = vmatmul.mubr.msk.f32.gmra.mrb[44].mxu1 %vm218_vm4, %v147_v50  ;;  %v93_v49 = vld [vmem:[%s4815_s0 + $0x1a8] sm:$0xff]  ;;  %v178_v50 = vld [vmem:[%s4815_s0 + $0x450] sm:$0xff] }
  0x86   :  { %2400 = vmatprep.mubr.msk.f32.mxu0 %vm2907_vm0, %v2908_v1  ;;  %2655 = vmatprep.mubr.msk.f32.mxu1 %vm2907_vm0, %v2908_v1 }
  0x89   :  { %2401 = vmatmul.mubr.msk.f32.gmra.mrb[46].mxu0 %vm218_vm4, %v63_v51  ;;  %2656 = vmatmul.mubr.msk.f32.gmra.mrb[46].mxu1 %vm218_vm4, %v148_v52 }
  0x8a   :  { %2403 = vmatprep.mubr.msk.f32.mxu0 %vm2907_vm0, %v2908_v1  ;;  %2658 = vmatprep.mubr.msk.f32.mxu1 %vm2907_vm0, %v2908_v1 }
  0x8d   :  { %2404 = vmatmul.mubr.msk.f32.gmra.mrb[48].mxu0 %vm218_vm4, %v64_v53  ;;  %2659 = vmatmul.mubr.msk.f32.gmra.mrb[48].mxu1 %vm218_vm4, %v149_v54 }
  0x8e   :  { %2406 = vmatprep.mubr.msk.f32.mxu0 %vm2907_vm0, %v2908_v1  ;;  %2661 = vmatprep.mubr.msk.f32.mxu1 %vm2907_vm0, %v2908_v1 }
  0x91   :  { %2407 = vmatmul.mubr.msk.f32.gmra.mrb[50].mxu0 %vm218_vm4, %v65_v55  ;;  %2662 = vmatmul.mubr.msk.f32.gmra.mrb[50].mxu1 %vm218_vm4, %v150_v56 }
  0x92   :  { %2409 = vmatprep.mubr.msk.f32.mxu0 %vm2907_vm0, %v2908_v1  ;;  %2664 = vmatprep.mubr.msk.f32.mxu1 %vm2907_vm0, %v2908_v1 }
  0x95   :  { %2410 = vmatmul.mubr.msk.f32.gmra.mrb[52].mxu0 %vm218_vm4, %v66_v57  ;;  %2665 = vmatmul.mubr.msk.f32.gmra.mrb[52].mxu1 %vm218_vm4, %v151_v58  ;;  %v94_v57 = vld [vmem:[%s4815_s0 + $0x1b0] sm:$0xff]  ;;  %v179_v58 = vld [vmem:[%s4815_s0 + $0x458] sm:$0xff] }
  0x96   :  { %2412 = vmatprep.mubr.msk.f32.mxu0 %vm2907_vm0, %v2908_v1  ;;  %2667 = vmatprep.mubr.msk.f32.mxu1 %vm2907_vm0, %v2908_v1 }
  0x99   :  { %2413 = vmatmul.mubr.msk.f32.gmra.mrb[54].mxu0 %vm218_vm4, %v67_v59  ;;  %2668 = vmatmul.mubr.msk.f32.gmra.mrb[54].mxu1 %vm218_vm4, %v152_v60 }
  0x9a   :  { %2415 = vmatprep.mubr.msk.f32.mxu0 %vm2907_vm0, %v2908_v1  ;;  %2670 = vmatprep.mubr.msk.f32.mxu1 %vm2907_vm0, %v2908_v1 }
  0x9d   :  { %2416 = vmatmul.mubr.msk.f32.gmra.mrb[56].mxu0 %vm218_vm4, %v68_v61  ;;  %2671 = vmatmul.mubr.msk.f32.gmra.mrb[56].mxu1 %vm218_vm4, %v153_v62 }
  0x9e   :  { %2418 = vmatprep.mubr.msk.f32.mxu0 %vm2907_vm0, %v2908_v1  ;;  %2673 = vmatprep.mubr.msk.f32.mxu1 %vm2907_vm0, %v2908_v1 }
  0xa1   :  { %2419 = vmatmul.mubr.msk.f32.gmra.mrb[58].mxu0 %vm218_vm4, %v69_v63  ;;  %2674 = vmatmul.mubr.msk.f32.gmra.mrb[58].mxu1 %vm218_vm4, %v154_v0 }
  0xa2   :  { %2421 = vmatprep.mubr.msk.f32.mxu0 %vm2907_vm0, %v2908_v1  ;;  %2676 = vmatprep.mubr.msk.f32.mxu1 %vm2907_vm0, %v2908_v1 }
  0xa5   :  { %2422 = vmatmul.mubr.msk.f32.gmra.mrb[60].mxu0 %vm218_vm4, %v70_v2  ;;  %2677 = vmatmul.mubr.msk.f32.gmra.mrb[60].mxu1 %vm218_vm4, %v155_v3 }
  0xa6   :  { %2424 = vmatprep.mubr.msk.f32.mxu0 %vm2907_vm0, %v2908_v1  ;;  %2679 = vmatprep.mubr.msk.f32.mxu1 %vm2907_vm0, %v2908_v1 }
  0xa9   :  { %2425 = vmatmul.mubr.msk.f32.gmra.mrb[62].mxu0 %vm218_vm4, %v71_v4  ;;  %2680 = vmatmul.mubr.msk.f32.gmra.mrb[62].mxu1 %vm218_vm4, %v156_v5  ;;  %v95_v4 = vld [vmem:[%s4815_s0 + $0x1b8] sm:$0xff]  ;;  %v180_v5 = vld [vmem:[%s4815_s0 + $0x460] sm:$0xff] }
  0xaa   :  { %2427 = vmatprep.mubr.msk.f32.mxu0 %vm2907_vm0, %v2908_v1  ;;  %2682 = vmatprep.mubr.msk.f32.mxu1 %vm2907_vm0, %v2908_v1 }
  0xad   :  { %2428 = vmatmul.mubr.msk.f32.gmra.mrb[64].mxu0 %vm218_vm4, %v72_v6  ;;  %2683 = vmatmul.mubr.msk.f32.gmra.mrb[64].mxu1 %vm218_vm4, %v157_v7 }
  0xae   :  { %2430 = vmatprep.mubr.msk.f32.mxu0 %vm2907_vm0, %v2908_v1  ;;  %2685 = vmatprep.mubr.msk.f32.mxu1 %vm2907_vm0, %v2908_v1 }
  0xb1   :  { %2431 = vmatmul.mubr.msk.f32.gmra.mrb[66].mxu0 %vm218_vm4, %v73_v8  ;;  %2686 = vmatmul.mubr.msk.f32.gmra.mrb[66].mxu1 %vm218_vm4, %v158_v9 }
  0xb2   :  { %2433 = vmatprep.mubr.msk.f32.mxu0 %vm2907_vm0, %v2908_v1  ;;  %2688 = vmatprep.mubr.msk.f32.mxu1 %vm2907_vm0, %v2908_v1 }
  0xb5   :  { %2434 = vmatmul.mubr.msk.f32.gmra.mrb[68].mxu0 %vm218_vm4, %v74_v10  ;;  %2689 = vmatmul.mubr.msk.f32.gmra.mrb[68].mxu1 %vm218_vm4, %v159_v11 }
  0xb6   :  { %2436 = vmatprep.mubr.msk.f32.mxu0 %vm2907_vm0, %v2908_v1  ;;  %2691 = vmatprep.mubr.msk.f32.mxu1 %vm2907_vm0, %v2908_v1 }
  0xb9   :  { %2437 = vmatmul.mubr.msk.f32.gmra.mrb[70].mxu0 %vm218_vm4, %v75_v12  ;;  %2692 = vmatmul.mubr.msk.f32.gmra.mrb[70].mxu1 %vm218_vm4, %v160_v13 }
  0xba   :  { %2439 = vmatprep.mubr.msk.f32.mxu0 %vm2907_vm0, %v2908_v1  ;;  %2694 = vmatprep.mubr.msk.f32.mxu1 %vm2907_vm0, %v2908_v1 }
  0xbd   :  { %2440 = vmatmul.mubr.msk.f32.gmra.mrb[72].mxu0 %vm218_vm4, %v76_v14  ;;  %2695 = vmatmul.mubr.msk.f32.gmra.mrb[72].mxu1 %vm218_vm4, %v161_v15  ;;  %v96_v14 = vld [vmem:[%s4815_s0 + $0x1c0] sm:$0xff]  ;;  %v181_v15 = vld [vmem:[%s4815_s0 + $0x468] sm:$0xff] }
  0xbe   :  { %2442 = vmatprep.mubr.msk.f32.mxu0 %vm2907_vm0, %v2908_v1  ;;  %2697 = vmatprep.mubr.msk.f32.mxu1 %vm2907_vm0, %v2908_v1 }
  0xc1   :  { %2443 = vmatmul.mubr.msk.f32.gmra.mrb[74].mxu0 %vm218_vm4, %v77_v16  ;;  %2698 = vmatmul.mubr.msk.f32.gmra.mrb[74].mxu1 %vm218_vm4, %v162_v17 }
  0xc2   :  { %2445 = vmatprep.mubr.msk.f32.mxu0 %vm2907_vm0, %v2908_v1  ;;  %2700 = vmatprep.mubr.msk.f32.mxu1 %vm2907_vm0, %v2908_v1 }
  0xc5   :  { %2446 = vmatmul.mubr.msk.f32.gmra.mrb[76].mxu0 %vm218_vm4, %v78_v18  ;;  %2701 = vmatmul.mubr.msk.f32.gmra.mrb[76].mxu1 %vm218_vm4, %v163_v19 }
  0xc6   :  { %2448 = vmatprep.mubr.msk.f32.mxu0 %vm2907_vm0, %v2908_v1  ;;  %2703 = vmatprep.mubr.msk.f32.mxu1 %vm2907_vm0, %v2908_v1 }
  0xc9   :  { %2449 = vmatmul.mubr.msk.f32.gmra.mrb[78].mxu0 %vm218_vm4, %v79_v20  ;;  %2704 = vmatmul.mubr.msk.f32.gmra.mrb[78].mxu1 %vm218_vm4, %v164_v21 }
  0xca   :  { %2451 = vmatprep.mubr.msk.f32.mxu0 %vm2907_vm0, %v2908_v1  ;;  %2706 = vmatprep.mubr.msk.f32.mxu1 %vm2907_vm0, %v2908_v1 }
  0xcd   :  { %2452 = vmatmul.mubr.msk.f32.gmra.mrb[80].mxu0 %vm218_vm4, %v80_v22  ;;  %2707 = vmatmul.mubr.msk.f32.gmra.mrb[80].mxu1 %vm218_vm4, %v165_v23 }
  0xce   :  { %2454 = vmatprep.mubr.msk.f32.mxu0 %vm2907_vm0, %v2908_v1  ;;  %2709 = vmatprep.mubr.msk.f32.mxu1 %vm2907_vm0, %v2908_v1 }
  0xd1   :  { %2455 = vmatmul.mubr.msk.f32.gmra.mrb[82].mxu0 %vm218_vm4, %v81_v24  ;;  %2710 = vmatmul.mubr.msk.f32.gmra.mrb[82].mxu1 %vm218_vm4, %v166_v25  ;;  %v97_v24 = vld [vmem:[%s4815_s0 + $0x1c8] sm:$0xff]  ;;  %v182_v25 = vld [vmem:[%s4815_s0 + $0x470] sm:$0xff] }
  0xd2   :  { %2457 = vmatprep.mubr.msk.f32.mxu0 %vm2907_vm0, %v2908_v1  ;;  %2712 = vmatprep.mubr.msk.f32.mxu1 %vm2907_vm0, %v2908_v1 }
  0xd5   :  { %2458 = vmatmul.mubr.msk.f32.gmra.mrb[84].mxu0 %vm218_vm4, %v82_v26  ;;  %2713 = vmatmul.mubr.msk.f32.gmra.mrb[84].mxu1 %vm218_vm4, %v167_v27 }
  0xd6   :  { %2460 = vmatprep.mubr.msk.f32.mxu0 %vm2907_vm0, %v2908_v1  ;;  %2715 = vmatprep.mubr.msk.f32.mxu1 %vm2907_vm0, %v2908_v1 }
  0xd9   :  { %2461 = vmatmul.mubr.msk.f32.gmra.mrb[86].mxu0 %vm218_vm4, %v83_v28  ;;  %2716 = vmatmul.mubr.msk.f32.gmra.mrb[86].mxu1 %vm218_vm4, %v168_v29 }
  0xda   :  { %2463 = vmatprep.mubr.msk.f32.mxu0 %vm2907_vm0, %v2908_v1  ;;  %2718 = vmatprep.mubr.msk.f32.mxu1 %vm2907_vm0, %v2908_v1 }
  0xdd   :  { %2464 = vmatmul.mubr.msk.f32.gmra.mrb[88].mxu0 %vm218_vm4, %v84_v30  ;;  %2719 = vmatmul.mubr.msk.f32.gmra.mrb[88].mxu1 %vm218_vm4, %v169_v31 }
  0xde   :  { %2466 = vmatprep.mubr.msk.f32.mxu0 %vm2907_vm0, %v2908_v1  ;;  %2721 = vmatprep.mubr.msk.f32.mxu1 %vm2907_vm0, %v2908_v1 }
  0xe1   :  { %2467 = vmatmul.mubr.msk.f32.gmra.mrb[90].mxu0 %vm218_vm4, %v85_v32  ;;  %2722 = vmatmul.mubr.msk.f32.gmra.mrb[90].mxu1 %vm218_vm4, %v170_v33 }
  0xe2   :  { %2469 = vmatprep.mubr.msk.f32.mxu0 %vm2907_vm0, %v2908_v1  ;;  %2724 = vmatprep.mubr.msk.f32.mxu1 %vm2907_vm0, %v2908_v1 }
  0xe5   :  { %2470 = vmatmul.mubr.msk.f32.gmra.mrb[92].mxu0 %vm218_vm4, %v86_v34  ;;  %2725 = vmatmul.mubr.msk.f32.gmra.mrb[92].mxu1 %vm218_vm4, %v171_v35  ;;  %v98_v34 = vld [vmem:[%s4815_s0 + $0x1d0] sm:$0xff]  ;;  %v183_v35 = vld [vmem:[%s4815_s0 + $0x478] sm:$0xff] }
  0xe6   :  { %2472 = vmatprep.mubr.msk.f32.mxu0 %vm2907_vm0, %v2908_v1  ;;  %2727 = vmatprep.mubr.msk.f32.mxu1 %vm2907_vm0, %v2908_v1 }
  0xe9   :  { %2473 = vmatmul.mubr.msk.f32.gmra.mrb[94].mxu0 %vm218_vm4, %v87_v36  ;;  %2728 = vmatmul.mubr.msk.f32.gmra.mrb[94].mxu1 %vm218_vm4, %v172_v37 }
  0xea   :  { %2475 = vmatprep.mubr.msk.f32.mxu0 %vm2907_vm0, %v2908_v1  ;;  %2730 = vmatprep.mubr.msk.f32.mxu1 %vm2907_vm0, %v2908_v1 }
  0xed   :  { %2476 = vmatmul.mubr.msk.f32.gmra.mrb[96].mxu0 %vm218_vm4, %v88_v38  ;;  %2731 = vmatmul.mubr.msk.f32.gmra.mrb[96].mxu1 %vm218_vm4, %v173_v39 }
  0xee   :  { %2478 = vmatprep.mubr.msk.f32.mxu0 %vm2907_vm0, %v2908_v1  ;;  %2733 = vmatprep.mubr.msk.f32.mxu1 %vm2907_vm0, %v2908_v1 }
  0xf1   :  { %2479 = vmatmul.mubr.msk.f32.gmra.mrb[98].mxu0 %vm218_vm4, %v89_v40  ;;  %2734 = vmatmul.mubr.msk.f32.gmra.mrb[98].mxu1 %vm218_vm4, %v174_v41 }
  0xf2   :  { %2481 = vmatprep.mubr.msk.f32.mxu0 %vm2907_vm0, %v2908_v1  ;;  %2736 = vmatprep.mubr.msk.f32.mxu1 %vm2907_vm0, %v2908_v1 }
  0xf5   :  { %2482 = vmatmul.mubr.msk.f32.gmra.mrb[100].mxu0 %vm218_vm4, %v90_v42  ;;  %2737 = vmatmul.mubr.msk.f32.gmra.mrb[100].mxu1 %vm218_vm4, %v175_v43 }
  0xf6   :  { %2484 = vmatprep.mubr.msk.f32.mxu0 %vm2907_vm0, %v2908_v1  ;;  %2739 = vmatprep.mubr.msk.f32.mxu1 %vm2907_vm0, %v2908_v1 }
  0xf9   :  { %2485 = vmatmul.mubr.msk.f32.gmra.mrb[102].mxu0 %vm218_vm4, %v91_v44  ;;  %2740 = vmatmul.mubr.msk.f32.gmra.mrb[102].mxu1 %vm218_vm4, %v176_v45  ;;  %v99_v44 = vld [vmem:[%s4815_s0 + $0x1d8] sm:$0xff]  ;;  %v184_v45 = vld [vmem:[%s4815_s0 + $0x480] sm:$0xff] }
  0xfa   :  { %2487 = vmatprep.mubr.msk.f32.mxu0 %vm2907_vm0, %v2908_v1  ;;  %2742 = vmatprep.mubr.msk.f32.mxu1 %vm2907_vm0, %v2908_v1 }
  0xfd   :  { %2488 = vmatmul.mubr.msk.f32.gmra.mrb[104].mxu0 %vm218_vm4, %v92_v46  ;;  %2743 = vmatmul.mubr.msk.f32.gmra.mrb[104].mxu1 %vm218_vm4, %v177_v47 }
  0xfe   :  { %2490 = vmatprep.mubr.msk.f32.mxu0 %vm2907_vm0, %v2908_v1  ;;  %2745 = vmatprep.mubr.msk.f32.mxu1 %vm2907_vm0, %v2908_v1 }
 0x100   :  { %v796_v51 = vpop.f32.mrb[0].mxu0  ;;  %v1221_v52 = vpop.f32.mrb[0].mxu1 }
 0x101   :  { %v797_v53 = vadd.f32 %v3590_v48, %v796_v51  ;;  %v2333_v54 = vpop.f32.mrb[1].mxu0  ;;  %2491 = vmatmul.mubr.msk.f32.gmra.mrb[106].mxu0 %vm218_vm4, %v93_v49  ;;  %v1222_v55 = vadd.f32 %v3590_v48, %v1221_v52  ;;  %v2588_v56 = vpop.f32.mrb[1].mxu1  ;;  %2746 = vmatmul.mubr.msk.f32.gmra.mrb[106].mxu1 %vm218_vm4, %v178_v50 }
 0x102   :  { %2493 = vmatprep.mubr.msk.f32.mxu0 %vm2907_vm0, %v2908_v1  ;;  %2748 = vmatprep.mubr.msk.f32.mxu1 %vm2907_vm0, %v2908_v1  ;;  %v185_v56 = vld [vmem:[%s4815_s0 + $0x488] sm:$0xff] }
 0x103   :  { %v1640_v59 = vmax.f32 %v797_v53, 0.0  ;;  %v1725_v60 = vmax.f32 %v1222_v55, 0.0  ;;  %v100_v55 = vld [vmem:[%s4815_s0 + $0x1e0] sm:$0xff] }
 0x104   :  { %v801_v61 = vpop.f32.mrb[2].mxu0  ;;  %v1226_v62 = vpop.f32.mrb[2].mxu1 }
 0x105   :  { %1810 = vst.msk [vmem:[%s4818_s3] sm:$0xff] %vm1809_vm5, %v1640_v59  ;;  %1895 = vst.msk [vmem:[%s4818_s3 + $0x2a8] sm:$0xff] %vm1809_vm5, %v1725_v60  ;;  %v802_v63 = vadd.f32 %v3590_v48, %v801_v61  ;;  %v2336_v0 = vpop.f32.mrb[3].mxu0  ;;  %2494 = vmatmul.mubr.msk.f32.gmra.mrb[108].mxu0 %vm218_vm4, %v94_v57  ;;  %v1227_v2 = vadd.f32 %v3590_v48, %v1226_v62  ;;  %v2591_v3 = vpop.f32.mrb[3].mxu1  ;;  %2749 = vmatmul.mubr.msk.f32.gmra.mrb[108].mxu1 %vm218_vm4, %v179_v58 }
 0x106   :  { %2496 = vmatprep.mubr.msk.f32.mxu0 %vm2907_vm0, %v2908_v1  ;;  %2751 = vmatprep.mubr.msk.f32.mxu1 %vm2907_vm0, %v2908_v1  ;;  %v186_v3 = vld [vmem:[%s4815_s0 + $0x490] sm:$0xff] }
 0x107   :  { %v1641_v6 = vmax.f32 %v802_v63, 0.0  ;;  %v1726_v7 = vmax.f32 %v1227_v2, 0.0  ;;  %v101_v2 = vld [vmem:[%s4815_s0 + $0x1e8] sm:$0xff] }
 0x108   :  { %v806_v8 = vpop.f32.mrb[4].mxu0  ;;  %v1231_v9 = vpop.f32.mrb[4].mxu1 }
 0x109   :  { %1811 = vst.msk [vmem:[%s4818_s3 + $0x8] sm:$0xff] %vm1809_vm5, %v1641_v6  ;;  %1896 = vst.msk [vmem:[%s4818_s3 + $0x2b0] sm:$0xff] %vm1809_vm5, %v1726_v7  ;;  %v807_v10 = vadd.f32 %v3590_v48, %v806_v8  ;;  %v2339_v11 = vpop.f32.mrb[5].mxu0  ;;  %2497 = vmatmul.mubr.msk.f32.gmra.mrb[110].mxu0 %vm218_vm4, %v95_v4  ;;  %v1232_v12 = vadd.f32 %v3590_v48, %v1231_v9  ;;  %v2594_v13 = vpop.f32.mrb[5].mxu1  ;;  %2752 = vmatmul.mubr.msk.f32.gmra.mrb[110].mxu1 %vm218_vm4, %v180_v5 }
 0x10a   :  { %2499 = vmatprep.mubr.msk.f32.mxu0 %vm2907_vm0, %v2908_v1  ;;  %2754 = vmatprep.mubr.msk.f32.mxu1 %vm2907_vm0, %v2908_v1  ;;  %v187_v13 = vld [vmem:[%s4815_s0 + $0x498] sm:$0xff] }
 0x10b   :  { %v1642_v16 = vmax.f32 %v807_v10, 0.0  ;;  %v1727_v17 = vmax.f32 %v1232_v12, 0.0  ;;  %v102_v12 = vld [vmem:[%s4815_s0 + $0x1f0] sm:$0xff] }
 0x10c   :  { %v811_v18 = vpop.f32.mrb[6].mxu0  ;;  %v1236_v19 = vpop.f32.mrb[6].mxu1 }
 0x10d   :  { %1812 = vst.msk [vmem:[%s4818_s3 + $0x10] sm:$0xff] %vm1809_vm5, %v1642_v16  ;;  %1897 = vst.msk [vmem:[%s4818_s3 + $0x2b8] sm:$0xff] %vm1809_vm5, %v1727_v17  ;;  %v812_v20 = vadd.f32 %v3590_v48, %v811_v18  ;;  %v2342_v21 = vpop.f32.mrb[7].mxu0  ;;  %2500 = vmatmul.mubr.msk.f32.gmra.mrb[112].mxu0 %vm218_vm4, %v96_v14  ;;  %v1237_v22 = vadd.f32 %v3590_v48, %v1236_v19  ;;  %v2597_v23 = vpop.f32.mrb[7].mxu1  ;;  %2755 = vmatmul.mubr.msk.f32.gmra.mrb[112].mxu1 %vm218_vm4, %v181_v15 }
 0x10e   :  { %2502 = vmatprep.mubr.msk.f32.mxu0 %vm2907_vm0, %v2908_v1  ;;  %2757 = vmatprep.mubr.msk.f32.mxu1 %vm2907_vm0, %v2908_v1  ;;  %v188_v23 = vld [vmem:[%s4815_s0 + $0x4a0] sm:$0xff] }
 0x10f   :  { %v1643_v26 = vmax.f32 %v812_v20, 0.0  ;;  %v1728_v27 = vmax.f32 %v1237_v22, 0.0  ;;  %v103_v22 = vld [vmem:[%s4815_s0 + $0x1f8] sm:$0xff] }
 0x110   :  { %v816_v28 = vpop.f32.mrb[8].mxu0  ;;  %v1241_v29 = vpop.f32.mrb[8].mxu1 }
 0x111   :  { %1813 = vst.msk [vmem:[%s4818_s3 + $0x18] sm:$0xff] %vm1809_vm5, %v1643_v26  ;;  %1898 = vst.msk [vmem:[%s4818_s3 + $0x2c0] sm:$0xff] %vm1809_vm5, %v1728_v27  ;;  %v817_v30 = vadd.f32 %v3590_v48, %v816_v28  ;;  %v2345_v31 = vpop.f32.mrb[9].mxu0  ;;  %2503 = vmatmul.mubr.msk.f32.gmra.mrb[114].mxu0 %vm218_vm4, %v97_v24  ;;  %v1242_v32 = vadd.f32 %v3590_v48, %v1241_v29  ;;  %v2600_v33 = vpop.f32.mrb[9].mxu1  ;;  %2758 = vmatmul.mubr.msk.f32.gmra.mrb[114].mxu1 %vm218_vm4, %v182_v25 }
 0x112   :  { %2505 = vmatprep.mubr.msk.f32.mxu0 %vm2907_vm0, %v2908_v1  ;;  %2760 = vmatprep.mubr.msk.f32.mxu1 %vm2907_vm0, %v2908_v1  ;;  %v189_v33 = vld [vmem:[%s4815_s0 + $0x4a8] sm:$0xff] }
 0x113   :  { %v1644_v36 = vmax.f32 %v817_v30, 0.0  ;;  %v1729_v37 = vmax.f32 %v1242_v32, 0.0  ;;  %v104_v32 = vld [vmem:[%s4815_s0 + $0x200] sm:$0xff] }
 0x114   :  { %v821_v38 = vpop.f32.mrb[10].mxu0  ;;  %v1246_v39 = vpop.f32.mrb[10].mxu1 }
 0x115   :  { %1814 = vst.msk [vmem:[%s4818_s3 + $0x20] sm:$0xff] %vm1809_vm5, %v1644_v36  ;;  %1899 = vst.msk [vmem:[%s4818_s3 + $0x2c8] sm:$0xff] %vm1809_vm5, %v1729_v37  ;;  %v822_v40 = vadd.f32 %v3590_v48, %v821_v38  ;;  %v2348_v41 = vpop.f32.mrb[11].mxu0  ;;  %2506 = vmatmul.mubr.msk.f32.gmra.mrb[116].mxu0 %vm218_vm4, %v98_v34  ;;  %v1247_v42 = vadd.f32 %v3590_v48, %v1246_v39  ;;  %v2603_v43 = vpop.f32.mrb[11].mxu1  ;;  %2761 = vmatmul.mubr.msk.f32.gmra.mrb[116].mxu1 %vm218_vm4, %v183_v35 }
 0x116   :  { %2508 = vmatprep.mubr.msk.f32.mxu0 %vm2907_vm0, %v2908_v1  ;;  %2763 = vmatprep.mubr.msk.f32.mxu1 %vm2907_vm0, %v2908_v1  ;;  %v190_v43 = vld [vmem:[%s4815_s0 + $0x4b0] sm:$0xff] }
 0x117   :  { %v1645_v46 = vmax.f32 %v822_v40, 0.0  ;;  %v1730_v47 = vmax.f32 %v1247_v42, 0.0  ;;  %v105_v42 = vld [vmem:[%s4815_s0 + $0x208] sm:$0xff] }
 0x118   :  { %v826_v49 = vpop.f32.mrb[12].mxu0  ;;  %v1251_v50 = vpop.f32.mrb[12].mxu1 }
 0x119   :  { %1815 = vst.msk [vmem:[%s4818_s3 + $0x28] sm:$0xff] %vm1809_vm5, %v1645_v46  ;;  %1900 = vst.msk [vmem:[%s4818_s3 + $0x2d0] sm:$0xff] %vm1809_vm5, %v1730_v47  ;;  %v827_v51 = vadd.f32 %v3590_v48, %v826_v49  ;;  %v2351_v52 = vpop.f32.mrb[13].mxu0  ;;  %2509 = vmatmul.mubr.msk.f32.gmra.mrb[118].mxu0 %vm218_vm4, %v99_v44  ;;  %v1252_v53 = vadd.f32 %v3590_v48, %v1251_v50  ;;  %v2606_v54 = vpop.f32.mrb[13].mxu1  ;;  %2764 = vmatmul.mubr.msk.f32.gmra.mrb[118].mxu1 %vm218_vm4, %v184_v45 }
 0x11a   :  { %2511 = vmatprep.mubr.msk.f32.mxu0 %vm2907_vm0, %v2908_v1  ;;  %2766 = vmatprep.mubr.msk.f32.mxu1 %vm2907_vm0, %v2908_v1  ;;  %v191_v54 = vld [vmem:[%s4815_s0 + $0x4b8] sm:$0xff] }
 0x11b   :  { %v1646_v57 = vmax.f32 %v827_v51, 0.0  ;;  %v1731_v58 = vmax.f32 %v1252_v53, 0.0  ;;  %v106_v53 = vld [vmem:[%s4815_s0 + $0x210] sm:$0xff] }
 0x11c   :  { %v831_v59 = vpop.f32.mrb[14].mxu0  ;;  %v1256_v60 = vpop.f32.mrb[14].mxu1 }
 0x11d   :  { %1816 = vst.msk [vmem:[%s4818_s3 + $0x30] sm:$0xff] %vm1809_vm5, %v1646_v57  ;;  %1901 = vst.msk [vmem:[%s4818_s3 + $0x2d8] sm:$0xff] %vm1809_vm5, %v1731_v58  ;;  %v832_v61 = vadd.f32 %v3590_v48, %v831_v59  ;;  %v2354_v62 = vpop.f32.mrb[15].mxu0  ;;  %2512 = vmatmul.mubr.msk.f32.gmra.mrb[120].mxu0 %vm218_vm4, %v100_v55  ;;  %v1257_v63 = vadd.f32 %v3590_v48, %v1256_v60  ;;  %v2609_v0 = vpop.f32.mrb[15].mxu1  ;;  %2767 = vmatmul.mubr.msk.f32.gmra.mrb[120].mxu1 %vm218_vm4, %v185_v56 }
 0x11e   :  { %2514 = vmatprep.mubr.msk.f32.mxu0 %vm2907_vm0, %v2908_v1  ;;  %2769 = vmatprep.mubr.msk.f32.mxu1 %vm2907_vm0, %v2908_v1  ;;  %v192_v0 = vld [vmem:[%s4815_s0 + $0x4c0] sm:$0xff] }
 0x11f   :  { %v1647_v4 = vmax.f32 %v832_v61, 0.0  ;;  %v1732_v5 = vmax.f32 %v1257_v63, 0.0  ;;  %v107_v63 = vld [vmem:[%s4815_s0 + $0x218] sm:$0xff] }
 0x120   :  { %v836_v6 = vpop.f32.mrb[16].mxu0  ;;  %v1261_v7 = vpop.f32.mrb[16].mxu1 }
 0x121   :  { %1817 = vst.msk [vmem:[%s4818_s3 + $0x38] sm:$0xff] %vm1809_vm5, %v1647_v4  ;;  %1902 = vst.msk [vmem:[%s4818_s3 + $0x2e0] sm:$0xff] %vm1809_vm5, %v1732_v5  ;;  %v837_v8 = vadd.f32 %v3590_v48, %v836_v6  ;;  %v2357_v9 = vpop.f32.mrb[17].mxu0  ;;  %2515 = vmatmul.mubr.msk.f32.gmra.mrb[122].mxu0 %vm218_vm4, %v101_v2  ;;  %v1262_v10 = vadd.f32 %v3590_v48, %v1261_v7  ;;  %v2612_v11 = vpop.f32.mrb[17].mxu1  ;;  %2770 = vmatmul.mubr.msk.f32.gmra.mrb[122].mxu1 %vm218_vm4, %v186_v3 }
 0x122   :  { %2517 = vmatprep.mubr.msk.f32.mxu0 %vm2907_vm0, %v2908_v1  ;;  %2772 = vmatprep.mubr.msk.f32.mxu1 %vm2907_vm0, %v2908_v1  ;;  %v193_v11 = vld [vmem:[%s4815_s0 + $0x4c8] sm:$0xff] }
 0x123   :  { %v1648_v14 = vmax.f32 %v837_v8, 0.0  ;;  %v1733_v15 = vmax.f32 %v1262_v10, 0.0  ;;  %v108_v10 = vld [vmem:[%s4815_s0 + $0x220] sm:$0xff] }
 0x124   :  { %v841_v16 = vpop.f32.mrb[18].mxu0  ;;  %v1266_v17 = vpop.f32.mrb[18].mxu1 }
 0x125   :  { %1818 = vst.msk [vmem:[%s4818_s3 + $0x40] sm:$0xff] %vm1809_vm5, %v1648_v14  ;;  %1903 = vst.msk [vmem:[%s4818_s3 + $0x2e8] sm:$0xff] %vm1809_vm5, %v1733_v15  ;;  %v842_v18 = vadd.f32 %v3590_v48, %v841_v16  ;;  %v2360_v19 = vpop.f32.mrb[19].mxu0  ;;  %2518 = vmatmul.mubr.msk.f32.gmra.mrb[124].mxu0 %vm218_vm4, %v102_v12  ;;  %v1267_v20 = vadd.f32 %v3590_v48, %v1266_v17  ;;  %v2615_v21 = vpop.f32.mrb[19].mxu1  ;;  %2773 = vmatmul.mubr.msk.f32.gmra.mrb[124].mxu1 %vm218_vm4, %v187_v13 }
 0x126   :  { %2520 = vmatprep.mubr.msk.f32.mxu0 %vm2907_vm0, %v2908_v1  ;;  %2775 = vmatprep.mubr.msk.f32.mxu1 %vm2907_vm0, %v2908_v1  ;;  %v194_v21 = vld [vmem:[%s4815_s0 + $0x4d0] sm:$0xff] }
 0x127   :  { %v1649_v24 = vmax.f32 %v842_v18, 0.0  ;;  %v1734_v25 = vmax.f32 %v1267_v20, 0.0  ;;  %v109_v20 = vld [vmem:[%s4815_s0 + $0x228] sm:$0xff] }
 0x128   :  { %v846_v26 = vpop.f32.mrb[20].mxu0  ;;  %v1271_v27 = vpop.f32.mrb[20].mxu1 }
 0x129   :  { %1819 = vst.msk [vmem:[%s4818_s3 + $0x48] sm:$0xff] %vm1809_vm5, %v1649_v24  ;;  %1904 = vst.msk [vmem:[%s4818_s3 + $0x2f0] sm:$0xff] %vm1809_vm5, %v1734_v25  ;;  %v847_v28 = vadd.f32 %v3590_v48, %v846_v26  ;;  %v2363_v29 = vpop.f32.mrb[21].mxu0  ;;  %2521 = vmatmul.mubr.msk.f32.gmra.mrb[126].mxu0 %vm218_vm4, %v103_v22  ;;  %v1272_v30 = vadd.f32 %v3590_v48, %v1271_v27  ;;  %v2618_v31 = vpop.f32.mrb[21].mxu1  ;;  %2776 = vmatmul.mubr.msk.f32.gmra.mrb[126].mxu1 %vm218_vm4, %v188_v23 }
 0x12a   :  { %2523 = vmatprep.mubr.msk.f32.mxu0 %vm2907_vm0, %v2908_v1  ;;  %2778 = vmatprep.mubr.msk.f32.mxu1 %vm2907_vm0, %v2908_v1  ;;  %v195_v31 = vld [vmem:[%s4815_s0 + $0x4d8] sm:$0xff] }
 0x12b   :  { %v1650_v34 = vmax.f32 %v847_v28, 0.0  ;;  %v1735_v35 = vmax.f32 %v1272_v30, 0.0  ;;  %v110_v30 = vld [vmem:[%s4815_s0 + $0x230] sm:$0xff] }
 0x12c   :  { %v851_v36 = vpop.f32.mrb[22].mxu0  ;;  %v1276_v37 = vpop.f32.mrb[22].mxu1 }
 0x12d   :  { %1820 = vst.msk [vmem:[%s4818_s3 + $0x50] sm:$0xff] %vm1809_vm5, %v1650_v34  ;;  %1905 = vst.msk [vmem:[%s4818_s3 + $0x2f8] sm:$0xff] %vm1809_vm5, %v1735_v35  ;;  %v852_v38 = vadd.f32 %v3590_v48, %v851_v36  ;;  %v2366_v39 = vpop.f32.mrb[23].mxu0  ;;  %2524 = vmatmul.mubr.msk.f32.gmra.mrb[128].mxu0 %vm218_vm4, %v104_v32  ;;  %v1277_v40 = vadd.f32 %v3590_v48, %v1276_v37  ;;  %v2621_v41 = vpop.f32.mrb[23].mxu1  ;;  %2779 = vmatmul.mubr.msk.f32.gmra.mrb[128].mxu1 %vm218_vm4, %v189_v33 }
 0x12e   :  { %2526 = vmatprep.mubr.msk.f32.mxu0 %vm2907_vm0, %v2908_v1  ;;  %2781 = vmatprep.mubr.msk.f32.mxu1 %vm2907_vm0, %v2908_v1  ;;  %v196_v41 = vld [vmem:[%s4815_s0 + $0x4e0] sm:$0xff] }
 0x12f   :  { %v1651_v44 = vmax.f32 %v852_v38, 0.0  ;;  %v1736_v45 = vmax.f32 %v1277_v40, 0.0  ;;  %v111_v40 = vld [vmem:[%s4815_s0 + $0x238] sm:$0xff] }
 0x130   :  { %v856_v46 = vpop.f32.mrb[24].mxu0  ;;  %v1281_v47 = vpop.f32.mrb[24].mxu1 }
 0x131   :  { %1821 = vst.msk [vmem:[%s4818_s3 + $0x58] sm:$0xff] %vm1809_vm5, %v1651_v44  ;;  %1906 = vst.msk [vmem:[%s4818_s3 + $0x300] sm:$0xff] %vm1809_vm5, %v1736_v45  ;;  %v857_v49 = vadd.f32 %v3590_v48, %v856_v46  ;;  %v2369_v50 = vpop.f32.mrb[25].mxu0  ;;  %2527 = vmatmul.mubr.msk.f32.gmra.mrb[130].mxu0 %vm218_vm4, %v105_v42  ;;  %v1282_v51 = vadd.f32 %v3590_v48, %v1281_v47  ;;  %v2624_v52 = vpop.f32.mrb[25].mxu1  ;;  %2782 = vmatmul.mubr.msk.f32.gmra.mrb[130].mxu1 %vm218_vm4, %v190_v43 }
 0x132   :  { %2529 = vmatprep.mubr.msk.f32.mxu0 %vm2907_vm0, %v2908_v1  ;;  %2784 = vmatprep.mubr.msk.f32.mxu1 %vm2907_vm0, %v2908_v1  ;;  %v197_v52 = vld [vmem:[%s4815_s0 + $0x4e8] sm:$0xff] }
 0x133   :  { %v1652_v55 = vmax.f32 %v857_v49, 0.0  ;;  %v1737_v56 = vmax.f32 %v1282_v51, 0.0  ;;  %v112_v51 = vld [vmem:[%s4815_s0 + $0x240] sm:$0xff] }
 0x134   :  { %v861_v57 = vpop.f32.mrb[26].mxu0  ;;  %v1286_v58 = vpop.f32.mrb[26].mxu1 }
 0x135   :  { %1822 = vst.msk [vmem:[%s4818_s3 + $0x60] sm:$0xff] %vm1809_vm5, %v1652_v55  ;;  %1907 = vst.msk [vmem:[%s4818_s3 + $0x308] sm:$0xff] %vm1809_vm5, %v1737_v56  ;;  %v862_v59 = vadd.f32 %v3590_v48, %v861_v57  ;;  %v2372_v60 = vpop.f32.mrb[27].mxu0  ;;  %2530 = vmatmul.mubr.msk.f32.gmra.mrb[132].mxu0 %vm218_vm4, %v106_v53  ;;  %v1287_v61 = vadd.f32 %v3590_v48, %v1286_v58  ;;  %v2627_v62 = vpop.f32.mrb[27].mxu1  ;;  %2785 = vmatmul.mubr.msk.f32.gmra.mrb[132].mxu1 %vm218_vm4, %v191_v54 }
 0x136   :  { %2532 = vmatprep.mubr.msk.f32.mxu0 %vm2907_vm0, %v2908_v1  ;;  %2787 = vmatprep.mubr.msk.f32.mxu1 %vm2907_vm0, %v2908_v1  ;;  %v198_v62 = vld [vmem:[%s4815_s0 + $0x4f0] sm:$0xff] }
 0x137   :  { %v1653_v2 = vmax.f32 %v862_v59, 0.0  ;;  %v1738_v3 = vmax.f32 %v1287_v61, 0.0  ;;  %v113_v61 = vld [vmem:[%s4815_s0 + $0x248] sm:$0xff] }
 0x138   :  { %v866_v4 = vpop.f32.mrb[28].mxu0  ;;  %v1291_v5 = vpop.f32.mrb[28].mxu1 }
 0x139   :  { %1823 = vst.msk [vmem:[%s4818_s3 + $0x68] sm:$0xff] %vm1809_vm5, %v1653_v2  ;;  %1908 = vst.msk [vmem:[%s4818_s3 + $0x310] sm:$0xff] %vm1809_vm5, %v1738_v3  ;;  %v867_v6 = vadd.f32 %v3590_v48, %v866_v4  ;;  %v2375_v7 = vpop.f32.mrb[29].mxu0  ;;  %2533 = vmatmul.mubr.msk.f32.gmra.mrb[134].mxu0 %vm218_vm4, %v107_v63  ;;  %v1292_v8 = vadd.f32 %v3590_v48, %v1291_v5  ;;  %v2630_v9 = vpop.f32.mrb[29].mxu1  ;;  %2788 = vmatmul.mubr.msk.f32.gmra.mrb[134].mxu1 %vm218_vm4, %v192_v0 }
 0x13a   :  { %2535 = vmatprep.mubr.msk.f32.mxu0 %vm2907_vm0, %v2908_v1  ;;  %2790 = vmatprep.mubr.msk.f32.mxu1 %vm2907_vm0, %v2908_v1  ;;  %v199_v9 = vld [vmem:[%s4815_s0 + $0x4f8] sm:$0xff] }
 0x13b   :  { %v1654_v12 = vmax.f32 %v867_v6, 0.0  ;;  %v1739_v13 = vmax.f32 %v1292_v8, 0.0  ;;  %v114_v8 = vld [vmem:[%s4815_s0 + $0x250] sm:$0xff] }
 0x13c   :  { %v871_v14 = vpop.f32.mrb[30].mxu0  ;;  %v1296_v15 = vpop.f32.mrb[30].mxu1 }
 0x13d   :  { %1824 = vst.msk [vmem:[%s4818_s3 + $0x70] sm:$0xff] %vm1809_vm5, %v1654_v12  ;;  %1909 = vst.msk [vmem:[%s4818_s3 + $0x318] sm:$0xff] %vm1809_vm5, %v1739_v13  ;;  %v872_v16 = vadd.f32 %v3590_v48, %v871_v14  ;;  %v2378_v17 = vpop.f32.mrb[31].mxu0  ;;  %2536 = vmatmul.mubr.msk.f32.gmra.mrb[136].mxu0 %vm218_vm4, %v108_v10  ;;  %v1297_v18 = vadd.f32 %v3590_v48, %v1296_v15  ;;  %v2633_v19 = vpop.f32.mrb[31].mxu1  ;;  %2791 = vmatmul.mubr.msk.f32.gmra.mrb[136].mxu1 %vm218_vm4, %v193_v11 }
 0x13e   :  { %2538 = vmatprep.mubr.msk.f32.mxu0 %vm2907_vm0, %v2908_v1  ;;  %2793 = vmatprep.mubr.msk.f32.mxu1 %vm2907_vm0, %v2908_v1  ;;  %v200_v19 = vld [vmem:[%s4815_s0 + $0x500] sm:$0xff] }
 0x13f   :  { %v1655_v22 = vmax.f32 %v872_v16, 0.0  ;;  %v1740_v23 = vmax.f32 %v1297_v18, 0.0  ;;  %v115_v18 = vld [vmem:[%s4815_s0 + $0x258] sm:$0xff] }
 0x140   :  { %v876_v24 = vpop.f32.mrb[32].mxu0  ;;  %v1301_v25 = vpop.f32.mrb[32].mxu1 }
 0x141   :  { %1825 = vst.msk [vmem:[%s4818_s3 + $0x78] sm:$0xff] %vm1809_vm5, %v1655_v22  ;;  %1910 = vst.msk [vmem:[%s4818_s3 + $0x320] sm:$0xff] %vm1809_vm5, %v1740_v23  ;;  %v877_v26 = vadd.f32 %v3590_v48, %v876_v24  ;;  %v2381_v27 = vpop.f32.mrb[33].mxu0  ;;  %2539 = vmatmul.mubr.msk.f32.gmra.mrb[138].mxu0 %vm218_vm4, %v109_v20  ;;  %v1302_v28 = vadd.f32 %v3590_v48, %v1301_v25  ;;  %v2636_v29 = vpop.f32.mrb[33].mxu1  ;;  %2794 = vmatmul.mubr.msk.f32.gmra.mrb[138].mxu1 %vm218_vm4, %v194_v21 }
 0x142   :  { %2541 = vmatprep.mubr.msk.f32.mxu0 %vm2907_vm0, %v2908_v1  ;;  %2796 = vmatprep.mubr.msk.f32.mxu1 %vm2907_vm0, %v2908_v1  ;;  %v201_v29 = vld [vmem:[%s4815_s0 + $0x508] sm:$0xff] }
 0x143   :  { %v1656_v32 = vmax.f32 %v877_v26, 0.0  ;;  %v1741_v33 = vmax.f32 %v1302_v28, 0.0  ;;  %v116_v28 = vld [vmem:[%s4815_s0 + $0x260] sm:$0xff] }
 0x144   :  { %v881_v34 = vpop.f32.mrb[34].mxu0  ;;  %v1306_v35 = vpop.f32.mrb[34].mxu1 }
 0x145   :  { %1826 = vst.msk [vmem:[%s4818_s3 + $0x80] sm:$0xff] %vm1809_vm5, %v1656_v32  ;;  %1911 = vst.msk [vmem:[%s4818_s3 + $0x328] sm:$0xff] %vm1809_vm5, %v1741_v33  ;;  %v882_v36 = vadd.f32 %v3590_v48, %v881_v34  ;;  %v2384_v37 = vpop.f32.mrb[35].mxu0  ;;  %2542 = vmatmul.mubr.msk.f32.gmra.mrb[140].mxu0 %vm218_vm4, %v110_v30  ;;  %v1307_v38 = vadd.f32 %v3590_v48, %v1306_v35  ;;  %v2639_v39 = vpop.f32.mrb[35].mxu1  ;;  %2797 = vmatmul.mubr.msk.f32.gmra.mrb[140].mxu1 %vm218_vm4, %v195_v31 }
 0x146   :  { %2544 = vmatprep.mubr.msk.f32.mxu0 %vm2907_vm0, %v2908_v1  ;;  %2799 = vmatprep.mubr.msk.f32.mxu1 %vm2907_vm0, %v2908_v1  ;;  %v202_v39 = vld [vmem:[%s4815_s0 + $0x510] sm:$0xff] }
 0x147   :  { %v1657_v42 = vmax.f32 %v882_v36, 0.0  ;;  %v1742_v43 = vmax.f32 %v1307_v38, 0.0  ;;  %v117_v38 = vld [vmem:[%s4815_s0 + $0x268] sm:$0xff] }
 0x148   :  { %v886_v44 = vpop.f32.mrb[36].mxu0  ;;  %v1311_v45 = vpop.f32.mrb[36].mxu1 }
 0x149   :  { %1827 = vst.msk [vmem:[%s4818_s3 + $0x88] sm:$0xff] %vm1809_vm5, %v1657_v42  ;;  %1912 = vst.msk [vmem:[%s4818_s3 + $0x330] sm:$0xff] %vm1809_vm5, %v1742_v43  ;;  %v887_v46 = vadd.f32 %v3590_v48, %v886_v44  ;;  %v2387_v47 = vpop.f32.mrb[37].mxu0  ;;  %2545 = vmatmul.mubr.msk.f32.gmra.mrb[142].mxu0 %vm218_vm4, %v111_v40  ;;  %v1312_v49 = vadd.f32 %v3590_v48, %v1311_v45  ;;  %v2642_v50 = vpop.f32.mrb[37].mxu1  ;;  %2800 = vmatmul.mubr.msk.f32.gmra.mrb[142].mxu1 %vm218_vm4, %v196_v41 }
 0x14a   :  { %2547 = vmatprep.mubr.msk.f32.mxu0 %vm2907_vm0, %v2908_v1  ;;  %2802 = vmatprep.mubr.msk.f32.mxu1 %vm2907_vm0, %v2908_v1  ;;  %v203_v50 = vld [vmem:[%s4815_s0 + $0x518] sm:$0xff] }
 0x14b   :  { %v1658_v53 = vmax.f32 %v887_v46, 0.0  ;;  %v1743_v54 = vmax.f32 %v1312_v49, 0.0  ;;  %v118_v49 = vld [vmem:[%s4815_s0 + $0x270] sm:$0xff] }
 0x14c   :  { %v891_v55 = vpop.f32.mrb[38].mxu0  ;;  %v1316_v56 = vpop.f32.mrb[38].mxu1 }
 0x14d   :  { %1828 = vst.msk [vmem:[%s4818_s3 + $0x90] sm:$0xff] %vm1809_vm5, %v1658_v53  ;;  %1913 = vst.msk [vmem:[%s4818_s3 + $0x338] sm:$0xff] %vm1809_vm5, %v1743_v54  ;;  %v892_v57 = vadd.f32 %v3590_v48, %v891_v55  ;;  %v2390_v58 = vpop.f32.mrb[39].mxu0  ;;  %2548 = vmatmul.mubr.msk.f32.gmra.mrb[144].mxu0 %vm218_vm4, %v112_v51  ;;  %v1317_v59 = vadd.f32 %v3590_v48, %v1316_v56  ;;  %v2645_v60 = vpop.f32.mrb[39].mxu1  ;;  %2803 = vmatmul.mubr.msk.f32.gmra.mrb[144].mxu1 %vm218_vm4, %v197_v52 }
 0x14e   :  { %2550 = vmatprep.mubr.msk.f32.mxu0 %vm2907_vm0, %v2908_v1  ;;  %2805 = vmatprep.mubr.msk.f32.mxu1 %vm2907_vm0, %v2908_v1  ;;  %v204_v60 = vld [vmem:[%s4815_s0 + $0x520] sm:$0xff] }
 0x14f   :  { %v1659_v63 = vmax.f32 %v892_v57, 0.0  ;;  %v1744_v0 = vmax.f32 %v1317_v59, 0.0  ;;  %v119_v59 = vld [vmem:[%s4815_s0 + $0x278] sm:$0xff] }
 0x150   :  { %v896_v2 = vpop.f32.mrb[40].mxu0  ;;  %v1321_v3 = vpop.f32.mrb[40].mxu1 }
 0x151   :  { %1829 = vst.msk [vmem:[%s4818_s3 + $0x98] sm:$0xff] %vm1809_vm5, %v1659_v63  ;;  %1914 = vst.msk [vmem:[%s4818_s3 + $0x340] sm:$0xff] %vm1809_vm5, %v1744_v0  ;;  %v897_v4 = vadd.f32 %v3590_v48, %v896_v2  ;;  %v2393_v5 = vpop.f32.mrb[41].mxu0  ;;  %2551 = vmatmul.mubr.msk.f32.gmra.mrb[146].mxu0 %vm218_vm4, %v113_v61  ;;  %v1322_v6 = vadd.f32 %v3590_v48, %v1321_v3  ;;  %v2648_v7 = vpop.f32.mrb[41].mxu1  ;;  %2806 = vmatmul.mubr.msk.f32.gmra.mrb[146].mxu1 %vm218_vm4, %v198_v62 }
 0x152   :  { %2553 = vmatprep.mubr.msk.f32.mxu0 %vm2907_vm0, %v2908_v1  ;;  %2808 = vmatprep.mubr.msk.f32.mxu1 %vm2907_vm0, %v2908_v1  ;;  %v205_v7 = vld [vmem:[%s4815_s0 + $0x528] sm:$0xff] }
 0x153   :  { %v1660_v10 = vmax.f32 %v897_v4, 0.0  ;;  %v1745_v11 = vmax.f32 %v1322_v6, 0.0  ;;  %v120_v6 = vld [vmem:[%s4815_s0 + $0x280] sm:$0xff] }
 0x154   :  { %v901_v12 = vpop.f32.mrb[42].mxu0  ;;  %v1326_v13 = vpop.f32.mrb[42].mxu1 }
 0x155   :  { %1830 = vst.msk [vmem:[%s4818_s3 + $0xa0] sm:$0xff] %vm1809_vm5, %v1660_v10  ;;  %1915 = vst.msk [vmem:[%s4818_s3 + $0x348] sm:$0xff] %vm1809_vm5, %v1745_v11  ;;  %v902_v14 = vadd.f32 %v3590_v48, %v901_v12  ;;  %v2396_v15 = vpop.f32.mrb[43].mxu0  ;;  %2554 = vmatmul.mubr.msk.f32.gmra.mrb[148].mxu0 %vm218_vm4, %v114_v8  ;;  %v1327_v16 = vadd.f32 %v3590_v48, %v1326_v13  ;;  %v2651_v17 = vpop.f32.mrb[43].mxu1  ;;  %2809 = vmatmul.mubr.msk.f32.gmra.mrb[148].mxu1 %vm218_vm4, %v199_v9 }
 0x156   :  { %2556 = vmatprep.mubr.msk.f32.mxu0 %vm2907_vm0, %v2908_v1  ;;  %2811 = vmatprep.mubr.msk.f32.mxu1 %vm2907_vm0, %v2908_v1  ;;  %v206_v17 = vld [vmem:[%s4815_s0 + $0x530] sm:$0xff] }
 0x157   :  { %v1661_v20 = vmax.f32 %v902_v14, 0.0  ;;  %v1746_v21 = vmax.f32 %v1327_v16, 0.0  ;;  %v121_v16 = vld [vmem:[%s4815_s0 + $0x288] sm:$0xff] }
 0x158   :  { %v906_v22 = vpop.f32.mrb[44].mxu0  ;;  %v1331_v23 = vpop.f32.mrb[44].mxu1 }
 0x159   :  { %1831 = vst.msk [vmem:[%s4818_s3 + $0xa8] sm:$0xff] %vm1809_vm5, %v1661_v20  ;;  %1916 = vst.msk [vmem:[%s4818_s3 + $0x350] sm:$0xff] %vm1809_vm5, %v1746_v21  ;;  %v907_v24 = vadd.f32 %v3590_v48, %v906_v22  ;;  %v2399_v25 = vpop.f32.mrb[45].mxu0  ;;  %2557 = vmatmul.mubr.msk.f32.gmra.mrb[150].mxu0 %vm218_vm4, %v115_v18  ;;  %v1332_v26 = vadd.f32 %v3590_v48, %v1331_v23  ;;  %v2654_v27 = vpop.f32.mrb[45].mxu1  ;;  %2812 = vmatmul.mubr.msk.f32.gmra.mrb[150].mxu1 %vm218_vm4, %v200_v19 }
 0x15a   :  { %2559 = vmatprep.mubr.msk.f32.mxu0 %vm2907_vm0, %v2908_v1  ;;  %2814 = vmatprep.mubr.msk.f32.mxu1 %vm2907_vm0, %v2908_v1  ;;  %v207_v27 = vld [vmem:[%s4815_s0 + $0x538] sm:$0xff] }
 0x15b   :  { %v1662_v30 = vmax.f32 %v907_v24, 0.0  ;;  %v1747_v31 = vmax.f32 %v1332_v26, 0.0  ;;  %v122_v26 = vld [vmem:[%s4815_s0 + $0x290] sm:$0xff] }
 0x15c   :  { %v911_v32 = vpop.f32.mrb[46].mxu0  ;;  %v1336_v33 = vpop.f32.mrb[46].mxu1 }
 0x15d   :  { %1832 = vst.msk [vmem:[%s4818_s3 + $0xb0] sm:$0xff] %vm1809_vm5, %v1662_v30  ;;  %1917 = vst.msk [vmem:[%s4818_s3 + $0x358] sm:$0xff] %vm1809_vm5, %v1747_v31  ;;  %v912_v34 = vadd.f32 %v3590_v48, %v911_v32  ;;  %v2402_v35 = vpop.f32.mrb[47].mxu0  ;;  %2560 = vmatmul.mubr.msk.f32.gmra.mrb[152].mxu0 %vm218_vm4, %v116_v28  ;;  %v1337_v36 = vadd.f32 %v3590_v48, %v1336_v33  ;;  %v2657_v37 = vpop.f32.mrb[47].mxu1  ;;  %2815 = vmatmul.mubr.msk.f32.gmra.mrb[152].mxu1 %vm218_vm4, %v201_v29 }
 0x15e   :  { %2562 = vmatprep.mubr.msk.f32.mxu0 %vm2907_vm0, %v2908_v1  ;;  %2817 = vmatprep.mubr.msk.f32.mxu1 %vm2907_vm0, %v2908_v1  ;;  %v208_v37 = vld [vmem:[%s4815_s0 + $0x540] sm:$0xff] }
 0x15f   :  { %v1663_v40 = vmax.f32 %v912_v34, 0.0  ;;  %v1748_v41 = vmax.f32 %v1337_v36, 0.0  ;;  %v123_v36 = vld [vmem:[%s4815_s0 + $0x298] sm:$0xff] }
 0x160   :  { %v916_v42 = vpop.f32.mrb[48].mxu0  ;;  %v1341_v43 = vpop.f32.mrb[48].mxu1 }
 0x161   :  { %1833 = vst.msk [vmem:[%s4818_s3 + $0xb8] sm:$0xff] %vm1809_vm5, %v1663_v40  ;;  %1918 = vst.msk [vmem:[%s4818_s3 + $0x360] sm:$0xff] %vm1809_vm5, %v1748_v41  ;;  %v917_v44 = vadd.f32 %v3590_v48, %v916_v42  ;;  %v2405_v45 = vpop.f32.mrb[49].mxu0  ;;  %2563 = vmatmul.mubr.msk.f32.gmra.mrb[154].mxu0 %vm218_vm4, %v117_v38  ;;  %v1342_v46 = vadd.f32 %v3590_v48, %v1341_v43  ;;  %v2660_v47 = vpop.f32.mrb[49].mxu1  ;;  %2818 = vmatmul.mubr.msk.f32.gmra.mrb[154].mxu1 %vm218_vm4, %v202_v39 }
 0x162   :  { %2565 = vmatprep.mubr.msk.f32.mxu0 %vm2907_vm0, %v2908_v1  ;;  %2820 = vmatprep.mubr.msk.f32.mxu1 %vm2907_vm0, %v2908_v1 }
 0x163   :  { %v1664_v51 = vmax.f32 %v917_v44, 0.0  ;;  %v1749_v52 = vmax.f32 %v1342_v46, 0.0  ;;  %v124_v46 = vld [vmem:[%s4815_s0 + $0x2a0] sm:$0xff] }
 0x164   :  { %v921_v53 = vpop.f32.mrb[50].mxu0  ;;  %v1346_v54 = vpop.f32.mrb[50].mxu1 }
 0x165   :  { %1834 = vst.msk [vmem:[%s4818_s3 + $0xc0] sm:$0xff] %vm1809_vm5, %v1664_v51  ;;  %1919 = vst.msk [vmem:[%s4818_s3 + $0x368] sm:$0xff] %vm1809_vm5, %v1749_v52  ;;  %v922_v55 = vadd.f32 %v3590_v48, %v921_v53  ;;  %v2408_v56 = vpop.f32.mrb[51].mxu0  ;;  %2566 = vmatmul.mubr.msk.f32.gmra.mrb[156].mxu0 %vm218_vm4, %v118_v49  ;;  %v1347_v57 = vadd.f32 %v3590_v48, %v1346_v54  ;;  %v2663_v58 = vpop.f32.mrb[51].mxu1  ;;  %2821 = vmatmul.mubr.msk.f32.gmra.mrb[156].mxu1 %vm218_vm4, %v203_v50 }
 0x166   :  { %2568 = vmatprep.mubr.msk.f32.mxu0 %vm2907_vm0, %v2908_v1  ;;  %2823 = vmatprep.mubr.msk.f32.mxu1 %vm2907_vm0, %v2908_v1 }
 0x167   :  { %v1665_v61 = vmax.f32 %v922_v55, 0.0  ;;  %v1750_v62 = vmax.f32 %v1347_v57, 0.0 }
 0x168   :  { %v926_v63 = vpop.f32.mrb[52].mxu0  ;;  %v1351_v0 = vpop.f32.mrb[52].mxu1 }
 0x169   :  { %1835 = vst.msk [vmem:[%s4818_s3 + $0xc8] sm:$0xff] %vm1809_vm5, %v1665_v61  ;;  %1920 = vst.msk [vmem:[%s4818_s3 + $0x370] sm:$0xff] %vm1809_vm5, %v1750_v62  ;;  %v927_v2 = vadd.f32 %v3590_v48, %v926_v63  ;;  %v2411_v3 = vpop.f32.mrb[53].mxu0  ;;  %2569 = vmatmul.mubr.msk.f32.gmra.mrb[158].mxu0 %vm218_vm4, %v119_v59  ;;  %v1352_v4 = vadd.f32 %v3590_v48, %v1351_v0  ;;  %v2666_v5 = vpop.f32.mrb[53].mxu1  ;;  %2824 = vmatmul.mubr.msk.f32.gmra.mrb[158].mxu1 %vm218_vm4, %v204_v60  ;;  %v4290_v59 = vld [vmem:[#allocation4] ss:$0 sm:$0xff] }
 0x16a   :  { %2571 = vmatprep.mubr.msk.f32.mxu0 %vm2907_vm0, %v2908_v1  ;;  %2826 = vmatprep.mubr.msk.f32.mxu1 %vm2907_vm0, %v2908_v1 }
 0x16b   :  { %v1666_v8 = vmax.f32 %v927_v2, 0.0  ;;  %v1751_v9 = vmax.f32 %v1352_v4, 0.0 }
 0x16c   :  { %v931_v10 = vpop.f32.mrb[54].mxu0  ;;  %v1356_v11 = vpop.f32.mrb[54].mxu1 }
 0x16d   :  { %1836 = vst.msk [vmem:[%s4818_s3 + $0xd0] sm:$0xff] %vm1809_vm5, %v1666_v8  ;;  %1921 = vst.msk [vmem:[%s4818_s3 + $0x378] sm:$0xff] %vm1809_vm5, %v1751_v9  ;;  %v932_v12 = vadd.f32 %v3590_v48, %v931_v10  ;;  %v2414_v13 = vpop.f32.mrb[55].mxu0  ;;  %2572 = vmatmul.mubr.msk.f32.gmra.mrb[160].mxu0 %vm218_vm4, %v120_v6  ;;  %v1357_v14 = vadd.f32 %v3590_v48, %v1356_v11  ;;  %v2669_v15 = vpop.f32.mrb[55].mxu1  ;;  %2827 = vmatmul.mubr.msk.f32.gmra.mrb[160].mxu1 %vm218_vm4, %v205_v7 }
 0x16e   :  { %2574 = vmatprep.mubr.msk.f32.mxu0 %vm2907_vm0, %v2908_v1  ;;  %2829 = vmatprep.mubr.msk.f32.mxu1 %vm2907_vm0, %v2908_v1 }
 0x16f   :  { %v1667_v18 = vmax.f32 %v932_v12, 0.0  ;;  %v1752_v19 = vmax.f32 %v1357_v14, 0.0 }
 0x170   :  { %v936_v20 = vpop.f32.mrb[56].mxu0  ;;  %v1361_v21 = vpop.f32.mrb[56].mxu1 }
 0x171   :  { %1837 = vst.msk [vmem:[%s4818_s3 + $0xd8] sm:$0xff] %vm1809_vm5, %v1667_v18  ;;  %1922 = vst.msk [vmem:[%s4818_s3 + $0x380] sm:$0xff] %vm1809_vm5, %v1752_v19  ;;  %v937_v22 = vadd.f32 %v3590_v48, %v936_v20  ;;  %v2417_v23 = vpop.f32.mrb[57].mxu0  ;;  %2575 = vmatmul.mubr.msk.f32.gmra.mrb[162].mxu0 %vm218_vm4, %v121_v16  ;;  %v1362_v24 = vadd.f32 %v3590_v48, %v1361_v21  ;;  %v2672_v25 = vpop.f32.mrb[57].mxu1  ;;  %2830 = vmatmul.mubr.msk.f32.gmra.mrb[162].mxu1 %vm218_vm4, %v206_v17 }
 0x172   :  { %2577 = vmatprep.mubr.msk.f32.mxu0 %vm2907_vm0, %v2908_v1  ;;  %2832 = vmatprep.mubr.msk.f32.mxu1 %vm2907_vm0, %v2908_v1 }
 0x173   :  { %v1668_v28 = vmax.f32 %v937_v22, 0.0  ;;  %v1753_v29 = vmax.f32 %v1362_v24, 0.0 }
 0x174   :  { %v941_v30 = vpop.f32.mrb[58].mxu0  ;;  %v1366_v31 = vpop.f32.mrb[58].mxu1 }
 0x175   :  { %1838 = vst.msk [vmem:[%s4818_s3 + $0xe0] sm:$0xff] %vm1809_vm5, %v1668_v28  ;;  %1923 = vst.msk [vmem:[%s4818_s3 + $0x388] sm:$0xff] %vm1809_vm5, %v1753_v29  ;;  %v942_v32 = vadd.f32 %v3590_v48, %v941_v30  ;;  %v2420_v33 = vpop.f32.mrb[59].mxu0  ;;  %2578 = vmatmul.mubr.msk.f32.gmra.mrb[164].mxu0 %vm218_vm4, %v122_v26  ;;  %v1367_v34 = vadd.f32 %v3590_v48, %v1366_v31  ;;  %v2675_v35 = vpop.f32.mrb[59].mxu1  ;;  %2833 = vmatmul.mubr.msk.f32.gmra.mrb[164].mxu1 %vm218_vm4, %v207_v27 }
 0x176   :  { %2580 = vmatprep.mubr.msk.f32.mxu0 %vm2907_vm0, %v2908_v1  ;;  %2835 = vmatprep.mubr.msk.f32.mxu1 %vm2907_vm0, %v2908_v1 }
 0x177   :  { %v1669_v38 = vmax.f32 %v942_v32, 0.0  ;;  %v1754_v39 = vmax.f32 %v1367_v34, 0.0 }
 0x178   :  { %v946_v40 = vpop.f32.mrb[60].mxu0  ;;  %v1371_v41 = vpop.f32.mrb[60].mxu1 }
 0x179   :  { %1839 = vst.msk [vmem:[%s4818_s3 + $0xe8] sm:$0xff] %vm1809_vm5, %v1669_v38  ;;  %1924 = vst.msk [vmem:[%s4818_s3 + $0x390] sm:$0xff] %vm1809_vm5, %v1754_v39  ;;  %v947_v42 = vadd.f32 %v3590_v48, %v946_v40  ;;  %v2423_v43 = vpop.f32.mrb[61].mxu0  ;;  %2581 = vmatmul.mubr.msk.f32.gmra.mrb[166].mxu0 %vm218_vm4, %v123_v36  ;;  %v1372_v44 = vadd.f32 %v3590_v48, %v1371_v41  ;;  %v2678_v45 = vpop.f32.mrb[61].mxu1  ;;  %2836 = vmatmul.mubr.msk.f32.gmra.mrb[166].mxu1 %vm218_vm4, %v208_v37 }
 0x17a   :  { %2583 = vmatprep.mubr.msk.f32.mxu0 %vm2907_vm0, %v2908_v1 }
 0x17b   :  { %v1670_v47 = vmax.f32 %v947_v42, 0.0  ;;  %v1755_v49 = vmax.f32 %v1372_v44, 0.0 }
 0x17c   :  { %v951_v50 = vpop.f32.mrb[62].mxu0  ;;  %v1376_v51 = vpop.f32.mrb[62].mxu1 }
 0x17d   :  { %1840 = vst.msk [vmem:[%s4818_s3 + $0xf0] sm:$0xff] %vm1809_vm5, %v1670_v47  ;;  %1925 = vst.msk [vmem:[%s4818_s3 + $0x398] sm:$0xff] %vm1809_vm5, %v1755_v49  ;;  %v952_v1 = vadd.f32 %v3590_v48, %v951_v50  ;;  %v2426_v52 = vpop.f32.mrb[63].mxu0  ;;  %2584 = vmatmul.mubr.msk.f32.gmra.mrb[168].mxu0 %vm218_vm4, %v124_v46  ;;  %v1377_v53 = vadd.f32 %v3590_v48, %v1376_v51  ;;  %v2681_v54 = vpop.f32.mrb[63].mxu1 }
 0x17f   :  { %v1671_v55 = vmax.f32 %v952_v1, 0.0  ;;  %v1756_v56 = vmax.f32 %v1377_v53, 0.0 }
 0x180   :  { %v956_v57 = vpop.f32.mrb[64].mxu0  ;;  %v1381_v58 = vpop.f32.mrb[64].mxu1 }
 0x181   :  { %1841 = vst.msk [vmem:[%s4818_s3 + $0xf8] sm:$0xff] %vm1809_vm5, %v1671_v55  ;;  %1926 = vst.msk [vmem:[%s4818_s3 + $0x3a0] sm:$0xff] %vm1809_vm5, %v1756_v56  ;;  %v957_v60 = vadd.f32 %v4290_v59, %v956_v57  ;;  %v2429_v48 = vpop.f32.mrb[65].mxu0  ;;  %v1382_v61 = vadd.f32 %v4290_v59, %v1381_v58  ;;  %v2684_v62 = vpop.f32.mrb[65].mxu1 }
 0x183   :  { %v1672_v63 = vmax.f32 %v957_v60, 0.0  ;;  %v1757_v0 = vmax.f32 %v1382_v61, 0.0 }
 0x184   :  { %v961_v2 = vpop.f32.mrb[66].mxu0  ;;  %v1386_v3 = vpop.f32.mrb[66].mxu1 }
 0x185   :  { %1842 = vst.msk [vmem:[%s4818_s3 + $0x100] sm:$0xff] %vm1809_vm5, %v1672_v63  ;;  %1927 = vst.msk [vmem:[%s4818_s3 + $0x3a8] sm:$0xff] %vm1809_vm5, %v1757_v0  ;;  %v962_v4 = vadd.f32 %v4290_v59, %v961_v2  ;;  %v2432_v5 = vpop.f32.mrb[67].mxu0  ;;  %v1387_v6 = vadd.f32 %v4290_v59, %v1386_v3  ;;  %v2687_v7 = vpop.f32.mrb[67].mxu1 }
 0x187   :  { %v1673_v8 = vmax.f32 %v962_v4, 0.0  ;;  %v1758_v9 = vmax.f32 %v1387_v6, 0.0 }
 0x188   :  { %v966_v10 = vpop.f32.mrb[68].mxu0  ;;  %v1391_v11 = vpop.f32.mrb[68].mxu1 }
 0x189   :  { %1843 = vst.msk [vmem:[%s4818_s3 + $0x108] sm:$0xff] %vm1809_vm5, %v1673_v8  ;;  %1928 = vst.msk [vmem:[%s4818_s3 + $0x3b0] sm:$0xff] %vm1809_vm5, %v1758_v9  ;;  %v967_v12 = vadd.f32 %v4290_v59, %v966_v10  ;;  %v2435_v13 = vpop.f32.mrb[69].mxu0  ;;  %v1392_v14 = vadd.f32 %v4290_v59, %v1391_v11  ;;  %v2690_v15 = vpop.f32.mrb[69].mxu1 }
 0x18b   :  { %v1674_v16 = vmax.f32 %v967_v12, 0.0  ;;  %v1759_v17 = vmax.f32 %v1392_v14, 0.0 }
 0x18c   :  { %v971_v18 = vpop.f32.mrb[70].mxu0  ;;  %v1396_v19 = vpop.f32.mrb[70].mxu1 }
 0x18d   :  { %1844 = vst.msk [vmem:[%s4818_s3 + $0x110] sm:$0xff] %vm1809_vm5, %v1674_v16  ;;  %1929 = vst.msk [vmem:[%s4818_s3 + $0x3b8] sm:$0xff] %vm1809_vm5, %v1759_v17  ;;  %v972_v20 = vadd.f32 %v4290_v59, %v971_v18  ;;  %v2438_v21 = vpop.f32.mrb[71].mxu0  ;;  %v1397_v22 = vadd.f32 %v4290_v59, %v1396_v19  ;;  %v2693_v23 = vpop.f32.mrb[71].mxu1 }
 0x18f   :  { %v1675_v24 = vmax.f32 %v972_v20, 0.0  ;;  %v1760_v25 = vmax.f32 %v1397_v22, 0.0 }
 0x190   :  { %v976_v26 = vpop.f32.mrb[72].mxu0  ;;  %v1401_v27 = vpop.f32.mrb[72].mxu1 }
 0x191   :  { %1845 = vst.msk [vmem:[%s4818_s3 + $0x118] sm:$0xff] %vm1809_vm5, %v1675_v24  ;;  %1930 = vst.msk [vmem:[%s4818_s3 + $0x3c0] sm:$0xff] %vm1809_vm5, %v1760_v25  ;;  %v977_v28 = vadd.f32 %v4290_v59, %v976_v26  ;;  %v2441_v29 = vpop.f32.mrb[73].mxu0  ;;  %v1402_v30 = vadd.f32 %v4290_v59, %v1401_v27  ;;  %v2696_v31 = vpop.f32.mrb[73].mxu1 }
 0x193   :  { %v1676_v32 = vmax.f32 %v977_v28, 0.0  ;;  %v1761_v33 = vmax.f32 %v1402_v30, 0.0 }
 0x194   :  { %v981_v34 = vpop.f32.mrb[74].mxu0  ;;  %v1406_v35 = vpop.f32.mrb[74].mxu1 }
 0x195   :  { %1846 = vst.msk [vmem:[%s4818_s3 + $0x120] sm:$0xff] %vm1809_vm5, %v1676_v32  ;;  %1931 = vst.msk [vmem:[%s4818_s3 + $0x3c8] sm:$0xff] %vm1809_vm5, %v1761_v33  ;;  %v982_v36 = vadd.f32 %v4290_v59, %v981_v34  ;;  %v2444_v37 = vpop.f32.mrb[75].mxu0  ;;  %v1407_v38 = vadd.f32 %v4290_v59, %v1406_v35  ;;  %v2699_v39 = vpop.f32.mrb[75].mxu1 }
 0x197   :  { %v1677_v40 = vmax.f32 %v982_v36, 0.0  ;;  %v1762_v41 = vmax.f32 %v1407_v38, 0.0 }
 0x198   :  { %v986_v42 = vpop.f32.mrb[76].mxu0  ;;  %v1411_v43 = vpop.f32.mrb[76].mxu1 }
 0x199   :  { %1847 = vst.msk [vmem:[%s4818_s3 + $0x128] sm:$0xff] %vm1809_vm5, %v1677_v40  ;;  %1932 = vst.msk [vmem:[%s4818_s3 + $0x3d0] sm:$0xff] %vm1809_vm5, %v1762_v41  ;;  %v987_v44 = vadd.f32 %v4290_v59, %v986_v42  ;;  %v2447_v45 = vpop.f32.mrb[77].mxu0  ;;  %v1412_v46 = vadd.f32 %v4290_v59, %v1411_v43  ;;  %v2702_v47 = vpop.f32.mrb[77].mxu1 }
 0x19b   :  { %v1678_v49 = vmax.f32 %v987_v44, 0.0  ;;  %v1763_v50 = vmax.f32 %v1412_v46, 0.0 }
 0x19c   :  { %v991_v51 = vpop.f32.mrb[78].mxu0  ;;  %v1416_v1 = vpop.f32.mrb[78].mxu1 }
 0x19d   :  { %1848 = vst.msk [vmem:[%s4818_s3 + $0x130] sm:$0xff] %vm1809_vm5, %v1678_v49  ;;  %1933 = vst.msk [vmem:[%s4818_s3 + $0x3d8] sm:$0xff] %vm1809_vm5, %v1763_v50  ;;  %v992_v52 = vadd.f32 %v4290_v59, %v991_v51  ;;  %v2450_v53 = vpop.f32.mrb[79].mxu0  ;;  %v1417_v54 = vadd.f32 %v4290_v59, %v1416_v1  ;;  %v2705_v55 = vpop.f32.mrb[79].mxu1 }
 0x19f   :  { %v1679_v56 = vmax.f32 %v992_v52, 0.0  ;;  %v1764_v57 = vmax.f32 %v1417_v54, 0.0 }
 0x1a0   :  { %v996_v58 = vpop.f32.mrb[80].mxu0  ;;  %v1421_v60 = vpop.f32.mrb[80].mxu1 }
 0x1a1   :  { %1849 = vst.msk [vmem:[%s4818_s3 + $0x138] sm:$0xff] %vm1809_vm5, %v1679_v56  ;;  %1934 = vst.msk [vmem:[%s4818_s3 + $0x3e0] sm:$0xff] %vm1809_vm5, %v1764_v57  ;;  %v997_v48 = vadd.f32 %v4290_v59, %v996_v58  ;;  %v2453_v61 = vpop.f32.mrb[81].mxu0  ;;  %v1422_v62 = vadd.f32 %v4290_v59, %v1421_v60  ;;  %v2708_v63 = vpop.f32.mrb[81].mxu1 }
 0x1a3   :  { %v1680_v0 = vmax.f32 %v997_v48, 0.0  ;;  %v1765_v2 = vmax.f32 %v1422_v62, 0.0 }
 0x1a4   :  { %v1001_v3 = vpop.f32.mrb[82].mxu0  ;;  %v1426_v4 = vpop.f32.mrb[82].mxu1 }
 0x1a5   :  { %1850 = vst.msk [vmem:[%s4818_s3 + $0x140] sm:$0xff] %vm1809_vm5, %v1680_v0  ;;  %1935 = vst.msk [vmem:[%s4818_s3 + $0x3e8] sm:$0xff] %vm1809_vm5, %v1765_v2  ;;  %v1002_v5 = vadd.f32 %v4290_v59, %v1001_v3  ;;  %v2456_v6 = vpop.f32.mrb[83].mxu0  ;;  %v1427_v7 = vadd.f32 %v4290_v59, %v1426_v4  ;;  %v2711_v8 = vpop.f32.mrb[83].mxu1 }
 0x1a7   :  { %v1681_v9 = vmax.f32 %v1002_v5, 0.0  ;;  %v1766_v10 = vmax.f32 %v1427_v7, 0.0 }
 0x1a8   :  { %v1006_v11 = vpop.f32.mrb[84].mxu0  ;;  %v1431_v12 = vpop.f32.mrb[84].mxu1 }
 0x1a9   :  { %1851 = vst.msk [vmem:[%s4818_s3 + $0x148] sm:$0xff] %vm1809_vm5, %v1681_v9  ;;  %1936 = vst.msk [vmem:[%s4818_s3 + $0x3f0] sm:$0xff] %vm1809_vm5, %v1766_v10  ;;  %v1007_v13 = vadd.f32 %v4290_v59, %v1006_v11  ;;  %v2459_v14 = vpop.f32.mrb[85].mxu0  ;;  %v1432_v15 = vadd.f32 %v4290_v59, %v1431_v12  ;;  %v2714_v16 = vpop.f32.mrb[85].mxu1 }
 0x1ab   :  { %v1682_v17 = vmax.f32 %v1007_v13, 0.0  ;;  %v1767_v18 = vmax.f32 %v1432_v15, 0.0 }
 0x1ac   :  { %v1011_v19 = vpop.f32.mrb[86].mxu0  ;;  %v1436_v20 = vpop.f32.mrb[86].mxu1 }
 0x1ad   :  { %1852 = vst.msk [vmem:[%s4818_s3 + $0x150] sm:$0xff] %vm1809_vm5, %v1682_v17  ;;  %1937 = vst.msk [vmem:[%s4818_s3 + $0x3f8] sm:$0xff] %vm1809_vm5, %v1767_v18  ;;  %v1012_v21 = vadd.f32 %v4290_v59, %v1011_v19  ;;  %v2462_v22 = vpop.f32.mrb[87].mxu0  ;;  %v1437_v23 = vadd.f32 %v4290_v59, %v1436_v20  ;;  %v2717_v24 = vpop.f32.mrb[87].mxu1 }
 0x1af   :  { %v1683_v25 = vmax.f32 %v1012_v21, 0.0  ;;  %v1768_v26 = vmax.f32 %v1437_v23, 0.0 }
 0x1b0   :  { %v1016_v27 = vpop.f32.mrb[88].mxu0  ;;  %v1441_v28 = vpop.f32.mrb[88].mxu1 }
 0x1b1   :  { %1853 = vst.msk [vmem:[%s4818_s3 + $0x158] sm:$0xff] %vm1809_vm5, %v1683_v25  ;;  %1938 = vst.msk [vmem:[%s4818_s3 + $0x400] sm:$0xff] %vm1809_vm5, %v1768_v26  ;;  %v1017_v29 = vadd.f32 %v4290_v59, %v1016_v27  ;;  %v2465_v30 = vpop.f32.mrb[89].mxu0  ;;  %v1442_v31 = vadd.f32 %v4290_v59, %v1441_v28  ;;  %v2720_v32 = vpop.f32.mrb[89].mxu1 }
 0x1b3   :  { %v1684_v33 = vmax.f32 %v1017_v29, 0.0  ;;  %v1769_v34 = vmax.f32 %v1442_v31, 0.0 }
 0x1b4   :  { %v1021_v35 = vpop.f32.mrb[90].mxu0  ;;  %v1446_v36 = vpop.f32.mrb[90].mxu1 }
 0x1b5   :  { %1854 = vst.msk [vmem:[%s4818_s3 + $0x160] sm:$0xff] %vm1809_vm5, %v1684_v33  ;;  %1939 = vst.msk [vmem:[%s4818_s3 + $0x408] sm:$0xff] %vm1809_vm5, %v1769_v34  ;;  %v1022_v37 = vadd.f32 %v4290_v59, %v1021_v35  ;;  %v2468_v38 = vpop.f32.mrb[91].mxu0  ;;  %v1447_v39 = vadd.f32 %v4290_v59, %v1446_v36  ;;  %v2723_v40 = vpop.f32.mrb[91].mxu1 }
 0x1b7   :  { %v1685_v41 = vmax.f32 %v1022_v37, 0.0  ;;  %v1770_v42 = vmax.f32 %v1447_v39, 0.0 }
 0x1b8   :  { %v1026_v43 = vpop.f32.mrb[92].mxu0  ;;  %v1451_v44 = vpop.f32.mrb[92].mxu1 }
 0x1b9   :  { %1855 = vst.msk [vmem:[%s4818_s3 + $0x168] sm:$0xff] %vm1809_vm5, %v1685_v41  ;;  %1940 = vst.msk [vmem:[%s4818_s3 + $0x410] sm:$0xff] %vm1809_vm5, %v1770_v42  ;;  %v1027_v45 = vadd.f32 %v4290_v59, %v1026_v43  ;;  %v2471_v46 = vpop.f32.mrb[93].mxu0  ;;  %v1452_v47 = vadd.f32 %v4290_v59, %v1451_v44  ;;  %v2726_v49 = vpop.f32.mrb[93].mxu1 }
 0x1bb   :  { %v1686_v50 = vmax.f32 %v1027_v45, 0.0  ;;  %v1771_v51 = vmax.f32 %v1452_v47, 0.0 }
 0x1bc   :  { %v1031_v1 = vpop.f32.mrb[94].mxu0  ;;  %v1456_v52 = vpop.f32.mrb[94].mxu1 }
 0x1bd   :  { %1856 = vst.msk [vmem:[%s4818_s3 + $0x170] sm:$0xff] %vm1809_vm5, %v1686_v50  ;;  %1941 = vst.msk [vmem:[%s4818_s3 + $0x418] sm:$0xff] %vm1809_vm5, %v1771_v51  ;;  %v1032_v53 = vadd.f32 %v4290_v59, %v1031_v1  ;;  %v2474_v54 = vpop.f32.mrb[95].mxu0  ;;  %v1457_v55 = vadd.f32 %v4290_v59, %v1456_v52  ;;  %v2729_v56 = vpop.f32.mrb[95].mxu1 }
 0x1bf   :  { %v1687_v57 = vmax.f32 %v1032_v53, 0.0  ;;  %v1772_v58 = vmax.f32 %v1457_v55, 0.0 }
 0x1c0   :  { %v1036_v60 = vpop.f32.mrb[96].mxu0  ;;  %v1461_v48 = vpop.f32.mrb[96].mxu1 }
 0x1c1   :  { %1857 = vst.msk [vmem:[%s4818_s3 + $0x178] sm:$0xff] %vm1809_vm5, %v1687_v57  ;;  %1942 = vst.msk [vmem:[%s4818_s3 + $0x420] sm:$0xff] %vm1809_vm5, %v1772_v58  ;;  %v1037_v61 = vadd.f32 %v4290_v59, %v1036_v60  ;;  %v2477_v62 = vpop.f32.mrb[97].mxu0  ;;  %v1462_v63 = vadd.f32 %v4290_v59, %v1461_v48  ;;  %v2732_v0 = vpop.f32.mrb[97].mxu1 }
 0x1c3   :  { %v1688_v2 = vmax.f32 %v1037_v61, 0.0  ;;  %v1773_v3 = vmax.f32 %v1462_v63, 0.0 }
 0x1c4   :  { %v1041_v4 = vpop.f32.mrb[98].mxu0  ;;  %v1466_v5 = vpop.f32.mrb[98].mxu1 }
 0x1c5   :  { %1858 = vst.msk [vmem:[%s4818_s3 + $0x180] sm:$0xff] %vm1809_vm5, %v1688_v2  ;;  %1943 = vst.msk [vmem:[%s4818_s3 + $0x428] sm:$0xff] %vm1809_vm5, %v1773_v3  ;;  %v1042_v6 = vadd.f32 %v4290_v59, %v1041_v4  ;;  %v2480_v7 = vpop.f32.mrb[99].mxu0  ;;  %v1467_v8 = vadd.f32 %v4290_v59, %v1466_v5  ;;  %v2735_v9 = vpop.f32.mrb[99].mxu1 }
 0x1c7   :  { %v1689_v10 = vmax.f32 %v1042_v6, 0.0  ;;  %v1774_v11 = vmax.f32 %v1467_v8, 0.0 }
 0x1c8   :  { %v1046_v12 = vpop.f32.mrb[100].mxu0  ;;  %v1471_v13 = vpop.f32.mrb[100].mxu1 }
 0x1c9   :  { %1859 = vst.msk [vmem:[%s4818_s3 + $0x188] sm:$0xff] %vm1809_vm5, %v1689_v10  ;;  %1944 = vst.msk [vmem:[%s4818_s3 + $0x430] sm:$0xff] %vm1809_vm5, %v1774_v11  ;;  %v1047_v14 = vadd.f32 %v4290_v59, %v1046_v12  ;;  %v2483_v15 = vpop.f32.mrb[101].mxu0  ;;  %v1472_v16 = vadd.f32 %v4290_v59, %v1471_v13  ;;  %v2738_v17 = vpop.f32.mrb[101].mxu1 }
 0x1cb   :  { %v1690_v18 = vmax.f32 %v1047_v14, 0.0  ;;  %v1775_v19 = vmax.f32 %v1472_v16, 0.0 }
 0x1cc   :  { %v1051_v20 = vpop.f32.mrb[102].mxu0  ;;  %v1476_v21 = vpop.f32.mrb[102].mxu1 }
 0x1cd   :  { %1860 = vst.msk [vmem:[%s4818_s3 + $0x190] sm:$0xff] %vm1809_vm5, %v1690_v18  ;;  %1945 = vst.msk [vmem:[%s4818_s3 + $0x438] sm:$0xff] %vm1809_vm5, %v1775_v19  ;;  %v1052_v22 = vadd.f32 %v4290_v59, %v1051_v20  ;;  %v2486_v23 = vpop.f32.mrb[103].mxu0  ;;  %v1477_v24 = vadd.f32 %v4290_v59, %v1476_v21  ;;  %v2741_v25 = vpop.f32.mrb[103].mxu1 }
 0x1cf   :  { %v1691_v26 = vmax.f32 %v1052_v22, 0.0  ;;  %v1776_v27 = vmax.f32 %v1477_v24, 0.0 }
 0x1d0   :  { %v1056_v28 = vpop.f32.mrb[104].mxu0  ;;  %v1481_v29 = vpop.f32.mrb[104].mxu1 }
 0x1d1   :  { %1861 = vst.msk [vmem:[%s4818_s3 + $0x198] sm:$0xff] %vm1809_vm5, %v1691_v26  ;;  %1946 = vst.msk [vmem:[%s4818_s3 + $0x440] sm:$0xff] %vm1809_vm5, %v1776_v27  ;;  %v1057_v30 = vadd.f32 %v4290_v59, %v1056_v28  ;;  %v2489_v31 = vpop.f32.mrb[105].mxu0  ;;  %v1482_v32 = vadd.f32 %v4290_v59, %v1481_v29  ;;  %v2744_v33 = vpop.f32.mrb[105].mxu1 }
 0x1d3   :  { %v1692_v34 = vmax.f32 %v1057_v30, 0.0  ;;  %v1777_v35 = vmax.f32 %v1482_v32, 0.0 }
 0x1d4   :  { %v1061_v36 = vpop.f32.mrb[106].mxu0  ;;  %v1486_v37 = vpop.f32.mrb[106].mxu1 }
 0x1d5   :  { %1862 = vst.msk [vmem:[%s4818_s3 + $0x1a0] sm:$0xff] %vm1809_vm5, %v1692_v34  ;;  %1947 = vst.msk [vmem:[%s4818_s3 + $0x448] sm:$0xff] %vm1809_vm5, %v1777_v35  ;;  %v1062_v38 = vadd.f32 %v4290_v59, %v1061_v36  ;;  %v2492_v39 = vpop.f32.mrb[107].mxu0  ;;  %v1487_v40 = vadd.f32 %v4290_v59, %v1486_v37  ;;  %v2747_v41 = vpop.f32.mrb[107].mxu1 }
 0x1d7   :  { %v1693_v42 = vmax.f32 %v1062_v38, 0.0  ;;  %v1778_v43 = vmax.f32 %v1487_v40, 0.0 }
 0x1d8   :  { %v1066_v44 = vpop.f32.mrb[108].mxu0  ;;  %v1491_v45 = vpop.f32.mrb[108].mxu1 }
 0x1d9   :  { %1863 = vst.msk [vmem:[%s4818_s3 + $0x1a8] sm:$0xff] %vm1809_vm5, %v1693_v42  ;;  %1948 = vst.msk [vmem:[%s4818_s3 + $0x450] sm:$0xff] %vm1809_vm5, %v1778_v43  ;;  %v1067_v46 = vadd.f32 %v4290_v59, %v1066_v44  ;;  %v2495_v47 = vpop.f32.mrb[109].mxu0  ;;  %v1492_v49 = vadd.f32 %v4290_v59, %v1491_v45  ;;  %v2750_v50 = vpop.f32.mrb[109].mxu1 }
 0x1db   :  { %v1694_v51 = vmax.f32 %v1067_v46, 0.0  ;;  %v1779_v1 = vmax.f32 %v1492_v49, 0.0 }
 0x1dc   :  { %v1071_v52 = vpop.f32.mrb[110].mxu0  ;;  %v1496_v53 = vpop.f32.mrb[110].mxu1 }
 0x1dd   :  { %1864 = vst.msk [vmem:[%s4818_s3 + $0x1b0] sm:$0xff] %vm1809_vm5, %v1694_v51  ;;  %1949 = vst.msk [vmem:[%s4818_s3 + $0x458] sm:$0xff] %vm1809_vm5, %v1779_v1  ;;  %v1072_v54 = vadd.f32 %v4290_v59, %v1071_v52  ;;  %v2498_v55 = vpop.f32.mrb[111].mxu0  ;;  %v1497_v56 = vadd.f32 %v4290_v59, %v1496_v53  ;;  %v2753_v57 = vpop.f32.mrb[111].mxu1 }
 0x1df   :  { %v1695_v58 = vmax.f32 %v1072_v54, 0.0  ;;  %v1780_v60 = vmax.f32 %v1497_v56, 0.0 }
 0x1e0   :  { %v1076_v48 = vpop.f32.mrb[112].mxu0  ;;  %v1501_v61 = vpop.f32.mrb[112].mxu1 }
 0x1e1   :  { %1865 = vst.msk [vmem:[%s4818_s3 + $0x1b8] sm:$0xff] %vm1809_vm5, %v1695_v58  ;;  %1950 = vst.msk [vmem:[%s4818_s3 + $0x460] sm:$0xff] %vm1809_vm5, %v1780_v60  ;;  %v1077_v62 = vadd.f32 %v4290_v59, %v1076_v48  ;;  %v2501_v63 = vpop.f32.mrb[113].mxu0  ;;  %v1502_v0 = vadd.f32 %v4290_v59, %v1501_v61  ;;  %v2756_v2 = vpop.f32.mrb[113].mxu1 }
 0x1e3   :  { %v1696_v3 = vmax.f32 %v1077_v62, 0.0  ;;  %v1781_v4 = vmax.f32 %v1502_v0, 0.0 }
 0x1e4   :  { %v1081_v5 = vpop.f32.mrb[114].mxu0  ;;  %v1506_v6 = vpop.f32.mrb[114].mxu1 }
 0x1e5   :  { %1866 = vst.msk [vmem:[%s4818_s3 + $0x1c0] sm:$0xff] %vm1809_vm5, %v1696_v3  ;;  %1951 = vst.msk [vmem:[%s4818_s3 + $0x468] sm:$0xff] %vm1809_vm5, %v1781_v4  ;;  %v1082_v7 = vadd.f32 %v4290_v59, %v1081_v5  ;;  %v2504_v8 = vpop.f32.mrb[115].mxu0  ;;  %v1507_v9 = vadd.f32 %v4290_v59, %v1506_v6  ;;  %v2759_v10 = vpop.f32.mrb[115].mxu1 }
 0x1e7   :  { %v1697_v11 = vmax.f32 %v1082_v7, 0.0  ;;  %v1782_v12 = vmax.f32 %v1507_v9, 0.0 }
 0x1e8   :  { %v1086_v13 = vpop.f32.mrb[116].mxu0  ;;  %v1511_v14 = vpop.f32.mrb[116].mxu1 }
 0x1e9   :  { %1867 = vst.msk [vmem:[%s4818_s3 + $0x1c8] sm:$0xff] %vm1809_vm5, %v1697_v11  ;;  %1952 = vst.msk [vmem:[%s4818_s3 + $0x470] sm:$0xff] %vm1809_vm5, %v1782_v12  ;;  %v1087_v15 = vadd.f32 %v4290_v59, %v1086_v13  ;;  %v2507_v16 = vpop.f32.mrb[117].mxu0  ;;  %v1512_v17 = vadd.f32 %v4290_v59, %v1511_v14  ;;  %v2762_v18 = vpop.f32.mrb[117].mxu1 }
 0x1eb   :  { %v1698_v19 = vmax.f32 %v1087_v15, 0.0  ;;  %v1783_v20 = vmax.f32 %v1512_v17, 0.0 }
 0x1ec   :  { %v1091_v21 = vpop.f32.mrb[118].mxu0  ;;  %v1516_v22 = vpop.f32.mrb[118].mxu1 }
 0x1ed   :  { %1868 = vst.msk [vmem:[%s4818_s3 + $0x1d0] sm:$0xff] %vm1809_vm5, %v1698_v19  ;;  %1953 = vst.msk [vmem:[%s4818_s3 + $0x478] sm:$0xff] %vm1809_vm5, %v1783_v20  ;;  %v1092_v23 = vadd.f32 %v4290_v59, %v1091_v21  ;;  %v2510_v24 = vpop.f32.mrb[119].mxu0  ;;  %v1517_v25 = vadd.f32 %v4290_v59, %v1516_v22  ;;  %v2765_v26 = vpop.f32.mrb[119].mxu1 }
 0x1ef   :  { %v1699_v27 = vmax.f32 %v1092_v23, 0.0  ;;  %v1784_v28 = vmax.f32 %v1517_v25, 0.0 }
 0x1f0   :  { %v1096_v29 = vpop.f32.mrb[120].mxu0  ;;  %v1521_v30 = vpop.f32.mrb[120].mxu1 }
 0x1f1   :  { %1869 = vst.msk [vmem:[%s4818_s3 + $0x1d8] sm:$0xff] %vm1809_vm5, %v1699_v27  ;;  %1954 = vst.msk [vmem:[%s4818_s3 + $0x480] sm:$0xff] %vm1809_vm5, %v1784_v28  ;;  %v1097_v31 = vadd.f32 %v4290_v59, %v1096_v29  ;;  %v2513_v32 = vpop.f32.mrb[121].mxu0  ;;  %v1522_v33 = vadd.f32 %v4290_v59, %v1521_v30  ;;  %v2768_v34 = vpop.f32.mrb[121].mxu1 }
 0x1f3   :  { %v1700_v35 = vmax.f32 %v1097_v31, 0.0  ;;  %v1785_v36 = vmax.f32 %v1522_v33, 0.0 }
 0x1f4   :  { %v1101_v37 = vpop.f32.mrb[122].mxu0  ;;  %v1526_v38 = vpop.f32.mrb[122].mxu1 }
 0x1f5   :  { %1870 = vst.msk [vmem:[%s4818_s3 + $0x1e0] sm:$0xff] %vm1809_vm5, %v1700_v35  ;;  %1955 = vst.msk [vmem:[%s4818_s3 + $0x488] sm:$0xff] %vm1809_vm5, %v1785_v36  ;;  %v1102_v39 = vadd.f32 %v4290_v59, %v1101_v37  ;;  %v2516_v40 = vpop.f32.mrb[123].mxu0  ;;  %v1527_v41 = vadd.f32 %v4290_v59, %v1526_v38  ;;  %v2771_v42 = vpop.f32.mrb[123].mxu1 }
 0x1f7   :  { %v1701_v43 = vmax.f32 %v1102_v39, 0.0  ;;  %v1786_v44 = vmax.f32 %v1527_v41, 0.0 }
 0x1f8   :  { %v1106_v45 = vpop.f32.mrb[124].mxu0  ;;  %v1531_v46 = vpop.f32.mrb[124].mxu1 }
 0x1f9   :  { %1871 = vst.msk [vmem:[%s4818_s3 + $0x1e8] sm:$0xff] %vm1809_vm5, %v1701_v43  ;;  %1956 = vst.msk [vmem:[%s4818_s3 + $0x490] sm:$0xff] %vm1809_vm5, %v1786_v44  ;;  %v1107_v47 = vadd.f32 %v4290_v59, %v1106_v45  ;;  %v2519_v49 = vpop.f32.mrb[125].mxu0  ;;  %v1532_v50 = vadd.f32 %v4290_v59, %v1531_v46  ;;  %v2774_v51 = vpop.f32.mrb[125].mxu1 }
 0x1fb   :  { %v1702_v1 = vmax.f32 %v1107_v47, 0.0  ;;  %v1787_v52 = vmax.f32 %v1532_v50, 0.0 }
 0x1fc   :  { %v1111_v53 = vpop.f32.mrb[126].mxu0  ;;  %v1536_v54 = vpop.f32.mrb[126].mxu1 }
 0x1fd   :  { %1872 = vst.msk [vmem:[%s4818_s3 + $0x1f0] sm:$0xff] %vm1809_vm5, %v1702_v1  ;;  %1957 = vst.msk [vmem:[%s4818_s3 + $0x498] sm:$0xff] %vm1809_vm5, %v1787_v52  ;;  %v1112_v55 = vadd.f32 %v4290_v59, %v1111_v53  ;;  %v2522_v56 = vpop.f32.mrb[127].mxu0  ;;  %v1537_v57 = vadd.f32 %v4290_v59, %v1536_v54  ;;  %v2777_v58 = vpop.f32.mrb[127].mxu1 }
 0x1ff   :  { %v1703_v60 = vmax.f32 %v1112_v55, 0.0  ;;  %v1788_v48 = vmax.f32 %v1537_v57, 0.0 }
 0x200   :  { %v1116_v61 = vpop.f32.mrb[128].mxu0  ;;  %v1541_v62 = vpop.f32.mrb[128].mxu1 }
 0x201   :  { %1873 = vst.msk [vmem:[%s4818_s3 + $0x1f8] sm:$0xff] %vm1809_vm5, %v1703_v60  ;;  %1958 = vst.msk [vmem:[%s4818_s3 + $0x4a0] sm:$0xff] %vm1809_vm5, %v1788_v48  ;;  %v1117_v63 = vadd.f32 %v4290_v59, %v1116_v61  ;;  %v2525_v0 = vpop.f32.mrb[129].mxu0  ;;  %v1542_v2 = vadd.f32 %v4290_v59, %v1541_v62  ;;  %v2780_v3 = vpop.f32.mrb[129].mxu1 }
 0x203   :  { %v1704_v4 = vmax.f32 %v1117_v63, 0.0  ;;  %v1789_v5 = vmax.f32 %v1542_v2, 0.0 }
 0x204   :  { %v1121_v6 = vpop.f32.mrb[130].mxu0  ;;  %v1546_v7 = vpop.f32.mrb[130].mxu1 }
 0x205   :  { %1874 = vst.msk [vmem:[%s4818_s3 + $0x200] sm:$0xff] %vm1809_vm5, %v1704_v4  ;;  %1959 = vst.msk [vmem:[%s4818_s3 + $0x4a8] sm:$0xff] %vm1809_vm5, %v1789_v5  ;;  %v1122_v8 = vadd.f32 %v4290_v59, %v1121_v6  ;;  %v2528_v9 = vpop.f32.mrb[131].mxu0  ;;  %v1547_v10 = vadd.f32 %v4290_v59, %v1546_v7  ;;  %v2783_v11 = vpop.f32.mrb[131].mxu1 }
 0x207   :  { %v1705_v12 = vmax.f32 %v1122_v8, 0.0  ;;  %v1790_v13 = vmax.f32 %v1547_v10, 0.0 }
 0x208   :  { %v1126_v14 = vpop.f32.mrb[132].mxu0  ;;  %v1551_v15 = vpop.f32.mrb[132].mxu1 }
 0x209   :  { %1875 = vst.msk [vmem:[%s4818_s3 + $0x208] sm:$0xff] %vm1809_vm5, %v1705_v12  ;;  %1960 = vst.msk [vmem:[%s4818_s3 + $0x4b0] sm:$0xff] %vm1809_vm5, %v1790_v13  ;;  %v1127_v16 = vadd.f32 %v4290_v59, %v1126_v14  ;;  %v2531_v17 = vpop.f32.mrb[133].mxu0  ;;  %v1552_v18 = vadd.f32 %v4290_v59, %v1551_v15  ;;  %v2786_v19 = vpop.f32.mrb[133].mxu1 }
 0x20b   :  { %v1706_v20 = vmax.f32 %v1127_v16, 0.0  ;;  %v1791_v21 = vmax.f32 %v1552_v18, 0.0 }
 0x20c   :  { %v1131_v22 = vpop.f32.mrb[134].mxu0  ;;  %v1556_v23 = vpop.f32.mrb[134].mxu1 }
 0x20d   :  { %1876 = vst.msk [vmem:[%s4818_s3 + $0x210] sm:$0xff] %vm1809_vm5, %v1706_v20  ;;  %1961 = vst.msk [vmem:[%s4818_s3 + $0x4b8] sm:$0xff] %vm1809_vm5, %v1791_v21  ;;  %v1132_v24 = vadd.f32 %v4290_v59, %v1131_v22  ;;  %v2534_v25 = vpop.f32.mrb[135].mxu0  ;;  %v1557_v26 = vadd.f32 %v4290_v59, %v1556_v23  ;;  %v2789_v27 = vpop.f32.mrb[135].mxu1 }
 0x20f   :  { %v1707_v28 = vmax.f32 %v1132_v24, 0.0  ;;  %v1792_v29 = vmax.f32 %v1557_v26, 0.0 }
 0x210   :  { %v1136_v30 = vpop.f32.mrb[136].mxu0  ;;  %v1561_v31 = vpop.f32.mrb[136].mxu1 }
 0x211   :  { %1877 = vst.msk [vmem:[%s4818_s3 + $0x218] sm:$0xff] %vm1809_vm5, %v1707_v28  ;;  %1962 = vst.msk [vmem:[%s4818_s3 + $0x4c0] sm:$0xff] %vm1809_vm5, %v1792_v29  ;;  %v1137_v32 = vadd.f32 %v4290_v59, %v1136_v30  ;;  %v2537_v33 = vpop.f32.mrb[137].mxu0  ;;  %v1562_v34 = vadd.f32 %v4290_v59, %v1561_v31  ;;  %v2792_v35 = vpop.f32.mrb[137].mxu1 }
 0x213   :  { %v1708_v36 = vmax.f32 %v1137_v32, 0.0  ;;  %v1793_v37 = vmax.f32 %v1562_v34, 0.0 }
 0x214   :  { %v1141_v38 = vpop.f32.mrb[138].mxu0  ;;  %v1566_v39 = vpop.f32.mrb[138].mxu1 }
 0x215   :  { %1878 = vst.msk [vmem:[%s4818_s3 + $0x220] sm:$0xff] %vm1809_vm5, %v1708_v36  ;;  %1963 = vst.msk [vmem:[%s4818_s3 + $0x4c8] sm:$0xff] %vm1809_vm5, %v1793_v37  ;;  %v1142_v40 = vadd.f32 %v4290_v59, %v1141_v38  ;;  %v2540_v41 = vpop.f32.mrb[139].mxu0  ;;  %v1567_v42 = vadd.f32 %v4290_v59, %v1566_v39  ;;  %v2795_v43 = vpop.f32.mrb[139].mxu1 }
 0x217   :  { %v1709_v44 = vmax.f32 %v1142_v40, 0.0  ;;  %v1794_v45 = vmax.f32 %v1567_v42, 0.0 }
 0x218   :  { %v1146_v46 = vpop.f32.mrb[140].mxu0  ;;  %v1571_v47 = vpop.f32.mrb[140].mxu1 }
 0x219   :  { %1879 = vst.msk [vmem:[%s4818_s3 + $0x228] sm:$0xff] %vm1809_vm5, %v1709_v44  ;;  %1964 = vst.msk [vmem:[%s4818_s3 + $0x4d0] sm:$0xff] %vm1809_vm5, %v1794_v45  ;;  %v1147_v49 = vadd.f32 %v4290_v59, %v1146_v46  ;;  %v2543_v50 = vpop.f32.mrb[141].mxu0  ;;  %v1572_v51 = vadd.f32 %v4290_v59, %v1571_v47  ;;  %v2798_v1 = vpop.f32.mrb[141].mxu1 }
 0x21b   :  { %v1710_v52 = vmax.f32 %v1147_v49, 0.0  ;;  %v1795_v53 = vmax.f32 %v1572_v51, 0.0 }
 0x21c   :  { %v1151_v54 = vpop.f32.mrb[142].mxu0  ;;  %v1576_v55 = vpop.f32.mrb[142].mxu1 }
 0x21d   :  { %1880 = vst.msk [vmem:[%s4818_s3 + $0x230] sm:$0xff] %vm1809_vm5, %v1710_v52  ;;  %1965 = vst.msk [vmem:[%s4818_s3 + $0x4d8] sm:$0xff] %vm1809_vm5, %v1795_v53  ;;  %v1152_v56 = vadd.f32 %v4290_v59, %v1151_v54  ;;  %v2546_v57 = vpop.f32.mrb[143].mxu0  ;;  %v1577_v58 = vadd.f32 %v4290_v59, %v1576_v55  ;;  %v2801_v60 = vpop.f32.mrb[143].mxu1 }
 0x21f   :  { %v1711_v48 = vmax.f32 %v1152_v56, 0.0  ;;  %v1796_v61 = vmax.f32 %v1577_v58, 0.0 }
 0x220   :  { %v1156_v62 = vpop.f32.mrb[144].mxu0  ;;  %v1581_v63 = vpop.f32.mrb[144].mxu1 }
 0x221   :  { %1881 = vst.msk [vmem:[%s4818_s3 + $0x238] sm:$0xff] %vm1809_vm5, %v1711_v48  ;;  %1966 = vst.msk [vmem:[%s4818_s3 + $0x4e0] sm:$0xff] %vm1809_vm5, %v1796_v61  ;;  %v1157_v0 = vadd.f32 %v4290_v59, %v1156_v62  ;;  %v2549_v2 = vpop.f32.mrb[145].mxu0  ;;  %v1582_v3 = vadd.f32 %v4290_v59, %v1581_v63  ;;  %v2804_v4 = vpop.f32.mrb[145].mxu1 }
 0x223   :  { %v1712_v5 = vmax.f32 %v1157_v0, 0.0  ;;  %v1797_v6 = vmax.f32 %v1582_v3, 0.0 }
 0x224   :  { %v1161_v7 = vpop.f32.mrb[146].mxu0  ;;  %v1586_v8 = vpop.f32.mrb[146].mxu1 }
 0x225   :  { %1882 = vst.msk [vmem:[%s4818_s3 + $0x240] sm:$0xff] %vm1809_vm5, %v1712_v5  ;;  %1967 = vst.msk [vmem:[%s4818_s3 + $0x4e8] sm:$0xff] %vm1809_vm5, %v1797_v6  ;;  %v1162_v9 = vadd.f32 %v4290_v59, %v1161_v7  ;;  %v2552_v10 = vpop.f32.mrb[147].mxu0  ;;  %v1587_v11 = vadd.f32 %v4290_v59, %v1586_v8  ;;  %v2807_v12 = vpop.f32.mrb[147].mxu1 }
 0x227   :  { %v1713_v13 = vmax.f32 %v1162_v9, 0.0  ;;  %v1798_v14 = vmax.f32 %v1587_v11, 0.0 }
 0x228   :  { %v1166_v15 = vpop.f32.mrb[148].mxu0  ;;  %v1591_v16 = vpop.f32.mrb[148].mxu1 }
 0x229   :  { %1883 = vst.msk [vmem:[%s4818_s3 + $0x248] sm:$0xff] %vm1809_vm5, %v1713_v13  ;;  %1968 = vst.msk [vmem:[%s4818_s3 + $0x4f0] sm:$0xff] %vm1809_vm5, %v1798_v14  ;;  %v1167_v17 = vadd.f32 %v4290_v59, %v1166_v15  ;;  %v2555_v18 = vpop.f32.mrb[149].mxu0  ;;  %v1592_v19 = vadd.f32 %v4290_v59, %v1591_v16  ;;  %v2810_v20 = vpop.f32.mrb[149].mxu1 }
 0x22b   :  { %v1714_v21 = vmax.f32 %v1167_v17, 0.0  ;;  %v1799_v22 = vmax.f32 %v1592_v19, 0.0 }
 0x22c   :  { %v1171_v23 = vpop.f32.mrb[150].mxu0  ;;  %v1596_v24 = vpop.f32.mrb[150].mxu1 }
 0x22d   :  { %1884 = vst.msk [vmem:[%s4818_s3 + $0x250] sm:$0xff] %vm1809_vm5, %v1714_v21  ;;  %1969 = vst.msk [vmem:[%s4818_s3 + $0x4f8] sm:$0xff] %vm1809_vm5, %v1799_v22  ;;  %v1172_v25 = vadd.f32 %v4290_v59, %v1171_v23  ;;  %v2558_v26 = vpop.f32.mrb[151].mxu0  ;;  %v1597_v27 = vadd.f32 %v4290_v59, %v1596_v24  ;;  %v2813_v28 = vpop.f32.mrb[151].mxu1 }
 0x22e   :  { %v2853_v28 = vld [vmem:[#allocation4] ss:$0 sm:$0xff] }
 0x22f   :  { %v1715_v29 = vmax.f32 %v1172_v25, 0.0  ;;  %v1800_v30 = vmax.f32 %v1597_v27, 0.0 }
 0x230   :  { %v1176_v31 = vpop.f32.mrb[152].mxu0  ;;  %v1601_v32 = vpop.f32.mrb[152].mxu1 }
 0x231   :  { %1885 = vst.msk [vmem:[%s4818_s3 + $0x258] sm:$0xff] %vm1809_vm5, %v1715_v29  ;;  %1970 = vst.msk [vmem:[%s4818_s3 + $0x500] sm:$0xff] %vm1809_vm5, %v1800_v30  ;;  %v1177_v33 = vadd.f32 %v4290_v59, %v1176_v31  ;;  %v2561_v34 = vpop.f32.mrb[153].mxu0  ;;  %v1602_v35 = vadd.f32 %v4290_v59, %v1601_v32  ;;  %v2816_v36 = vpop.f32.mrb[153].mxu1 }
 0x233   :  { %v1716_v37 = vmax.f32 %v1177_v33, 0.0  ;;  %v1801_v38 = vmax.f32 %v1602_v35, 0.0 }
 0x234   :  { %v1181_v39 = vpop.f32.mrb[154].mxu0  ;;  %v1606_v40 = vpop.f32.mrb[154].mxu1 }
 0x235   :  { %1886 = vst.msk [vmem:[%s4818_s3 + $0x260] sm:$0xff] %vm1809_vm5, %v1716_v37  ;;  %1971 = vst.msk [vmem:[%s4818_s3 + $0x508] sm:$0xff] %vm1809_vm5, %v1801_v38  ;;  %v1182_v41 = vadd.f32 %v4290_v59, %v1181_v39  ;;  %v2564_v42 = vpop.f32.mrb[155].mxu0  ;;  %v1607_v43 = vadd.f32 %v4290_v59, %v1606_v40  ;;  %v2819_v44 = vpop.f32.mrb[155].mxu1 }
 0x237   :  { %v1717_v45 = vmax.f32 %v1182_v41, 0.0  ;;  %v1802_v46 = vmax.f32 %v1607_v43, 0.0 }
 0x238   :  { %v1186_v47 = vpop.f32.mrb[156].mxu0  ;;  %v1611_v49 = vpop.f32.mrb[156].mxu1 }
 0x239   :  { %1887 = vst.msk [vmem:[%s4818_s3 + $0x268] sm:$0xff] %vm1809_vm5, %v1717_v45  ;;  %1972 = vst.msk [vmem:[%s4818_s3 + $0x510] sm:$0xff] %vm1809_vm5, %v1802_v46  ;;  %v1187_v50 = vadd.f32 %v4290_v59, %v1186_v47  ;;  %v2567_v51 = vpop.f32.mrb[157].mxu0  ;;  %v1612_v1 = vadd.f32 %v4290_v59, %v1611_v49  ;;  %v2822_v52 = vpop.f32.mrb[157].mxu1 }
 0x23b   :  { %v1718_v53 = vmax.f32 %v1187_v50, 0.0  ;;  %v1803_v54 = vmax.f32 %v1612_v1, 0.0 }
 0x23c   :  { %v1191_v55 = vpop.f32.mrb[158].mxu0  ;;  %v1616_v56 = vpop.f32.mrb[158].mxu1 }
 0x23d   :  { %1888 = vst.msk [vmem:[%s4818_s3 + $0x270] sm:$0xff] %vm1809_vm5, %v1718_v53  ;;  %1973 = vst.msk [vmem:[%s4818_s3 + $0x518] sm:$0xff] %vm1809_vm5, %v1803_v54  ;;  %v1192_v57 = vadd.f32 %v4290_v59, %v1191_v55  ;;  %v2570_v58 = vpop.f32.mrb[159].mxu0  ;;  %v1617_v60 = vadd.f32 %v4290_v59, %v1616_v56  ;;  %v2825_v48 = vpop.f32.mrb[159].mxu1 }
 0x23f   :  { %v1719_v61 = vmax.f32 %v1192_v57, 0.0  ;;  %v1804_v62 = vmax.f32 %v1617_v60, 0.0 }
 0x240   :  { %v1196_v63 = vpop.f32.mrb[160].mxu0  ;;  %v1621_v0 = vpop.f32.mrb[160].mxu1 }
 0x241   :  { %1889 = vst.msk [vmem:[%s4818_s3 + $0x278] sm:$0xff] %vm1809_vm5, %v1719_v61  ;;  %1974 = vst.msk [vmem:[%s4818_s3 + $0x520] sm:$0xff] %vm1809_vm5, %v1804_v62  ;;  %v1197_v2 = vadd.f32 %v4290_v59, %v1196_v63  ;;  %v2573_v3 = vpop.f32.mrb[161].mxu0  ;;  %v1622_v4 = vadd.f32 %v4290_v59, %v1621_v0  ;;  %v2828_v5 = vpop.f32.mrb[161].mxu1 }
 0x243   :  { %v1720_v6 = vmax.f32 %v1197_v2, 0.0  ;;  %v1805_v7 = vmax.f32 %v1622_v4, 0.0 }
 0x244   :  { %v1201_v8 = vpop.f32.mrb[162].mxu0  ;;  %v1626_v9 = vpop.f32.mrb[162].mxu1 }
 0x245   :  { %1890 = vst.msk [vmem:[%s4818_s3 + $0x280] sm:$0xff] %vm1809_vm5, %v1720_v6  ;;  %1975 = vst.msk [vmem:[%s4818_s3 + $0x528] sm:$0xff] %vm1809_vm5, %v1805_v7  ;;  %v1202_v10 = vadd.f32 %v4290_v59, %v1201_v8  ;;  %v2576_v11 = vpop.f32.mrb[163].mxu0  ;;  %v1627_v12 = vadd.f32 %v4290_v59, %v1626_v9  ;;  %v2831_v13 = vpop.f32.mrb[163].mxu1 }
 0x247   :  { %v1721_v14 = vmax.f32 %v1202_v10, 0.0  ;;  %v1806_v15 = vmax.f32 %v1627_v12, 0.0 }
 0x248   :  { %v1206_v16 = vpop.f32.mrb[164].mxu0  ;;  %v1631_v17 = vpop.f32.mrb[164].mxu1 }
 0x249   :  { %1891 = vst.msk [vmem:[%s4818_s3 + $0x288] sm:$0xff] %vm1809_vm5, %v1721_v14  ;;  %1976 = vst.msk [vmem:[%s4818_s3 + $0x530] sm:$0xff] %vm1809_vm5, %v1806_v15  ;;  %v1207_v18 = vadd.f32 %v4290_v59, %v1206_v16  ;;  %v2579_v19 = vpop.f32.mrb[165].mxu0  ;;  %v1632_v20 = vadd.f32 %v4290_v59, %v1631_v17  ;;  %v2834_v21 = vpop.f32.mrb[165].mxu1 }
 0x24b   :  { %v1722_v22 = vmax.f32 %v1207_v18, 0.0  ;;  %v1807_v23 = vmax.f32 %v1632_v20, 0.0 }
 0x24c   :  { %v1211_v24 = vpop.f32.mrb[166].mxu0  ;;  %v1636_v25 = vpop.f32.mrb[166].mxu1 }
 0x24d   :  { %1892 = vst.msk [vmem:[%s4818_s3 + $0x290] sm:$0xff] %vm1809_vm5, %v1722_v22  ;;  %1977 = vst.msk [vmem:[%s4818_s3 + $0x538] sm:$0xff] %vm1809_vm5, %v1807_v23  ;;  %v1212_v26 = vadd.f32 %v4290_v59, %v1211_v24  ;;  %v2582_v27 = vpop.f32.mrb[167].mxu0  ;;  %v1637_v29 = vadd.f32 %v2853_v28, %v1636_v25  ;;  %v2837_v30 = vpop.f32.mrb[167].mxu1 }
 0x24f   :  { %v1723_v31 = vmax.f32 %v1212_v26, 0.0  ;;  %v1808_v32 = vmax.f32 %v1637_v29, 0.0 }
 0x250   :  { %v1216_v33 = vpop.f32.mrb[168].mxu0 }
 0x251   :  { %1893 = vst.msk [vmem:[%s4818_s3 + $0x298] sm:$0xff] %vm1809_vm5, %v1723_v31  ;;  %1978 = vst.msk [vmem:[%s4818_s3 + $0x540] sm:$0xff] %vm1809_vm5, %v1808_v32  ;;  %v1217_v34 = vadd.f32 %v2853_v28, %v1216_v33  ;;  %v2585_v35 = vpop.f32.mrb[169].mxu0 }
 0x253   :  { %v1724_v59 = vmax.f32 %v1217_v34, 0.0 }
 0x255   :  { %1894 = vst.msk [vmem:[%s4818_s3 + $0x2a0] sm:$0xff] %vm1809_vm5, %v1724_v59 }
 0x256   :  { %1983 = vsyncpa [#allocation3], 1 }
 0x257   :  { %1984 = vsyncpa [#allocation5], 1 }

// kernel: image_classifier_forward.5
= control target key start
LH: loop header
LB: loop body
LE: loop exit
PB: predicated region body
PF: predicated region fallthrough
CT: control target
= control target key end

     0   :  { %v3392_v0 = vmov 0.0|0.0   ;;  %vm489_vm0 = vcmask 261120   ;;  %vm2636_vm1 = vcmask 523264   ;;  %s6077_s1 = inlined_call_operand.vmem [shape: f32[288,64], index: 1, kind: input, shape index: {}]   ;;  %s6078_s0 = inlined_call_operand.vmem [shape: f32[1152,288], index: 0, kind: input, shape index: {}]   ;;  %s6079_s2 = inlined_call_operand.vmem [shape: f32[1,64], index: 2, kind: input, shape index: {}]   ;;  %s6080_s3 = inlined_call_operand.vmem [shape: f32[1152,64], index: 3, kind: output, shape index: {}]  }
   0x1   :  { %3302 = vmatprep.subr.bf16.mxu0 %v3392_v0  ;;  %3358 = vmatprep.subr.bf16.mxu1 %v3392_v0  ;;  %v446_v1 = vld [vmem:[%s6077_s1] sm:$0xff]  ;;  %v447_v2 = vld [vmem:[%s6077_s1 + $0x8] sm:$0xff]  ;;  %v448_v3 = vld [vmem:[%s6077_s1 + $0x10] sm:$0xff] }
   0x2   :  { %v3303_v4 = vpack.c.bf16 %v447_v2, %v446_v1  ;;  %v449_v5 = vld [vmem:[%s6077_s1 + $0x18] sm:$0xff]  ;;  %v450_v7 = vld [vmem:[%s6077_s1 + $0x20] sm:$0xff]  ;;  %v451_v8 = vld [vmem:[%s6077_s1 + $0x28] sm:$0xff] }
   0x3   :  { %v3306_v6 = vpack.c.bf16 %v449_v5, %v448_v3  ;;  %v3309_v9 = vpack.c.bf16 %v451_v8, %v450_v7  ;;  %v452_v10 = vld [vmem:[%s6077_s1 + $0x30] sm:$0xff]  ;;  %v453_v11 = vld [vmem:[%s6077_s1 + $0x38] sm:$0xff]  ;;  %v15_v12 = vld [vmem:[%s6078_s0 + $0x8] sm:$0xff] }
   0x4   :  { %3304 = vmatpush1.bf16.msra.mxu0 %v3303_v4  ;;  %3374 = vmatpush1.bf16.msra.mxu1 %v3303_v4  ;;  %v3312_v13 = vpack.c.bf16 %v453_v11, %v452_v10  ;;  %v339_v14 = vld [vmem:[%s6078_s0 + $0xa28] sm:$0xff]  ;;  %v454_v15 = vld [vmem:[%s6077_s1 + $0x40] sm:$0xff]  ;;  %v456_v18 = vld [vmem:[%s6077_s1 + $0x50] sm:$0xff] }
   0x5   :  { %3305 = vmatprep.subr.bf16.mxu0 %v3392_v0  ;;  %3359 = vmatprep.subr.bf16.mxu1 %v3392_v0  ;;  %v455_v16 = vld [vmem:[%s6077_s1 + $0x48] sm:$0xff]  ;;  %v457_v19 = vld [vmem:[%s6077_s1 + $0x58] sm:$0xff]  ;;  %v458_v21 = vld [vmem:[%s6077_s1 + $0x60] sm:$0xff] }
   0x6   :  { %986 = vmatprep.mubr.f32.mxu0 %v15_v12  ;;  %1526 = vmatprep.mubr.f32.mxu1 %v339_v14  ;;  %v3315_v17 = vpack.c.bf16 %v455_v16, %v454_v15  ;;  %v3318_v20 = vpack.c.bf16 %v457_v19, %v456_v18  ;;  %v459_v22 = vld [vmem:[%s6077_s1 + $0x68] sm:$0xff]  ;;  %v460_v24 = vld [vmem:[%s6077_s1 + $0x70] sm:$0xff]  ;;  %v461_v25 = vld [vmem:[%s6077_s1 + $0x78] sm:$0xff] }
   0x7   :  { %v3321_v23 = vpack.c.bf16 %v459_v22, %v458_v21  ;;  %v3324_v26 = vpack.c.bf16 %v461_v25, %v460_v24  ;;  %v462_v27 = vld [vmem:[%s6077_s1 + $0x80] sm:$0xff]  ;;  %v463_v28 = vld [vmem:[%s6077_s1 + $0x88] sm:$0xff]  ;;  %v464_v30 = vld [vmem:[%s6077_s1 + $0x90] sm:$0xff] }
   0x8   :  { %3307 = vmatpush1.bf16.msra.mxu0 %v3306_v6  ;;  %3375 = vmatpush1.bf16.msra.mxu1 %v3306_v6  ;;  %v3327_v29 = vpack.c.bf16 %v463_v28, %v462_v27  ;;  %v465_v31 = vld [vmem:[%s6077_s1 + $0x98] sm:$0xff]  ;;  %v466_v33 = vld [vmem:[%s6077_s1 + $0xa0] sm:$0xff]  ;;  %v467_v34 = vld [vmem:[%s6077_s1 + $0xa8] sm:$0xff] }
   0x9   :  { %3308 = vmatprep.subr.bf16.mxu0 %v3392_v0  ;;  %3360 = vmatprep.subr.bf16.mxu1 %v3392_v0  ;;  %v3330_v32 = vpack.c.bf16 %v465_v31, %v464_v30  ;;  %v3333_v35 = vpack.c.bf16 %v467_v34, %v466_v33  ;;  %v468_v36 = vld [vmem:[%s6077_s1 + $0xb0] sm:$0xff]  ;;  %v469_v37 = vld [vmem:[%s6077_s1 + $0xb8] sm:$0xff]  ;;  %v470_v39 = vld [vmem:[%s6077_s1 + $0xc0] sm:$0xff] }
   0xa   :  { %v3336_v38 = vpack.c.bf16 %v469_v37, %v468_v36  ;;  %v471_v40 = vld [vmem:[%s6077_s1 + $0xc8] sm:$0xff]  ;;  %v472_v42 = vld [vmem:[%s6077_s1 + $0xd0] sm:$0xff]  ;;  %v473_v43 = vld [vmem:[%s6077_s1 + $0xd8] sm:$0xff] }
   0xb   :  { %v3339_v41 = vpack.c.bf16 %v471_v40, %v470_v39  ;;  %v3342_v44 = vpack.c.bf16 %v473_v43, %v472_v42  ;;  %v474_v45 = vld [vmem:[%s6077_s1 + $0xe0] sm:$0xff]  ;;  %v475_v46 = vld [vmem:[%s6077_s1 + $0xe8] sm:$0xff]  ;;  %v476_v48 = vld [vmem:[%s6077_s1 + $0xf0] sm:$0xff] }
   0xc   :  { %3310 = vmatpush1.bf16.msra.mxu0 %v3309_v9  ;;  %3376 = vmatpush1.bf16.msra.mxu1 %v3309_v9  ;;  %v3345_v47 = vpack.c.bf16 %v475_v46, %v474_v45  ;;  %v477_v49 = vld [vmem:[%s6077_s1 + $0xf8] sm:$0xff]  ;;  %v478_v50 = vld [vmem:[%s6077_s1 + $0x100] sm:$0xff]  ;;  %v479_v51 = vld [vmem:[%s6077_s1 + $0x108] sm:$0xff] }
   0xd   :  { %3311 = vmatprep.subr.bf16.mxu0 %v3392_v0  ;;  %3361 = vmatprep.subr.bf16.mxu1 %v3392_v0  ;;  %v3348_v52 = vpack.c.bf16 %v477_v49, %v476_v48  ;;  %v3350_v53 = vpack.c.bf16 %v479_v51, %v478_v50  ;;  %v480_v54 = vld [vmem:[%s6077_s1 + $0x110] sm:$0xff]  ;;  %v481_v55 = vld [vmem:[%s6077_s1 + $0x118] sm:$0xff]  ;;  %v14_v56 = vld [vmem:[%s6078_s0] sm:$0xff] }
   0xe   :  { %v338_v57 = vld [vmem:[%s6078_s0 + $0xa20] sm:$0xff]  ;;  %v3354_v59 = vpack.c.bf16 %v481_v55, %v480_v54  ;;  %v17_v61 = vld [vmem:[%s6078_s0 + $0x18] sm:$0xff]  ;;  %v20_v1 = vld [vmem:[%s6078_s0 + $0x30] sm:$0xff] }
   0xf   :  { %v18_v58 = vld [vmem:[%s6078_s0 + $0x20] sm:$0xff]  ;;  %v341_v62 = vld [vmem:[%s6078_s0 + $0xa38] sm:$0xff]  ;;  %v344_v2 = vld [vmem:[%s6078_s0 + $0xa50] sm:$0xff] }
  0x10   :  { %3313 = vmatpush1.bf16.msra.mxu0 %v3312_v13  ;;  %3377 = vmatpush1.bf16.msra.mxu1 %v3312_v13  ;;  %v342_v60 = vld [vmem:[%s6078_s0 + $0xa40] sm:$0xff]  ;;  %v21_v63 = vld [vmem:[%s6078_s0 + $0x38] sm:$0xff]  ;;  %v24_v3 = vld [vmem:[%s6078_s0 + $0x50] sm:$0xff] }
  0x11   :  { %3314 = vmatprep.subr.bf16.mxu0 %v3392_v0  ;;  %3362 = vmatprep.subr.bf16.mxu1 %v3392_v0  ;;  %v348_v4 = vld [vmem:[%s6078_s0 + $0xa70] sm:$0xff]  ;;  %v23_v5 = vld [vmem:[%s6078_s0 + $0x48] sm:$0xff]  ;;  %v26_v9 = vld [vmem:[%s6078_s0 + $0x60] sm:$0xff] }
  0x12   :  { %v347_v6 = vld [vmem:[%s6078_s0 + $0xa68] sm:$0xff]  ;;  %v350_v10 = vld [vmem:[%s6078_s0 + $0xa80] sm:$0xff]  ;;  %v29_v13 = vld [vmem:[%s6078_s0 + $0x78] sm:$0xff] }
  0x13   :  { %v27_v7 = vld [vmem:[%s6078_s0 + $0x68] sm:$0xff]  ;;  %v30_v11 = vld [vmem:[%s6078_s0 + $0x80] sm:$0xff]  ;;  %v353_v14 = vld [vmem:[%s6078_s0 + $0xa98] sm:$0xff] }
  0x14   :  { %3316 = vmatpush1.bf16.msra.mxu0 %v3315_v17  ;;  %3378 = vmatpush1.bf16.msra.mxu1 %v3315_v17  ;;  %v351_v8 = vld [vmem:[%s6078_s0 + $0xa88] sm:$0xff]  ;;  %v354_v12 = vld [vmem:[%s6078_s0 + $0xaa0] sm:$0xff]  ;;  %v33_v15 = vld [vmem:[%s6078_s0 + $0x98] sm:$0xff] }
  0x15   :  { %3317 = vmatprep.subr.bf16.mxu0 %v3392_v0  ;;  %3363 = vmatprep.subr.bf16.mxu1 %v3392_v0  ;;  %v357_v16 = vld [vmem:[%s6078_s0 + $0xab8] sm:$0xff]  ;;  %v32_v17 = vld [vmem:[%s6078_s0 + $0x90] sm:$0xff]  ;;  %v35_v21 = vld [vmem:[%s6078_s0 + $0xa8] sm:$0xff] }
  0x16   :  { %v356_v18 = vld [vmem:[%s6078_s0 + $0xab0] sm:$0xff]  ;;  %v359_v22 = vld [vmem:[%s6078_s0 + $0xac8] sm:$0xff]  ;;  %v38_v25 = vld [vmem:[%s6078_s0 + $0xc0] sm:$0xff] }
  0x17   :  { %v36_v19 = vld [vmem:[%s6078_s0 + $0xb0] sm:$0xff]  ;;  %v363_v24 = vld [vmem:[%s6078_s0 + $0xae8] sm:$0xff]  ;;  %v42_v27 = vld [vmem:[%s6078_s0 + $0xe0] sm:$0xff] }
  0x18   :  { %3319 = vmatpush1.bf16.msra.mxu0 %v3318_v20  ;;  %3379 = vmatpush1.bf16.msra.mxu1 %v3318_v20  ;;  %v360_v20 = vld [vmem:[%s6078_s0 + $0xad0] sm:$0xff]  ;;  %v366_v28 = vld [vmem:[%s6078_s0 + $0xb00] sm:$0xff]  ;;  %v365_v30 = vld [vmem:[%s6078_s0 + $0xaf8] sm:$0xff] }
  0x19   :  { %3320 = vmatprep.subr.bf16.mxu0 %v3392_v0  ;;  %3364 = vmatprep.subr.bf16.mxu1 %v3392_v0  ;;  %v45_v31 = vld [vmem:[%s6078_s0 + $0xf8] sm:$0xff]  ;;  %v44_v33 = vld [vmem:[%s6078_s0 + $0xf0] sm:$0xff]  ;;  %v47_v37 = vld [vmem:[%s6078_s0 + $0x108] sm:$0xff] }
  0x1a   :  { %v368_v34 = vld [vmem:[%s6078_s0 + $0xb10] sm:$0xff]  ;;  %v51_v39 = vld [vmem:[%s6078_s0 + $0x128] sm:$0xff]  ;;  %v374_v42 = vld [vmem:[%s6078_s0 + $0xb40] sm:$0xff] }
  0x1b   :  { %v372_v36 = vld [vmem:[%s6078_s0 + $0xb30] sm:$0xff]  ;;  %v375_v40 = vld [vmem:[%s6078_s0 + $0xb48] sm:$0xff]  ;;  %v54_v43 = vld [vmem:[%s6078_s0 + $0x140] sm:$0xff] }
  0x1c   :  { %3322 = vmatpush1.bf16.msra.mxu0 %v3321_v23  ;;  %3380 = vmatpush1.bf16.msra.mxu1 %v3321_v23  ;;  %v39_v23 = vld [vmem:[%s6078_s0 + $0xc8] sm:$0xff]  ;;  %v53_v45 = vld [vmem:[%s6078_s0 + $0x138] sm:$0xff]  ;;  %v56_v49 = vld [vmem:[%s6078_s0 + $0x150] sm:$0xff] }
  0x1d   :  { %3323 = vmatprep.subr.bf16.mxu0 %v3392_v0  ;;  %3365 = vmatprep.subr.bf16.mxu1 %v3392_v0  ;;  %v377_v46 = vld [vmem:[%s6078_s0 + $0xb58] sm:$0xff]  ;;  %v380_v50 = vld [vmem:[%s6078_s0 + $0xb70] sm:$0xff]  ;;  %v383_v54 = vld [vmem:[%s6078_s0 + $0xb88] sm:$0xff] }
  0x1e   :  { %v381_v48 = vld [vmem:[%s6078_s0 + $0xb78] sm:$0xff]  ;;  %v60_v51 = vld [vmem:[%s6078_s0 + $0x170] sm:$0xff]  ;;  %v63_v55 = vld [vmem:[%s6078_s0 + $0x188] sm:$0xff] }
  0x20   :  { %3325 = vmatpush1.bf16.msra.mxu0 %v3324_v26  ;;  %3381 = vmatpush1.bf16.msra.mxu1 %v3324_v26  ;;  %v362_v26 = vld [vmem:[%s6078_s0 + $0xae0] sm:$0xff] }
  0x21   :  { %3326 = vmatprep.subr.bf16.mxu0 %v3392_v0  ;;  %3366 = vmatprep.subr.bf16.mxu1 %v3392_v0 }
  0x24   :  { %3328 = vmatpush1.bf16.msra.mxu0 %v3327_v29  ;;  %3382 = vmatpush1.bf16.msra.mxu1 %v3327_v29  ;;  %v41_v29 = vld [vmem:[%s6078_s0 + $0xd8] sm:$0xff] }
  0x25   :  { %3329 = vmatprep.subr.bf16.mxu0 %v3392_v0  ;;  %3367 = vmatprep.subr.bf16.mxu1 %v3392_v0 }
  0x28   :  { %3331 = vmatpush1.bf16.msra.mxu0 %v3330_v32  ;;  %3383 = vmatpush1.bf16.msra.mxu1 %v3330_v32  ;;  %v369_v32 = vld [vmem:[%s6078_s0 + $0xb18] sm:$0xff] }
  0x29   :  { %3332 = vmatprep.subr.bf16.mxu0 %v3392_v0  ;;  %3368 = vmatprep.subr.bf16.mxu1 %v3392_v0 }
  0x2c   :  { %3334 = vmatpush1.bf16.msra.mxu0 %v3333_v35  ;;  %3384 = vmatpush1.bf16.msra.mxu1 %v3333_v35  ;;  %v48_v35 = vld [vmem:[%s6078_s0 + $0x110] sm:$0xff] }
  0x2d   :  { %3335 = vmatprep.subr.bf16.mxu0 %v3392_v0  ;;  %3369 = vmatprep.subr.bf16.mxu1 %v3392_v0 }
  0x30   :  { %3337 = vmatpush1.bf16.msra.mxu0 %v3336_v38  ;;  %3385 = vmatpush1.bf16.msra.mxu1 %v3336_v38  ;;  %v371_v38 = vld [vmem:[%s6078_s0 + $0xb28] sm:$0xff] }
  0x31   :  { %3338 = vmatprep.subr.bf16.mxu0 %v3392_v0  ;;  %3370 = vmatprep.subr.bf16.mxu1 %v3392_v0 }
  0x34   :  { %3340 = vmatpush1.bf16.msra.mxu0 %v3339_v41  ;;  %3386 = vmatpush1.bf16.msra.mxu1 %v3339_v41  ;;  %v50_v41 = vld [vmem:[%s6078_s0 + $0x120] sm:$0xff] }
  0x35   :  { %3341 = vmatprep.subr.bf16.mxu0 %v3392_v0  ;;  %3371 = vmatprep.subr.bf16.mxu1 %v3392_v0 }
  0x38   :  { %3343 = vmatpush1.bf16.msra.mxu0 %v3342_v44  ;;  %3387 = vmatpush1.bf16.msra.mxu1 %v3342_v44  ;;  %v378_v44 = vld [vmem:[%s6078_s0 + $0xb60] sm:$0xff] }
  0x39   :  { %3344 = vmatprep.subr.bf16.mxu0 %v3392_v0  ;;  %3372 = vmatprep.subr.bf16.mxu1 %v3392_v0 }
  0x3c   :  { %3346 = vmatpush1.bf16.msra.mxu0 %v3345_v47  ;;  %3388 = vmatpush1.bf16.msra.mxu1 %v3345_v47  ;;  %v57_v47 = vld [vmem:[%s6078_s0 + $0x158] sm:$0xff] }
  0x3d   :  { %3347 = vmatprep.subr.bf16.mxu0 %v3392_v0  ;;  %3373 = vmatprep.subr.bf16.mxu1 %v3392_v0  ;;  %v345_v0 = vld [vmem:[%s6078_s0 + $0xa58] sm:$0xff] }
  0x40   :  { %3349 = vmatpush1.bf16.msra.mxu0 %v3348_v52  ;;  %3389 = vmatpush1.bf16.msra.mxu1 %v3348_v52  ;;  %v384_v52 = vld [vmem:[%s6078_s0 + $0xb90] sm:$0xff] }
  0x41   :  { %3351 = vmatprep.subr.bf16.mxu1 %v3350_v53 }
  0x43   :  { %987 = vmatmul.mubr.f32.vlgmr.msra.gmra.mrb[0].mxu0 %v14_v56  ;;  %1527 = vmatmul.mubr.f32.vlgmr.msra.gmra.mrb[0].mxu1 %v338_v57  ;;  %v387_v56 = vld [vmem:[%s6078_s0 + $0xba8] sm:$0xff]  ;;  %v62_v57 = vld [vmem:[%s6078_s0 + $0x180] sm:$0xff] }
  0x44   :  { %3353 = vmatpush3.bf16.msra.mxu1 %v3350_v53  ;;  %991 = vmatprep.mubr.f32.mxu0 %v18_v58  ;;  %v59_v53 = vld [vmem:[%s6078_s0 + $0x168] sm:$0xff]  ;;  %v386_v58 = vld [vmem:[%s6078_s0 + $0xba0] sm:$0xff] }
  0x45   :  { %1531 = vmatprep.mubr.f32.mxu1 %v342_v60  ;;  %3355 = vmatprep.subr.bf16.mxu1 %v3354_v59  ;;  %v390_v60 = vld [vmem:[%s6078_s0 + $0xbc0] sm:$0xff] }
  0x47   :  { %992 = vmatmul.mubr.f32.gmra.mrb[2].mxu0 %v17_v61  ;;  %1532 = vmatmul.mubr.f32.gmra.mrb[2].mxu1 %v341_v62  ;;  %v65_v61 = vld [vmem:[%s6078_s0 + $0x198] sm:$0xff] }
  0x48   :  { %996 = vmatprep.mubr.f32.mxu0 %v21_v63  ;;  %1536 = vmatprep.mubr.f32.mxu1 %v345_v0  ;;  %v389_v62 = vld [vmem:[%s6078_s0 + $0xbb8] sm:$0xff] }
  0x49   :  { %3357 = vmatpush3.bf16.msra.mxu1 %v3354_v59  ;;  %v66_v59 = vld [vmem:[%s6078_s0 + $0x1a0] sm:$0xff]  ;;  %v69_v63 = vld [vmem:[%s6078_s0 + $0x1b8] sm:$0xff] }
  0x4a   :  { %v393_v0 = vld [vmem:[%s6078_s0 + $0xbd8] sm:$0xff] }
  0x4b   :  { %997 = vmatmul.mubr.f32.gmra.mrb[4].mxu0 %v20_v1  ;;  %1537 = vmatmul.mubr.f32.gmra.mrb[4].mxu1 %v344_v2  ;;  %v68_v1 = vld [vmem:[%s6078_s0 + $0x1b0] sm:$0xff] }
  0x4c   :  { %1001 = vmatprep.mubr.f32.mxu0 %v24_v3  ;;  %1541 = vmatprep.mubr.f32.mxu1 %v348_v4  ;;  %v392_v2 = vld [vmem:[%s6078_s0 + $0xbd0] sm:$0xff] }
  0x4d   :  { %v72_v3 = vld [vmem:[%s6078_s0 + $0x1d0] sm:$0xff] }
  0x4e   :  { %v396_v4 = vld [vmem:[%s6078_s0 + $0xbf0] sm:$0xff] }
  0x4f   :  { %1002 = vmatmul.mubr.f32.gmra.mrb[6].mxu0 %v23_v5  ;;  %1542 = vmatmul.mubr.f32.gmra.mrb[6].mxu1 %v347_v6  ;;  %v71_v5 = vld [vmem:[%s6078_s0 + $0x1c8] sm:$0xff] }
  0x50   :  { %1006 = vmatprep.mubr.f32.mxu0 %v27_v7  ;;  %1546 = vmatprep.mubr.f32.mxu1 %v351_v8  ;;  %v395_v6 = vld [vmem:[%s6078_s0 + $0xbe8] sm:$0xff] }
  0x51   :  { %v75_v7 = vld [vmem:[%s6078_s0 + $0x1e8] sm:$0xff] }
  0x52   :  { %v399_v8 = vld [vmem:[%s6078_s0 + $0xc08] sm:$0xff] }
  0x53   :  { %1007 = vmatmul.mubr.f32.gmra.mrb[8].mxu0 %v26_v9  ;;  %1547 = vmatmul.mubr.f32.gmra.mrb[8].mxu1 %v350_v10  ;;  %v74_v9 = vld [vmem:[%s6078_s0 + $0x1e0] sm:$0xff] }
  0x54   :  { %1011 = vmatprep.mubr.f32.mxu0 %v30_v11  ;;  %1551 = vmatprep.mubr.f32.mxu1 %v354_v12  ;;  %v398_v10 = vld [vmem:[%s6078_s0 + $0xc00] sm:$0xff] }
  0x55   :  { %v78_v11 = vld [vmem:[%s6078_s0 + $0x200] sm:$0xff] }
  0x56   :  { %v402_v12 = vld [vmem:[%s6078_s0 + $0xc20] sm:$0xff] }
  0x57   :  { %1012 = vmatmul.mubr.f32.gmra.mrb[10].mxu0 %v29_v13  ;;  %1552 = vmatmul.mubr.f32.gmra.mrb[10].mxu1 %v353_v14  ;;  %v77_v13 = vld [vmem:[%s6078_s0 + $0x1f8] sm:$0xff] }
  0x58   :  { %1016 = vmatprep.mubr.f32.mxu0 %v33_v15  ;;  %1556 = vmatprep.mubr.f32.mxu1 %v357_v16  ;;  %v401_v14 = vld [vmem:[%s6078_s0 + $0xc18] sm:$0xff] }
  0x59   :  { %v81_v15 = vld [vmem:[%s6078_s0 + $0x218] sm:$0xff] }
  0x5a   :  { %v405_v16 = vld [vmem:[%s6078_s0 + $0xc38] sm:$0xff] }
  0x5b   :  { %1017 = vmatmul.mubr.f32.gmra.mrb[12].mxu0 %v32_v17  ;;  %1557 = vmatmul.mubr.f32.gmra.mrb[12].mxu1 %v356_v18  ;;  %v80_v17 = vld [vmem:[%s6078_s0 + $0x210] sm:$0xff] }
  0x5c   :  { %1021 = vmatprep.mubr.f32.mxu0 %v36_v19  ;;  %1561 = vmatprep.mubr.f32.mxu1 %v360_v20  ;;  %v404_v18 = vld [vmem:[%s6078_s0 + $0xc30] sm:$0xff] }
  0x5d   :  { %v84_v19 = vld [vmem:[%s6078_s0 + $0x230] sm:$0xff] }
  0x5e   :  { %v408_v20 = vld [vmem:[%s6078_s0 + $0xc50] sm:$0xff] }
  0x5f   :  { %1022 = vmatmul.mubr.f32.gmra.mrb[14].mxu0 %v35_v21  ;;  %1562 = vmatmul.mubr.f32.gmra.mrb[14].mxu1 %v359_v22  ;;  %v83_v21 = vld [vmem:[%s6078_s0 + $0x228] sm:$0xff] }
  0x60   :  { %1026 = vmatprep.mubr.f32.mxu0 %v39_v23  ;;  %1566 = vmatprep.mubr.f32.mxu1 %v363_v24  ;;  %v407_v22 = vld [vmem:[%s6078_s0 + $0xc48] sm:$0xff] }
  0x61   :  { %v87_v23 = vld [vmem:[%s6078_s0 + $0x248] sm:$0xff] }
  0x62   :  { %v411_v24 = vld [vmem:[%s6078_s0 + $0xc68] sm:$0xff] }
  0x63   :  { %1027 = vmatmul.mubr.f32.gmra.mrb[16].mxu0 %v38_v25  ;;  %1567 = vmatmul.mubr.f32.gmra.mrb[16].mxu1 %v362_v26  ;;  %v86_v25 = vld [vmem:[%s6078_s0 + $0x240] sm:$0xff] }
  0x64   :  { %1031 = vmatprep.mubr.f32.mxu0 %v42_v27  ;;  %1571 = vmatprep.mubr.f32.mxu1 %v366_v28  ;;  %v410_v26 = vld [vmem:[%s6078_s0 + $0xc60] sm:$0xff] }
  0x65   :  { %v90_v27 = vld [vmem:[%s6078_s0 + $0x260] sm:$0xff] }
  0x66   :  { %v414_v28 = vld [vmem:[%s6078_s0 + $0xc80] sm:$0xff] }
  0x67   :  { %1032 = vmatmul.mubr.f32.gmra.mrb[18].mxu0 %v41_v29  ;;  %1572 = vmatmul.mubr.f32.gmra.mrb[18].mxu1 %v365_v30  ;;  %v89_v29 = vld [vmem:[%s6078_s0 + $0x258] sm:$0xff] }
  0x68   :  { %1036 = vmatprep.mubr.f32.mxu0 %v45_v31  ;;  %1576 = vmatprep.mubr.f32.mxu1 %v369_v32  ;;  %v413_v30 = vld [vmem:[%s6078_s0 + $0xc78] sm:$0xff] }
  0x69   :  { %v93_v31 = vld [vmem:[%s6078_s0 + $0x278] sm:$0xff] }
  0x6a   :  { %v417_v32 = vld [vmem:[%s6078_s0 + $0xc98] sm:$0xff] }
  0x6b   :  { %1037 = vmatmul.mubr.f32.gmra.mrb[20].mxu0 %v44_v33  ;;  %1577 = vmatmul.mubr.f32.gmra.mrb[20].mxu1 %v368_v34  ;;  %v92_v33 = vld [vmem:[%s6078_s0 + $0x270] sm:$0xff] }
  0x6c   :  { %1041 = vmatprep.mubr.f32.mxu0 %v48_v35  ;;  %1581 = vmatprep.mubr.f32.mxu1 %v372_v36  ;;  %v416_v34 = vld [vmem:[%s6078_s0 + $0xc90] sm:$0xff] }
  0x6d   :  { %v96_v35 = vld [vmem:[%s6078_s0 + $0x290] sm:$0xff] }
  0x6e   :  { %v420_v36 = vld [vmem:[%s6078_s0 + $0xcb0] sm:$0xff] }
  0x6f   :  { %1042 = vmatmul.mubr.f32.gmra.mrb[22].mxu0 %v47_v37  ;;  %1582 = vmatmul.mubr.f32.gmra.mrb[22].mxu1 %v371_v38  ;;  %v95_v37 = vld [vmem:[%s6078_s0 + $0x288] sm:$0xff] }
  0x70   :  { %1046 = vmatprep.mubr.f32.mxu0 %v51_v39  ;;  %1586 = vmatprep.mubr.f32.mxu1 %v375_v40  ;;  %v419_v38 = vld [vmem:[%s6078_s0 + $0xca8] sm:$0xff] }
  0x71   :  { %v99_v39 = vld [vmem:[%s6078_s0 + $0x2a8] sm:$0xff] }
  0x72   :  { %v423_v40 = vld [vmem:[%s6078_s0 + $0xcc8] sm:$0xff] }
  0x73   :  { %1047 = vmatmul.mubr.f32.gmra.mrb[24].mxu0 %v50_v41  ;;  %1587 = vmatmul.mubr.f32.gmra.mrb[24].mxu1 %v374_v42  ;;  %v98_v41 = vld [vmem:[%s6078_s0 + $0x2a0] sm:$0xff] }
  0x74   :  { %1051 = vmatprep.mubr.f32.mxu0 %v54_v43  ;;  %1591 = vmatprep.mubr.f32.mxu1 %v378_v44  ;;  %v422_v42 = vld [vmem:[%s6078_s0 + $0xcc0] sm:$0xff] }
  0x75   :  { %v102_v43 = vld [vmem:[%s6078_s0 + $0x2c0] sm:$0xff] }
  0x76   :  { %v426_v44 = vld [vmem:[%s6078_s0 + $0xce0] sm:$0xff] }
  0x77   :  { %1052 = vmatmul.mubr.f32.gmra.mrb[26].mxu0 %v53_v45  ;;  %1592 = vmatmul.mubr.f32.gmra.mrb[26].mxu1 %v377_v46  ;;  %v101_v45 = vld [vmem:[%s6078_s0 + $0x2b8] sm:$0xff] }
  0x78   :  { %1056 = vmatprep.mubr.f32.mxu0 %v57_v47  ;;  %1596 = vmatprep.mubr.f32.mxu1 %v381_v48  ;;  %v425_v46 = vld [vmem:[%s6078_s0 + $0xcd8] sm:$0xff] }
  0x79   :  { %v105_v47 = vld [vmem:[%s6078_s0 + $0x2d8] sm:$0xff] }
  0x7a   :  { %v429_v48 = vld [vmem:[%s6078_s0 + $0xcf8] sm:$0xff] }
  0x7b   :  { %1057 = vmatmul.mubr.f32.gmra.mrb[28].mxu0 %v56_v49  ;;  %1597 = vmatmul.mubr.f32.gmra.mrb[28].mxu1 %v380_v50  ;;  %v104_v49 = vld [vmem:[%s6078_s0 + $0x2d0] sm:$0xff] }
  0x7c   :  { %1061 = vmatprep.mubr.f32.mxu0 %v60_v51  ;;  %1601 = vmatprep.mubr.f32.mxu1 %v384_v52  ;;  %v428_v50 = vld [vmem:[%s6078_s0 + $0xcf0] sm:$0xff] }
  0x7d   :  { %v108_v51 = vld [vmem:[%s6078_s0 + $0x2f0] sm:$0xff] }
  0x7e   :  { %v432_v52 = vld [vmem:[%s6078_s0 + $0xd10] sm:$0xff] }
  0x7f   :  { %1062 = vmatmul.mubr.f32.gmra.mrb[30].mxu0 %v59_v53  ;;  %1602 = vmatmul.mubr.f32.gmra.mrb[30].mxu1 %v383_v54  ;;  %v107_v53 = vld [vmem:[%s6078_s0 + $0x2e8] sm:$0xff] }
  0x80   :  { %1066 = vmatprep.mubr.f32.mxu0 %v63_v55  ;;  %1606 = vmatprep.mubr.f32.mxu1 %v387_v56  ;;  %v431_v54 = vld [vmem:[%s6078_s0 + $0xd08] sm:$0xff] }
  0x81   :  { %v111_v55 = vld [vmem:[%s6078_s0 + $0x308] sm:$0xff] }
  0x82   :  { %v435_v56 = vld [vmem:[%s6078_s0 + $0xd28] sm:$0xff] }
  0x83   :  { %1067 = vmatmul.mubr.f32.gmra.mrb[32].mxu0 %v62_v57  ;;  %1607 = vmatmul.mubr.f32.gmra.mrb[32].mxu1 %v386_v58  ;;  %v110_v57 = vld [vmem:[%s6078_s0 + $0x300] sm:$0xff] }
  0x84   :  { %1071 = vmatprep.mubr.f32.mxu0 %v66_v59  ;;  %1611 = vmatprep.mubr.f32.mxu1 %v390_v60  ;;  %v434_v58 = vld [vmem:[%s6078_s0 + $0xd20] sm:$0xff] }
  0x85   :  { %v114_v59 = vld [vmem:[%s6078_s0 + $0x320] sm:$0xff] }
  0x86   :  { %v438_v60 = vld [vmem:[%s6078_s0 + $0xd40] sm:$0xff] }
  0x87   :  { %1072 = vmatmul.mubr.f32.gmra.mrb[34].mxu0 %v65_v61  ;;  %1612 = vmatmul.mubr.f32.gmra.mrb[34].mxu1 %v389_v62  ;;  %v113_v61 = vld [vmem:[%s6078_s0 + $0x318] sm:$0xff] }
  0x88   :  { %1076 = vmatprep.mubr.f32.mxu0 %v69_v63  ;;  %1616 = vmatprep.mubr.f32.mxu1 %v393_v0  ;;  %v437_v62 = vld [vmem:[%s6078_s0 + $0xd38] sm:$0xff] }
  0x89   :  { %v117_v63 = vld [vmem:[%s6078_s0 + $0x338] sm:$0xff] }
  0x8a   :  { %v441_v0 = vld [vmem:[%s6078_s0 + $0xd58] sm:$0xff] }
  0x8b   :  { %1077 = vmatmul.mubr.f32.gmra.mrb[36].mxu0 %v68_v1  ;;  %1617 = vmatmul.mubr.f32.gmra.mrb[36].mxu1 %v392_v2  ;;  %v116_v1 = vld [vmem:[%s6078_s0 + $0x330] sm:$0xff] }
  0x8c   :  { %1081 = vmatprep.mubr.f32.mxu0 %v72_v3  ;;  %1621 = vmatprep.mubr.f32.mxu1 %v396_v4  ;;  %v440_v2 = vld [vmem:[%s6078_s0 + $0xd50] sm:$0xff] }
  0x8d   :  { %v120_v3 = vld [vmem:[%s6078_s0 + $0x350] sm:$0xff] }
  0x8e   :  { %v444_v4 = vld [vmem:[%s6078_s0 + $0xd70] sm:$0xff] }
  0x8f   :  { %1082 = vmatmul.mubr.f32.gmra.mrb[38].mxu0 %v71_v5  ;;  %1622 = vmatmul.mubr.f32.gmra.mrb[38].mxu1 %v395_v6  ;;  %v119_v5 = vld [vmem:[%s6078_s0 + $0x348] sm:$0xff] }
  0x90   :  { %1086 = vmatprep.mubr.f32.mxu0 %v75_v7  ;;  %1626 = vmatprep.mubr.f32.mxu1 %v399_v8  ;;  %v443_v6 = vld [vmem:[%s6078_s0 + $0xd68] sm:$0xff]  ;;  %v16_v8 = vld [vmem:[%s6078_s0 + $0x10] sm:$0xff] }
  0x91   :  { %v123_v7 = vld [vmem:[%s6078_s0 + $0x368] sm:$0xff] }
  0x93   :  { %1087 = vmatmul.mubr.f32.gmra.mrb[40].mxu0 %v74_v9  ;;  %1627 = vmatmul.mubr.f32.gmra.mrb[40].mxu1 %v398_v10  ;;  %v122_v9 = vld [vmem:[%s6078_s0 + $0x360] sm:$0xff]  ;;  %v19_v10 = vld [vmem:[%s6078_s0 + $0x28] sm:$0xff] }
  0x94   :  { %1091 = vmatprep.mubr.f32.mxu0 %v78_v11  ;;  %1631 = vmatprep.mubr.f32.mxu1 %v402_v12  ;;  %v126_v11 = vld [vmem:[%s6078_s0 + $0x380] sm:$0xff] }
  0x95   :  { %v22_v12 = vld [vmem:[%s6078_s0 + $0x40] sm:$0xff] }
  0x97   :  { %1092 = vmatmul.mubr.f32.gmra.mrb[42].mxu0 %v77_v13  ;;  %1632 = vmatmul.mubr.f32.gmra.mrb[42].mxu1 %v401_v14  ;;  %v125_v13 = vld [vmem:[%s6078_s0 + $0x378] sm:$0xff] }
  0x98   :  { %1096 = vmatprep.mubr.f32.mxu0 %v81_v15  ;;  %1636 = vmatprep.mubr.f32.mxu1 %v405_v16  ;;  %v25_v14 = vld [vmem:[%s6078_s0 + $0x58] sm:$0xff]  ;;  %v28_v16 = vld [vmem:[%s6078_s0 + $0x70] sm:$0xff] }
  0x99   :  { %v129_v15 = vld [vmem:[%s6078_s0 + $0x398] sm:$0xff] }
  0x9b   :  { %1097 = vmatmul.mubr.f32.gmra.mrb[44].mxu0 %v80_v17  ;;  %1637 = vmatmul.mubr.f32.gmra.mrb[44].mxu1 %v404_v18  ;;  %v128_v17 = vld [vmem:[%s6078_s0 + $0x390] sm:$0xff]  ;;  %v31_v18 = vld [vmem:[%s6078_s0 + $0x88] sm:$0xff] }
  0x9c   :  { %1101 = vmatprep.mubr.f32.mxu0 %v84_v19  ;;  %1641 = vmatprep.mubr.f32.mxu1 %v408_v20  ;;  %v132_v19 = vld [vmem:[%s6078_s0 + $0x3b0] sm:$0xff]  ;;  %v34_v20 = vld [vmem:[%s6078_s0 + $0xa0] sm:$0xff] }
  0x9f   :  { %1102 = vmatmul.mubr.f32.gmra.mrb[46].mxu0 %v83_v21  ;;  %1642 = vmatmul.mubr.f32.gmra.mrb[46].mxu1 %v407_v22  ;;  %v131_v21 = vld [vmem:[%s6078_s0 + $0x3a8] sm:$0xff]  ;;  %v37_v22 = vld [vmem:[%s6078_s0 + $0xb8] sm:$0xff] }
  0xa0   :  { %1106 = vmatprep.mubr.f32.mxu0 %v87_v23  ;;  %1646 = vmatprep.mubr.f32.mxu1 %v411_v24  ;;  %v135_v23 = vld [vmem:[%s6078_s0 + $0x3c8] sm:$0xff]  ;;  %v40_v24 = vld [vmem:[%s6078_s0 + $0xd0] sm:$0xff] }
  0xa3   :  { %1107 = vmatmul.mubr.f32.gmra.mrb[48].mxu0 %v86_v25  ;;  %1647 = vmatmul.mubr.f32.gmra.mrb[48].mxu1 %v410_v26  ;;  %v134_v25 = vld [vmem:[%s6078_s0 + $0x3c0] sm:$0xff]  ;;  %v43_v26 = vld [vmem:[%s6078_s0 + $0xe8] sm:$0xff] }
  0xa4   :  { %1111 = vmatprep.mubr.f32.mxu0 %v90_v27  ;;  %1651 = vmatprep.mubr.f32.mxu1 %v414_v28  ;;  %v138_v27 = vld [vmem:[%s6078_s0 + $0x3e0] sm:$0xff] }
  0xa5   :  { %v46_v28 = vld [vmem:[%s6078_s0 + $0x100] sm:$0xff] }
  0xa7   :  { %1112 = vmatmul.mubr.f32.gmra.mrb[50].mxu0 %v89_v29  ;;  %1652 = vmatmul.mubr.f32.gmra.mrb[50].mxu1 %v413_v30  ;;  %v137_v29 = vld [vmem:[%s6078_s0 + $0x3d8] sm:$0xff] }
  0xa8   :  { %1116 = vmatprep.mubr.f32.mxu0 %v93_v31  ;;  %1656 = vmatprep.mubr.f32.mxu1 %v417_v32  ;;  %v49_v30 = vld [vmem:[%s6078_s0 + $0x118] sm:$0xff]  ;;  %v52_v32 = vld [vmem:[%s6078_s0 + $0x130] sm:$0xff] }
  0xa9   :  { %v141_v31 = vld [vmem:[%s6078_s0 + $0x3f8] sm:$0xff] }
  0xab   :  { %1117 = vmatmul.mubr.f32.gmra.mrb[52].mxu0 %v92_v33  ;;  %1657 = vmatmul.mubr.f32.gmra.mrb[52].mxu1 %v416_v34  ;;  %v140_v33 = vld [vmem:[%s6078_s0 + $0x3f0] sm:$0xff]  ;;  %v55_v34 = vld [vmem:[%s6078_s0 + $0x148] sm:$0xff] }
  0xac   :  { %1121 = vmatprep.mubr.f32.mxu0 %v96_v35  ;;  %1661 = vmatprep.mubr.f32.mxu1 %v420_v36  ;;  %v144_v35 = vld [vmem:[%s6078_s0 + $0x410] sm:$0xff]  ;;  %v58_v36 = vld [vmem:[%s6078_s0 + $0x160] sm:$0xff] }
  0xaf   :  { %1122 = vmatmul.mubr.f32.gmra.mrb[54].mxu0 %v95_v37  ;;  %1662 = vmatmul.mubr.f32.gmra.mrb[54].mxu1 %v419_v38  ;;  %v143_v37 = vld [vmem:[%s6078_s0 + $0x408] sm:$0xff]  ;;  %v61_v38 = vld [vmem:[%s6078_s0 + $0x178] sm:$0xff] }
  0xb0   :  { %1126 = vmatprep.mubr.f32.mxu0 %v99_v39  ;;  %1666 = vmatprep.mubr.f32.mxu1 %v423_v40  ;;  %v147_v39 = vld [vmem:[%s6078_s0 + $0x428] sm:$0xff]  ;;  %v64_v40 = vld [vmem:[%s6078_s0 + $0x190] sm:$0xff] }
  0xb3   :  { %1127 = vmatmul.mubr.f32.gmra.mrb[56].mxu0 %v98_v41  ;;  %1667 = vmatmul.mubr.f32.gmra.mrb[56].mxu1 %v422_v42  ;;  %v146_v41 = vld [vmem:[%s6078_s0 + $0x420] sm:$0xff]  ;;  %v67_v42 = vld [vmem:[%s6078_s0 + $0x1a8] sm:$0xff] }
  0xb4   :  { %1131 = vmatprep.mubr.f32.mxu0 %v102_v43  ;;  %1671 = vmatprep.mubr.f32.mxu1 %v426_v44  ;;  %v150_v43 = vld [vmem:[%s6078_s0 + $0x440] sm:$0xff] }
  0xb5   :  { %v70_v44 = vld [vmem:[%s6078_s0 + $0x1c0] sm:$0xff] }
  0xb7   :  { %1132 = vmatmul.mubr.f32.gmra.mrb[58].mxu0 %v101_v45  ;;  %1672 = vmatmul.mubr.f32.gmra.mrb[58].mxu1 %v425_v46  ;;  %v149_v45 = vld [vmem:[%s6078_s0 + $0x438] sm:$0xff] }
  0xb8   :  { %1136 = vmatprep.mubr.f32.mxu0 %v105_v47  ;;  %1676 = vmatprep.mubr.f32.mxu1 %v429_v48  ;;  %v73_v46 = vld [vmem:[%s6078_s0 + $0x1d8] sm:$0xff]  ;;  %v76_v48 = vld [vmem:[%s6078_s0 + $0x1f0] sm:$0xff] }
  0xb9   :  { %v153_v47 = vld [vmem:[%s6078_s0 + $0x458] sm:$0xff] }
  0xbb   :  { %1137 = vmatmul.mubr.f32.gmra.mrb[60].mxu0 %v104_v49  ;;  %1677 = vmatmul.mubr.f32.gmra.mrb[60].mxu1 %v428_v50  ;;  %v152_v49 = vld [vmem:[%s6078_s0 + $0x450] sm:$0xff]  ;;  %v79_v50 = vld [vmem:[%s6078_s0 + $0x208] sm:$0xff] }
  0xbc   :  { %1141 = vmatprep.mubr.f32.mxu0 %v108_v51  ;;  %1681 = vmatprep.mubr.f32.mxu1 %v432_v52  ;;  %v156_v51 = vld [vmem:[%s6078_s0 + $0x470] sm:$0xff]  ;;  %v82_v52 = vld [vmem:[%s6078_s0 + $0x220] sm:$0xff] }
  0xbf   :  { %1142 = vmatmul.mubr.f32.gmra.mrb[62].mxu0 %v107_v53  ;;  %1682 = vmatmul.mubr.f32.gmra.mrb[62].mxu1 %v431_v54  ;;  %v155_v53 = vld [vmem:[%s6078_s0 + $0x468] sm:$0xff]  ;;  %v85_v54 = vld [vmem:[%s6078_s0 + $0x238] sm:$0xff] }
  0xc0   :  { %1146 = vmatprep.mubr.f32.mxu0 %v111_v55  ;;  %1686 = vmatprep.mubr.f32.mxu1 %v435_v56  ;;  %v159_v55 = vld [vmem:[%s6078_s0 + $0x488] sm:$0xff]  ;;  %v88_v56 = vld [vmem:[%s6078_s0 + $0x250] sm:$0xff] }
  0xc3   :  { %1147 = vmatmul.mubr.f32.gmra.mrb[64].mxu0 %v110_v57  ;;  %1687 = vmatmul.mubr.f32.gmra.mrb[64].mxu1 %v434_v58  ;;  %v158_v57 = vld [vmem:[%s6078_s0 + $0x480] sm:$0xff]  ;;  %v91_v58 = vld [vmem:[%s6078_s0 + $0x268] sm:$0xff] }
  0xc4   :  { %1151 = vmatprep.mubr.f32.mxu0 %v114_v59  ;;  %1691 = vmatprep.mubr.f32.mxu1 %v438_v60  ;;  %v162_v59 = vld [vmem:[%s6078_s0 + $0x4a0] sm:$0xff] }
  0xc5   :  { %v94_v60 = vld [vmem:[%s6078_s0 + $0x280] sm:$0xff] }
  0xc7   :  { %1152 = vmatmul.mubr.f32.gmra.mrb[66].mxu0 %v113_v61  ;;  %1692 = vmatmul.mubr.f32.gmra.mrb[66].mxu1 %v437_v62  ;;  %v161_v61 = vld [vmem:[%s6078_s0 + $0x498] sm:$0xff] }
  0xc8   :  { %1156 = vmatprep.mubr.f32.mxu0 %v117_v63  ;;  %1696 = vmatprep.mubr.f32.mxu1 %v441_v0  ;;  %v97_v62 = vld [vmem:[%s6078_s0 + $0x298] sm:$0xff]  ;;  %v100_v0 = vld [vmem:[%s6078_s0 + $0x2b0] sm:$0xff] }
  0xc9   :  { %v165_v63 = vld [vmem:[%s6078_s0 + $0x4b8] sm:$0xff] }
  0xcb   :  { %1157 = vmatmul.mubr.f32.gmra.mrb[68].mxu0 %v116_v1  ;;  %1697 = vmatmul.mubr.f32.gmra.mrb[68].mxu1 %v440_v2  ;;  %v164_v1 = vld [vmem:[%s6078_s0 + $0x4b0] sm:$0xff]  ;;  %v103_v2 = vld [vmem:[%s6078_s0 + $0x2c8] sm:$0xff] }
  0xcc   :  { %1161 = vmatprep.mubr.f32.mxu0 %v120_v3  ;;  %1701 = vmatprep.mubr.f32.mxu1 %v444_v4  ;;  %v168_v3 = vld [vmem:[%s6078_s0 + $0x4d0] sm:$0xff]  ;;  %v106_v4 = vld [vmem:[%s6078_s0 + $0x2e0] sm:$0xff] }
  0xcf   :  { %1162 = vmatmul.mubr.f32.gmra.mrb[70].mxu0 %v119_v5  ;;  %1702 = vmatmul.mubr.f32.gmra.mrb[70].mxu1 %v443_v6  ;;  %v167_v5 = vld [vmem:[%s6078_s0 + $0x4c8] sm:$0xff]  ;;  %v109_v6 = vld [vmem:[%s6078_s0 + $0x2f8] sm:$0xff] }
  0xd0   :  { %1166 = vmatprep.mubr.f32.mxu0 %v123_v7  ;;  %3086 = vmatprep.mubr.msk.f32.mxu1 %vm489_vm0, %v16_v8  ;;  %v171_v7 = vld [vmem:[%s6078_s0 + $0x4e8] sm:$0xff]  ;;  %v112_v8 = vld [vmem:[%s6078_s0 + $0x310] sm:$0xff] }
  0xd3   :  { %1167 = vmatmul.mubr.f32.gmra.mrb[72].mxu0 %v122_v9  ;;  %3087 = vmatmul.mubr.msk.f32.vlgmr.msra.gmra.mrb[72].mxu1 %vm489_vm0, %v19_v10  ;;  %v170_v9 = vld [vmem:[%s6078_s0 + $0x4e0] sm:$0xff]  ;;  %v115_v10 = vld [vmem:[%s6078_s0 + $0x328] sm:$0xff] }
  0xd4   :  { %1171 = vmatprep.mubr.f32.mxu0 %v126_v11  ;;  %3089 = vmatprep.mubr.msk.f32.mxu1 %vm489_vm0, %v22_v12  ;;  %v174_v11 = vld [vmem:[%s6078_s0 + $0x500] sm:$0xff] }
  0xd5   :  { %v118_v12 = vld [vmem:[%s6078_s0 + $0x340] sm:$0xff] }
  0xd7   :  { %1172 = vmatmul.mubr.f32.gmra.mrb[74].mxu0 %v125_v13  ;;  %3090 = vmatmul.mubr.msk.f32.gmra.mrb[74].mxu1 %vm489_vm0, %v25_v14  ;;  %v173_v13 = vld [vmem:[%s6078_s0 + $0x4f8] sm:$0xff] }
  0xd8   :  { %1176 = vmatprep.mubr.f32.mxu0 %v129_v15  ;;  %3092 = vmatprep.mubr.msk.f32.mxu1 %vm489_vm0, %v28_v16  ;;  %v121_v14 = vld [vmem:[%s6078_s0 + $0x358] sm:$0xff]  ;;  %v124_v16 = vld [vmem:[%s6078_s0 + $0x370] sm:$0xff] }
  0xd9   :  { %v177_v15 = vld [vmem:[%s6078_s0 + $0x518] sm:$0xff] }
  0xdb   :  { %1177 = vmatmul.mubr.f32.gmra.mrb[76].mxu0 %v128_v17  ;;  %3093 = vmatmul.mubr.msk.f32.gmra.mrb[76].mxu1 %vm489_vm0, %v31_v18 }
  0xdc   :  { %1181 = vmatprep.mubr.f32.mxu0 %v132_v19  ;;  %3095 = vmatprep.mubr.msk.f32.mxu1 %vm489_vm0, %v34_v20 }
  0xdf   :  { %1182 = vmatmul.mubr.f32.gmra.mrb[78].mxu0 %v131_v21  ;;  %3096 = vmatmul.mubr.msk.f32.gmra.mrb[78].mxu1 %vm489_vm0, %v37_v22  ;;  %v176_v21 = vld [vmem:[%s6078_s0 + $0x510] sm:$0xff]  ;;  %v127_v22 = vld [vmem:[%s6078_s0 + $0x388] sm:$0xff] }
  0xe0   :  { %1186 = vmatprep.mubr.f32.mxu0 %v135_v23  ;;  %3098 = vmatprep.mubr.msk.f32.mxu1 %vm489_vm0, %v40_v24  ;;  %v180_v23 = vld [vmem:[%s6078_s0 + $0x530] sm:$0xff]  ;;  %v130_v24 = vld [vmem:[%s6078_s0 + $0x3a0] sm:$0xff] }
  0xe3   :  { %1187 = vmatmul.mubr.f32.gmra.mrb[80].mxu0 %v134_v25  ;;  %3099 = vmatmul.mubr.msk.f32.gmra.mrb[80].mxu1 %vm489_vm0, %v43_v26 }
  0xe4   :  { %1191 = vmatprep.mubr.f32.mxu0 %v138_v27  ;;  %3101 = vmatprep.mubr.msk.f32.mxu1 %vm489_vm0, %v46_v28 }
  0xe7   :  { %1192 = vmatmul.mubr.f32.gmra.mrb[82].mxu0 %v137_v29  ;;  %3102 = vmatmul.mubr.msk.f32.gmra.mrb[82].mxu1 %vm489_vm0, %v49_v30  ;;  %v179_v29 = vld [vmem:[%s6078_s0 + $0x528] sm:$0xff]  ;;  %v133_v30 = vld [vmem:[%s6078_s0 + $0x3b8] sm:$0xff] }
  0xe8   :  { %1196 = vmatprep.mubr.f32.mxu0 %v141_v31  ;;  %3104 = vmatprep.mubr.msk.f32.mxu1 %vm489_vm0, %v52_v32  ;;  %v183_v31 = vld [vmem:[%s6078_s0 + $0x548] sm:$0xff]  ;;  %v136_v32 = vld [vmem:[%s6078_s0 + $0x3d0] sm:$0xff] }
  0xeb   :  { %1197 = vmatmul.mubr.f32.gmra.mrb[84].mxu0 %v140_v33  ;;  %3105 = vmatmul.mubr.msk.f32.gmra.mrb[84].mxu1 %vm489_vm0, %v55_v34 }
  0xec   :  { %1201 = vmatprep.mubr.f32.mxu0 %v144_v35  ;;  %3107 = vmatprep.mubr.msk.f32.mxu1 %vm489_vm0, %v58_v36 }
  0xef   :  { %1202 = vmatmul.mubr.f32.gmra.mrb[86].mxu0 %v143_v37  ;;  %3108 = vmatmul.mubr.msk.f32.gmra.mrb[86].mxu1 %vm489_vm0, %v61_v38  ;;  %v182_v37 = vld [vmem:[%s6078_s0 + $0x540] sm:$0xff]  ;;  %v139_v38 = vld [vmem:[%s6078_s0 + $0x3e8] sm:$0xff] }
  0xf0   :  { %1206 = vmatprep.mubr.f32.mxu0 %v147_v39  ;;  %3110 = vmatprep.mubr.msk.f32.mxu1 %vm489_vm0, %v64_v40  ;;  %v186_v39 = vld [vmem:[%s6078_s0 + $0x560] sm:$0xff] }
  0xf1   :  { %v142_v40 = vld [vmem:[%s6078_s0 + $0x400] sm:$0xff] }
  0xf3   :  { %1207 = vmatmul.mubr.f32.gmra.mrb[88].mxu0 %v146_v41  ;;  %3111 = vmatmul.mubr.msk.f32.gmra.mrb[88].mxu1 %vm489_vm0, %v67_v42 }
  0xf4   :  { %1211 = vmatprep.mubr.f32.mxu0 %v150_v43  ;;  %3113 = vmatprep.mubr.msk.f32.mxu1 %vm489_vm0, %v70_v44 }
  0xf7   :  { %1212 = vmatmul.mubr.f32.gmra.mrb[90].mxu0 %v149_v45  ;;  %3114 = vmatmul.mubr.msk.f32.gmra.mrb[90].mxu1 %vm489_vm0, %v73_v46  ;;  %v185_v45 = vld [vmem:[%s6078_s0 + $0x558] sm:$0xff] }
  0xf8   :  { %1216 = vmatprep.mubr.f32.mxu0 %v153_v47  ;;  %3116 = vmatprep.mubr.msk.f32.mxu1 %vm489_vm0, %v76_v48  ;;  %v145_v46 = vld [vmem:[%s6078_s0 + $0x418] sm:$0xff]  ;;  %v148_v48 = vld [vmem:[%s6078_s0 + $0x430] sm:$0xff] }
  0xf9   :  { %v189_v47 = vld [vmem:[%s6078_s0 + $0x578] sm:$0xff] }
  0xfb   :  { %1217 = vmatmul.mubr.f32.gmra.mrb[92].mxu0 %v152_v49  ;;  %3117 = vmatmul.mubr.msk.f32.gmra.mrb[92].mxu1 %vm489_vm0, %v79_v50 }
  0xfc   :  { %1221 = vmatprep.mubr.f32.mxu0 %v156_v51  ;;  %3119 = vmatprep.mubr.msk.f32.mxu1 %vm489_vm0, %v82_v52 }
  0xff   :  { %1222 = vmatmul.mubr.f32.gmra.mrb[94].mxu0 %v155_v53  ;;  %3120 = vmatmul.mubr.msk.f32.gmra.mrb[94].mxu1 %vm489_vm0, %v85_v54  ;;  %v188_v53 = vld [vmem:[%s6078_s0 + $0x570] sm:$0xff]  ;;  %v151_v54 = vld [vmem:[%s6078_s0 + $0x448] sm:$0xff] }
 0x100   :  { %1226 = vmatprep.mubr.f32.mxu0 %v159_v55  ;;  %3122 = vmatprep.mubr.msk.f32.mxu1 %vm489_vm0, %v88_v56  ;;  %v192_v55 = vld [vmem:[%s6078_s0 + $0x590] sm:$0xff]  ;;  %v154_v56 = vld [vmem:[%s6078_s0 + $0x460] sm:$0xff] }
 0x103   :  { %1227 = vmatmul.mubr.f32.gmra.mrb[96].mxu0 %v158_v57  ;;  %3123 = vmatmul.mubr.msk.f32.gmra.mrb[96].mxu1 %vm489_vm0, %v91_v58 }
 0x104   :  { %1231 = vmatprep.mubr.f32.mxu0 %v162_v59  ;;  %3125 = vmatprep.mubr.msk.f32.mxu1 %vm489_vm0, %v94_v60 }
 0x107   :  { %1232 = vmatmul.mubr.f32.gmra.mrb[98].mxu0 %v161_v61  ;;  %3126 = vmatmul.mubr.msk.f32.gmra.mrb[98].mxu1 %vm489_vm0, %v97_v62  ;;  %v191_v61 = vld [vmem:[%s6078_s0 + $0x588] sm:$0xff]  ;;  %v157_v62 = vld [vmem:[%s6078_s0 + $0x478] sm:$0xff] }
 0x108   :  { %1236 = vmatprep.mubr.f32.mxu0 %v165_v63  ;;  %3128 = vmatprep.mubr.msk.f32.mxu1 %vm489_vm0, %v100_v0  ;;  %v195_v63 = vld [vmem:[%s6078_s0 + $0x5a8] sm:$0xff]  ;;  %v160_v0 = vld [vmem:[%s6078_s0 + $0x490] sm:$0xff] }
 0x10b   :  { %1237 = vmatmul.mubr.f32.gmra.mrb[100].mxu0 %v164_v1  ;;  %3129 = vmatmul.mubr.msk.f32.gmra.mrb[100].mxu1 %vm489_vm0, %v103_v2 }
 0x10c   :  { %1241 = vmatprep.mubr.f32.mxu0 %v168_v3  ;;  %3131 = vmatprep.mubr.msk.f32.mxu1 %vm489_vm0, %v106_v4 }
 0x10f   :  { %1242 = vmatmul.mubr.f32.gmra.mrb[102].mxu0 %v167_v5  ;;  %3132 = vmatmul.mubr.msk.f32.gmra.mrb[102].mxu1 %vm489_vm0, %v109_v6  ;;  %v194_v5 = vld [vmem:[%s6078_s0 + $0x5a0] sm:$0xff]  ;;  %v163_v6 = vld [vmem:[%s6078_s0 + $0x4a8] sm:$0xff] }
 0x110   :  { %1246 = vmatprep.mubr.f32.mxu0 %v171_v7  ;;  %3134 = vmatprep.mubr.msk.f32.mxu1 %vm489_vm0, %v112_v8  ;;  %v198_v7 = vld [vmem:[%s6078_s0 + $0x5c0] sm:$0xff] }
 0x111   :  { %v166_v8 = vld [vmem:[%s6078_s0 + $0x4c0] sm:$0xff] }
 0x113   :  { %1247 = vmatmul.mubr.f32.gmra.mrb[104].mxu0 %v170_v9  ;;  %3135 = vmatmul.mubr.msk.f32.gmra.mrb[104].mxu1 %vm489_vm0, %v115_v10 }
 0x114   :  { %1251 = vmatprep.mubr.f32.mxu0 %v174_v11  ;;  %3137 = vmatprep.mubr.msk.f32.mxu1 %vm489_vm0, %v118_v12 }
 0x116   :  { %v4242_v17 = vpop.f32.mrb[0].mxu0  ;;  %v4244_v18 = vpop.f32.mrb[0].mxu1 }
 0x117   :  { %v990_v19 = vpop.f32.mrb[1].mxu0  ;;  %1252 = vmatmul.mubr.f32.gmra.mrb[106].mxu0 %v173_v13  ;;  %v1530_v20 = vpop.f32.mrb[1].mxu1  ;;  %3138 = vmatmul.mubr.msk.f32.gmra.mrb[106].mxu1 %vm489_vm0, %v121_v14  ;;  %v197_v13 = vld [vmem:[%s6078_s0 + $0x5b8] sm:$0xff] }
 0x118   :  { %1256 = vmatprep.mubr.f32.mxu0 %v177_v15  ;;  %3140 = vmatprep.mubr.msk.f32.mxu1 %vm489_vm0, %v124_v16  ;;  %v169_v14 = vld [vmem:[%s6078_s0 + $0x4d8] sm:$0xff]  ;;  %v172_v16 = vld [vmem:[%s6078_s0 + $0x4f0] sm:$0xff] }
 0x119   :  { %v201_v15 = vld [vmem:[%s6078_s0 + $0x5d8] sm:$0xff] }
 0x11a   :  { %v4260_v25 = vpop.f32.mrb[2].mxu0  ;;  %v4262_v26 = vpop.f32.mrb[2].mxu1 }
 0x11b   :  { %v995_v27 = vpop.f32.mrb[3].mxu0  ;;  %1257 = vmatmul.mubr.f32.gmra.mrb[108].mxu0 %v176_v21  ;;  %v1535_v28 = vpop.f32.mrb[3].mxu1  ;;  %3141 = vmatmul.mubr.msk.f32.gmra.mrb[108].mxu1 %vm489_vm0, %v127_v22 }
 0x11c   :  { %1261 = vmatprep.mubr.f32.mxu0 %v180_v23  ;;  %3143 = vmatprep.mubr.msk.f32.mxu1 %vm489_vm0, %v130_v24  ;;  %v200_v23 = vld [vmem:[%s6078_s0 + $0x5d0] sm:$0xff]  ;;  %v175_v24 = vld [vmem:[%s6078_s0 + $0x508] sm:$0xff]  ;;  %v178_v28 = vld [vmem:[%s6078_s0 + $0x520] sm:$0xff] }
 0x11d   :  { %v204_v27 = vld [vmem:[%s6078_s0 + $0x5f0] sm:$0xff] }
 0x11e   :  { %v4278_v33 = vpop.f32.mrb[4].mxu0  ;;  %v4280_v34 = vpop.f32.mrb[4].mxu1 }
 0x11f   :  { %v1000_v35 = vpop.f32.mrb[5].mxu0  ;;  %1262 = vmatmul.mubr.f32.gmra.mrb[110].mxu0 %v179_v29  ;;  %v1540_v36 = vpop.f32.mrb[5].mxu1  ;;  %3144 = vmatmul.mubr.msk.f32.gmra.mrb[110].mxu1 %vm489_vm0, %v133_v30 }
 0x120   :  { %1266 = vmatprep.mubr.f32.mxu0 %v183_v31  ;;  %3146 = vmatprep.mubr.msk.f32.mxu1 %vm489_vm0, %v136_v32  ;;  %v203_v35 = vld [vmem:[%s6078_s0 + $0x5e8] sm:$0xff]  ;;  %v181_v36 = vld [vmem:[%s6078_s0 + $0x538] sm:$0xff] }
 0x122   :  { %v4296_v41 = vpop.f32.mrb[6].mxu0  ;;  %v4298_v42 = vpop.f32.mrb[6].mxu1 }
 0x123   :  { %v1005_v43 = vpop.f32.mrb[7].mxu0  ;;  %1267 = vmatmul.mubr.f32.gmra.mrb[112].mxu0 %v182_v37  ;;  %v1545_v44 = vpop.f32.mrb[7].mxu1  ;;  %3147 = vmatmul.mubr.msk.f32.gmra.mrb[112].mxu1 %vm489_vm0, %v139_v38  ;;  %v207_v37 = vld [vmem:[%s6078_s0 + $0x608] sm:$0xff]  ;;  %v184_v38 = vld [vmem:[%s6078_s0 + $0x550] sm:$0xff] }
 0x124   :  { %1271 = vmatprep.mubr.f32.mxu0 %v186_v39  ;;  %3149 = vmatprep.mubr.msk.f32.mxu1 %vm489_vm0, %v142_v40 }
 0x126   :  { %v4314_v49 = vpop.f32.mrb[8].mxu0  ;;  %v4316_v50 = vpop.f32.mrb[8].mxu1 }
 0x127   :  { %v1010_v51 = vpop.f32.mrb[9].mxu0  ;;  %1272 = vmatmul.mubr.f32.gmra.mrb[114].mxu0 %v185_v45  ;;  %v1550_v52 = vpop.f32.mrb[9].mxu1  ;;  %3150 = vmatmul.mubr.msk.f32.gmra.mrb[114].mxu1 %vm489_vm0, %v145_v46  ;;  %v206_v45 = vld [vmem:[%s6078_s0 + $0x600] sm:$0xff]  ;;  %v187_v46 = vld [vmem:[%s6078_s0 + $0x568] sm:$0xff] }
 0x128   :  { %1276 = vmatprep.mubr.f32.mxu0 %v189_v47  ;;  %3152 = vmatprep.mubr.msk.f32.mxu1 %vm489_vm0, %v148_v48  ;;  %v210_v47 = vld [vmem:[%s6078_s0 + $0x620] sm:$0xff] }
 0x129   :  { %v190_v48 = vld [vmem:[%s6078_s0 + $0x580] sm:$0xff] }
 0x12a   :  { %v4332_v57 = vpop.f32.mrb[10].mxu0  ;;  %v4334_v58 = vpop.f32.mrb[10].mxu1 }
 0x12b   :  { %v1015_v59 = vpop.f32.mrb[11].mxu0  ;;  %1277 = vmatmul.mubr.f32.gmra.mrb[116].mxu0 %v188_v53  ;;  %v1555_v60 = vpop.f32.mrb[11].mxu1  ;;  %3153 = vmatmul.mubr.msk.f32.gmra.mrb[116].mxu1 %vm489_vm0, %v151_v54 }
 0x12c   :  { %1281 = vmatprep.mubr.f32.mxu0 %v192_v55  ;;  %3155 = vmatprep.mubr.msk.f32.mxu1 %vm489_vm0, %v154_v56  ;;  %v209_v55 = vld [vmem:[%s6078_s0 + $0x618] sm:$0xff]  ;;  %v196_v60 = vld [vmem:[%s6078_s0 + $0x5b0] sm:$0xff] }
 0x12d   :  { %v193_v56 = vld [vmem:[%s6078_s0 + $0x598] sm:$0xff] }
 0x12e   :  { %v4350_v1 = vpop.f32.mrb[12].mxu0  ;;  %v4352_v2 = vpop.f32.mrb[12].mxu1  ;;  %v213_v59 = vld [vmem:[%s6078_s0 + $0x638] sm:$0xff] }
 0x12f   :  { %v1020_v3 = vpop.f32.mrb[13].mxu0  ;;  %1282 = vmatmul.mubr.f32.gmra.mrb[118].mxu0 %v191_v61  ;;  %v1560_v4 = vpop.f32.mrb[13].mxu1  ;;  %3156 = vmatmul.mubr.msk.f32.gmra.mrb[118].mxu1 %vm489_vm0, %v157_v62 }
 0x130   :  { %1286 = vmatprep.mubr.f32.mxu0 %v195_v63  ;;  %3158 = vmatprep.mubr.msk.f32.mxu1 %vm489_vm0, %v160_v0  ;;  %v212_v3 = vld [vmem:[%s6078_s0 + $0x630] sm:$0xff]  ;;  %v199_v4 = vld [vmem:[%s6078_s0 + $0x5c8] sm:$0xff] }
 0x132   :  { %v4368_v9 = vpop.f32.mrb[14].mxu0  ;;  %v4370_v10 = vpop.f32.mrb[14].mxu1 }
 0x133   :  { %v1025_v11 = vpop.f32.mrb[15].mxu0  ;;  %1287 = vmatmul.mubr.f32.gmra.mrb[120].mxu0 %v194_v5  ;;  %v1565_v12 = vpop.f32.mrb[15].mxu1  ;;  %3159 = vmatmul.mubr.msk.f32.gmra.mrb[120].mxu1 %vm489_vm0, %v163_v6  ;;  %v216_v5 = vld [vmem:[%s6078_s0 + $0x650] sm:$0xff]  ;;  %v202_v6 = vld [vmem:[%s6078_s0 + $0x5e0] sm:$0xff] }
 0x134   :  { %1291 = vmatprep.mubr.f32.mxu0 %v198_v7  ;;  %3161 = vmatprep.mubr.msk.f32.mxu1 %vm489_vm0, %v166_v8 }
 0x136   :  { %v4386_v19 = vpop.f32.mrb[16].mxu0  ;;  %v4388_v20 = vpop.f32.mrb[16].mxu1 }
 0x137   :  { %v1030_v21 = vpop.f32.mrb[17].mxu0  ;;  %1292 = vmatmul.mubr.f32.gmra.mrb[122].mxu0 %v197_v13  ;;  %v1570_v22 = vpop.f32.mrb[17].mxu1  ;;  %3162 = vmatmul.mubr.msk.f32.gmra.mrb[122].mxu1 %vm489_vm0, %v169_v14  ;;  %v215_v13 = vld [vmem:[%s6078_s0 + $0x648] sm:$0xff]  ;;  %v205_v14 = vld [vmem:[%s6078_s0 + $0x5f8] sm:$0xff] }
 0x138   :  { %1296 = vmatprep.mubr.f32.mxu0 %v201_v15  ;;  %3164 = vmatprep.mubr.msk.f32.mxu1 %vm489_vm0, %v172_v16  ;;  %v219_v15 = vld [vmem:[%s6078_s0 + $0x668] sm:$0xff]  ;;  %v208_v16 = vld [vmem:[%s6078_s0 + $0x610] sm:$0xff] }
 0x13a   :  { %v4404_v29 = vpop.f32.mrb[18].mxu0  ;;  %v4406_v30 = vpop.f32.mrb[18].mxu1 }
 0x13b   :  { %v1035_v31 = vpop.f32.mrb[19].mxu0  ;;  %1297 = vmatmul.mubr.f32.gmra.mrb[124].mxu0 %v200_v23  ;;  %v1575_v32 = vpop.f32.mrb[19].mxu1  ;;  %3165 = vmatmul.mubr.msk.f32.gmra.mrb[124].mxu1 %vm489_vm0, %v175_v24 }
 0x13c   :  { %1301 = vmatprep.mubr.f32.mxu0 %v204_v27  ;;  %3167 = vmatprep.mubr.msk.f32.mxu1 %vm489_vm0, %v178_v28  ;;  %v218_v27 = vld [vmem:[%s6078_s0 + $0x660] sm:$0xff]  ;;  %v211_v28 = vld [vmem:[%s6078_s0 + $0x628] sm:$0xff] }
 0x13d   :  { %v222_v31 = vld [vmem:[%s6078_s0 + $0x680] sm:$0xff] }
 0x13e   :  { %v4422_v39 = vpop.f32.mrb[20].mxu0  ;;  %v4424_v40 = vpop.f32.mrb[20].mxu1  ;;  %v214_v32 = vld [vmem:[%s6078_s0 + $0x640] sm:$0xff] }
 0x13f   :  { %v1040_v43 = vpop.f32.mrb[21].mxu0  ;;  %1302 = vmatmul.mubr.f32.gmra.mrb[126].mxu0 %v203_v35  ;;  %v1580_v44 = vpop.f32.mrb[21].mxu1  ;;  %3168 = vmatmul.mubr.msk.f32.gmra.mrb[126].mxu1 %vm489_vm0, %v181_v36 }
 0x140   :  { %1306 = vmatprep.mubr.f32.mxu0 %v207_v37  ;;  %3170 = vmatprep.mubr.msk.f32.mxu1 %vm489_vm0, %v184_v38  ;;  %v221_v43 = vld [vmem:[%s6078_s0 + $0x678] sm:$0xff] }
 0x141   :  { %v217_v44 = vld [vmem:[%s6078_s0 + $0x658] sm:$0xff] }
 0x142   :  { %v4440_v51 = vpop.f32.mrb[22].mxu0  ;;  %v4442_v52 = vpop.f32.mrb[22].mxu1 }
 0x143   :  { %v1045_v53 = vpop.f32.mrb[23].mxu0  ;;  %1307 = vmatmul.mubr.f32.gmra.mrb[128].mxu0 %v206_v45  ;;  %v1585_v54 = vpop.f32.mrb[23].mxu1  ;;  %3171 = vmatmul.mubr.msk.f32.gmra.mrb[128].mxu1 %vm489_vm0, %v187_v46  ;;  %v225_v45 = vld [vmem:[%s6078_s0 + $0x698] sm:$0xff]  ;;  %v220_v46 = vld [vmem:[%s6078_s0 + $0x670] sm:$0xff] }
 0x144   :  { %1311 = vmatprep.mubr.f32.mxu0 %v210_v47  ;;  %3173 = vmatprep.mubr.msk.f32.mxu1 %vm489_vm0, %v190_v48 }
 0x146   :  { %v4458_v61 = vpop.f32.mrb[24].mxu0  ;;  %v4460_v62 = vpop.f32.mrb[24].mxu1 }
 0x147   :  { %v1050_v63 = vpop.f32.mrb[25].mxu0  ;;  %1312 = vmatmul.mubr.f32.gmra.mrb[130].mxu0 %v209_v55  ;;  %v1590_v0 = vpop.f32.mrb[25].mxu1  ;;  %3174 = vmatmul.mubr.msk.f32.gmra.mrb[130].mxu1 %vm489_vm0, %v193_v56  ;;  %v224_v55 = vld [vmem:[%s6078_s0 + $0x690] sm:$0xff]  ;;  %v223_v56 = vld [vmem:[%s6078_s0 + $0x688] sm:$0xff] }
 0x148   :  { %1316 = vmatprep.mubr.f32.mxu0 %v213_v59  ;;  %3176 = vmatprep.mubr.msk.f32.mxu1 %vm489_vm0, %v196_v60  ;;  %v228_v59 = vld [vmem:[%s6078_s0 + $0x6b0] sm:$0xff]  ;;  %v226_v60 = vld [vmem:[%s6078_s0 + $0x6a0] sm:$0xff] }
 0x14a   :  { %v4476_v7 = vpop.f32.mrb[26].mxu0  ;;  %v4478_v8 = vpop.f32.mrb[26].mxu1 }
 0x14b   :  { %v1055_v11 = vpop.f32.mrb[27].mxu0  ;;  %1317 = vmatmul.mubr.f32.gmra.mrb[132].mxu0 %v212_v3  ;;  %v1595_v12 = vpop.f32.mrb[27].mxu1  ;;  %3177 = vmatmul.mubr.msk.f32.gmra.mrb[132].mxu1 %vm489_vm0, %v199_v4 }
 0x14c   :  { %1321 = vmatprep.mubr.f32.mxu0 %v216_v5  ;;  %3179 = vmatprep.mubr.msk.f32.mxu1 %vm489_vm0, %v202_v6  ;;  %v227_v5 = vld [vmem:[%s6078_s0 + $0x6a8] sm:$0xff]  ;;  %v229_v6 = vld [vmem:[%s6078_s0 + $0x6b8] sm:$0xff]  ;;  %v232_v12 = vld [vmem:[%s6078_s0 + $0x6d0] sm:$0xff] }
 0x14d   :  { %v231_v11 = vld [vmem:[%s6078_s0 + $0x6c8] sm:$0xff] }
 0x14e   :  { %v4494_v21 = vpop.f32.mrb[28].mxu0  ;;  %v4496_v22 = vpop.f32.mrb[28].mxu1 }
 0x14f   :  { %6081 = vst [vmem:[#allocation2_spill] sm:$0xff] %v4496_v22  ;;  %v1060_v23 = vpop.f32.mrb[29].mxu0  ;;  %1322 = vmatmul.mubr.f32.gmra.mrb[134].mxu0 %v215_v13  ;;  %v1600_v24 = vpop.f32.mrb[29].mxu1  ;;  %3180 = vmatmul.mubr.msk.f32.gmra.mrb[134].mxu1 %vm489_vm0, %v205_v14  ;;  %v284_v22 = vld [vmem:[%s6078_s0 + $0x870] sm:$0xff] }
 0x150   :  { %1326 = vmatprep.mubr.f32.mxu0 %v219_v15  ;;  %3182 = vmatprep.mubr.msk.f32.mxu1 %vm489_vm0, %v208_v16  ;;  %v230_v23 = vld [vmem:[%s6078_s0 + $0x6c0] sm:$0xff]  ;;  %v235_v24 = vld [vmem:[%s6078_s0 + $0x6e8] sm:$0xff] }
 0x152   :  { %v4512_v35 = vpop.f32.mrb[30].mxu0  ;;  %v4514_v36 = vpop.f32.mrb[30].mxu1 }
 0x153   :  { %v1065_v37 = vpop.f32.mrb[31].mxu0  ;;  %1327 = vmatmul.mubr.f32.gmra.mrb[136].mxu0 %v218_v27  ;;  %v1605_v38 = vpop.f32.mrb[31].mxu1  ;;  %3183 = vmatmul.mubr.msk.f32.gmra.mrb[136].mxu1 %vm489_vm0, %v211_v28  ;;  %v234_v27 = vld [vmem:[%s6078_s0 + $0x6e0] sm:$0xff] }
 0x154   :  { %1331 = vmatprep.mubr.f32.mxu0 %v222_v31  ;;  %3185 = vmatprep.mubr.msk.f32.mxu1 %vm489_vm0, %v214_v32  ;;  %v238_v28 = vld [vmem:[%s6078_s0 + $0x700] sm:$0xff] }
 0x156   :  { %v4530_v47 = vpop.f32.mrb[32].mxu0  ;;  %v4532_v48 = vpop.f32.mrb[32].mxu1 }
 0x157   :  { %6082 = vst [vmem:[#allocation3_spill] sm:$0xff] %v4532_v48  ;;  %v1070_v53 = vpop.f32.mrb[33].mxu0  ;;  %1332 = vmatmul.mubr.f32.gmra.mrb[138].mxu0 %v221_v43  ;;  %v1610_v54 = vpop.f32.mrb[33].mxu1  ;;  %3186 = vmatmul.mubr.msk.f32.gmra.mrb[138].mxu1 %vm489_vm0, %v217_v44  ;;  %v233_v43 = vld [vmem:[%s6078_s0 + $0x6d8] sm:$0xff] }
 0x158   :  { %1336 = vmatprep.mubr.f32.mxu0 %v225_v45  ;;  %3188 = vmatprep.mubr.msk.f32.mxu1 %vm489_vm0, %v220_v46  ;;  %v241_v44 = vld [vmem:[%s6078_s0 + $0x718] sm:$0xff]  ;;  %v244_v46 = vld [vmem:[%s6078_s0 + $0x730] sm:$0xff] }
 0x159   :  { %v237_v45 = vld [vmem:[%s6078_s0 + $0x6f8] sm:$0xff] }
 0x15a   :  { %v4548_v63 = vpop.f32.mrb[34].mxu0  ;;  %v4550_v0 = vpop.f32.mrb[34].mxu1 }
 0x15b   :  { %6083 = vst [vmem:[#allocation4_spill] sm:$0xff] %v4550_v0  ;;  %v1075_v3 = vpop.f32.mrb[35].mxu0  ;;  %1337 = vmatmul.mubr.f32.gmra.mrb[140].mxu0 %v224_v55  ;;  %v1615_v4 = vpop.f32.mrb[35].mxu1  ;;  %3189 = vmatmul.mubr.msk.f32.gmra.mrb[140].mxu1 %vm489_vm0, %v223_v56 }
 0x15c   :  { %1341 = vmatprep.mubr.f32.mxu0 %v228_v59  ;;  %3191 = vmatprep.mubr.msk.f32.mxu1 %vm489_vm0, %v226_v60  ;;  %v236_v59 = vld [vmem:[%s6078_s0 + $0x6f0] sm:$0xff]  ;;  %v247_v60 = vld [vmem:[%s6078_s0 + $0x748] sm:$0xff]  ;;  %v250_v4 = vld [vmem:[%s6078_s0 + $0x760] sm:$0xff] }
 0x15d   :  { %v240_v3 = vld [vmem:[%s6078_s0 + $0x710] sm:$0xff] }
 0x15e   :  { %v4566_v13 = vpop.f32.mrb[36].mxu0  ;;  %v4568_v14 = vpop.f32.mrb[36].mxu1 }
 0x15f   :  { %6084 = vst [vmem:[#allocation5_spill] sm:$0xff] %v4568_v14  ;;  %v1080_v15 = vpop.f32.mrb[37].mxu0  ;;  %1342 = vmatmul.mubr.f32.gmra.mrb[142].mxu0 %v227_v5  ;;  %v1620_v16 = vpop.f32.mrb[37].mxu1  ;;  %3192 = vmatmul.mubr.msk.f32.gmra.mrb[142].mxu1 %vm489_vm0, %v229_v6  ;;  %v281_v14 = vld [vmem:[%s6078_s0 + $0x858] sm:$0xff] }
 0x160   :  { %1346 = vmatprep.mubr.f32.mxu0 %v231_v11  ;;  %3194 = vmatprep.mubr.msk.f32.mxu1 %vm489_vm0, %v232_v12  ;;  %v239_v15 = vld [vmem:[%s6078_s0 + $0x708] sm:$0xff]  ;;  %v253_v16 = vld [vmem:[%s6078_s0 + $0x778] sm:$0xff] }
 0x162   :  { %v4584_v31 = vpop.f32.mrb[38].mxu0  ;;  %v4586_v32 = vpop.f32.mrb[38].mxu1 }
 0x163   :  { %6085 = vst [vmem:[#allocation6_spill] sm:$0xff] %v4586_v32  ;;  %v1085_v37 = vpop.f32.mrb[39].mxu0  ;;  %1347 = vmatmul.mubr.f32.gmra.mrb[144].mxu0 %v230_v23  ;;  %v1625_v38 = vpop.f32.mrb[39].mxu1  ;;  %3195 = vmatmul.mubr.msk.f32.gmra.mrb[144].mxu1 %vm489_vm0, %v235_v24  ;;  %v243_v23 = vld [vmem:[%s6078_s0 + $0x728] sm:$0xff]  ;;  %v256_v24 = vld [vmem:[%s6078_s0 + $0x790] sm:$0xff] }
 0x164   :  { %1351 = vmatprep.mubr.f32.mxu0 %v234_v27  ;;  %3197 = vmatprep.mubr.msk.f32.mxu1 %vm489_vm0, %v238_v28 }
 0x166   :  { %v4602_v53 = vpop.f32.mrb[40].mxu0  ;;  %v4604_v54 = vpop.f32.mrb[40].mxu1 }
 0x167   :  { %6086 = vst [vmem:[#allocation7_spill] sm:$0xff] %v4604_v54  ;;  %v1090_v55 = vpop.f32.mrb[41].mxu0  ;;  %1352 = vmatmul.mubr.f32.gmra.mrb[146].mxu0 %v233_v43  ;;  %v1630_v56 = vpop.f32.mrb[41].mxu1  ;;  %3198 = vmatmul.mubr.msk.f32.gmra.mrb[146].mxu1 %vm489_vm0, %v241_v44  ;;  %v242_v43 = vld [vmem:[%s6078_s0 + $0x720] sm:$0xff]  ;;  %v259_v44 = vld [vmem:[%s6078_s0 + $0x7a8] sm:$0xff]  ;;  %v325_v54 = vld [vmem:[%s6078_s0 + $0x9b8] sm:$0xff] }
 0x168   :  { %1356 = vmatprep.mubr.f32.mxu0 %v237_v45  ;;  %3200 = vmatprep.mubr.msk.f32.mxu1 %vm489_vm0, %v244_v46  ;;  %v246_v45 = vld [vmem:[%s6078_s0 + $0x740] sm:$0xff] }
 0x169   :  { %v262_v46 = vld [vmem:[%s6078_s0 + $0x7c0] sm:$0xff] }
 0x16a   :  { %v4620_v5 = vpop.f32.mrb[42].mxu0  ;;  %v4622_v6 = vpop.f32.mrb[42].mxu1 }
 0x16b   :  { %6087 = vst [vmem:[#allocation8_spill] sm:$0xff] %v4622_v6  ;;  %v1095_v11 = vpop.f32.mrb[43].mxu0  ;;  %1357 = vmatmul.mubr.f32.gmra.mrb[148].mxu0 %v236_v59  ;;  %v1635_v12 = vpop.f32.mrb[43].mxu1  ;;  %3201 = vmatmul.mubr.msk.f32.gmra.mrb[148].mxu1 %vm489_vm0, %v247_v60  ;;  %v331_v6 = vld [vmem:[%s6078_s0 + $0x9e8] sm:$0xff] }
 0x16c   :  { %1361 = vmatprep.mubr.f32.mxu0 %v240_v3  ;;  %3203 = vmatprep.mubr.msk.f32.mxu1 %vm489_vm0, %v250_v4  ;;  %v245_v3 = vld [vmem:[%s6078_s0 + $0x738] sm:$0xff]  ;;  %v268_v12 = vld [vmem:[%s6078_s0 + $0x7f0] sm:$0xff] }
 0x16d   :  { %v265_v4 = vld [vmem:[%s6078_s0 + $0x7d8] sm:$0xff] }
 0x16e   :  { %v4638_v27 = vpop.f32.mrb[44].mxu0  ;;  %v4640_v28 = vpop.f32.mrb[44].mxu1  ;;  %v249_v11 = vld [vmem:[%s6078_s0 + $0x758] sm:$0xff] }
 0x16f   :  { %6088 = vst [vmem:[#allocation9_spill] sm:$0xff] %v4640_v28  ;;  %v1100_v37 = vpop.f32.mrb[45].mxu0  ;;  %1362 = vmatmul.mubr.f32.gmra.mrb[150].mxu0 %v239_v15  ;;  %v1640_v38 = vpop.f32.mrb[45].mxu1  ;;  %3204 = vmatmul.mubr.msk.f32.gmra.mrb[150].mxu1 %vm489_vm0, %v253_v16  ;;  %v313_v28 = vld [vmem:[%s6078_s0 + $0x958] sm:$0xff] }
 0x170   :  { %1366 = vmatprep.mubr.f32.mxu0 %v243_v23  ;;  %3206 = vmatprep.mubr.msk.f32.mxu1 %vm489_vm0, %v256_v24  ;;  %v248_v37 = vld [vmem:[%s6078_s0 + $0x750] sm:$0xff]  ;;  %v271_v38 = vld [vmem:[%s6078_s0 + $0x808] sm:$0xff] }
 0x172   :  { %v4656_v55 = vpop.f32.mrb[46].mxu0  ;;  %v4658_v56 = vpop.f32.mrb[46].mxu1 }
 0x173   :  { %6089 = vst [vmem:[#allocation10_spill] sm:$0xff] %v4658_v56  ;;  %v1105_v59 = vpop.f32.mrb[47].mxu0  ;;  %1367 = vmatmul.mubr.f32.gmra.mrb[152].mxu0 %v242_v43  ;;  %v1645_v60 = vpop.f32.mrb[47].mxu1  ;;  %3207 = vmatmul.mubr.msk.f32.gmra.mrb[152].mxu1 %vm489_vm0, %v259_v44  ;;  %v252_v43 = vld [vmem:[%s6078_s0 + $0x770] sm:$0xff]  ;;  %v274_v44 = vld [vmem:[%s6078_s0 + $0x820] sm:$0xff]  ;;  %v319_v56 = vld [vmem:[%s6078_s0 + $0x988] sm:$0xff] }
 0x174   :  { %1371 = vmatprep.mubr.f32.mxu0 %v246_v45  ;;  %3209 = vmatprep.mubr.msk.f32.mxu1 %vm489_vm0, %v262_v46 }
 0x176   :  { %v4674_v15 = vpop.f32.mrb[48].mxu0  ;;  %v4676_v16 = vpop.f32.mrb[48].mxu1 }
 0x177   :  { %6090 = vst [vmem:[#allocation11_spill] sm:$0xff] %v4676_v16  ;;  %v1110_v23 = vpop.f32.mrb[49].mxu0  ;;  %1372 = vmatmul.mubr.f32.gmra.mrb[154].mxu0 %v245_v3  ;;  %v1650_v24 = vpop.f32.mrb[49].mxu1  ;;  %3210 = vmatmul.mubr.msk.f32.gmra.mrb[154].mxu1 %vm489_vm0, %v265_v4  ;;  %v251_v3 = vld [vmem:[%s6078_s0 + $0x768] sm:$0xff]  ;;  %v277_v4 = vld [vmem:[%s6078_s0 + $0x838] sm:$0xff] }
 0x178   :  { %1376 = vmatprep.mubr.f32.mxu0 %v249_v11  ;;  %3212 = vmatprep.mubr.msk.f32.mxu1 %vm489_vm0, %v268_v12  ;;  %v255_v11 = vld [vmem:[%s6078_s0 + $0x788] sm:$0xff]  ;;  %v280_v12 = vld [vmem:[%s6078_s0 + $0x850] sm:$0xff]  ;;  %v301_v16 = vld [vmem:[%s6078_s0 + $0x8f8] sm:$0xff] }
 0x17a   :  { %v4692_v45 = vpop.f32.mrb[50].mxu0  ;;  %v4694_v46 = vpop.f32.mrb[50].mxu1 }
 0x17b   :  { %6091 = vst [vmem:[#allocation12_spill] sm:$0xff] %v4694_v46  ;;  %v1115_v59 = vpop.f32.mrb[51].mxu0  ;;  %1377 = vmatmul.mubr.f32.gmra.mrb[156].mxu0 %v248_v37  ;;  %v1655_v60 = vpop.f32.mrb[51].mxu1  ;;  %3213 = vmatmul.mubr.msk.f32.gmra.mrb[156].mxu1 %vm489_vm0, %v271_v38  ;;  %v307_v46 = vld [vmem:[%s6078_s0 + $0x928] sm:$0xff] }
 0x17c   :  { %1381 = vmatprep.mubr.f32.mxu0 %v252_v43  ;;  %3215 = vmatprep.mubr.msk.f32.mxu1 %vm489_vm0, %v274_v44  ;;  %v254_v43 = vld [vmem:[%s6078_s0 + $0x780] sm:$0xff]  ;;  %v283_v44 = vld [vmem:[%s6078_s0 + $0x868] sm:$0xff] }
 0x17d   :  { %v258_v59 = vld [vmem:[%s6078_s0 + $0x7a0] sm:$0xff] }
 0x17e   :  { %v4710_v23 = vpop.f32.mrb[52].mxu0  ;;  %v4712_v24 = vpop.f32.mrb[52].mxu1  ;;  %v286_v60 = vld [vmem:[%s6078_s0 + $0x880] sm:$0xff] }
 0x17f   :  { %6092 = vst [vmem:[#allocation13_spill] sm:$0xff] %v4712_v24  ;;  %v1120_v37 = vpop.f32.mrb[53].mxu0  ;;  %1382 = vmatmul.mubr.f32.gmra.mrb[158].mxu0 %v251_v3  ;;  %v1660_v38 = vpop.f32.mrb[53].mxu1  ;;  %3216 = vmatmul.mubr.msk.f32.gmra.mrb[158].mxu1 %vm489_vm0, %v277_v4  ;;  %v261_v24 = vld [vmem:[%s6078_s0 + $0x7b8] sm:$0xff] }
 0x180   :  { %1386 = vmatprep.mubr.f32.mxu0 %v255_v11  ;;  %3218 = vmatprep.mubr.msk.f32.mxu1 %vm489_vm0, %v280_v12  ;;  %v257_v37 = vld [vmem:[%s6078_s0 + $0x798] sm:$0xff] }
 0x181   :  { %v289_v38 = vld [vmem:[%s6078_s0 + $0x898] sm:$0xff] }
 0x182   :  { %v4728_v3 = vpop.f32.mrb[54].mxu0  ;;  %v4730_v4 = vpop.f32.mrb[54].mxu1 }
 0x183   :  { %6093 = vst [vmem:[#allocation14_spill] sm:$0xff] %v4730_v4  ;;  %v1125_v11 = vpop.f32.mrb[55].mxu0  ;;  %1387 = vmatmul.mubr.f32.gmra.mrb[160].mxu0 %v254_v43  ;;  %v1665_v12 = vpop.f32.mrb[55].mxu1  ;;  %3219 = vmatmul.mubr.msk.f32.gmra.mrb[160].mxu1 %vm489_vm0, %v283_v44  ;;  %v292_v43 = vld [vmem:[%s6078_s0 + $0x8b0] sm:$0xff]  ;;  %v295_v4 = vld [vmem:[%s6078_s0 + $0x8c8] sm:$0xff] }
 0x184   :  { %1391 = vmatprep.mubr.f32.mxu0 %v258_v59  ;;  %3221 = vmatprep.mubr.msk.f32.mxu1 %vm489_vm0, %v286_v60  ;;  %v260_v12 = vld [vmem:[%s6078_s0 + $0x7b0] sm:$0xff] }
 0x186   :  { %v4746_v44 = vpop.f32.mrb[56].mxu0  ;;  %v4748_v59 = vpop.f32.mrb[56].mxu1 }
 0x187   :  { %6094 = vst [vmem:[#allocation15_spill] sm:$0xff] %v4748_v59  ;;  %v1130_v60 = vpop.f32.mrb[57].mxu0  ;;  %1392 = vmatmul.mubr.f32.gmra.mrb[162].mxu0 %v257_v37  ;;  %v1670_v11 = vpop.f32.mrb[57].mxu1  ;;  %3222 = vmatmul.mubr.msk.f32.gmra.mrb[162].mxu1 %vm489_vm0, %v289_v38  ;;  %v264_v59 = vld [vmem:[%s6078_s0 + $0x7d0] sm:$0xff]  ;;  %v298_v37 = vld [vmem:[%s6078_s0 + $0x8e0] sm:$0xff] }
 0x188   :  { %1396 = vmatprep.mubr.f32.mxu0 %v261_v24  ;;  %3224 = vmatprep.mubr.msk.f32.mxu1 %vm489_vm0, %v292_v43  ;;  %v263_v11 = vld [vmem:[%s6078_s0 + $0x7c8] sm:$0xff] }
 0x18a   :  { %v4764_v38 = vpop.f32.mrb[58].mxu0  ;;  %v4766_v24 = vpop.f32.mrb[58].mxu1 }
 0x18b   :  { %6095 = vst [vmem:[#allocation16_spill] sm:$0xff] %v4766_v24  ;;  %v1135_v43 = vpop.f32.mrb[59].mxu0  ;;  %1397 = vmatmul.mubr.f32.gmra.mrb[164].mxu0 %v260_v12  ;;  %v1675_v60 = vpop.f32.mrb[59].mxu1  ;;  %3225 = vmatmul.mubr.msk.f32.gmra.mrb[164].mxu1 %vm489_vm0, %v295_v4  ;;  %v267_v24 = vld [vmem:[%s6078_s0 + $0x7e8] sm:$0xff]  ;;  %v304_v12 = vld [vmem:[%s6078_s0 + $0x910] sm:$0xff] }
 0x18c   :  { %1401 = vmatprep.mubr.f32.mxu0 %v264_v59  ;;  %3227 = vmatprep.mubr.msk.f32.mxu1 %vm489_vm0, %v298_v37  ;;  %v266_v60 = vld [vmem:[%s6078_s0 + $0x7e0] sm:$0xff] }
 0x18e   :  { %v4782_v4 = vpop.f32.mrb[60].mxu0  ;;  %v4784_v59 = vpop.f32.mrb[60].mxu1 }
 0x18f   :  { %6096 = vst [vmem:[#allocation17_spill] sm:$0xff] %v4784_v59  ;;  %v1140_v37 = vpop.f32.mrb[61].mxu0  ;;  %1402 = vmatmul.mubr.f32.gmra.mrb[166].mxu0 %v263_v11  ;;  %v1680_v43 = vpop.f32.mrb[61].mxu1  ;;  %3228 = vmatmul.mubr.msk.f32.gmra.mrb[166].mxu1 %vm489_vm0, %v301_v16  ;;  %v270_v59 = vld [vmem:[%s6078_s0 + $0x800] sm:$0xff] }
 0x190   :  { %1406 = vmatprep.mubr.f32.mxu0 %v267_v24  ;;  %3230 = vmatprep.mubr.msk.f32.mxu1 %vm489_vm0, %v304_v12  ;;  %v310_v11 = vld [vmem:[%s6078_s0 + $0x940] sm:$0xff]  ;;  %v269_v43 = vld [vmem:[%s6078_s0 + $0x7f8] sm:$0xff] }
 0x192   :  { %v4800_v16 = vpop.f32.mrb[62].mxu0  ;;  %v4802_v24 = vpop.f32.mrb[62].mxu1 }
 0x193   :  { %6097 = vst [vmem:[#allocation18_spill] sm:$0xff] %v4802_v24  ;;  %v1145_v12 = vpop.f32.mrb[63].mxu0  ;;  %1407 = vmatmul.mubr.f32.gmra.mrb[168].mxu0 %v266_v60  ;;  %v1685_v37 = vpop.f32.mrb[63].mxu1  ;;  %3231 = vmatmul.mubr.msk.f32.gmra.mrb[168].mxu1 %vm489_vm0, %v307_v46  ;;  %v273_v24 = vld [vmem:[%s6078_s0 + $0x818] sm:$0xff]  ;;  %v316_v60 = vld [vmem:[%s6078_s0 + $0x970] sm:$0xff] }
 0x194   :  { %1411 = vmatprep.mubr.f32.mxu0 %v270_v59  ;;  %3233 = vmatprep.mubr.msk.f32.mxu1 %vm489_vm0, %v310_v11  ;;  %v272_v37 = vld [vmem:[%s6078_s0 + $0x810] sm:$0xff] }
 0x196   :  { %v4818_v46 = vpop.f32.mrb[64].mxu0  ;;  %v4820_v59 = vpop.f32.mrb[64].mxu1 }
 0x197   :  { %6098 = vst [vmem:[#allocation19_spill] sm:$0xff] %v4820_v59  ;;  %v1150_v11 = vpop.f32.mrb[65].mxu0  ;;  %1412 = vmatmul.mubr.f32.gmra.mrb[170].mxu0 %v269_v43  ;;  %v1690_v12 = vpop.f32.mrb[65].mxu1  ;;  %3234 = vmatmul.mubr.msk.f32.gmra.mrb[170].mxu1 %vm489_vm0, %v313_v28  ;;  %v276_v59 = vld [vmem:[%s6078_s0 + $0x830] sm:$0xff]  ;;  %v322_v43 = vld [vmem:[%s6078_s0 + $0x9a0] sm:$0xff] }
 0x198   :  { %1416 = vmatprep.mubr.f32.mxu0 %v273_v24  ;;  %3236 = vmatprep.mubr.msk.f32.mxu1 %vm489_vm0, %v316_v60  ;;  %v275_v12 = vld [vmem:[%s6078_s0 + $0x828] sm:$0xff] }
 0x19a   :  { %v4836_v28 = vpop.f32.mrb[66].mxu0  ;;  %v4838_v24 = vpop.f32.mrb[66].mxu1 }
 0x19b   :  { %6099 = vst [vmem:[#allocation20_spill] sm:$0xff] %v4838_v24  ;;  %v1155_v60 = vpop.f32.mrb[67].mxu0  ;;  %1417 = vmatmul.mubr.f32.gmra.mrb[172].mxu0 %v272_v37  ;;  %v1695_v11 = vpop.f32.mrb[67].mxu1  ;;  %3237 = vmatmul.mubr.msk.f32.gmra.mrb[172].mxu1 %vm489_vm0, %v319_v56  ;;  %v279_v24 = vld [vmem:[%s6078_s0 + $0x848] sm:$0xff]  ;;  %v328_v37 = vld [vmem:[%s6078_s0 + $0x9d0] sm:$0xff] }
 0x19c   :  { %1421 = vmatprep.mubr.f32.mxu0 %v276_v59  ;;  %3239 = vmatprep.mubr.msk.f32.mxu1 %vm489_vm0, %v322_v43  ;;  %v278_v11 = vld [vmem:[%s6078_s0 + $0x840] sm:$0xff] }
 0x19e   :  { %v4854_v56 = vpop.f32.mrb[68].mxu0  ;;  %v4856_v59 = vpop.f32.mrb[68].mxu1 }
 0x19f   :  { %6100 = vst [vmem:[#allocation21_spill] sm:$0xff] %v4856_v59  ;;  %v1160_v43 = vpop.f32.mrb[69].mxu0  ;;  %1422 = vmatmul.mubr.f32.gmra.mrb[174].mxu0 %v275_v12  ;;  %v1700_v60 = vpop.f32.mrb[69].mxu1  ;;  %3240 = vmatmul.mubr.msk.f32.gmra.mrb[174].mxu1 %vm489_vm0, %v325_v54  ;;  %v282_v59 = vld [vmem:[%s6078_s0 + $0x860] sm:$0xff] }
 0x1a0   :  { %1426 = vmatprep.mubr.f32.mxu0 %v279_v24  ;;  %3242 = vmatprep.mubr.msk.f32.mxu1 %vm489_vm0, %v328_v37  ;;  %v334_v12 = vld [vmem:[%s6078_s0 + $0xa00] sm:$0xff] }
 0x1a1   :  { %v4879_v37 = vld [vmem:[%s6079_s2] ss:$0 sm:$0xff] }
 0x1a2   :  { %v4872_v54 = vpop.f32.mrb[70].mxu0  ;;  %v4874_v24 = vpop.f32.mrb[70].mxu1  ;;  %v994_v32 = vadd.f32 %v4879_v37, %v4260_v25 }
 0x1a3   :  { %6101 = vst [vmem:[#allocation22_spill] sm:$0xff] %v4874_v24  ;;  %v1165_v43 = vpop.f32.mrb[71].mxu0  ;;  %1427 = vmatmul.mubr.f32.gmra.mrb[176].mxu0 %v278_v11  ;;  %v1705_v60 = vpop.f32.mrb[71].mxu1  ;;  %3243 = vmatmul.mubr.msk.f32.gmra.mrb[176].mxu1 %vm489_vm0, %v331_v6  ;;  %v337_v24 = vld [vmem:[%s6078_s0 + $0xa18] sm:$0xff]  ;;  %v340_v6 = vld [vmem:[%s6078_s0 + $0xa30] sm:$0xff] }
 0x1a4   :  { %1431 = vmatprep.mubr.f32.mxu0 %v282_v59  ;;  %3245 = vmatprep.mubr.msk.f32.mxu1 %vm489_vm0, %v334_v12  ;;  %v285_v11 = vld [vmem:[%s6078_s0 + $0x878] sm:$0xff]  ;;  %v989_v59 = vadd.f32 %v4879_v37, %v4242_v17  ;;  %v343_v17 = vld [vmem:[%s6078_s0 + $0xa48] sm:$0xff] }
 0x1a6   :  { %v4899_v12 = vpop.f32.mrb[72].mxu0  ;;  %v3088_v43 = vpop.f32.mrb[72].mxu1 }
 0x1a7   :  { %v1779_v60 = vadd.f32 %v3088_v43, %v994_v32  ;;  %v1170_v48 = vpop.f32.mrb[73].mxu0  ;;  %1432 = vmatmul.mubr.f32.gmra.mrb[178].mxu0 %v281_v14  ;;  %v1773_v0 = vpop.f32.mrb[73].mxu1  ;;  %3246 = vmatmul.mubr.msk.f32.gmra.mrb[178].mxu1 %vm489_vm0, %v337_v24  ;;  %v288_v32 = vld [vmem:[%s6078_s0 + $0x890] sm:$0xff]  ;;  %v999_v24 = vadd.f32 %v4879_v37, %v4278_v33 }
 0x1a8   :  { %v1774_v25 = vadd.f32 %v1773_v0, %v989_v59  ;;  %1436 = vmatprep.mubr.f32.mxu0 %v285_v11  ;;  %3248 = vmatprep.mubr.msk.f32.mxu1 %vm489_vm0, %v340_v6  ;;  %v1004_v48 = vadd.f32 %v4879_v37, %v4296_v41  ;;  %v346_v0 = vld [vmem:[%s6078_s0 + $0xa60] sm:$0xff] }
 0x1a9   :  { %v2493_v14 = vmax.f32 %v1779_v60, 0.0 }
 0x1aa   :  { %v2492_v11 = vmax.f32 %v1774_v25, 0.0  ;;  %v4919_v6 = vpop.f32.mrb[74].mxu0  ;;  %v3091_v59 = vpop.f32.mrb[74].mxu1  ;;  %v287_v25 = vld [vmem:[%s6078_s0 + $0x888] sm:$0xff] }
 0x1ab   :  { %2638 = vst.msk [vmem:[%s6080_s3 + $0x8] sm:$0xff] %vm2636_vm1, %v2493_v14  ;;  %v1789_v41 = vadd.f32 %v3091_v59, %v1004_v48  ;;  %v1175_v43 = vpop.f32.mrb[75].mxu0  ;;  %1437 = vmatmul.mubr.f32.gmra.mrb[180].mxu0 %v284_v22  ;;  %v1783_v60 = vpop.f32.mrb[75].mxu1  ;;  %3249 = vmatmul.mubr.msk.f32.gmra.mrb[180].mxu1 %vm489_vm0, %v343_v17  ;;  %v349_v22 = vld [vmem:[%s6078_s0 + $0xa78] sm:$0xff]  ;;  %v1014_v17 = vadd.f32 %v4879_v37, %v4332_v57  ;;  %v291_v14 = vld [vmem:[%s6078_s0 + $0x8a8] sm:$0xff] }
 0x1ac   :  { %2637 = vst.msk [vmem:[%s6080_s3] sm:$0xff] %vm2636_vm1, %v2492_v11  ;;  %v1784_v33 = vadd.f32 %v1783_v60, %v999_v24  ;;  %1441 = vmatprep.mubr.f32.mxu0 %v288_v32  ;;  %3251 = vmatprep.mubr.msk.f32.mxu1 %vm489_vm0, %v346_v0  ;;  %v352_v32 = vld [vmem:[%s6078_s0 + $0xa90] sm:$0xff]  ;;  %v1009_v0 = vadd.f32 %v4879_v37, %v4314_v49  ;;  %v290_v60 = vld [vmem:[%s6078_s0 + $0x8a0] sm:$0xff] }
 0x1ad   :  { %v2495_v48 = vmax.f32 %v1789_v41, 0.0 }
 0x1ae   :  { %v2494_v24 = vmax.f32 %v1784_v33, 0.0  ;;  %v4947_v11 = vpop.f32.mrb[76].mxu0  ;;  %v3094_v59 = vpop.f32.mrb[76].mxu1  ;;  %v355_v33 = vld [vmem:[%s6078_s0 + $0xaa8] sm:$0xff] }
 0x1af   :  { %2640 = vst.msk [vmem:[%s6080_s3 + $0x18] sm:$0xff] %vm2636_vm1, %v2495_v48  ;;  %v1799_v57 = vadd.f32 %v3094_v59, %v1014_v17  ;;  %v1180_v41 = vpop.f32.mrb[77].mxu0  ;;  %1442 = vmatmul.mubr.f32.gmra.mrb[182].mxu0 %v287_v25  ;;  %v1793_v43 = vpop.f32.mrb[77].mxu1  ;;  %3252 = vmatmul.mubr.msk.f32.gmra.mrb[182].mxu1 %vm489_vm0, %v349_v22  ;;  %v1024_v25 = vadd.f32 %v4879_v37, %v4368_v9  ;;  %v294_v17 = vld [vmem:[%s6078_s0 + $0x8c0] sm:$0xff] }
 0x1b0   :  { %2639 = vst.msk [vmem:[%s6080_s3 + $0x10] sm:$0xff] %vm2636_vm1, %v2494_v24  ;;  %v1794_v49 = vadd.f32 %v1793_v43, %v1009_v0  ;;  %1446 = vmatprep.mubr.f32.mxu0 %v291_v14  ;;  %3254 = vmatprep.mubr.msk.f32.mxu1 %vm489_vm0, %v352_v32  ;;  %v358_v48 = vld [vmem:[%s6078_s0 + $0xac0] sm:$0xff]  ;;  %v1019_v14 = vadd.f32 %v4879_v37, %v4350_v1  ;;  %v293_v41 = vld [vmem:[%s6078_s0 + $0x8b8] sm:$0xff] }
 0x1b1   :  { %v2497_v22 = vmax.f32 %v1799_v57, 0.0  ;;  %v361_v43 = vld [vmem:[%s6078_s0 + $0xad8] sm:$0xff] }
 0x1b2   :  { %v2496_v32 = vmax.f32 %v1794_v49, 0.0  ;;  %v4975_v0 = vpop.f32.mrb[78].mxu0  ;;  %v3097_v24 = vpop.f32.mrb[78].mxu1  ;;  %v1034_v49 = vadd.f32 %v4879_v37, %v4404_v29 }
 0x1b3   :  { %2642 = vst.msk [vmem:[%s6080_s3 + $0x28] sm:$0xff] %vm2636_vm1, %v2497_v22  ;;  %v1809_v9 = vadd.f32 %v3097_v24, %v1024_v25  ;;  %v1185_v59 = vpop.f32.mrb[79].mxu0  ;;  %1447 = vmatmul.mubr.f32.gmra.mrb[184].mxu0 %v290_v60  ;;  %v1803_v57 = vpop.f32.mrb[79].mxu1  ;;  %3255 = vmatmul.mubr.msk.f32.gmra.mrb[184].mxu1 %vm489_vm0, %v355_v33  ;;  %v297_v33 = vld [vmem:[%s6078_s0 + $0x8d8] sm:$0xff]  ;;  %v364_v25 = vld [vmem:[%s6078_s0 + $0xaf0] sm:$0xff]  ;;  %v1029_v22 = vadd.f32 %v4879_v37, %v4386_v19 }
 0x1b4   :  { %2641 = vst.msk [vmem:[%s6080_s3 + $0x20] sm:$0xff] %vm2636_vm1, %v2496_v32  ;;  %v1804_v1 = vadd.f32 %v1803_v57, %v1019_v14  ;;  %1451 = vmatprep.mubr.f32.mxu0 %v294_v17  ;;  %3257 = vmatprep.mubr.msk.f32.mxu1 %vm489_vm0, %v358_v48  ;;  %v367_v59 = vld [vmem:[%s6078_s0 + $0xb08] sm:$0xff]  ;;  %v1044_v57 = vadd.f32 %v4879_v37, %v4440_v51 }
 0x1b5   :  { %v2499_v60 = vmax.f32 %v1809_v9, 0.0  ;;  %v296_v9 = vld [vmem:[%s6078_s0 + $0x8d0] sm:$0xff] }
 0x1b6   :  { %v2498_v17 = vmax.f32 %v1804_v1, 0.0  ;;  %v5003_v48 = vpop.f32.mrb[80].mxu0  ;;  %v3100_v14 = vpop.f32.mrb[80].mxu1 }
 0x1b7   :  { %2644 = vst.msk [vmem:[%s6080_s3 + $0x38] sm:$0xff] %vm2636_vm1, %v2499_v60  ;;  %v1819_v29 = vadd.f32 %v3100_v14, %v1034_v49  ;;  %v1190_v32 = vpop.f32.mrb[81].mxu0  ;;  %1452 = vmatmul.mubr.f32.gmra.mrb[186].mxu0 %v293_v41  ;;  %v1813_v24 = vpop.f32.mrb[81].mxu1  ;;  %3258 = vmatmul.mubr.msk.f32.gmra.mrb[186].mxu1 %vm489_vm0, %v361_v43  ;;  %v300_v41 = vld [vmem:[%s6078_s0 + $0x8f0] sm:$0xff]  ;;  %v370_v43 = vld [vmem:[%s6078_s0 + $0xb20] sm:$0xff]  ;;  %v1039_v49 = vadd.f32 %v4879_v37, %v4422_v39  ;;  %v299_v14 = vld [vmem:[%s6078_s0 + $0x8e8] sm:$0xff] }
 0x1b8   :  { %2643 = vst.msk [vmem:[%s6080_s3 + $0x30] sm:$0xff] %vm2636_vm1, %v2498_v17  ;;  %v1814_v19 = vadd.f32 %v1813_v24, %v1029_v22  ;;  %1456 = vmatprep.mubr.f32.mxu0 %v297_v33  ;;  %3260 = vmatprep.mubr.msk.f32.mxu1 %vm489_vm0, %v364_v25  ;;  %v1054_v32 = vadd.f32 %v4879_v37, %v4476_v7 }
 0x1b9   :  { %v2501_v1 = vmax.f32 %v1819_v29, 0.0  ;;  %v373_v29 = vld [vmem:[%s6078_s0 + $0xb38] sm:$0xff] }
 0x1ba   :  { %v2500_v60 = vmax.f32 %v1814_v19, 0.0  ;;  %v5031_v33 = vpop.f32.mrb[82].mxu0  ;;  %v3103_v25 = vpop.f32.mrb[82].mxu1  ;;  %v303_v19 = vld [vmem:[%s6078_s0 + $0x908] sm:$0xff] }
 0x1bb   :  { %2646 = vst.msk [vmem:[%s6080_s3 + $0x48] sm:$0xff] %vm2636_vm1, %v2501_v1  ;;  %v1829_v51 = vadd.f32 %v3103_v25, %v1044_v57  ;;  %v1195_v22 = vpop.f32.mrb[83].mxu0  ;;  %1457 = vmatmul.mubr.f32.gmra.mrb[188].mxu0 %v296_v9  ;;  %v1823_v17 = vpop.f32.mrb[83].mxu1  ;;  %3261 = vmatmul.mubr.msk.f32.gmra.mrb[188].mxu1 %vm489_vm0, %v367_v59  ;;  %v376_v9 = vld [vmem:[%s6078_s0 + $0xb50] sm:$0xff]  ;;  %v1049_v59 = vadd.f32 %v4879_v37, %v4458_v61  ;;  %v379_v25 = vld [vmem:[%s6078_s0 + $0xb68] sm:$0xff] }
 0x1bc   :  { %2645 = vst.msk [vmem:[%s6080_s3 + $0x40] sm:$0xff] %vm2636_vm1, %v2500_v60  ;;  %v1824_v39 = vadd.f32 %v1823_v17, %v1039_v49  ;;  %1461 = vmatprep.mubr.f32.mxu0 %v300_v41  ;;  %3263 = vmatprep.mubr.msk.f32.mxu1 %vm489_vm0, %v370_v43  ;;  %v302_v60 = vld [vmem:[%s6078_s0 + $0x900] sm:$0xff] }
 0x1bd   :  { %v2503_v24 = vmax.f32 %v1829_v51, 0.0  ;;  %v1064_v51 = vadd.f32 %v4879_v37, %v4512_v35  ;;  %v306_v17 = vld [vmem:[%s6078_s0 + $0x920] sm:$0xff] }
 0x1be   :  { %v2502_v57 = vmax.f32 %v1824_v39, 0.0  ;;  %v5059_v1 = vpop.f32.mrb[84].mxu0  ;;  %v3106_v41 = vpop.f32.mrb[84].mxu1  ;;  %v382_v39 = vld [vmem:[%s6078_s0 + $0xb80] sm:$0xff] }
 0x1bf   :  { %2648 = vst.msk [vmem:[%s6080_s3 + $0x58] sm:$0xff] %vm2636_vm1, %v2503_v24  ;;  %v1839_v7 = vadd.f32 %v3106_v41, %v1054_v32  ;;  %v1200_v43 = vpop.f32.mrb[85].mxu0  ;;  %1462 = vmatmul.mubr.f32.gmra.mrb[190].mxu0 %v299_v14  ;;  %v1833_v49 = vpop.f32.mrb[85].mxu1  ;;  %3264 = vmatmul.mubr.msk.f32.gmra.mrb[190].mxu1 %vm489_vm0, %v373_v29  ;;  %v1059_v14 = vadd.f32 %v4879_v37, %v4494_v21 }
 0x1c0   :  { %2647 = vst.msk [vmem:[%s6080_s3 + $0x50] sm:$0xff] %vm2636_vm1, %v2502_v57  ;;  %v1834_v61 = vadd.f32 %v1833_v49, %v1049_v59  ;;  %1466 = vmatprep.mubr.f32.mxu0 %v303_v19  ;;  %3266 = vmatprep.mubr.msk.f32.mxu1 %vm489_vm0, %v376_v9  ;;  %v305_v59 = vld [vmem:[%s6078_s0 + $0x918] sm:$0xff]  ;;  %v1074_v41 = vadd.f32 %v4879_v37, %v4548_v63  ;;  %v388_v49 = vld [vmem:[%s6078_s0 + $0xbb0] sm:$0xff] }
 0x1c1   :  { %v2505_v22 = vmax.f32 %v1839_v7, 0.0  ;;  %v385_v57 = vld [vmem:[%s6078_s0 + $0xb98] sm:$0xff] }
 0x1c2   :  { %v2504_v29 = vmax.f32 %v1834_v61, 0.0  ;;  %v5087_v32 = vpop.f32.mrb[86].mxu0  ;;  %v3109_v24 = vpop.f32.mrb[86].mxu1  ;;  %v309_v43 = vld [vmem:[%s6078_s0 + $0x938] sm:$0xff]  ;;  %v1069_v61 = vadd.f32 %v4879_v37, %v4530_v47 }
 0x1c3   :  { %2650 = vst.msk [vmem:[%s6080_s3 + $0x68] sm:$0xff] %vm2636_vm1, %v2505_v22  ;;  %v1849_v35 = vadd.f32 %v3109_v24, %v1064_v51  ;;  %v1205_v19 = vpop.f32.mrb[87].mxu0  ;;  %1467 = vmatmul.mubr.f32.gmra.mrb[192].mxu0 %v302_v60  ;;  %v1843_v9 = vpop.f32.mrb[87].mxu1  ;;  %3267 = vmatmul.mubr.msk.f32.gmra.mrb[192].mxu1 %vm489_vm0, %v379_v25 }
 0x1c4   :  { %2649 = vst.msk [vmem:[%s6080_s3 + $0x60] sm:$0xff] %vm2636_vm1, %v2504_v29  ;;  %v1844_v21 = vadd.f32 %v1843_v9, %v1059_v14  ;;  %1471 = vmatprep.mubr.f32.mxu0 %v306_v17  ;;  %3269 = vmatprep.mubr.msk.f32.mxu1 %vm489_vm0, %v382_v39  ;;  %v308_v39 = vld [vmem:[%s6078_s0 + $0x930] sm:$0xff]  ;;  %v391_v14 = vld [vmem:[%s6078_s0 + $0xbc8] sm:$0xff]  ;;  %v1084_v29 = vadd.f32 %v4879_v37, %v4584_v31  ;;  %v394_v19 = vld [vmem:[%s6078_s0 + $0xbe0] sm:$0xff] }
 0x1c5   :  { %v2507_v7 = vmax.f32 %v1849_v35, 0.0  ;;  %v312_v35 = vld [vmem:[%s6078_s0 + $0x950] sm:$0xff]  ;;  %v1079_v9 = vadd.f32 %v4879_v37, %v4566_v13 }
 0x1c6   :  { %v2506_v60 = vmax.f32 %v1844_v21, 0.0  ;;  %v5115_v25 = vpop.f32.mrb[88].mxu0  ;;  %v3112_v51 = vpop.f32.mrb[88].mxu1 }
 0x1c7   :  { %2652 = vst.msk [vmem:[%s6080_s3 + $0x78] sm:$0xff] %vm2636_vm1, %v2507_v7  ;;  %v1859_v63 = vadd.f32 %v3112_v51, %v1074_v41  ;;  %v1210_v22 = vpop.f32.mrb[89].mxu0  ;;  %1472 = vmatmul.mubr.f32.gmra.mrb[194].mxu0 %v305_v59  ;;  %v1853_v17 = vpop.f32.mrb[89].mxu1  ;;  %3270 = vmatmul.mubr.msk.f32.gmra.mrb[194].mxu1 %vm489_vm0, %v385_v57  ;;  %v315_v51 = vld [vmem:[%s6078_s0 + $0x968] sm:$0xff] }
 0x1c8   :  { %2651 = vst.msk [vmem:[%s6080_s3 + $0x70] sm:$0xff] %vm2636_vm1, %v2506_v60  ;;  %v1854_v47 = vadd.f32 %v1853_v17, %v1069_v61  ;;  %1476 = vmatprep.mubr.f32.mxu0 %v309_v43  ;;  %3272 = vmatprep.mubr.msk.f32.mxu1 %vm489_vm0, %v388_v49  ;;  %v311_v43 = vld [vmem:[%s6078_s0 + $0x948] sm:$0xff]  ;;  %v397_v49 = vld [vmem:[%s6078_s0 + $0xbf8] sm:$0xff]  ;;  %v1094_v61 = vadd.f32 %v4879_v37, %v4620_v5 }
 0x1c9   :  { %v2509_v24 = vmax.f32 %v1859_v63, 0.0  ;;  %v400_v63 = vld [vmem:[%s6078_s0 + $0xc10] sm:$0xff]  ;;  %v1089_v22 = vadd.f32 %v4879_v37, %v4602_v53 }
 0x1ca   :  { %v2508_v21 = vmax.f32 %v1854_v47, 0.0  ;;  %v5143_v59 = vpop.f32.mrb[90].mxu0  ;;  %v3115_v57 = vpop.f32.mrb[90].mxu1 }
 0x1cb   :  { %2654 = vst.msk [vmem:[%s6080_s3 + $0x88] sm:$0xff] %vm2636_vm1, %v2509_v24  ;;  %v1869_v31 = vadd.f32 %v3115_v57, %v1084_v29  ;;  %v1215_v41 = vpop.f32.mrb[91].mxu0  ;;  %1477 = vmatmul.mubr.f32.gmra.mrb[196].mxu0 %v308_v39  ;;  %v1863_v7 = vpop.f32.mrb[91].mxu1  ;;  %3273 = vmatmul.mubr.msk.f32.gmra.mrb[196].mxu1 %vm489_vm0, %v391_v14  ;;  %v314_v24 = vld [vmem:[%s6078_s0 + $0x960] sm:$0xff] }
 0x1cc   :  { %2653 = vst.msk [vmem:[%s6080_s3 + $0x80] sm:$0xff] %vm2636_vm1, %v2508_v21  ;;  %v1864_v13 = vadd.f32 %v1863_v7, %v1079_v9  ;;  %1481 = vmatprep.mubr.f32.mxu0 %v312_v35  ;;  %3275 = vmatprep.mubr.msk.f32.mxu1 %vm489_vm0, %v394_v19  ;;  %v403_v35 = vld [vmem:[%s6078_s0 + $0xc28] sm:$0xff]  ;;  %v1104_v19 = vadd.f32 %v4879_v37, %v4656_v55  ;;  %v318_v21 = vld [vmem:[%s6078_s0 + $0x980] sm:$0xff] }
 0x1cd   :  { %v2511_v60 = vmax.f32 %v1869_v31, 0.0  ;;  %v406_v57 = vld [vmem:[%s6078_s0 + $0xc40] sm:$0xff]  ;;  %v1099_v31 = vadd.f32 %v4879_v37, %v4638_v27 }
 0x1ce   :  { %v2510_v17 = vmax.f32 %v1864_v13, 0.0  ;;  %v5171_v47 = vpop.f32.mrb[92].mxu0  ;;  %v3118_v39 = vpop.f32.mrb[92].mxu1 }
 0x1cf   :  { %2656 = vst.msk [vmem:[%s6080_s3 + $0x98] sm:$0xff] %vm2636_vm1, %v2511_v60  ;;  %v1879_v5 = vadd.f32 %v3118_v39, %v1094_v61  ;;  %v1220_v14 = vpop.f32.mrb[93].mxu0  ;;  %1482 = vmatmul.mubr.f32.gmra.mrb[198].mxu0 %v311_v43  ;;  %v1873_v29 = vpop.f32.mrb[93].mxu1  ;;  %3276 = vmatmul.mubr.msk.f32.gmra.mrb[198].mxu1 %vm489_vm0, %v397_v49  ;;  %v317_v61 = vld [vmem:[%s6078_s0 + $0x978] sm:$0xff]  ;;  %v1109_v39 = vadd.f32 %v4879_v37, %v4674_v15 }
 0x1d0   :  { %2655 = vst.msk [vmem:[%s6080_s3 + $0x90] sm:$0xff] %vm2636_vm1, %v2510_v17  ;;  %v1874_v53 = vadd.f32 %v1873_v29, %v1089_v22  ;;  %1486 = vmatprep.mubr.f32.mxu0 %v315_v51  ;;  %3278 = vmatprep.mubr.msk.f32.mxu1 %vm489_vm0, %v400_v63  ;;  %v409_v60 = vld [vmem:[%s6078_s0 + $0xc58] sm:$0xff]  ;;  %v1114_v51 = vadd.f32 %v4879_v37, %v4692_v45  ;;  %v412_v17 = vld [vmem:[%s6078_s0 + $0xc70] sm:$0xff] }
 0x1d1   :  { %v2513_v9 = vmax.f32 %v1879_v5, 0.0  ;;  %v321_v22 = vld [vmem:[%s6078_s0 + $0x998] sm:$0xff] }
 0x1d2   :  { %v2512_v41 = vmax.f32 %v1874_v53, 0.0  ;;  %v5199_v7 = vpop.f32.mrb[94].mxu0  ;;  %v3121_v13 = vpop.f32.mrb[94].mxu1 }
 0x1d3   :  { %2658 = vst.msk [vmem:[%s6080_s3 + $0xa8] sm:$0xff] %vm2636_vm1, %v2513_v9  ;;  %v1889_v55 = vadd.f32 %v3121_v13, %v1104_v19  ;;  %v1225_v43 = vpop.f32.mrb[95].mxu0  ;;  %1487 = vmatmul.mubr.f32.gmra.mrb[200].mxu0 %v314_v24  ;;  %v1883_v49 = vpop.f32.mrb[95].mxu1  ;;  %3279 = vmatmul.mubr.msk.f32.gmra.mrb[200].mxu1 %vm489_vm0, %v403_v35  ;;  %v320_v35 = vld [vmem:[%s6078_s0 + $0x990] sm:$0xff]  ;;  %v415_v19 = vld [vmem:[%s6078_s0 + $0xc88] sm:$0xff]  ;;  %v1124_v9 = vadd.f32 %v4879_v37, %v4728_v3 }
 0x1d4   :  { %2657 = vst.msk [vmem:[%s6080_s3 + $0xa0] sm:$0xff] %vm2636_vm1, %v2512_v41  ;;  %v1884_v27 = vadd.f32 %v1883_v49, %v1099_v31  ;;  %1491 = vmatprep.mubr.f32.mxu0 %v318_v21  ;;  %3281 = vmatprep.mubr.msk.f32.mxu1 %vm489_vm0, %v406_v57  ;;  %v324_v57 = vld [vmem:[%s6078_s0 + $0x9b0] sm:$0xff]  ;;  %v418_v31 = vld [vmem:[%s6078_s0 + $0xca0] sm:$0xff]  ;;  %v1119_v41 = vadd.f32 %v4879_v37, %v4710_v23 }
 0x1d5   :  { %v2515_v63 = vmax.f32 %v1889_v55, 0.0 }
 0x1d6   :  { %v2514_v5 = vmax.f32 %v1884_v27, 0.0  ;;  %v5227_v14 = vpop.f32.mrb[96].mxu0  ;;  %v3124_v29 = vpop.f32.mrb[96].mxu1 }
 0x1d7   :  { %2660 = vst.msk [vmem:[%s6080_s3 + $0xb8] sm:$0xff] %vm2636_vm1, %v2515_v63  ;;  %v1899_v45 = vadd.f32 %v3124_v29, %v1114_v51  ;;  %v1230_v53 = vpop.f32.mrb[97].mxu0  ;;  %1492 = vmatmul.mubr.f32.gmra.mrb[202].mxu0 %v317_v61  ;;  %v1893_v24 = vpop.f32.mrb[97].mxu1  ;;  %3282 = vmatmul.mubr.msk.f32.gmra.mrb[202].mxu1 %vm489_vm0, %v409_v60  ;;  %v323_v61 = vld [vmem:[%s6078_s0 + $0x9a8] sm:$0xff]  ;;  %v421_v60 = vld [vmem:[%s6078_s0 + $0xcb8] sm:$0xff]  ;;  %v1134_v51 = vadd.f32 %v4879_v37, %v4764_v38 }
 0x1d8   :  { %2659 = vst.msk [vmem:[%s6080_s3 + $0xb0] sm:$0xff] %vm2636_vm1, %v2514_v5  ;;  %v1894_v15 = vadd.f32 %v1893_v24, %v1109_v39  ;;  %1496 = vmatprep.mubr.f32.mxu0 %v321_v22  ;;  %3284 = vmatprep.mubr.msk.f32.mxu1 %vm489_vm0, %v412_v17  ;;  %v327_v22 = vld [vmem:[%s6078_s0 + $0x9c8] sm:$0xff]  ;;  %v424_v17 = vld [vmem:[%s6078_s0 + $0xcd0] sm:$0xff]  ;;  %v1129_v39 = vadd.f32 %v4879_v37, %v4746_v44 }
 0x1d9   :  { %v2517_v21 = vmax.f32 %v1899_v45, 0.0 }
 0x1da   :  { %v2516_v13 = vmax.f32 %v1894_v15, 0.0  ;;  %v5255_v55 = vpop.f32.mrb[98].mxu0  ;;  %v3127_v43 = vpop.f32.mrb[98].mxu1  ;;  %v326_v15 = vld [vmem:[%s6078_s0 + $0x9c0] sm:$0xff] }
 0x1db   :  { %2662 = vst.msk [vmem:[%s6080_s3 + $0xc8] sm:$0xff] %vm2636_vm1, %v2517_v21  ;;  %v1909_v3 = vadd.f32 %v3127_v43, %v1124_v9  ;;  %v1235_v49 = vpop.f32.mrb[99].mxu0  ;;  %1497 = vmatmul.mubr.f32.gmra.mrb[204].mxu0 %v320_v35  ;;  %v1903_v27 = vpop.f32.mrb[99].mxu1  ;;  %3285 = vmatmul.mubr.msk.f32.gmra.mrb[204].mxu1 %vm489_vm0, %v415_v19  ;;  %v427_v35 = vld [vmem:[%s6078_s0 + $0xce8] sm:$0xff]  ;;  %v1144_v19 = vadd.f32 %v4879_v37, %v4800_v16  ;;  %v330_v21 = vld [vmem:[%s6078_s0 + $0x9e0] sm:$0xff] }
 0x1dc   :  { %2661 = vst.msk [vmem:[%s6080_s3 + $0xc0] sm:$0xff] %vm2636_vm1, %v2516_v13  ;;  %v1904_v23 = vadd.f32 %v1903_v27, %v1119_v41  ;;  %1501 = vmatprep.mubr.f32.mxu0 %v324_v57  ;;  %3287 = vmatprep.mubr.msk.f32.mxu1 %vm489_vm0, %v418_v31  ;;  %v430_v57 = vld [vmem:[%s6078_s0 + $0xd00] sm:$0xff]  ;;  %v1139_v31 = vadd.f32 %v4879_v37, %v4782_v4  ;;  %v329_v27 = vld [vmem:[%s6078_s0 + $0x9d8] sm:$0xff] }
 0x1dd   :  { %v2519_v63 = vmax.f32 %v1909_v3, 0.0 }
 0x1de   :  { %v2518_v5 = vmax.f32 %v1904_v23, 0.0  ;;  %v5283_v29 = vpop.f32.mrb[100].mxu0  ;;  %v3130_v45 = vpop.f32.mrb[100].mxu1  ;;  %v433_v23 = vld [vmem:[%s6078_s0 + $0xd18] sm:$0xff] }
 0x1df   :  { %2664 = vst.msk [vmem:[%s6080_s3 + $0xd8] sm:$0xff] %vm2636_vm1, %v2519_v63  ;;  %v1919_v38 = vadd.f32 %v3130_v45, %v1134_v51  ;;  %v1240_v53 = vpop.f32.mrb[101].mxu0  ;;  %1502 = vmatmul.mubr.f32.gmra.mrb[206].mxu0 %v323_v61  ;;  %v1913_v24 = vpop.f32.mrb[101].mxu1  ;;  %3288 = vmatmul.mubr.msk.f32.gmra.mrb[206].mxu1 %vm489_vm0, %v421_v60  ;;  %v1154_v61 = vadd.f32 %v4879_v37, %v4836_v28  ;;  %v333_v51 = vld [vmem:[%s6078_s0 + $0x9f8] sm:$0xff]  ;;  %v436_v63 = vld [vmem:[%s6078_s0 + $0xd30] sm:$0xff] }
 0x1e0   :  { %2663 = vst.msk [vmem:[%s6080_s3 + $0xd0] sm:$0xff] %vm2636_vm1, %v2518_v5  ;;  %v1914_v44 = vadd.f32 %v1913_v24, %v1129_v39  ;;  %1506 = vmatprep.mubr.f32.mxu0 %v327_v22  ;;  %3290 = vmatprep.mubr.msk.f32.mxu1 %vm489_vm0, %v424_v17  ;;  %v1149_v22 = vadd.f32 %v4879_v37, %v4818_v46  ;;  %v332_v53 = vld [vmem:[%s6078_s0 + $0x9f0] sm:$0xff]  ;;  %v439_v24 = vld [vmem:[%s6078_s0 + $0xd48] sm:$0xff] }
 0x1e1   :  { %v2521_v9 = vmax.f32 %v1919_v38, 0.0 }
 0x1e2   :  { %v2520_v41 = vmax.f32 %v1914_v44, 0.0  ;;  %v5311_v13 = vpop.f32.mrb[102].mxu0  ;;  %v3133_v43 = vpop.f32.mrb[102].mxu1  ;;  %v1164_v44 = vadd.f32 %v4879_v37, %v4872_v54 }
 0x1e3   :  { %2666 = vst.msk [vmem:[%s6080_s3 + $0xe8] sm:$0xff] %vm2636_vm1, %v2521_v9  ;;  %v1929_v16 = vadd.f32 %v3133_v43, %v1144_v19  ;;  %v1245_v3 = vpop.f32.mrb[103].mxu0  ;;  %1507 = vmatmul.mubr.f32.gmra.mrb[208].mxu0 %v326_v15  ;;  %v1923_v49 = vpop.f32.mrb[103].mxu1  ;;  %3291 = vmatmul.mubr.msk.f32.gmra.mrb[208].mxu1 %vm489_vm0, %v427_v35  ;;  %v336_v35 = vld [vmem:[%s6078_s0 + $0xa10] sm:$0xff]  ;;  %v442_v19 = vld [vmem:[%s6078_s0 + $0xd60] sm:$0xff]  ;;  %v1159_v9 = vadd.f32 %v4879_v37, %v4854_v56 }
 0x1e4   :  { %2665 = vst.msk [vmem:[%s6080_s3 + $0xe0] sm:$0xff] %vm2636_vm1, %v2520_v41  ;;  %v1924_v4 = vadd.f32 %v1923_v49, %v1139_v31  ;;  %1511 = vmatprep.mubr.f32.mxu0 %v330_v21  ;;  %3293 = vmatprep.mubr.msk.f32.mxu1 %vm489_vm0, %v430_v57  ;;  %v445_v3 = vld [vmem:[%s6078_s0 + $0xd78] sm:$0xff]  ;;  %v1174_v49 = vadd.f32 %v4879_v37, %v4919_v6 }
 0x1e5   :  { %v2523_v60 = vmax.f32 %v1929_v16, 0.0  ;;  %v335_v16 = vld [vmem:[%s6078_s0 + $0xa08] sm:$0xff]  ;;  %v1184_v6 = vadd.f32 %v4879_v37, %v4975_v0 }
 0x1e6   :  { %v2522_v17 = vmax.f32 %v1924_v4, 0.0  ;;  %v5339_v39 = vpop.f32.mrb[104].mxu0  ;;  %v3136_v5 = vpop.f32.mrb[104].mxu1 }
 0x1e7   :  { %2668 = vst.msk [vmem:[%s6080_s3 + $0xf8] sm:$0xff] %vm2636_vm1, %v2523_v60  ;;  %v1939_v28 = vadd.f32 %v3136_v5, %v1154_v61  ;;  %v1250_v45 = vpop.f32.mrb[105].mxu0  ;;  %1512 = vmatmul.mubr.f32.gmra.mrb[210].mxu0 %v329_v27  ;;  %v1933_v38 = vpop.f32.mrb[105].mxu1  ;;  %3294 = vmatmul.mubr.msk.f32.gmra.mrb[210].mxu1 %vm489_vm0, %v433_v23  ;;  %v1169_v27 = vadd.f32 %v4879_v37, %v4899_v12 }
 0x1e8   :  { %2667 = vst.msk [vmem:[%s6080_s3 + $0xf0] sm:$0xff] %vm2636_vm1, %v2522_v17  ;;  %v1934_v46 = vadd.f32 %v1933_v38, %v1149_v22  ;;  %1516 = vmatprep.mubr.f32.mxu0 %v333_v51  ;;  %3296 = vmatprep.mubr.msk.f32.mxu1 %vm489_vm0, %v436_v63  ;;  %v1179_v5 = vadd.f32 %v4879_v37, %v4947_v11 }
 0x1e9   :  { %v2525_v15 = vmax.f32 %v1939_v28, 0.0  ;;  %v1194_v11 = vadd.f32 %v4879_v37, %v5031_v33 }
 0x1ea   :  { %v2524_v21 = vmax.f32 %v1934_v46, 0.0  ;;  %v5367_v57 = vpop.f32.mrb[106].mxu0  ;;  %v3139_v31 = vpop.f32.mrb[106].mxu1 }
 0x1eb   :  { %2670 = vst.msk [vmem:[%s6080_s3 + $0x108] sm:$0xff] %vm2636_vm1, %v2525_v15  ;;  %v1949_v54 = vadd.f32 %v3139_v31, %v1164_v44  ;;  %v1255_v41 = vpop.f32.mrb[107].mxu0  ;;  %1517 = vmatmul.mubr.f32.gmra.mrb[212].mxu0 %v332_v53  ;;  %v1943_v43 = vpop.f32.mrb[107].mxu1  ;;  %3297 = vmatmul.mubr.msk.f32.gmra.mrb[212].mxu1 %vm489_vm0, %v439_v24  ;;  %v1189_v15 = vadd.f32 %v4879_v37, %v5003_v48 }
 0x1ec   :  { %2669 = vst.msk [vmem:[%s6080_s3 + $0x100] sm:$0xff] %vm2636_vm1, %v2524_v21  ;;  %v1944_v56 = vadd.f32 %v1943_v43, %v1159_v9  ;;  %1521 = vmatprep.mubr.f32.mxu0 %v336_v35  ;;  %3299 = vmatprep.mubr.msk.f32.mxu1 %vm489_vm0, %v442_v19  ;;  %v1204_v48 = vadd.f32 %v4879_v37, %v5087_v32 }
 0x1ed   :  { %v2527_v4 = vmax.f32 %v1949_v54, 0.0  ;;  %v1199_v43 = vadd.f32 %v4879_v37, %v5059_v1  ;;  %v1214_v1 = vadd.f32 %v4879_v37, %v5143_v59 }
 0x1ee   :  { %v2526_v23 = vmax.f32 %v1944_v56, 0.0  ;;  %v5389_v61 = vpop.f32.mrb[108].mxu0  ;;  %v3142_v60 = vpop.f32.mrb[108].mxu1 }
 0x1ef   :  { %2672 = vst.msk [vmem:[%s6080_s3 + $0x118] sm:$0xff] %vm2636_vm1, %v2527_v4  ;;  %v1959_v51 = vadd.f32 %v3142_v60, %v1174_v49  ;;  %v1260_v63 = vpop.f32.mrb[109].mxu0  ;;  %1522 = vmatmul.mubr.f32.gmra.mrb[214].mxu0 %v335_v16  ;;  %v1953_v22 = vpop.f32.mrb[109].mxu1  ;;  %3300 = vmatmul.mubr.msk.f32.gmra.mrb[214].mxu1 %vm489_vm0, %v445_v3  ;;  %v1209_v60 = vadd.f32 %v4879_v37, %v5115_v25 }
 0x1f0   :  { %2671 = vst.msk [vmem:[%s6080_s3 + $0x110] sm:$0xff] %vm2636_vm1, %v2526_v23  ;;  %v1954_v12 = vadd.f32 %v1953_v22, %v1169_v27  ;;  %v1224_v25 = vadd.f32 %v4879_v37, %v5199_v7 }
 0x1f1   :  { %v2529_v17 = vmax.f32 %v1959_v51, 0.0 }
 0x1f2   :  { %v2528_v28 = vmax.f32 %v1954_v12, 0.0  ;;  %v5404_v45 = vpop.f32.mrb[110].mxu0  ;;  %v3145_v38 = vpop.f32.mrb[110].mxu1 }
 0x1f3   :  { %2674 = vst.msk [vmem:[%s6080_s3 + $0x128] sm:$0xff] %vm2636_vm1, %v2529_v17  ;;  %v1969_v46 = vadd.f32 %v3145_v38, %v1184_v6  ;;  %v1265_v53 = vpop.f32.mrb[111].mxu0  ;;  %v1963_v24 = vpop.f32.mrb[111].mxu1 }
 0x1f4   :  { %2673 = vst.msk [vmem:[%s6080_s3 + $0x120] sm:$0xff] %vm2636_vm1, %v2528_v28  ;;  %v1964_v0 = vadd.f32 %v1963_v24, %v1179_v5  ;;  %v1219_v28 = vadd.f32 %v4879_v37, %v5171_v47  ;;  %v1234_v47 = vadd.f32 %v4879_v37, %v5255_v55 }
 0x1f5   :  { %v2531_v44 = vmax.f32 %v1969_v46, 0.0 }
 0x1f6   :  { %v2530_v35 = vmax.f32 %v1964_v0, 0.0  ;;  %v5418_v19 = vpop.f32.mrb[112].mxu0  ;;  %v3148_v9 = vpop.f32.mrb[112].mxu1 }
 0x1f7   :  { %2676 = vst.msk [vmem:[%s6080_s3 + $0x138] sm:$0xff] %vm2636_vm1, %v2531_v44  ;;  %v1979_v21 = vadd.f32 %v3148_v9, %v1194_v11  ;;  %v1270_v31 = vpop.f32.mrb[113].mxu0  ;;  %v1973_v54 = vpop.f32.mrb[113].mxu1 }
 0x1f8   :  { %2675 = vst.msk [vmem:[%s6080_s3 + $0x130] sm:$0xff] %vm2636_vm1, %v2530_v35  ;;  %v1974_v33 = vadd.f32 %v1973_v54, %v1189_v15  ;;  %v1229_v15 = vadd.f32 %v4879_v37, %v5227_v14  ;;  %v1244_v14 = vadd.f32 %v4879_v37, %v5311_v13 }
 0x1f9   :  { %v2533_v41 = vmax.f32 %v1979_v21, 0.0 }
 0x1fa   :  { %v2532_v56 = vmax.f32 %v1974_v33, 0.0  ;;  %v5432_v16 = vpop.f32.mrb[114].mxu0  ;;  %v3151_v3 = vpop.f32.mrb[114].mxu1 }
 0x1fb   :  { %2678 = vst.msk [vmem:[%s6080_s3 + $0x148] sm:$0xff] %vm2636_vm1, %v2533_v41  ;;  %v1989_v49 = vadd.f32 %v3151_v3, %v1204_v48  ;;  %v1275_v4 = vpop.f32.mrb[115].mxu0  ;;  %v1983_v27 = vpop.f32.mrb[115].mxu1  ;;  %v1239_v41 = vadd.f32 %v4879_v37, %v5283_v29  ;;  %v1254_v29 = vadd.f32 %v4879_v37, %v5367_v57 }
 0x1fc   :  { %2677 = vst.msk [vmem:[%s6080_s3 + $0x140] sm:$0xff] %vm2636_vm1, %v2532_v56  ;;  %v1984_v32 = vadd.f32 %v1983_v27, %v1199_v43 }
 0x1fd   :  { %v2535_v23 = vmax.f32 %v1989_v49, 0.0 }
 0x1fe   :  { %v2534_v51 = vmax.f32 %v1984_v32, 0.0  ;;  %v5446_v63 = vpop.f32.mrb[116].mxu0  ;;  %v3154_v22 = vpop.f32.mrb[116].mxu1 }
 0x1ff   :  { %2680 = vst.msk [vmem:[%s6080_s3 + $0x158] sm:$0xff] %vm2636_vm1, %v2535_v23  ;;  %v1999_v12 = vadd.f32 %v3154_v22, %v1214_v1  ;;  %v1280_v6 = vpop.f32.mrb[117].mxu0  ;;  %v1993_v17 = vpop.f32.mrb[117].mxu1  ;;  %v1249_v1 = vadd.f32 %v4879_v37, %v5339_v39  ;;  %v1264_v39 = vadd.f32 %v4879_v37, %v5404_v45 }
 0x200   :  { %2679 = vst.msk [vmem:[%s6080_s3 + $0x150] sm:$0xff] %vm2636_vm1, %v2534_v51  ;;  %v1994_v59 = vadd.f32 %v1993_v17, %v1209_v60 }
 0x201   :  { %v2537_v5 = vmax.f32 %v1999_v12, 0.0 }
 0x202   :  { %v2536_v38 = vmax.f32 %v1994_v59, 0.0  ;;  %v5460_v46 = vpop.f32.mrb[118].mxu0  ;;  %v3157_v53 = vpop.f32.mrb[118].mxu1  ;;  %v1259_v59 = vadd.f32 %v4879_v37, %v5389_v61  ;;  %v1274_v61 = vadd.f32 %v4879_v37, %v5432_v16 }
 0x203   :  { %2682 = vst.msk [vmem:[%s6080_s3 + $0x168] sm:$0xff] %vm2636_vm1, %v2537_v5  ;;  %v2009_v24 = vadd.f32 %v3157_v53, %v1224_v25  ;;  %v1285_v0 = vpop.f32.mrb[119].mxu0  ;;  %v2003_v11 = vpop.f32.mrb[119].mxu1 }
 0x204   :  { %2681 = vst.msk [vmem:[%s6080_s3 + $0x160] sm:$0xff] %vm2636_vm1, %v2536_v38  ;;  %v2004_v7 = vadd.f32 %v2003_v11, %v1219_v28  ;;  %v1269_v11 = vadd.f32 %v4879_v37, %v5418_v19  ;;  %v1284_v19 = vadd.f32 %v4879_v37, %v5460_v46 }
 0x205   :  { %v2539_v44 = vmax.f32 %v2009_v24, 0.0 }
 0x206   :  { %v2538_v35 = vmax.f32 %v2004_v7, 0.0  ;;  %v5474_v9 = vpop.f32.mrb[120].mxu0  ;;  %v3160_v21 = vpop.f32.mrb[120].mxu1 }
 0x207   :  { %2684 = vst.msk [vmem:[%s6080_s3 + $0x178] sm:$0xff] %vm2636_vm1, %v2539_v44  ;;  %v2019_v31 = vadd.f32 %v3160_v21, %v1234_v47  ;;  %v1290_v54 = vpop.f32.mrb[121].mxu0  ;;  %v2013_v33 = vpop.f32.mrb[121].mxu1 }
 0x208   :  { %2683 = vst.msk [vmem:[%s6080_s3 + $0x170] sm:$0xff] %vm2636_vm1, %v2538_v35  ;;  %v2014_v55 = vadd.f32 %v2013_v33, %v1229_v15  ;;  %v1279_v54 = vadd.f32 %v4879_v37, %v5446_v63  ;;  %v5547_v37 = vld [vmem:[%s6079_s2] ss:$0 sm:$0xff] }
 0x209   :  { %v2541_v48 = vmax.f32 %v2019_v31, 0.0 }
 0x20a   :  { %v2540_v43 = vmax.f32 %v2014_v55, 0.0  ;;  %v1293_v56 = vpop.f32.mrb[122].mxu0  ;;  %v3163_v3 = vpop.f32.mrb[122].mxu1 }
 0x20b   :  { %2686 = vst.msk [vmem:[%s6080_s3 + $0x188] sm:$0xff] %vm2636_vm1, %v2541_v48  ;;  %v2029_v49 = vadd.f32 %v3163_v3, %v1244_v14  ;;  %v1295_v4 = vpop.f32.mrb[123].mxu0  ;;  %v2023_v27 = vpop.f32.mrb[123].mxu1  ;;  %v1294_v63 = vadd.f32 %v5547_v37, %v1293_v56 }
 0x20c   :  { %2685 = vst.msk [vmem:[%s6080_s3 + $0x180] sm:$0xff] %vm2636_vm1, %v2540_v43  ;;  %v2024_v13 = vadd.f32 %v2023_v27, %v1239_v41 }
 0x20d   :  { %v2543_v32 = vmax.f32 %v2029_v49, 0.0  ;;  %v1289_v49 = vadd.f32 %v5547_v37, %v5474_v9 }
 0x20e   :  { %v2542_v23 = vmax.f32 %v2024_v13, 0.0  ;;  %v1298_v60 = vpop.f32.mrb[124].mxu0  ;;  %v3166_v51 = vpop.f32.mrb[124].mxu1 }
 0x20f   :  { %2688 = vst.msk [vmem:[%s6080_s3 + $0x198] sm:$0xff] %vm2636_vm1, %v2543_v32  ;;  %v2039_v22 = vadd.f32 %v3166_v51, %v1254_v29  ;;  %v1300_v12 = vpop.f32.mrb[125].mxu0  ;;  %v2033_v6 = vpop.f32.mrb[125].mxu1  ;;  %v1299_v51 = vadd.f32 %v5547_v37, %v1298_v60 }
 0x210   :  { %2687 = vst.msk [vmem:[%s6080_s3 + $0x190] sm:$0xff] %vm2636_vm1, %v2542_v23  ;;  %v2034_v57 = vadd.f32 %v2033_v6, %v1249_v1 }
 0x211   :  { %v2545_v17 = vmax.f32 %v2039_v22, 0.0 }
 0x212   :  { %v2544_v25 = vmax.f32 %v2034_v57, 0.0  ;;  %v1303_v5 = vpop.f32.mrb[126].mxu0  ;;  %v3169_v28 = vpop.f32.mrb[126].mxu1 }
 0x213   :  { %2690 = vst.msk [vmem:[%s6080_s3 + $0x1a8] sm:$0xff] %vm2636_vm1, %v2545_v17  ;;  %v2049_v38 = vadd.f32 %v3169_v28, %v1264_v39  ;;  %v1305_v53 = vpop.f32.mrb[127].mxu0  ;;  %v2043_v24 = vpop.f32.mrb[127].mxu1  ;;  %v1304_v23 = vadd.f32 %v5547_v37, %v1303_v5 }
 0x214   :  { %2689 = vst.msk [vmem:[%s6080_s3 + $0x1a0] sm:$0xff] %vm2636_vm1, %v2544_v25  ;;  %v2044_v45 = vadd.f32 %v2043_v24, %v1259_v59 }
 0x215   :  { %v2547_v0 = vmax.f32 %v2049_v38, 0.0 }
 0x216   :  { %v2546_v7 = vmax.f32 %v2044_v45, 0.0  ;;  %v1308_v47 = vpop.f32.mrb[128].mxu0  ;;  %v3172_v44 = vpop.f32.mrb[128].mxu1 }
 0x217   :  { %2692 = vst.msk [vmem:[%s6080_s3 + $0x1b8] sm:$0xff] %vm2636_vm1, %v2547_v0  ;;  %v2059_v15 = vadd.f32 %v3172_v44, %v1274_v61  ;;  %v1310_v35 = vpop.f32.mrb[129].mxu0  ;;  %v2053_v21 = vpop.f32.mrb[129].mxu1  ;;  %v1309_v5 = vadd.f32 %v5547_v37, %v1308_v47 }
 0x218   :  { %2691 = vst.msk [vmem:[%s6080_s3 + $0x1b0] sm:$0xff] %vm2636_vm1, %v2546_v7  ;;  %v2054_v16 = vadd.f32 %v2053_v21, %v1269_v11 }
 0x219   :  { %v2549_v31 = vmax.f32 %v2059_v15, 0.0 }
 0x21a   :  { %v2548_v33 = vmax.f32 %v2054_v16, 0.0  ;;  %v1313_v55 = vpop.f32.mrb[130].mxu0  ;;  %v3175_v14 = vpop.f32.mrb[130].mxu1 }
 0x21b   :  { %2694 = vst.msk [vmem:[%s6080_s3 + $0x1c8] sm:$0xff] %vm2636_vm1, %v2549_v31  ;;  %v2069_v48 = vadd.f32 %v3175_v14, %v1284_v19  ;;  %v1315_v41 = vpop.f32.mrb[131].mxu0  ;;  %v2063_v43 = vpop.f32.mrb[131].mxu1  ;;  %v1314_v25 = vadd.f32 %v5547_v37, %v1313_v55 }
 0x21c   :  { %2693 = vst.msk [vmem:[%s6080_s3 + $0x1c0] sm:$0xff] %vm2636_vm1, %v2548_v33  ;;  %v2064_v46 = vadd.f32 %v2063_v43, %v1279_v54 }
 0x21d   :  { %v2551_v3 = vmax.f32 %v2069_v48, 0.0 }
 0x21e   :  { %v2550_v4 = vmax.f32 %v2064_v46, 0.0  ;;  %v1318_v27 = vpop.f32.mrb[132].mxu0  ;;  %v3178_v13 = vpop.f32.mrb[132].mxu1 }
 0x21f   :  { %2696 = vst.msk [vmem:[%s6080_s3 + $0x1d8] sm:$0xff] %vm2636_vm1, %v2551_v3  ;;  %v2079_v29 = vadd.f32 %v3178_v13, %v1294_v63  ;;  %v1320_v32 = vpop.f32.mrb[133].mxu0  ;;  %v2073_v1 = vpop.f32.mrb[133].mxu1  ;;  %v1319_v47 = vadd.f32 %v5547_v37, %v1318_v27 }
 0x220   :  { %2695 = vst.msk [vmem:[%s6080_s3 + $0x1d0] sm:$0xff] %vm2636_vm1, %v2550_v4  ;;  %v2074_v56 = vadd.f32 %v2073_v1, %v1289_v49 }
 0x221   :  { %v2553_v9 = vmax.f32 %v2079_v29, 0.0 }
 0x222   :  { %v2552_v22 = vmax.f32 %v2074_v56, 0.0  ;;  %v1323_v12 = vpop.f32.mrb[134].mxu0  ;;  %v3181_v6 = vpop.f32.mrb[134].mxu1 }
 0x223   :  { %2698 = vst.msk [vmem:[%s6080_s3 + $0x1e8] sm:$0xff] %vm2636_vm1, %v2553_v9  ;;  %v2089_v57 = vadd.f32 %v3181_v6, %v1304_v23  ;;  %v1325_v39 = vpop.f32.mrb[135].mxu0  ;;  %v2083_v17 = vpop.f32.mrb[135].mxu1  ;;  %v1324_v11 = vadd.f32 %v5547_v37, %v1323_v12 }
 0x224   :  { %2697 = vst.msk [vmem:[%s6080_s3 + $0x1e0] sm:$0xff] %vm2636_vm1, %v2552_v22  ;;  %v2084_v59 = vadd.f32 %v2083_v17, %v1299_v51 }
 0x225   :  { %v2555_v60 = vmax.f32 %v2089_v57, 0.0 }
 0x226   :  { %v2554_v28 = vmax.f32 %v2084_v59, 0.0  ;;  %v1328_v38 = vpop.f32.mrb[136].mxu0  ;;  %v3184_v53 = vpop.f32.mrb[136].mxu1 }
 0x227   :  { %2700 = vst.msk [vmem:[%s6080_s3 + $0x1f8] sm:$0xff] %vm2636_vm1, %v2555_v60  ;;  %v2099_v24 = vadd.f32 %v3184_v53, %v1314_v25  ;;  %v1330_v45 = vpop.f32.mrb[137].mxu0  ;;  %v2093_v61 = vpop.f32.mrb[137].mxu1  ;;  %v1329_v55 = vadd.f32 %v5547_v37, %v1328_v38 }
 0x228   :  { %2699 = vst.msk [vmem:[%s6080_s3 + $0x1f0] sm:$0xff] %vm2636_vm1, %v2554_v28  ;;  %v2094_v0 = vadd.f32 %v2093_v61, %v1309_v5 }
 0x229   :  { %v2557_v7 = vmax.f32 %v2099_v24, 0.0 }
 0x22a   :  { %v2556_v44 = vmax.f32 %v2094_v0, 0.0  ;;  %v1333_v15 = vpop.f32.mrb[138].mxu0  ;;  %v3187_v35 = vpop.f32.mrb[138].mxu1 }
 0x22b   :  { %2702 = vst.msk [vmem:[%s6080_s3 + $0x208] sm:$0xff] %vm2636_vm1, %v2557_v7  ;;  %v2109_v21 = vadd.f32 %v3187_v35, %v1324_v11  ;;  %v1335_v16 = vpop.f32.mrb[139].mxu0  ;;  %v2103_v19 = vpop.f32.mrb[139].mxu1  ;;  %v1334_v54 = vadd.f32 %v5547_v37, %v1333_v15 }
 0x22c   :  { %2701 = vst.msk [vmem:[%s6080_s3 + $0x200] sm:$0xff] %vm2636_vm1, %v2556_v44  ;;  %v2104_v31 = vadd.f32 %v2103_v19, %v1319_v47 }
 0x22d   :  { %v2559_v33 = vmax.f32 %v2109_v21, 0.0 }
 0x22e   :  { %v2558_v14 = vmax.f32 %v2104_v31, 0.0  ;;  %v1338_v48 = vpop.f32.mrb[140].mxu0  ;;  %v3190_v41 = vpop.f32.mrb[140].mxu1 }
 0x22f   :  { %2704 = vst.msk [vmem:[%s6080_s3 + $0x218] sm:$0xff] %vm2636_vm1, %v2559_v33  ;;  %v2119_v43 = vadd.f32 %v3190_v41, %v1334_v54  ;;  %v1340_v46 = vpop.f32.mrb[141].mxu0  ;;  %v2113_v63 = vpop.f32.mrb[141].mxu1  ;;  %v1339_v4 = vadd.f32 %v5547_v37, %v1338_v48 }
 0x230   :  { %2703 = vst.msk [vmem:[%s6080_s3 + $0x210] sm:$0xff] %vm2636_vm1, %v2558_v14  ;;  %v2114_v3 = vadd.f32 %v2113_v63, %v1329_v55 }
 0x231   :  { %v2561_v49 = vmax.f32 %v2119_v43, 0.0 }
 0x232   :  { %v2560_v27 = vmax.f32 %v2114_v3, 0.0  ;;  %v1343_v13 = vpop.f32.mrb[142].mxu0  ;;  %v3193_v29 = vpop.f32.mrb[142].mxu1 }
 0x233   :  { %2706 = vst.msk [vmem:[%s6080_s3 + $0x228] sm:$0xff] %vm2636_vm1, %v2561_v49  ;;  %v1344_v32 = vadd.f32 %v5547_v37, %v1343_v13  ;;  %v1345_v1 = vpop.f32.mrb[143].mxu0  ;;  %v2123_v56 = vpop.f32.mrb[143].mxu1 }
 0x234   :  { %2705 = vst.msk [vmem:[%s6080_s3 + $0x220] sm:$0xff] %vm2636_vm1, %v2560_v27  ;;  %v2124_v23 = vadd.f32 %v2123_v56, %v1339_v4 }
 0x235   :  { %v2129_v9 = vadd.f32 %v3193_v29, %v1344_v32 }
 0x236   :  { %v2562_v51 = vmax.f32 %v2124_v23, 0.0  ;;  %v1348_v22 = vpop.f32.mrb[144].mxu0  ;;  %v3196_v12 = vpop.f32.mrb[144].mxu1 }
 0x237   :  { %v2563_v6 = vmax.f32 %v2129_v9, 0.0  ;;  %v1349_v57 = vadd.f32 %v5547_v37, %v1348_v22  ;;  %v1350_v39 = vpop.f32.mrb[145].mxu0  ;;  %v2133_v17 = vpop.f32.mrb[145].mxu1 }
 0x238   :  { %2707 = vst.msk [vmem:[%s6080_s3 + $0x230] sm:$0xff] %vm2636_vm1, %v2562_v51 }
 0x239   :  { %2708 = vst.msk [vmem:[%s6080_s3 + $0x238] sm:$0xff] %vm2636_vm1, %v2563_v6  ;;  %v2134_v59 = vadd.f32 %v2133_v17, %v1349_v57 }
 0x23a   :  { %v1353_v25 = vpop.f32.mrb[146].mxu0  ;;  %v3199_v60 = vpop.f32.mrb[146].mxu1 }
 0x23b   :  { %v2564_v5 = vmax.f32 %v2134_v59, 0.0  ;;  %v1354_v28 = vadd.f32 %v5547_v37, %v1353_v25  ;;  %v1355_v38 = vpop.f32.mrb[147].mxu0  ;;  %v2143_v53 = vpop.f32.mrb[147].mxu1 }
 0x23d   :  { %2709 = vst.msk [vmem:[%s6080_s3 + $0x240] sm:$0xff] %vm2636_vm1, %v2564_v5  ;;  %v2139_v24 = vadd.f32 %v3196_v12, %v1354_v28 }
 0x23e   :  { %v1358_v45 = vpop.f32.mrb[148].mxu0  ;;  %v3202_v61 = vpop.f32.mrb[148].mxu1 }
 0x23f   :  { %v2565_v0 = vmax.f32 %v2139_v24, 0.0  ;;  %v1359_v11 = vadd.f32 %v5547_v37, %v1358_v45  ;;  %v1360_v7 = vpop.f32.mrb[149].mxu0  ;;  %v2153_v47 = vpop.f32.mrb[149].mxu1 }
 0x241   :  { %2710 = vst.msk [vmem:[%s6080_s3 + $0x248] sm:$0xff] %vm2636_vm1, %v2565_v0  ;;  %v2144_v44 = vadd.f32 %v2143_v53, %v1359_v11 }
 0x242   :  { %v1363_v15 = vpop.f32.mrb[150].mxu0  ;;  %v3205_v35 = vpop.f32.mrb[150].mxu1 }
 0x243   :  { %v2566_v21 = vmax.f32 %v2144_v44, 0.0  ;;  %v1364_v16 = vadd.f32 %v5547_v37, %v1363_v15  ;;  %v1365_v19 = vpop.f32.mrb[151].mxu0  ;;  %v2163_v31 = vpop.f32.mrb[151].mxu1 }
 0x245   :  { %2711 = vst.msk [vmem:[%s6080_s3 + $0x250] sm:$0xff] %vm2636_vm1, %v2566_v21  ;;  %v2149_v54 = vadd.f32 %v3199_v60, %v1364_v16 }
 0x246   :  { %v1368_v33 = vpop.f32.mrb[152].mxu0  ;;  %v3208_v55 = vpop.f32.mrb[152].mxu1 }
 0x247   :  { %v2567_v14 = vmax.f32 %v2149_v54, 0.0  ;;  %v1369_v48 = vadd.f32 %v5547_v37, %v1368_v33  ;;  %v1370_v41 = vpop.f32.mrb[153].mxu0  ;;  %v2173_v43 = vpop.f32.mrb[153].mxu1 }
 0x249   :  { %2712 = vst.msk [vmem:[%s6080_s3 + $0x258] sm:$0xff] %vm2636_vm1, %v2567_v14  ;;  %v2154_v46 = vadd.f32 %v2153_v47, %v1369_v48 }
 0x24a   :  { %v1373_v63 = vpop.f32.mrb[154].mxu0  ;;  %v3211_v3 = vpop.f32.mrb[154].mxu1 }
 0x24b   :  { %v2568_v49 = vmax.f32 %v2154_v46, 0.0  ;;  %v1374_v4 = vadd.f32 %v5547_v37, %v1373_v63  ;;  %v1375_v27 = vpop.f32.mrb[155].mxu0  ;;  %v2183_v13 = vpop.f32.mrb[155].mxu1 }
 0x24d   :  { %2713 = vst.msk [vmem:[%s6080_s3 + $0x260] sm:$0xff] %vm2636_vm1, %v2568_v49  ;;  %v2159_v29 = vadd.f32 %v3202_v61, %v1374_v4 }
 0x24e   :  { %v1378_v32 = vpop.f32.mrb[156].mxu0  ;;  %v3214_v1 = vpop.f32.mrb[156].mxu1 }
 0x24f   :  { %v2569_v56 = vmax.f32 %v2159_v29, 0.0  ;;  %v1379_v23 = vadd.f32 %v5547_v37, %v1378_v32  ;;  %v1380_v9 = vpop.f32.mrb[157].mxu0  ;;  %v2193_v51 = vpop.f32.mrb[157].mxu1 }
 0x251   :  { %2714 = vst.msk [vmem:[%s6080_s3 + $0x268] sm:$0xff] %vm2636_vm1, %v2569_v56  ;;  %v2164_v22 = vadd.f32 %v2163_v31, %v1379_v23 }
 0x252   :  { %v1383_v12 = vpop.f32.mrb[158].mxu0  ;;  %v5649_v6 = vpop.f32.mrb[158].mxu1 }
 0x253   :  { %v2570_v57 = vmax.f32 %v2164_v22, 0.0  ;;  %v1384_v39 = vadd.f32 %v5547_v37, %v1383_v12  ;;  %v1385_v17 = vpop.f32.mrb[159].mxu0  ;;  %v2203_v59 = vpop.f32.mrb[159].mxu1 }
 0x255   :  { %2715 = vst.msk [vmem:[%s6080_s3 + $0x270] sm:$0xff] %vm2636_vm1, %v2570_v57  ;;  %v2169_v25 = vadd.f32 %v3205_v35, %v1384_v39 }
 0x256   :  { %v1388_v60 = vpop.f32.mrb[160].mxu0  ;;  %v5656_v5 = vpop.f32.mrb[160].mxu1 }
 0x257   :  { %v2571_v28 = vmax.f32 %v2169_v25, 0.0  ;;  %v1389_v38 = vadd.f32 %v5547_v37, %v1388_v60  ;;  %v1390_v53 = vpop.f32.mrb[161].mxu0  ;;  %v5659_v24 = vpop.f32.mrb[161].mxu1 }
 0x259   :  { %2716 = vst.msk [vmem:[%s6080_s3 + $0x278] sm:$0xff] %vm2636_vm1, %v2571_v28  ;;  %v2174_v45 = vadd.f32 %v2173_v43, %v1389_v38 }
 0x25a   :  { %v1393_v61 = vpop.f32.mrb[162].mxu0  ;;  %v5665_v0 = vpop.f32.mrb[162].mxu1 }
 0x25b   :  { %v2572_v11 = vmax.f32 %v2174_v45, 0.0  ;;  %v1394_v7 = vadd.f32 %v5547_v37, %v1393_v61  ;;  %v1395_v47 = vpop.f32.mrb[163].mxu0  ;;  %v5668_v44 = vpop.f32.mrb[163].mxu1 }
 0x25d   :  { %2717 = vst.msk [vmem:[%s6080_s3 + $0x280] sm:$0xff] %vm2636_vm1, %v2572_v11  ;;  %v2179_v15 = vadd.f32 %v3208_v55, %v1394_v7 }
 0x25e   :  { %v1398_v35 = vpop.f32.mrb[164].mxu0  ;;  %v5674_v21 = vpop.f32.mrb[164].mxu1 }
 0x25f   :  { %v2573_v16 = vmax.f32 %v2179_v15, 0.0  ;;  %v1399_v19 = vadd.f32 %v5547_v37, %v1398_v35  ;;  %v1400_v31 = vpop.f32.mrb[165].mxu0  ;;  %v5677_v54 = vpop.f32.mrb[165].mxu1 }
 0x261   :  { %2718 = vst.msk [vmem:[%s6080_s3 + $0x288] sm:$0xff] %vm2636_vm1, %v2573_v16  ;;  %v2184_v33 = vadd.f32 %v2183_v13, %v1399_v19 }
 0x262   :  { %v1403_v14 = vpop.f32.mrb[166].mxu0  ;;  %v5683_v48 = vpop.f32.mrb[166].mxu1 }
 0x263   :  { %v2574_v41 = vmax.f32 %v2184_v33, 0.0  ;;  %v1404_v55 = vadd.f32 %v5547_v37, %v1403_v14  ;;  %v1405_v43 = vpop.f32.mrb[167].mxu0  ;;  %v5686_v46 = vpop.f32.mrb[167].mxu1 }
 0x265   :  { %2719 = vst.msk [vmem:[%s6080_s3 + $0x290] sm:$0xff] %vm2636_vm1, %v2574_v41  ;;  %v2189_v63 = vadd.f32 %v3211_v3, %v1404_v55 }
 0x266   :  { %v1408_v49 = vpop.f32.mrb[168].mxu0  ;;  %v5692_v4 = vpop.f32.mrb[168].mxu1 }
 0x267   :  { %v2575_v27 = vmax.f32 %v2189_v63, 0.0  ;;  %v1409_v13 = vadd.f32 %v5547_v37, %v1408_v49  ;;  %v1410_v29 = vpop.f32.mrb[169].mxu0  ;;  %v5695_v32 = vpop.f32.mrb[169].mxu1 }
 0x269   :  { %2720 = vst.msk [vmem:[%s6080_s3 + $0x298] sm:$0xff] %vm2636_vm1, %v2575_v27  ;;  %v2194_v56 = vadd.f32 %v2193_v51, %v1409_v13  ;;  %v1534_v27 = vadd.f32 %v5547_v37, %v4262_v26  ;;  %v1544_v26 = vadd.f32 %v5547_v37, %v4298_v42 }
 0x26a   :  { %v1413_v23 = vpop.f32.mrb[170].mxu0  ;;  %v5701_v9 = vpop.f32.mrb[170].mxu1 }
 0x26b   :  { %v2576_v22 = vmax.f32 %v2194_v56, 0.0  ;;  %v1414_v3 = vadd.f32 %v5547_v37, %v1413_v23  ;;  %v1415_v12 = vpop.f32.mrb[171].mxu0  ;;  %v5704_v57 = vpop.f32.mrb[171].mxu1 }
 0x26d   :  { %2721 = vst.msk [vmem:[%s6080_s3 + $0x2a0] sm:$0xff] %vm2636_vm1, %v2576_v22  ;;  %v2199_v39 = vadd.f32 %v3214_v1, %v1414_v3 }
 0x26e   :  { %v1418_v17 = vpop.f32.mrb[172].mxu0  ;;  %v5710_v25 = vpop.f32.mrb[172].mxu1 }
 0x26f   :  { %v2577_v60 = vmax.f32 %v2199_v39, 0.0  ;;  %v1419_v51 = vadd.f32 %v5547_v37, %v1418_v17  ;;  %v1420_v28 = vpop.f32.mrb[173].mxu0  ;;  %v5713_v38 = vpop.f32.mrb[173].mxu1 }
 0x271   :  { %2722 = vst.msk [vmem:[%s6080_s3 + $0x2a8] sm:$0xff] %vm2636_vm1, %v2577_v60  ;;  %v2204_v53 = vadd.f32 %v2203_v59, %v1419_v51  ;;  %v1539_v60 = vadd.f32 %v5547_v37, %v4280_v34 }
 0x272   :  { %v1423_v45 = vpop.f32.mrb[174].mxu0  ;;  %v5719_v61 = vpop.f32.mrb[174].mxu1 }
 0x273   :  { %v2578_v11 = vmax.f32 %v2204_v53, 0.0  ;;  %v1424_v1 = vadd.f32 %v5547_v37, %v1423_v45  ;;  %v1425_v7 = vpop.f32.mrb[175].mxu0  ;;  %v5722_v47 = vpop.f32.mrb[175].mxu1 }
 0x275   :  { %2723 = vst.msk [vmem:[%s6080_s3 + $0x2b0] sm:$0xff] %vm2636_vm1, %v2578_v11  ;;  %v2209_v15 = vadd.f32 %v5649_v6, %v1424_v1 }
 0x276   :  { %v1428_v35 = vpop.f32.mrb[176].mxu0  ;;  %v5729_v16 = vpop.f32.mrb[176].mxu1 }
 0x277   :  { %v2579_v59 = vmax.f32 %v2209_v15, 0.0  ;;  %v1429_v19 = vadd.f32 %v5547_v37, %v1428_v35  ;;  %v1430_v31 = vpop.f32.mrb[177].mxu0  ;;  %v5732_v33 = vpop.f32.mrb[177].mxu1 }
 0x279   :  { %2724 = vst.msk [vmem:[%s6080_s3 + $0x2b8] sm:$0xff] %vm2636_vm1, %v2579_v59  ;;  %v2214_v14 = vadd.f32 %v5659_v24, %v1429_v19  ;;  %v1529_v24 = vadd.f32 %v5547_v37, %v4244_v18  ;;  %v1549_v59 = vadd.f32 %v5547_v37, %v4316_v50 }
 0x27a   :  { %v1433_v41 = vpop.f32.mrb[178].mxu0  ;;  %v5739_v55 = vpop.f32.mrb[178].mxu1 }
 0x27b   :  { %v2580_v6 = vmax.f32 %v2214_v14, 0.0  ;;  %v1434_v43 = vadd.f32 %v5547_v37, %v1433_v41  ;;  %v1435_v63 = vpop.f32.mrb[179].mxu0  ;;  %v5742_v49 = vpop.f32.mrb[179].mxu1 }
 0x27d   :  { %2725 = vst.msk [vmem:[%s6080_s3 + $0x2c0] sm:$0xff] %vm2636_vm1, %v2580_v6  ;;  %v2219_v13 = vadd.f32 %v5656_v5, %v1434_v43 }
 0x27e   :  { %v1438_v29 = vpop.f32.mrb[180].mxu0  ;;  %v3250_v56 = vpop.f32.mrb[180].mxu1 }
 0x27f   :  { %v2581_v23 = vmax.f32 %v2219_v13, 0.0  ;;  %v1439_v22 = vadd.f32 %v5547_v37, %v1438_v29  ;;  %v2319_v3 = vadd.f32 %v3250_v56, %v1534_v27  ;;  %v1440_v12 = vpop.f32.mrb[181].mxu0  ;;  %v2313_v39 = vpop.f32.mrb[181].mxu1 }
 0x280   :  { %v2314_v17 = vadd.f32 %v2313_v39, %v1529_v24  ;;  %v1559_v24 = vadd.f32 %v5547_v37, %v4352_v2 }
 0x281   :  { %2726 = vst.msk [vmem:[%s6080_s3 + $0x2c8] sm:$0xff] %vm2636_vm1, %v2581_v23  ;;  %v2224_v5 = vadd.f32 %v5668_v44, %v1439_v22  ;;  %v2601_v18 = vmax.f32 %v2319_v3, 0.0  ;;  %v1554_v44 = vadd.f32 %v5547_v37, %v4334_v58 }
 0x282   :  { %v2600_v51 = vmax.f32 %v2314_v17, 0.0  ;;  %v1443_v28 = vpop.f32.mrb[182].mxu0  ;;  %v3253_v53 = vpop.f32.mrb[182].mxu1 }
 0x283   :  { %v2582_v45 = vmax.f32 %v2224_v5, 0.0  ;;  %2746 = vst.msk [vmem:[%s6080_s3 + $0x368] sm:$0xff] %vm2636_vm1, %v2601_v18  ;;  %v1444_v42 = vadd.f32 %v5547_v37, %v1443_v28  ;;  %v2329_v11 = vadd.f32 %v3253_v53, %v1544_v26  ;;  %v1445_v1 = vpop.f32.mrb[183].mxu0  ;;  %v2323_v7 = vpop.f32.mrb[183].mxu1  ;;  %v1569_v5 = vadd.f32 %v5547_v37, %v4388_v20 }
 0x284   :  { %2745 = vst.msk [vmem:[%s6080_s3 + $0x360] sm:$0xff] %vm2636_vm1, %v2600_v51  ;;  %v2324_v34 = vadd.f32 %v2323_v7, %v1539_v60  ;;  %v1579_v7 = vadd.f32 %v5547_v37, %v4424_v40 }
 0x285   :  { %2727 = vst.msk [vmem:[%s6080_s3 + $0x2d0] sm:$0xff] %vm2636_vm1, %v2582_v45  ;;  %v2229_v15 = vadd.f32 %v5665_v0, %v1444_v42  ;;  %v2603_v35 = vmax.f32 %v2329_v11, 0.0  ;;  %v1564_v0 = vadd.f32 %v5547_v37, %v4370_v10 }
 0x286   :  { %v2602_v19 = vmax.f32 %v2324_v34, 0.0  ;;  %v1448_v31 = vpop.f32.mrb[184].mxu0  ;;  %v3256_v14 = vpop.f32.mrb[184].mxu1 }
 0x287   :  { %v2583_v41 = vmax.f32 %v2229_v15, 0.0  ;;  %2748 = vst.msk [vmem:[%s6080_s3 + $0x378] sm:$0xff] %vm2636_vm1, %v2603_v35  ;;  %v1449_v58 = vadd.f32 %v5547_v37, %v1448_v31  ;;  %v2339_v6 = vadd.f32 %v3256_v14, %v1554_v44  ;;  %v1450_v43 = vpop.f32.mrb[185].mxu0  ;;  %v2333_v63 = vpop.f32.mrb[185].mxu1 }
 0x288   :  { %2747 = vst.msk [vmem:[%s6080_s3 + $0x370] sm:$0xff] %vm2636_vm1, %v2602_v19  ;;  %v2334_v50 = vadd.f32 %v2333_v63, %v1549_v59 }
 0x289   :  { %2728 = vst.msk [vmem:[%s6080_s3 + $0x2d8] sm:$0xff] %vm2636_vm1, %v2583_v41  ;;  %v2234_v27 = vadd.f32 %v5677_v54, %v1449_v58  ;;  %v2605_v13 = vmax.f32 %v2339_v6, 0.0  ;;  %v1574_v54 = vadd.f32 %v5547_v37, %v4406_v30  ;;  %v1589_v58 = vadd.f32 %v5547_v37, %v4460_v62 }
 0x28a   :  { %v2604_v29 = vmax.f32 %v2334_v50, 0.0  ;;  %v1453_v56 = vpop.f32.mrb[186].mxu0  ;;  %v3259_v23 = vpop.f32.mrb[186].mxu1 }
 0x28b   :  { %v2584_v22 = vmax.f32 %v2234_v27, 0.0  ;;  %2750 = vst.msk [vmem:[%s6080_s3 + $0x388] sm:$0xff] %vm2636_vm1, %v2605_v13  ;;  %v1454_v10 = vadd.f32 %v5547_v37, %v1453_v56  ;;  %v2349_v3 = vadd.f32 %v3259_v23, %v1564_v0  ;;  %v1455_v12 = vpop.f32.mrb[187].mxu0  ;;  %v2343_v39 = vpop.f32.mrb[187].mxu1  ;;  %v6102_v56 = vld [vmem:[#allocation2_spill] sm:$0xff] }
 0x28c   :  { %2749 = vst.msk [vmem:[%s6080_s3 + $0x380] sm:$0xff] %vm2636_vm1, %v2604_v29  ;;  %v2344_v2 = vadd.f32 %v2343_v39, %v1559_v24  ;;  %v1599_v23 = vadd.f32 %v5547_v37, %v6102_v56 }
 0x28d   :  { %2729 = vst.msk [vmem:[%s6080_s3 + $0x2e0] sm:$0xff] %vm2636_vm1, %v2584_v22  ;;  %v2239_v17 = vadd.f32 %v5674_v21, %v1454_v10  ;;  %v2607_v26 = vmax.f32 %v2349_v3, 0.0  ;;  %v1584_v21 = vadd.f32 %v5547_v37, %v4442_v52 }
 0x28e   :  { %v2606_v18 = vmax.f32 %v2344_v2, 0.0  ;;  %v1458_v60 = vpop.f32.mrb[188].mxu0  ;;  %v3262_v51 = vpop.f32.mrb[188].mxu1 }
 0x28f   :  { %v2585_v28 = vmax.f32 %v2239_v17, 0.0  ;;  %2752 = vst.msk [vmem:[%s6080_s3 + $0x398] sm:$0xff] %vm2636_vm1, %v2607_v26  ;;  %v1459_v30 = vadd.f32 %v5547_v37, %v1458_v60  ;;  %v2359_v53 = vadd.f32 %v3262_v51, %v1574_v54  ;;  %v1460_v45 = vpop.f32.mrb[189].mxu0  ;;  %v2353_v42 = vpop.f32.mrb[189].mxu1  ;;  %v6103_v17 = vld [vmem:[#allocation4_spill] sm:$0xff]  ;;  %v6104_v60 = vld [vmem:[#allocation3_spill] sm:$0xff] }
 0x290   :  { %2751 = vst.msk [vmem:[%s6080_s3 + $0x390] sm:$0xff] %vm2636_vm1, %v2606_v18  ;;  %v2354_v20 = vadd.f32 %v2353_v42, %v1569_v5  ;;  %v1614_v26 = vadd.f32 %v5547_v37, %v6103_v17  ;;  %v1609_v51 = vadd.f32 %v5547_v37, %v6104_v60  ;;  %v6111_v60 = vld [vmem:[#allocation12_spill] sm:$0xff] }
 0x291   :  { %2730 = vst.msk [vmem:[%s6080_s3 + $0x2e8] sm:$0xff] %vm2636_vm1, %v2585_v28  ;;  %v2244_v11 = vadd.f32 %v5686_v46, %v1459_v30  ;;  %v2609_v1 = vmax.f32 %v2359_v53, 0.0  ;;  %v1594_v46 = vadd.f32 %v5547_v37, %v4478_v8 }
 0x292   :  { %v2608_v34 = vmax.f32 %v2354_v20, 0.0  ;;  %v1463_v44 = vpop.f32.mrb[190].mxu0  ;;  %v3265_v15 = vpop.f32.mrb[190].mxu1 }
 0x293   :  { %v2586_v35 = vmax.f32 %v2244_v11, 0.0  ;;  %2754 = vst.msk [vmem:[%s6080_s3 + $0x3a8] sm:$0xff] %vm2636_vm1, %v2609_v1  ;;  %v1464_v52 = vadd.f32 %v5547_v37, %v1463_v44  ;;  %v2369_v59 = vadd.f32 %v3265_v15, %v1584_v21  ;;  %v1465_v19 = vpop.f32.mrb[191].mxu0  ;;  %v2363_v31 = vpop.f32.mrb[191].mxu1  ;;  %v6105_v1 = vld [vmem:[#allocation6_spill] sm:$0xff]  ;;  %v6106_v15 = vld [vmem:[#allocation5_spill] sm:$0xff] }
 0x294   :  { %2753 = vst.msk [vmem:[%s6080_s3 + $0x3a0] sm:$0xff] %vm2636_vm1, %v2608_v34  ;;  %v2364_v40 = vadd.f32 %v2363_v31, %v1579_v7  ;;  %v1624_v7 = vadd.f32 %v5547_v37, %v6105_v1 }
 0x295   :  { %2731 = vst.msk [vmem:[%s6080_s3 + $0x2f0] sm:$0xff] %vm2636_vm1, %v2586_v35  ;;  %v2249_v14 = vadd.f32 %v5683_v48, %v1464_v52  ;;  %v2611_v41 = vmax.f32 %v2369_v59, 0.0  ;;  %v1604_v48 = vadd.f32 %v5547_v37, %v4514_v36  ;;  %v1619_v35 = vadd.f32 %v5547_v37, %v6106_v15 }
 0x296   :  { %v2610_v6 = vmax.f32 %v2364_v40, 0.0  ;;  %v1468_v43 = vpop.f32.mrb[192].mxu0  ;;  %v3268_v63 = vpop.f32.mrb[192].mxu1 }
 0x297   :  { %v2587_v50 = vmax.f32 %v2249_v14, 0.0  ;;  %2756 = vst.msk [vmem:[%s6080_s3 + $0x3b8] sm:$0xff] %vm2636_vm1, %v2611_v41  ;;  %v1469_v8 = vadd.f32 %v5547_v37, %v1468_v43  ;;  %v2379_v0 = vadd.f32 %v3268_v63, %v1594_v46  ;;  %v1470_v27 = vpop.f32.mrb[193].mxu0  ;;  %v2373_v13 = vpop.f32.mrb[193].mxu1 }
 0x298   :  { %2755 = vst.msk [vmem:[%s6080_s3 + $0x3b0] sm:$0xff] %vm2636_vm1, %v2610_v6  ;;  %v2374_v62 = vadd.f32 %v2373_v13, %v1589_v58  ;;  %v6107_v58 = vld [vmem:[#allocation8_spill] sm:$0xff] }
 0x299   :  { %2732 = vst.msk [vmem:[%s6080_s3 + $0x2f8] sm:$0xff] %vm2636_vm1, %v2587_v50  ;;  %v2254_v24 = vadd.f32 %v5695_v32, %v1469_v8  ;;  %v2613_v29 = vmax.f32 %v2379_v0, 0.0  ;;  %v1634_v6 = vadd.f32 %v5547_v37, %v6107_v58  ;;  %v6108_v50 = vld [vmem:[#allocation7_spill] sm:$0xff] }
 0x29a   :  { %v2612_v22 = vmax.f32 %v2374_v62, 0.0  ;;  %v1473_v10 = vpop.f32.mrb[194].mxu0  ;;  %v3271_v3 = vpop.f32.mrb[194].mxu1  ;;  %v1629_v8 = vadd.f32 %v5547_v37, %v6108_v50 }
 0x29b   :  { %v2588_v12 = vmax.f32 %v2254_v24, 0.0  ;;  %2758 = vst.msk [vmem:[%s6080_s3 + $0x3c8] sm:$0xff] %vm2636_vm1, %v2613_v29  ;;  %v1474_v36 = vadd.f32 %v5547_v37, %v1473_v10  ;;  %v2389_v39 = vadd.f32 %v3271_v3, %v1604_v48  ;;  %v1475_v2 = vpop.f32.mrb[195].mxu0  ;;  %v2383_v54 = vpop.f32.mrb[195].mxu1 }
 0x29c   :  { %2757 = vst.msk [vmem:[%s6080_s3 + $0x3c0] sm:$0xff] %vm2636_vm1, %v2612_v22  ;;  %v2384_v32 = vadd.f32 %v2383_v54, %v1599_v23  ;;  %v6109_v23 = vld [vmem:[#allocation10_spill] sm:$0xff] }
 0x29d   :  { %2733 = vst.msk [vmem:[%s6080_s3 + $0x300] sm:$0xff] %vm2636_vm1, %v2588_v12  ;;  %v2259_v5 = vadd.f32 %v5692_v4, %v1474_v36  ;;  %v2615_v18 = vmax.f32 %v2389_v39, 0.0  ;;  %v1644_v22 = vadd.f32 %v5547_v37, %v6109_v23  ;;  %v6110_v12 = vld [vmem:[#allocation9_spill] sm:$0xff] }
 0x29e   :  { %v2614_v28 = vmax.f32 %v2384_v32, 0.0  ;;  %v1478_v30 = vpop.f32.mrb[196].mxu0  ;;  %v3274_v53 = vpop.f32.mrb[196].mxu1  ;;  %v1639_v36 = vadd.f32 %v5547_v37, %v6110_v12 }
 0x29f   :  { %v2589_v45 = vmax.f32 %v2259_v5, 0.0  ;;  %2760 = vst.msk [vmem:[%s6080_s3 + $0x3d8] sm:$0xff] %vm2636_vm1, %v2615_v18  ;;  %v1479_v42 = vadd.f32 %v5547_v37, %v1478_v30  ;;  %v2399_v20 = vadd.f32 %v3274_v53, %v1614_v26  ;;  %v1480_v21 = vpop.f32.mrb[197].mxu0  ;;  %v2393_v11 = vpop.f32.mrb[197].mxu1  ;;  %v6112_v53 = vld [vmem:[#allocation11_spill] sm:$0xff] }
 0x2a0   :  { %2759 = vst.msk [vmem:[%s6080_s3 + $0x3d0] sm:$0xff] %vm2636_vm1, %v2614_v28  ;;  %v2394_v4 = vadd.f32 %v2393_v11, %v1609_v51  ;;  %v1654_v51 = vadd.f32 %v5547_v37, %v6111_v60  ;;  %v6119_v60 = vld [vmem:[#allocation20_spill] sm:$0xff] }
 0x2a1   :  { %2734 = vst.msk [vmem:[%s6080_s3 + $0x308] sm:$0xff] %vm2636_vm1, %v2589_v45  ;;  %v2264_v34 = vadd.f32 %v5704_v57, %v1479_v42  ;;  %v2617_v44 = vmax.f32 %v2399_v20, 0.0  ;;  %v1649_v45 = vadd.f32 %v5547_v37, %v6112_v53  ;;  %v6120_v53 = vld [vmem:[#allocation19_spill] sm:$0xff] }
 0x2a2   :  { %v2616_v52 = vmax.f32 %v2394_v4, 0.0  ;;  %v1483_v59 = vpop.f32.mrb[198].mxu0  ;;  %v3277_v19 = vpop.f32.mrb[198].mxu1 }
 0x2a3   :  { %v2590_v31 = vmax.f32 %v2264_v34, 0.0  ;;  %2762 = vst.msk [vmem:[%s6080_s3 + $0x3e8] sm:$0xff] %vm2636_vm1, %v2617_v44  ;;  %v1484_v40 = vadd.f32 %v5547_v37, %v1483_v59  ;;  %v2409_v46 = vadd.f32 %v3277_v19, %v1624_v7  ;;  %v1485_v14 = vpop.f32.mrb[199].mxu0  ;;  %v2403_v41 = vpop.f32.mrb[199].mxu1  ;;  %v6113_v44 = vld [vmem:[#allocation14_spill] sm:$0xff]  ;;  %v6114_v59 = vld [vmem:[#allocation13_spill] sm:$0xff] }
 0x2a4   :  { %2761 = vst.msk [vmem:[%s6080_s3 + $0x3e0] sm:$0xff] %vm2636_vm1, %v2616_v52  ;;  %v2404_v57 = vadd.f32 %v2403_v41, %v1619_v35  ;;  %v1664_v15 = vadd.f32 %v5547_v37, %v6113_v44  ;;  %v1659_v19 = vadd.f32 %v5547_v37, %v6114_v59 }
 0x2a5   :  { %2735 = vst.msk [vmem:[%s6080_s3 + $0x310] sm:$0xff] %vm2636_vm1, %v2590_v31  ;;  %v2269_v43 = vadd.f32 %v5701_v9, %v1484_v40  ;;  %v2619_v63 = vmax.f32 %v2409_v46, 0.0 }
 0x2a6   :  { %v2618_v0 = vmax.f32 %v2404_v57, 0.0  ;;  %v1488_v27 = vpop.f32.mrb[200].mxu0  ;;  %v3280_v13 = vpop.f32.mrb[200].mxu1 }
 0x2a7   :  { %v2591_v62 = vmax.f32 %v2269_v43, 0.0  ;;  %2764 = vst.msk [vmem:[%s6080_s3 + $0x3f8] sm:$0xff] %vm2636_vm1, %v2619_v63  ;;  %v1489_v48 = vadd.f32 %v5547_v37, %v1488_v27  ;;  %v2419_v24 = vadd.f32 %v3280_v13, %v1634_v6  ;;  %v1490_v29 = vpop.f32.mrb[201].mxu0  ;;  %v2413_v56 = vpop.f32.mrb[201].mxu1  ;;  %v6115_v43 = vld [vmem:[#allocation16_spill] sm:$0xff] }
 0x2a8   :  { %2763 = vst.msk [vmem:[%s6080_s3 + $0x3f0] sm:$0xff] %vm2636_vm1, %v2618_v0  ;;  %v2414_v9 = vadd.f32 %v2413_v56, %v1629_v8  ;;  %v1674_v63 = vadd.f32 %v5547_v37, %v6115_v43  ;;  %v6116_v0 = vld [vmem:[#allocation15_spill] sm:$0xff] }
 0x2a9   :  { %2736 = vst.msk [vmem:[%s6080_s3 + $0x318] sm:$0xff] %vm2636_vm1, %v2591_v62  ;;  %v2274_v10 = vadd.f32 %v5713_v38, %v1489_v48  ;;  %v2621_v3 = vmax.f32 %v2419_v24, 0.0  ;;  %v1669_v27 = vadd.f32 %v5547_v37, %v6116_v0 }
 0x2aa   :  { %v2620_v39 = vmax.f32 %v2414_v9, 0.0  ;;  %v1493_v2 = vpop.f32.mrb[202].mxu0  ;;  %v3283_v54 = vpop.f32.mrb[202].mxu1 }
 0x2ab   :  { %v2592_v32 = vmax.f32 %v2274_v10, 0.0  ;;  %2766 = vst.msk [vmem:[%s6080_s3 + $0x408] sm:$0xff] %vm2636_vm1, %v2621_v3  ;;  %v1494_v17 = vadd.f32 %v5547_v37, %v1493_v2  ;;  %v2429_v26 = vadd.f32 %v3283_v54, %v1644_v22  ;;  %v1495_v5 = vpop.f32.mrb[203].mxu0  ;;  %v2423_v18 = vpop.f32.mrb[203].mxu1  ;;  %v6117_v22 = vld [vmem:[#allocation18_spill] sm:$0xff] }
 0x2ac   :  { %2765 = vst.msk [vmem:[%s6080_s3 + $0x400] sm:$0xff] %vm2636_vm1, %v2620_v39  ;;  %v2424_v38 = vadd.f32 %v2423_v18, %v1639_v36  ;;  %v1684_v10 = vadd.f32 %v5547_v37, %v6117_v22  ;;  %v6118_v36 = vld [vmem:[#allocation17_spill] sm:$0xff] }
 0x2ad   :  { %2737 = vst.msk [vmem:[%s6080_s3 + $0x320] sm:$0xff] %vm2636_vm1, %v2592_v32  ;;  %v2279_v28 = vadd.f32 %v5710_v25, %v1494_v17  ;;  %v2623_v30 = vmax.f32 %v2429_v26, 0.0  ;;  %v1679_v39 = vadd.f32 %v5547_v37, %v6118_v36 }
 0x2ae   :  { %v2622_v42 = vmax.f32 %v2424_v38, 0.0  ;;  %v1498_v20 = vpop.f32.mrb[204].mxu0  ;;  %v3286_v21 = vpop.f32.mrb[204].mxu1 }
 0x2af   :  { %v2593_v11 = vmax.f32 %v2279_v28, 0.0  ;;  %2768 = vst.msk [vmem:[%s6080_s3 + $0x418] sm:$0xff] %vm2636_vm1, %v2623_v30  ;;  %v1499_v4 = vadd.f32 %v5547_v37, %v1498_v20  ;;  %v2439_v1 = vadd.f32 %v3286_v21, %v1654_v51  ;;  %v1500_v7 = vpop.f32.mrb[205].mxu0  ;;  %v2433_v34 = vpop.f32.mrb[205].mxu1  ;;  %v1694_v51 = vadd.f32 %v5547_v37, %v6119_v60 }
 0x2b0   :  { %2767 = vst.msk [vmem:[%s6080_s3 + $0x410] sm:$0xff] %vm2636_vm1, %v2622_v42  ;;  %v2434_v25 = vadd.f32 %v2433_v34, %v1649_v45  ;;  %v1689_v45 = vadd.f32 %v5547_v37, %v6120_v53 }
 0x2b1   :  { %2738 = vst.msk [vmem:[%s6080_s3 + $0x328] sm:$0xff] %vm2636_vm1, %v2593_v11  ;;  %v2284_v35 = vadd.f32 %v5722_v47, %v1499_v4  ;;  %v2625_v52 = vmax.f32 %v2439_v1, 0.0 }
 0x2b2   :  { %v2624_v31 = vmax.f32 %v2434_v25, 0.0  ;;  %v1503_v40 = vpop.f32.mrb[206].mxu0  ;;  %v3289_v46 = vpop.f32.mrb[206].mxu1  ;;  %v6121_v25 = vld [vmem:[#allocation22_spill] sm:$0xff] }
 0x2b3   :  { %v2594_v14 = vmax.f32 %v2284_v35, 0.0  ;;  %2770 = vst.msk [vmem:[%s6080_s3 + $0x428] sm:$0xff] %vm2636_vm1, %v2625_v52  ;;  %v1504_v41 = vadd.f32 %v5547_v37, %v1503_v40  ;;  %v2449_v57 = vadd.f32 %v3289_v46, %v1664_v15  ;;  %v1505_v58 = vpop.f32.mrb[207].mxu0  ;;  %v2443_v6 = vpop.f32.mrb[207].mxu1  ;;  %v1704_v44 = vadd.f32 %v5547_v37, %v6121_v25  ;;  %v6122_v52 = vld [vmem:[#allocation21_spill] sm:$0xff] }
 0x2b4   :  { %2769 = vst.msk [vmem:[%s6080_s3 + $0x420] sm:$0xff] %vm2636_vm1, %v2624_v31  ;;  %v2444_v47 = vadd.f32 %v2443_v6, %v1659_v19  ;;  %v1699_v59 = vadd.f32 %v5547_v37, %v6122_v52 }
 0x2b5   :  { %2739 = vst.msk [vmem:[%s6080_s3 + $0x330] sm:$0xff] %vm2636_vm1, %v2594_v14  ;;  %v2289_v50 = vadd.f32 %v5719_v61, %v1504_v41  ;;  %v2627_v8 = vmax.f32 %v2449_v57, 0.0 }
 0x2b6   :  { %v2626_v13 = vmax.f32 %v2444_v47, 0.0  ;;  %v1508_v62 = vpop.f32.mrb[208].mxu0  ;;  %v3292_v48 = vpop.f32.mrb[208].mxu1 }
 0x2b7   :  { %v2595_v24 = vmax.f32 %v2289_v50, 0.0  ;;  %2772 = vst.msk [vmem:[%s6080_s3 + $0x438] sm:$0xff] %vm2636_vm1, %v2627_v8  ;;  %v1509_v29 = vadd.f32 %v5547_v37, %v1508_v62  ;;  %v2459_v56 = vadd.f32 %v3292_v48, %v1674_v63  ;;  %v1510_v9 = vpop.f32.mrb[209].mxu0  ;;  %v2453_v23 = vpop.f32.mrb[209].mxu1 }
 0x2b8   :  { %2771 = vst.msk [vmem:[%s6080_s3 + $0x430] sm:$0xff] %vm2636_vm1, %v2626_v13  ;;  %v2454_v61 = vadd.f32 %v2453_v23, %v1669_v27 }
 0x2b9   :  { %2740 = vst.msk [vmem:[%s6080_s3 + $0x338] sm:$0xff] %vm2636_vm1, %v2595_v24  ;;  %v2294_v3 = vadd.f32 %v5732_v33, %v1509_v29  ;;  %v2629_v12 = vmax.f32 %v2459_v56, 0.0 }
 0x2ba   :  { %v2628_v2 = vmax.f32 %v2454_v61, 0.0  ;;  %v1513_v54 = vpop.f32.mrb[210].mxu0  ;;  %v3295_v32 = vpop.f32.mrb[210].mxu1 }
 0x2bb   :  { %v2596_v17 = vmax.f32 %v2294_v3, 0.0  ;;  %2774 = vst.msk [vmem:[%s6080_s3 + $0x448] sm:$0xff] %vm2636_vm1, %v2629_v12  ;;  %v1514_v26 = vadd.f32 %v5547_v37, %v1513_v54  ;;  %v2469_v5 = vadd.f32 %v3295_v32, %v1684_v10  ;;  %v1515_v18 = vpop.f32.mrb[211].mxu0  ;;  %v2463_v38 = vpop.f32.mrb[211].mxu1 }
 0x2bc   :  { %2773 = vst.msk [vmem:[%s6080_s3 + $0x440] sm:$0xff] %vm2636_vm1, %v2628_v2  ;;  %v2464_v33 = vadd.f32 %v2463_v38, %v1679_v39 }
 0x2bd   :  { %2741 = vst.msk [vmem:[%s6080_s3 + $0x340] sm:$0xff] %vm2636_vm1, %v2596_v17  ;;  %v2299_v28 = vadd.f32 %v5729_v16, %v1514_v26  ;;  %v2631_v30 = vmax.f32 %v2469_v5, 0.0 }
 0x2be   :  { %v2630_v42 = vmax.f32 %v2464_v33, 0.0  ;;  %v1518_v20 = vpop.f32.mrb[212].mxu0  ;;  %v3298_v21 = vpop.f32.mrb[212].mxu1 }
 0x2bf   :  { %v2597_v11 = vmax.f32 %v2299_v28, 0.0  ;;  %2776 = vst.msk [vmem:[%s6080_s3 + $0x458] sm:$0xff] %vm2636_vm1, %v2631_v30  ;;  %v1519_v4 = vadd.f32 %v5547_v37, %v1518_v20  ;;  %v2479_v1 = vadd.f32 %v3298_v21, %v1694_v51  ;;  %v1520_v7 = vpop.f32.mrb[213].mxu0  ;;  %v2473_v34 = vpop.f32.mrb[213].mxu1 }
 0x2c0   :  { %2775 = vst.msk [vmem:[%s6080_s3 + $0x450] sm:$0xff] %vm2636_vm1, %v2630_v42  ;;  %v2474_v16 = vadd.f32 %v2473_v34, %v1689_v45 }
 0x2c1   :  { %2742 = vst.msk [vmem:[%s6080_s3 + $0x348] sm:$0xff] %vm2636_vm1, %v2597_v11  ;;  %v2304_v15 = vadd.f32 %v5742_v49, %v1519_v4  ;;  %v2633_v35 = vmax.f32 %v2479_v1, 0.0 }
 0x2c2   :  { %v2632_v19 = vmax.f32 %v2474_v16, 0.0  ;;  %v1523_v31 = vpop.f32.mrb[214].mxu0  ;;  %v3301_v40 = vpop.f32.mrb[214].mxu1 }
 0x2c3   :  { %v2598_v46 = vmax.f32 %v2304_v15, 0.0  ;;  %2778 = vst.msk [vmem:[%s6080_s3 + $0x468] sm:$0xff] %vm2636_vm1, %v2633_v35  ;;  %v1524_v14 = vadd.f32 %v5547_v37, %v1523_v31  ;;  %v2489_v41 = vadd.f32 %v3301_v40, %v1704_v44  ;;  %v1525_v57 = vpop.f32.mrb[215].mxu0  ;;  %v2483_v58 = vpop.f32.mrb[215].mxu1 }
 0x2c4   :  { %2777 = vst.msk [vmem:[%s6080_s3 + $0x460] sm:$0xff] %vm2636_vm1, %v2632_v19  ;;  %v2484_v49 = vadd.f32 %v2483_v58, %v1699_v59 }
 0x2c5   :  { %2743 = vst.msk [vmem:[%s6080_s3 + $0x350] sm:$0xff] %vm2636_vm1, %v2598_v46  ;;  %v2309_v6 = vadd.f32 %v5739_v55, %v1524_v14  ;;  %v2635_v47 = vmax.f32 %v2489_v41, 0.0 }
 0x2c6   :  { %v2634_v43 = vmax.f32 %v2484_v49, 0.0 }
 0x2c7   :  { %v2599_v63 = vmax.f32 %v2309_v6, 0.0  ;;  %2780 = vst.msk [vmem:[%s6080_s3 + $0x478] sm:$0xff] %vm2636_vm1, %v2635_v47 }
 0x2c8   :  { %2779 = vst.msk [vmem:[%s6080_s3 + $0x470] sm:$0xff] %vm2636_vm1, %v2634_v43 }
 0x2c9   :  { %2744 = vst.msk [vmem:[%s6080_s3 + $0x358] sm:$0xff] %vm2636_vm1, %v2599_v63 }

// kernel: image_classifier_forward.6
= control target key start
LH: loop header
LB: loop body
LE: loop exit
PB: predicated region body
PF: predicated region fallthrough
CT: control target
= control target key end

     0   :  { %v4577_v0 = vmov 0.0|0.0   ;;  %vm4578_vm0 = vmmov 0   ;;  %vm698_vm1 = vcmask 523264   ;;  %s7913_s1 = inlined_call_operand.vmem [shape: f32[576,64], index: 1, kind: input, shape index: {}]   ;;  %s7914_s0 = inlined_call_operand.vmem [shape: f32[968,576], index: 0, kind: input, shape index: {}]   ;;  %s7915_s2 = inlined_call_operand.vmem [shape: f32[1,64], index: 2, kind: input, shape index: {}]   ;;  %s7916_s3 = inlined_call_operand.vmem [shape: f32[968,64], index: 3, kind: output, shape index: {}]  }
   0x1   :  { %3948 = vmatprep.subr.bf16.mxu1 %v4577_v0  ;;  %3996 = vmatprep.subr.bf16.mxu0 %v4577_v0  ;;  %v619_v1 = vld [vmem:[%s7913_s1] sm:$0xff]  ;;  %v620_v2 = vld [vmem:[%s7913_s1 + $0x8] sm:$0xff]  ;;  %v621_v6 = vld [vmem:[%s7913_s1 + $0x10] sm:$0xff] }
   0x2   :  { %v651_v3 = vld [vmem:[%s7913_s1 + $0x100] sm:$0xff]  ;;  %v3949_v4 = vpack.c.bf16 %v620_v2, %v619_v1  ;;  %v652_v5 = vld [vmem:[%s7913_s1 + $0x108] sm:$0xff]  ;;  %v622_v7 = vld [vmem:[%s7913_s1 + $0x18] sm:$0xff] }
   0x3   :  { %v4620_v8 = vpack.c.bf16 %v652_v5, %v651_v3  ;;  %v653_v9 = vld [vmem:[%s7913_s1 + $0x110] sm:$0xff]  ;;  %v654_v10 = vld [vmem:[%s7913_s1 + $0x118] sm:$0xff]  ;;  %v3952_v11 = vpack.c.bf16 %v622_v7, %v621_v6  ;;  %v623_v13 = vld [vmem:[%s7913_s1 + $0x20] sm:$0xff] }
   0x4   :  { %3950 = vmatpush1.bf16.msra.mxu1 %v3949_v4  ;;  %v4630_v12 = vpack.c.bf16 %v654_v10, %v653_v9  ;;  %v624_v14 = vld [vmem:[%s7913_s1 + $0x28] sm:$0xff]  ;;  %v655_v15 = vld [vmem:[%s7913_s1 + $0x120] sm:$0xff]  ;;  %v625_v19 = vld [vmem:[%s7913_s1 + $0x30] sm:$0xff] }
   0x5   :  { %3998 = vmatpush1.bf16.msra.mxu0 %v4620_v8  ;;  %3951 = vmatprep.subr.bf16.mxu1 %v4577_v0  ;;  %v656_v16 = vld [vmem:[%s7913_s1 + $0x128] sm:$0xff]  ;;  %v3955_v17 = vpack.c.bf16 %v624_v14, %v623_v13  ;;  %v626_v20 = vld [vmem:[%s7913_s1 + $0x38] sm:$0xff]  ;;  %v657_v21 = vld [vmem:[%s7913_s1 + $0x130] sm:$0xff] }
   0x6   :  { %3999 = vmatprep.subr.bf16.mxu0 %v4577_v0  ;;  %v4647_v18 = vpack.c.bf16 %v656_v16, %v655_v15  ;;  %v658_v22 = vld [vmem:[%s7913_s1 + $0x138] sm:$0xff]  ;;  %v3958_v23 = vpack.c.bf16 %v626_v20, %v625_v19  ;;  %v627_v25 = vld [vmem:[%s7913_s1 + $0x40] sm:$0xff]  ;;  %v628_v26 = vld [vmem:[%s7913_s1 + $0x48] sm:$0xff] }
   0x7   :  { %v4664_v24 = vpack.c.bf16 %v658_v22, %v657_v21  ;;  %v659_v27 = vld [vmem:[%s7913_s1 + $0x140] sm:$0xff]  ;;  %v660_v28 = vld [vmem:[%s7913_s1 + $0x148] sm:$0xff]  ;;  %v3961_v29 = vpack.c.bf16 %v628_v26, %v627_v25  ;;  %v629_v31 = vld [vmem:[%s7913_s1 + $0x50] sm:$0xff] }
   0x8   :  { %3953 = vmatpush1.bf16.msra.mxu1 %v3952_v11  ;;  %v4681_v30 = vpack.c.bf16 %v660_v28, %v659_v27  ;;  %v630_v32 = vld [vmem:[%s7913_s1 + $0x58] sm:$0xff]  ;;  %v661_v33 = vld [vmem:[%s7913_s1 + $0x150] sm:$0xff]  ;;  %v631_v37 = vld [vmem:[%s7913_s1 + $0x60] sm:$0xff] }
   0x9   :  { %4001 = vmatpush1.bf16.msra.mxu0 %v4630_v12  ;;  %3954 = vmatprep.subr.bf16.mxu1 %v4577_v0  ;;  %v662_v34 = vld [vmem:[%s7913_s1 + $0x158] sm:$0xff]  ;;  %v3964_v35 = vpack.c.bf16 %v630_v32, %v629_v31  ;;  %v632_v38 = vld [vmem:[%s7913_s1 + $0x68] sm:$0xff]  ;;  %v663_v39 = vld [vmem:[%s7913_s1 + $0x160] sm:$0xff] }
   0xa   :  { %4002 = vmatprep.subr.bf16.mxu0 %v4577_v0  ;;  %v4698_v36 = vpack.c.bf16 %v662_v34, %v661_v33  ;;  %v664_v40 = vld [vmem:[%s7913_s1 + $0x168] sm:$0xff]  ;;  %v17_v42 = vld [vmem:[%s7914_s0 + $0x18] sm:$0xff]  ;;  %v3967_v43 = vpack.c.bf16 %v632_v38, %v631_v37  ;;  %v633_v45 = vld [vmem:[%s7913_s1 + $0x70] sm:$0xff] }
   0xb   :  { %v15_v41 = vld [vmem:[%s7914_s0 + $0x8] sm:$0xff]  ;;  %1796 = vmatprep.mubr.f32.mxu0 %v17_v42  ;;  %v4721_v44 = vpack.c.bf16 %v664_v40, %v663_v39  ;;  %v634_v46 = vld [vmem:[%s7913_s1 + $0x78] sm:$0xff]  ;;  %v665_v47 = vld [vmem:[%s7913_s1 + $0x170] sm:$0xff] }
   0xc   :  { %3956 = vmatpush1.bf16.msra.mxu1 %v3955_v17  ;;  %1126 = vmatprep.mubr.f32.mxu1 %v15_v41  ;;  %v666_v48 = vld [vmem:[%s7913_s1 + $0x178] sm:$0xff]  ;;  %v3970_v49 = vpack.c.bf16 %v634_v46, %v633_v45  ;;  %v635_v51 = vld [vmem:[%s7913_s1 + $0x80] sm:$0xff]  ;;  %v636_v52 = vld [vmem:[%s7913_s1 + $0x88] sm:$0xff] }
   0xd   :  { %4004 = vmatpush1.bf16.msra.mxu0 %v4647_v18  ;;  %3957 = vmatprep.subr.bf16.mxu1 %v4577_v0  ;;  %v4738_v50 = vpack.c.bf16 %v666_v48, %v665_v47  ;;  %v667_v53 = vld [vmem:[%s7913_s1 + $0x180] sm:$0xff]  ;;  %v668_v54 = vld [vmem:[%s7913_s1 + $0x188] sm:$0xff]  ;;  %v3973_v55 = vpack.c.bf16 %v636_v52, %v635_v51  ;;  %v637_v57 = vld [vmem:[%s7913_s1 + $0x90] sm:$0xff] }
   0xe   :  { %4005 = vmatprep.subr.bf16.mxu0 %v4577_v0  ;;  %v4755_v56 = vpack.c.bf16 %v668_v54, %v667_v53  ;;  %v638_v58 = vld [vmem:[%s7913_s1 + $0x98] sm:$0xff]  ;;  %v669_v59 = vld [vmem:[%s7913_s1 + $0x190] sm:$0xff]  ;;  %v639_v63 = vld [vmem:[%s7913_s1 + $0xa0] sm:$0xff] }
   0xf   :  { %v670_v60 = vld [vmem:[%s7913_s1 + $0x198] sm:$0xff]  ;;  %v3976_v61 = vpack.c.bf16 %v638_v58, %v637_v57  ;;  %v640_v1 = vld [vmem:[%s7913_s1 + $0xa8] sm:$0xff]  ;;  %v671_v2 = vld [vmem:[%s7913_s1 + $0x1a0] sm:$0xff] }
  0x10   :  { %3959 = vmatpush1.bf16.msra.mxu1 %v3958_v23  ;;  %v4772_v62 = vpack.c.bf16 %v670_v60, %v669_v59  ;;  %v672_v3 = vld [vmem:[%s7913_s1 + $0x1a8] sm:$0xff]  ;;  %v3979_v4 = vpack.c.bf16 %v640_v1, %v639_v63  ;;  %v641_v6 = vld [vmem:[%s7913_s1 + $0xb0] sm:$0xff]  ;;  %v642_v7 = vld [vmem:[%s7913_s1 + $0xb8] sm:$0xff] }
  0x11   :  { %4007 = vmatpush1.bf16.msra.mxu0 %v4664_v24  ;;  %3960 = vmatprep.subr.bf16.mxu1 %v4577_v0  ;;  %v4789_v5 = vpack.c.bf16 %v672_v3, %v671_v2  ;;  %v673_v9 = vld [vmem:[%s7913_s1 + $0x1b0] sm:$0xff]  ;;  %v674_v10 = vld [vmem:[%s7913_s1 + $0x1b8] sm:$0xff]  ;;  %v3982_v11 = vpack.c.bf16 %v642_v7, %v641_v6  ;;  %v643_v14 = vld [vmem:[%s7913_s1 + $0xc0] sm:$0xff] }
  0x12   :  { %4008 = vmatprep.subr.bf16.mxu0 %v4577_v0  ;;  %v4806_v13 = vpack.c.bf16 %v674_v10, %v673_v9  ;;  %v644_v15 = vld [vmem:[%s7913_s1 + $0xc8] sm:$0xff]  ;;  %v675_v16 = vld [vmem:[%s7913_s1 + $0x1c0] sm:$0xff]  ;;  %v645_v21 = vld [vmem:[%s7913_s1 + $0xd0] sm:$0xff] }
  0x13   :  { %v676_v17 = vld [vmem:[%s7913_s1 + $0x1c8] sm:$0xff]  ;;  %v3985_v19 = vpack.c.bf16 %v644_v15, %v643_v14  ;;  %v646_v22 = vld [vmem:[%s7913_s1 + $0xd8] sm:$0xff]  ;;  %v677_v23 = vld [vmem:[%s7913_s1 + $0x1d0] sm:$0xff] }
  0x14   :  { %3962 = vmatpush1.bf16.msra.mxu1 %v3961_v29  ;;  %v4823_v20 = vpack.c.bf16 %v676_v17, %v675_v16  ;;  %v678_v25 = vld [vmem:[%s7913_s1 + $0x1d8] sm:$0xff]  ;;  %v3988_v26 = vpack.c.bf16 %v646_v22, %v645_v21  ;;  %v647_v28 = vld [vmem:[%s7913_s1 + $0xe0] sm:$0xff]  ;;  %v648_v29 = vld [vmem:[%s7913_s1 + $0xe8] sm:$0xff] }
  0x15   :  { %4010 = vmatpush1.bf16.msra.mxu0 %v4681_v30  ;;  %3963 = vmatprep.subr.bf16.mxu1 %v4577_v0  ;;  %v4840_v27 = vpack.c.bf16 %v678_v25, %v677_v23  ;;  %v679_v31 = vld [vmem:[%s7913_s1 + $0x1e0] sm:$0xff]  ;;  %v680_v32 = vld [vmem:[%s7913_s1 + $0x1e8] sm:$0xff]  ;;  %v3991_v33 = vpack.c.bf16 %v648_v29, %v647_v28  ;;  %v650_v37 = vld [vmem:[%s7913_s1 + $0xf8] sm:$0xff] }
  0x16   :  { %4011 = vmatprep.subr.bf16.mxu0 %v4577_v0  ;;  %v4857_v34 = vpack.c.bf16 %v680_v32, %v679_v31  ;;  %v681_v38 = vld [vmem:[%s7913_s1 + $0x1f0] sm:$0xff]  ;;  %v682_v39 = vld [vmem:[%s7913_s1 + $0x1f8] sm:$0xff]  ;;  %v683_v42 = vld [vmem:[%s7913_s1 + $0x200] sm:$0xff] }
  0x17   :  { %v4874_v41 = vpack.c.bf16 %v682_v39, %v681_v38  ;;  %v14_v45 = vld [vmem:[%s7914_s0] sm:$0xff]  ;;  %v16_v46 = vld [vmem:[%s7914_s0 + $0x10] sm:$0xff]  ;;  %v686_v52 = vld [vmem:[%s7913_s1 + $0x218] sm:$0xff] }
  0x18   :  { %3965 = vmatpush1.bf16.msra.mxu1 %v3964_v35  ;;  %v649_v35 = vld [vmem:[%s7913_s1 + $0xf0] sm:$0xff]  ;;  %v19_v53 = vld [vmem:[%s7914_s0 + $0x28] sm:$0xff]  ;;  %v21_v54 = vld [vmem:[%s7914_s0 + $0x38] sm:$0xff] }
  0x19   :  { %4013 = vmatpush1.bf16.msra.mxu0 %v4698_v36  ;;  %3966 = vmatprep.subr.bf16.mxu1 %v4577_v0  ;;  %v3994_v40 = vpack.c.bf16 %v650_v37, %v649_v35  ;;  %v20_v48 = vld [vmem:[%s7914_s0 + $0x30] sm:$0xff]  ;;  %v27_v57 = vld [vmem:[%s7914_s0 + $0x68] sm:$0xff]  ;;  %v30_v63 = vld [vmem:[%s7914_s0 + $0x80] sm:$0xff] }
  0x1a   :  { %4014 = vmatprep.subr.bf16.mxu0 %v4577_v0  ;;  %v685_v51 = vld [vmem:[%s7913_s1 + $0x210] sm:$0xff]  ;;  %v688_v59 = vld [vmem:[%s7913_s1 + $0x228] sm:$0xff]  ;;  %v29_v3 = vld [vmem:[%s7914_s0 + $0x78] sm:$0xff] }
  0x1b   :  { %v4048_v58 = vpack.c.bf16 %v686_v52, %v685_v51  ;;  %v24_v60 = vld [vmem:[%s7914_s0 + $0x50] sm:$0xff]  ;;  %v37_v6 = vld [vmem:[%s7914_s0 + $0xb8] sm:$0xff]  ;;  %v34_v7 = vld [vmem:[%s7914_s0 + $0xa0] sm:$0xff] }
  0x1c   :  { %3968 = vmatpush1.bf16.msra.mxu1 %v3967_v43  ;;  %v684_v43 = vld [vmem:[%s7913_s1 + $0x208] sm:$0xff]  ;;  %v32_v1 = vld [vmem:[%s7914_s0 + $0x90] sm:$0xff]  ;;  %v42_v10 = vld [vmem:[%s7914_s0 + $0xe0] sm:$0xff] }
  0x1d   :  { %4016 = vmatpush1.bf16.msra.mxu0 %v4721_v44  ;;  %3969 = vmatprep.subr.bf16.mxu1 %v4577_v0  ;;  %v4045_v47 = vpack.c.bf16 %v684_v43, %v683_v42  ;;  %v40_v9 = vld [vmem:[%s7914_s0 + $0xd0] sm:$0xff]  ;;  %v41_v14 = vld [vmem:[%s7914_s0 + $0xd8] sm:$0xff]  ;;  %v47_v15 = vld [vmem:[%s7914_s0 + $0x108] sm:$0xff] }
  0x1e   :  { %4017 = vmatprep.subr.bf16.mxu0 %v4577_v0  ;;  %v44_v16 = vld [vmem:[%s7914_s0 + $0xf0] sm:$0xff]  ;;  %v46_v17 = vld [vmem:[%s7914_s0 + $0x100] sm:$0xff]  ;;  %v49_v21 = vld [vmem:[%s7914_s0 + $0x118] sm:$0xff] }
  0x1f   :  { %v51_v22 = vld [vmem:[%s7914_s0 + $0x128] sm:$0xff]  ;;  %v57_v23 = vld [vmem:[%s7914_s0 + $0x158] sm:$0xff]  ;;  %v54_v25 = vld [vmem:[%s7914_s0 + $0x140] sm:$0xff] }
  0x20   :  { %3971 = vmatpush1.bf16.msra.mxu1 %v3970_v49  ;;  %v22_v49 = vld [vmem:[%s7914_s0 + $0x40] sm:$0xff]  ;;  %v59_v29 = vld [vmem:[%s7914_s0 + $0x168] sm:$0xff]  ;;  %v61_v31 = vld [vmem:[%s7914_s0 + $0x178] sm:$0xff] }
  0x21   :  { %4019 = vmatpush1.bf16.msra.mxu0 %v4738_v50  ;;  %3972 = vmatprep.subr.bf16.mxu1 %v4577_v0  ;;  %v62_v28 = vld [vmem:[%s7914_s0 + $0x180] sm:$0xff]  ;;  %v67_v32 = vld [vmem:[%s7914_s0 + $0x1a8] sm:$0xff]  ;;  %v72_v37 = vld [vmem:[%s7914_s0 + $0x1d0] sm:$0xff] }
  0x22   :  { %4020 = vmatprep.subr.bf16.mxu0 %v4577_v0  ;;  %v66_v35 = vld [vmem:[%s7914_s0 + $0x1a0] sm:$0xff]  ;;  %v69_v38 = vld [vmem:[%s7914_s0 + $0x1b8] sm:$0xff]  ;;  %v71_v39 = vld [vmem:[%s7914_s0 + $0x1c8] sm:$0xff] }
  0x23   :  { %v74_v42 = vld [vmem:[%s7914_s0 + $0x1e0] sm:$0xff]  ;;  %v76_v43 = vld [vmem:[%s7914_s0 + $0x1f0] sm:$0xff] }
  0x24   :  { %3974 = vmatpush1.bf16.msra.mxu1 %v3973_v55  ;;  %v25_v55 = vld [vmem:[%s7914_s0 + $0x58] sm:$0xff]  ;;  %v86_v51 = vld [vmem:[%s7914_s0 + $0x240] sm:$0xff]  ;;  %v92_v52 = vld [vmem:[%s7914_s0 + $0x270] sm:$0xff] }
  0x25   :  { %4022 = vmatpush1.bf16.msra.mxu0 %v4755_v56  ;;  %3975 = vmatprep.subr.bf16.mxu1 %v4577_v0 }
  0x26   :  { %4023 = vmatprep.subr.bf16.mxu0 %v4577_v0 }
  0x28   :  { %3977 = vmatpush1.bf16.msra.mxu1 %v3976_v61  ;;  %v26_v61 = vld [vmem:[%s7914_s0 + $0x60] sm:$0xff] }
  0x29   :  { %4025 = vmatpush1.bf16.msra.mxu0 %v4772_v62  ;;  %3978 = vmatprep.subr.bf16.mxu1 %v4577_v0 }
  0x2a   :  { %4026 = vmatprep.subr.bf16.mxu0 %v4577_v0 }
  0x2c   :  { %3980 = vmatpush1.bf16.msra.mxu1 %v3979_v4  ;;  %v35_v4 = vld [vmem:[%s7914_s0 + $0xa8] sm:$0xff] }
  0x2d   :  { %4028 = vmatpush1.bf16.msra.mxu0 %v4789_v5  ;;  %3981 = vmatprep.subr.bf16.mxu1 %v4577_v0 }
  0x2e   :  { %4029 = vmatprep.subr.bf16.mxu0 %v4577_v0 }
  0x30   :  { %3983 = vmatpush1.bf16.msra.mxu1 %v3982_v11  ;;  %v39_v11 = vld [vmem:[%s7914_s0 + $0xc8] sm:$0xff] }
  0x31   :  { %4031 = vmatpush1.bf16.msra.mxu0 %v4806_v13  ;;  %3984 = vmatprep.subr.bf16.mxu1 %v4577_v0 }
  0x32   :  { %4032 = vmatprep.subr.bf16.mxu0 %v4577_v0 }
  0x34   :  { %3986 = vmatpush1.bf16.msra.mxu1 %v3985_v19  ;;  %v52_v19 = vld [vmem:[%s7914_s0 + $0x130] sm:$0xff] }
  0x35   :  { %4034 = vmatpush1.bf16.msra.mxu0 %v4823_v20  ;;  %3987 = vmatprep.subr.bf16.mxu1 %v4577_v0 }
  0x36   :  { %4035 = vmatprep.subr.bf16.mxu0 %v4577_v0 }
  0x38   :  { %3989 = vmatpush1.bf16.msra.mxu1 %v3988_v26  ;;  %v56_v26 = vld [vmem:[%s7914_s0 + $0x150] sm:$0xff] }
  0x39   :  { %4037 = vmatpush1.bf16.msra.mxu0 %v4840_v27  ;;  %3990 = vmatprep.subr.bf16.mxu1 %v4577_v0 }
  0x3a   :  { %4038 = vmatprep.subr.bf16.mxu0 %v4577_v0 }
  0x3c   :  { %3992 = vmatpush1.bf16.msra.mxu1 %v3991_v33  ;;  %v64_v33 = vld [vmem:[%s7914_s0 + $0x190] sm:$0xff] }
  0x3d   :  { %4040 = vmatpush1.bf16.msra.mxu0 %v4857_v34  ;;  %3993 = vmatprep.subr.bf16.mxu1 %v4577_v0 }
  0x3e   :  { %4041 = vmatprep.subr.bf16.mxu0 %v4577_v0 }
  0x40   :  { %3995 = vmatpush1.bf16.msra.mxu1 %v3994_v40  ;;  %v77_v40 = vld [vmem:[%s7914_s0 + $0x1f8] sm:$0xff] }
  0x41   :  { %4043 = vmatpush1.bf16.msra.mxu0 %v4874_v41  ;;  %4056 = vmatprep.subr.bf16.mxu1 %v4577_v0 }
  0x42   :  { %4044 = vmatprep.subr.bf16.mxu0 %v4577_v0 }
  0x43   :  { %1127 = vmatmul.mubr.f32.vlgmr.msra.gmra.mrb[0].mxu1 %v14_v45  ;;  %v82_v45 = vld [vmem:[%s7914_s0 + $0x220] sm:$0xff] }
  0x44   :  { %1797 = vmatmul.mubr.f32.vlgmr.msra.gmra.mrb[0].mxu0 %v16_v46  ;;  %1131 = vmatprep.mubr.f32.mxu1 %v20_v48  ;;  %v79_v46 = vld [vmem:[%s7914_s0 + $0x208] sm:$0xff] }
  0x45   :  { %4046 = vmatpush3.bf16.msra.mxu0 %v4045_v47  ;;  %4072 = vmatpush1.bf16.msra.mxu1 %v4620_v8  ;;  %v687_v8 = vld [vmem:[%s7913_s1 + $0x220] sm:$0xff]  ;;  %v81_v47 = vld [vmem:[%s7914_s0 + $0x218] sm:$0xff]  ;;  %v87_v48 = vld [vmem:[%s7914_s0 + $0x248] sm:$0xff] }
  0x46   :  { %1801 = vmatprep.mubr.f32.mxu0 %v22_v49  ;;  %4057 = vmatprep.subr.bf16.mxu1 %v4577_v0  ;;  %v4051_v2 = vpack.c.bf16 %v688_v59, %v687_v8  ;;  %v84_v49 = vld [vmem:[%s7914_s0 + $0x230] sm:$0xff]  ;;  %v97_v8 = vld [vmem:[%s7914_s0 + $0x298] sm:$0xff]  ;;  %v94_v59 = vld [vmem:[%s7914_s0 + $0x280] sm:$0xff] }
  0x47   :  { %1132 = vmatmul.mubr.f32.gmra.mrb[2].mxu1 %v19_v53  ;;  %4047 = vmatprep.subr.bf16.mxu0 %v4577_v0  ;;  %v89_v53 = vld [vmem:[%s7914_s0 + $0x258] sm:$0xff] }
  0x48   :  { %1802 = vmatmul.mubr.f32.gmra.mrb[2].mxu0 %v21_v54  ;;  %1136 = vmatprep.mubr.f32.mxu1 %v25_v55  ;;  %v689_v54 = vld [vmem:[%s7913_s1 + $0x230] sm:$0xff]  ;;  %v91_v55 = vld [vmem:[%s7914_s0 + $0x268] sm:$0xff] }
  0x49   :  { %1806 = vmatprep.mubr.f32.mxu0 %v27_v57  ;;  %4073 = vmatpush1.bf16.msra.mxu1 %v4630_v12  ;;  %v31_v12 = vld [vmem:[%s7914_s0 + $0x88] sm:$0xff] }
  0x4a   :  { %4049 = vmatpush3.bf16.msra.mxu0 %v4048_v58  ;;  %4058 = vmatprep.subr.bf16.mxu1 %v4577_v0  ;;  %v95_v57 = vld [vmem:[%s7914_s0 + $0x288] sm:$0xff] }
  0x4b   :  { %1137 = vmatmul.mubr.f32.gmra.mrb[4].mxu1 %v24_v60  ;;  %4050 = vmatprep.subr.bf16.mxu0 %v4577_v0  ;;  %v96_v60 = vld [vmem:[%s7914_s0 + $0x290] sm:$0xff] }
  0x4c   :  { %1807 = vmatmul.mubr.f32.gmra.mrb[4].mxu0 %v26_v61  ;;  %1141 = vmatprep.mubr.f32.mxu1 %v30_v63  ;;  %v99_v61 = vld [vmem:[%s7914_s0 + $0x2a8] sm:$0xff]  ;;  %v101_v63 = vld [vmem:[%s7914_s0 + $0x2b8] sm:$0xff] }
  0x4d   :  { %1811 = vmatprep.mubr.f32.mxu0 %v32_v1  ;;  %4074 = vmatpush1.bf16.msra.mxu1 %v4647_v18  ;;  %v36_v18 = vld [vmem:[%s7914_s0 + $0xb0] sm:$0xff]  ;;  %v107_v1 = vld [vmem:[%s7914_s0 + $0x2e8] sm:$0xff] }
  0x4e   :  { %4059 = vmatprep.subr.bf16.mxu1 %v4577_v0  ;;  %4052 = vmatpush3.bf16.msra.mxu0 %v4051_v2  ;;  %v104_v2 = vld [vmem:[%s7914_s0 + $0x2d0] sm:$0xff] }
  0x4f   :  { %1142 = vmatmul.mubr.f32.gmra.mrb[6].mxu1 %v29_v3  ;;  %4053 = vmatprep.subr.bf16.mxu0 %v4577_v0  ;;  %v106_v3 = vld [vmem:[%s7914_s0 + $0x2e0] sm:$0xff] }
  0x50   :  { %1812 = vmatmul.mubr.f32.gmra.mrb[6].mxu0 %v31_v12  ;;  %1146 = vmatprep.mubr.f32.mxu1 %v35_v4  ;;  %v110_v12 = vld [vmem:[%s7914_s0 + $0x300] sm:$0xff]  ;;  %v112_v4 = vld [vmem:[%s7914_s0 + $0x310] sm:$0xff] }
  0x51   :  { %1816 = vmatprep.mubr.f32.mxu0 %v37_v6  ;;  %4075 = vmatpush1.bf16.msra.mxu1 %v4664_v24  ;;  %v45_v24 = vld [vmem:[%s7914_s0 + $0xf8] sm:$0xff] }
  0x52   :  { %4060 = vmatprep.subr.bf16.mxu1 %v4577_v0  ;;  %v109_v6 = vld [vmem:[%s7914_s0 + $0x2f8] sm:$0xff] }
  0x53   :  { %1147 = vmatmul.mubr.f32.gmra.mrb[8].mxu1 %v34_v7  ;;  %v111_v7 = vld [vmem:[%s7914_s0 + $0x308] sm:$0xff] }
  0x54   :  { %1817 = vmatmul.mubr.f32.gmra.mrb[8].mxu0 %v36_v18  ;;  %1151 = vmatprep.mubr.f32.mxu1 %v40_v9  ;;  %v115_v18 = vld [vmem:[%s7914_s0 + $0x328] sm:$0xff]  ;;  %v117_v9 = vld [vmem:[%s7914_s0 + $0x338] sm:$0xff] }
  0x55   :  { %1821 = vmatprep.mubr.f32.mxu0 %v42_v10  ;;  %4076 = vmatpush1.bf16.msra.mxu1 %v4681_v30  ;;  %v50_v30 = vld [vmem:[%s7914_s0 + $0x120] sm:$0xff] }
  0x56   :  { %4061 = vmatprep.subr.bf16.mxu1 %v4577_v0  ;;  %v114_v10 = vld [vmem:[%s7914_s0 + $0x320] sm:$0xff] }
  0x57   :  { %1152 = vmatmul.mubr.f32.gmra.mrb[10].mxu1 %v39_v11  ;;  %v116_v11 = vld [vmem:[%s7914_s0 + $0x330] sm:$0xff] }
  0x58   :  { %1822 = vmatmul.mubr.f32.gmra.mrb[10].mxu0 %v41_v14  ;;  %1156 = vmatprep.mubr.f32.mxu1 %v45_v24  ;;  %v120_v14 = vld [vmem:[%s7914_s0 + $0x350] sm:$0xff]  ;;  %v122_v24 = vld [vmem:[%s7914_s0 + $0x360] sm:$0xff] }
  0x59   :  { %1826 = vmatprep.mubr.f32.mxu0 %v47_v15  ;;  %4077 = vmatpush1.bf16.msra.mxu1 %v4698_v36  ;;  %v55_v36 = vld [vmem:[%s7914_s0 + $0x148] sm:$0xff] }
  0x5a   :  { %4062 = vmatprep.subr.bf16.mxu1 %v4577_v0  ;;  %v119_v15 = vld [vmem:[%s7914_s0 + $0x348] sm:$0xff] }
  0x5b   :  { %1157 = vmatmul.mubr.f32.gmra.mrb[12].mxu1 %v44_v16  ;;  %v121_v16 = vld [vmem:[%s7914_s0 + $0x358] sm:$0xff] }
  0x5c   :  { %1827 = vmatmul.mubr.f32.gmra.mrb[12].mxu0 %v46_v17  ;;  %1161 = vmatprep.mubr.f32.mxu1 %v50_v30  ;;  %v125_v17 = vld [vmem:[%s7914_s0 + $0x378] sm:$0xff]  ;;  %v127_v30 = vld [vmem:[%s7914_s0 + $0x388] sm:$0xff] }
  0x5d   :  { %1831 = vmatprep.mubr.f32.mxu0 %v52_v19  ;;  %4078 = vmatpush1.bf16.msra.mxu1 %v4721_v44  ;;  %v60_v44 = vld [vmem:[%s7914_s0 + $0x170] sm:$0xff] }
  0x5e   :  { %4063 = vmatprep.subr.bf16.mxu1 %v4577_v0  ;;  %v124_v19 = vld [vmem:[%s7914_s0 + $0x370] sm:$0xff] }
  0x5f   :  { %1162 = vmatmul.mubr.f32.gmra.mrb[14].mxu1 %v49_v21  ;;  %v126_v21 = vld [vmem:[%s7914_s0 + $0x380] sm:$0xff] }
  0x60   :  { %1832 = vmatmul.mubr.f32.gmra.mrb[14].mxu0 %v51_v22  ;;  %1166 = vmatprep.mubr.f32.mxu1 %v55_v36  ;;  %v130_v22 = vld [vmem:[%s7914_s0 + $0x3a0] sm:$0xff]  ;;  %v132_v36 = vld [vmem:[%s7914_s0 + $0x3b0] sm:$0xff] }
  0x61   :  { %1836 = vmatprep.mubr.f32.mxu0 %v57_v23  ;;  %4079 = vmatpush1.bf16.msra.mxu1 %v4738_v50  ;;  %v65_v50 = vld [vmem:[%s7914_s0 + $0x198] sm:$0xff] }
  0x62   :  { %4064 = vmatprep.subr.bf16.mxu1 %v4577_v0  ;;  %v129_v23 = vld [vmem:[%s7914_s0 + $0x398] sm:$0xff] }
  0x63   :  { %1167 = vmatmul.mubr.f32.gmra.mrb[16].mxu1 %v54_v25  ;;  %v131_v25 = vld [vmem:[%s7914_s0 + $0x3a8] sm:$0xff] }
  0x64   :  { %1837 = vmatmul.mubr.f32.gmra.mrb[16].mxu0 %v56_v26  ;;  %1171 = vmatprep.mubr.f32.mxu1 %v60_v44  ;;  %v135_v26 = vld [vmem:[%s7914_s0 + $0x3c8] sm:$0xff]  ;;  %v137_v44 = vld [vmem:[%s7914_s0 + $0x3d8] sm:$0xff] }
  0x65   :  { %1841 = vmatprep.mubr.f32.mxu0 %v62_v28  ;;  %4080 = vmatpush1.bf16.msra.mxu1 %v4755_v56  ;;  %v70_v56 = vld [vmem:[%s7914_s0 + $0x1c0] sm:$0xff] }
  0x66   :  { %4065 = vmatprep.subr.bf16.mxu1 %v4577_v0  ;;  %v134_v28 = vld [vmem:[%s7914_s0 + $0x3c0] sm:$0xff] }
  0x67   :  { %1172 = vmatmul.mubr.f32.gmra.mrb[18].mxu1 %v59_v29  ;;  %v136_v29 = vld [vmem:[%s7914_s0 + $0x3d0] sm:$0xff] }
  0x68   :  { %1842 = vmatmul.mubr.f32.gmra.mrb[18].mxu0 %v61_v31  ;;  %1176 = vmatprep.mubr.f32.mxu1 %v65_v50  ;;  %v140_v31 = vld [vmem:[%s7914_s0 + $0x3f0] sm:$0xff]  ;;  %v142_v50 = vld [vmem:[%s7914_s0 + $0x400] sm:$0xff] }
  0x69   :  { %1846 = vmatprep.mubr.f32.mxu0 %v67_v32  ;;  %4081 = vmatpush1.bf16.msra.mxu1 %v4772_v62  ;;  %v75_v62 = vld [vmem:[%s7914_s0 + $0x1e8] sm:$0xff] }
  0x6a   :  { %4066 = vmatprep.subr.bf16.mxu1 %v4577_v0  ;;  %v139_v32 = vld [vmem:[%s7914_s0 + $0x3e8] sm:$0xff] }
  0x6b   :  { %1177 = vmatmul.mubr.f32.gmra.mrb[20].mxu1 %v64_v33  ;;  %v141_v33 = vld [vmem:[%s7914_s0 + $0x3f8] sm:$0xff] }
  0x6c   :  { %1847 = vmatmul.mubr.f32.gmra.mrb[20].mxu0 %v66_v35  ;;  %1181 = vmatprep.mubr.f32.mxu1 %v70_v56  ;;  %v145_v35 = vld [vmem:[%s7914_s0 + $0x418] sm:$0xff]  ;;  %v147_v56 = vld [vmem:[%s7914_s0 + $0x428] sm:$0xff] }
  0x6d   :  { %1851 = vmatprep.mubr.f32.mxu0 %v72_v37  ;;  %4082 = vmatpush1.bf16.msra.mxu1 %v4789_v5  ;;  %v80_v5 = vld [vmem:[%s7914_s0 + $0x210] sm:$0xff] }
  0x6e   :  { %4067 = vmatprep.subr.bf16.mxu1 %v4577_v0  ;;  %v144_v37 = vld [vmem:[%s7914_s0 + $0x410] sm:$0xff] }
  0x6f   :  { %1182 = vmatmul.mubr.f32.gmra.mrb[22].mxu1 %v69_v38  ;;  %v146_v38 = vld [vmem:[%s7914_s0 + $0x420] sm:$0xff] }
  0x70   :  { %1852 = vmatmul.mubr.f32.gmra.mrb[22].mxu0 %v71_v39  ;;  %1186 = vmatprep.mubr.f32.mxu1 %v75_v62  ;;  %v150_v39 = vld [vmem:[%s7914_s0 + $0x440] sm:$0xff]  ;;  %v152_v62 = vld [vmem:[%s7914_s0 + $0x450] sm:$0xff] }
  0x71   :  { %1856 = vmatprep.mubr.f32.mxu0 %v77_v40  ;;  %4083 = vmatpush1.bf16.msra.mxu1 %v4806_v13  ;;  %v85_v13 = vld [vmem:[%s7914_s0 + $0x238] sm:$0xff] }
  0x72   :  { %4068 = vmatprep.subr.bf16.mxu1 %v4577_v0  ;;  %v149_v40 = vld [vmem:[%s7914_s0 + $0x438] sm:$0xff] }
  0x73   :  { %1187 = vmatmul.mubr.f32.gmra.mrb[24].mxu1 %v74_v42  ;;  %v151_v42 = vld [vmem:[%s7914_s0 + $0x448] sm:$0xff] }
  0x74   :  { %1857 = vmatmul.mubr.f32.gmra.mrb[24].mxu0 %v76_v43  ;;  %1191 = vmatprep.mubr.f32.mxu1 %v80_v5  ;;  %v155_v43 = vld [vmem:[%s7914_s0 + $0x468] sm:$0xff]  ;;  %v157_v5 = vld [vmem:[%s7914_s0 + $0x478] sm:$0xff] }
  0x75   :  { %1861 = vmatprep.mubr.f32.mxu0 %v82_v45  ;;  %4084 = vmatpush1.bf16.msra.mxu1 %v4823_v20  ;;  %v90_v20 = vld [vmem:[%s7914_s0 + $0x260] sm:$0xff] }
  0x76   :  { %4069 = vmatprep.subr.bf16.mxu1 %v4577_v0  ;;  %v154_v45 = vld [vmem:[%s7914_s0 + $0x460] sm:$0xff] }
  0x77   :  { %1192 = vmatmul.mubr.f32.gmra.mrb[26].mxu1 %v79_v46  ;;  %v156_v46 = vld [vmem:[%s7914_s0 + $0x470] sm:$0xff] }
  0x78   :  { %1862 = vmatmul.mubr.f32.gmra.mrb[26].mxu0 %v81_v47  ;;  %1196 = vmatprep.mubr.f32.mxu1 %v85_v13  ;;  %v160_v47 = vld [vmem:[%s7914_s0 + $0x490] sm:$0xff]  ;;  %v162_v13 = vld [vmem:[%s7914_s0 + $0x4a0] sm:$0xff] }
  0x79   :  { %1866 = vmatprep.mubr.f32.mxu0 %v87_v48  ;;  %4085 = vmatpush1.bf16.msra.mxu1 %v4840_v27  ;;  %v690_v27 = vld [vmem:[%s7913_s1 + $0x238] sm:$0xff]  ;;  %v159_v48 = vld [vmem:[%s7914_s0 + $0x488] sm:$0xff] }
  0x7a   :  { %4070 = vmatprep.subr.bf16.mxu1 %v4577_v0  ;;  %v4054_v58 = vpack.c.bf16 %v690_v27, %v689_v54  ;;  %v170_v54 = vld [vmem:[%s7914_s0 + $0x4e0] sm:$0xff]  ;;  %v172_v27 = vld [vmem:[%s7914_s0 + $0x4f0] sm:$0xff] }
  0x7b   :  { %1197 = vmatmul.mubr.f32.gmra.mrb[28].mxu1 %v84_v49  ;;  %v161_v49 = vld [vmem:[%s7914_s0 + $0x498] sm:$0xff] }
  0x7c   :  { %1867 = vmatmul.mubr.f32.gmra.mrb[28].mxu0 %v86_v51  ;;  %1201 = vmatprep.mubr.f32.mxu1 %v90_v20  ;;  %v165_v51 = vld [vmem:[%s7914_s0 + $0x4b8] sm:$0xff]  ;;  %v167_v20 = vld [vmem:[%s7914_s0 + $0x4c8] sm:$0xff] }
  0x7d   :  { %1871 = vmatprep.mubr.f32.mxu0 %v92_v52  ;;  %4086 = vmatpush1.bf16.msra.mxu1 %v4857_v34  ;;  %v100_v34 = vld [vmem:[%s7914_s0 + $0x2b0] sm:$0xff] }
  0x7e   :  { %4071 = vmatprep.subr.bf16.mxu1 %v4577_v0  ;;  %4055 = vmatpush3.bf16.msra.mxu0 %v4054_v58  ;;  %v102_v0 = vld [vmem:[%s7914_s0 + $0x2c0] sm:$0xff]  ;;  %v164_v52 = vld [vmem:[%s7914_s0 + $0x4b0] sm:$0xff]  ;;  %v175_v58 = vld [vmem:[%s7914_s0 + $0x508] sm:$0xff] }
  0x7f   :  { %1202 = vmatmul.mubr.f32.gmra.mrb[30].mxu1 %v89_v53  ;;  %v166_v53 = vld [vmem:[%s7914_s0 + $0x4c0] sm:$0xff] }
  0x80   :  { %1872 = vmatmul.mubr.f32.gmra.mrb[30].mxu0 %v91_v55  ;;  %1206 = vmatprep.mubr.f32.mxu1 %v95_v57  ;;  %v169_v55 = vld [vmem:[%s7914_s0 + $0x4d8] sm:$0xff]  ;;  %v171_v57 = vld [vmem:[%s7914_s0 + $0x4e8] sm:$0xff] }
  0x81   :  { %1876 = vmatprep.mubr.f32.mxu0 %v97_v8  ;;  %4087 = vmatpush1.bf16.msra.mxu1 %v4874_v41  ;;  %v105_v41 = vld [vmem:[%s7914_s0 + $0x2d8] sm:$0xff] }
  0x82   :  { %v177_v8 = vld [vmem:[%s7914_s0 + $0x518] sm:$0xff] }
  0x83   :  { %1207 = vmatmul.mubr.f32.gmra.mrb[32].mxu1 %v94_v59  ;;  %v174_v59 = vld [vmem:[%s7914_s0 + $0x500] sm:$0xff] }
  0x84   :  { %1877 = vmatmul.mubr.f32.gmra.mrb[32].mxu0 %v96_v60  ;;  %1211 = vmatprep.mubr.f32.mxu1 %v100_v34  ;;  %v176_v60 = vld [vmem:[%s7914_s0 + $0x510] sm:$0xff] }
  0x85   :  { %1881 = vmatprep.mubr.f32.mxu0 %v102_v0  ;;  %v180_v34 = vld [vmem:[%s7914_s0 + $0x530] sm:$0xff]  ;;  %v182_v0 = vld [vmem:[%s7914_s0 + $0x540] sm:$0xff] }
  0x87   :  { %1212 = vmatmul.mubr.f32.gmra.mrb[34].mxu1 %v99_v61  ;;  %v179_v61 = vld [vmem:[%s7914_s0 + $0x528] sm:$0xff] }
  0x88   :  { %1882 = vmatmul.mubr.f32.gmra.mrb[34].mxu0 %v101_v63  ;;  %1216 = vmatprep.mubr.f32.mxu1 %v105_v41  ;;  %v181_v63 = vld [vmem:[%s7914_s0 + $0x538] sm:$0xff] }
  0x89   :  { %1886 = vmatprep.mubr.f32.mxu0 %v107_v1  ;;  %v185_v41 = vld [vmem:[%s7914_s0 + $0x558] sm:$0xff]  ;;  %v187_v1 = vld [vmem:[%s7914_s0 + $0x568] sm:$0xff] }
  0x8b   :  { %1217 = vmatmul.mubr.f32.gmra.mrb[36].mxu1 %v104_v2  ;;  %v184_v2 = vld [vmem:[%s7914_s0 + $0x550] sm:$0xff] }
  0x8c   :  { %1887 = vmatmul.mubr.f32.gmra.mrb[36].mxu0 %v106_v3  ;;  %1221 = vmatprep.mubr.f32.mxu1 %v110_v12  ;;  %v186_v3 = vld [vmem:[%s7914_s0 + $0x560] sm:$0xff] }
  0x8d   :  { %1891 = vmatprep.mubr.f32.mxu0 %v112_v4  ;;  %v190_v12 = vld [vmem:[%s7914_s0 + $0x580] sm:$0xff]  ;;  %v192_v4 = vld [vmem:[%s7914_s0 + $0x590] sm:$0xff] }
  0x8f   :  { %1222 = vmatmul.mubr.f32.gmra.mrb[38].mxu1 %v109_v6  ;;  %v189_v6 = vld [vmem:[%s7914_s0 + $0x578] sm:$0xff] }
  0x90   :  { %1892 = vmatmul.mubr.f32.gmra.mrb[38].mxu0 %v111_v7  ;;  %1226 = vmatprep.mubr.f32.mxu1 %v115_v18  ;;  %v191_v7 = vld [vmem:[%s7914_s0 + $0x588] sm:$0xff] }
  0x91   :  { %1896 = vmatprep.mubr.f32.mxu0 %v117_v9  ;;  %v195_v18 = vld [vmem:[%s7914_s0 + $0x5a8] sm:$0xff]  ;;  %v197_v9 = vld [vmem:[%s7914_s0 + $0x5b8] sm:$0xff] }
  0x93   :  { %1227 = vmatmul.mubr.f32.gmra.mrb[40].mxu1 %v114_v10  ;;  %v194_v10 = vld [vmem:[%s7914_s0 + $0x5a0] sm:$0xff] }
  0x94   :  { %1897 = vmatmul.mubr.f32.gmra.mrb[40].mxu0 %v116_v11  ;;  %1231 = vmatprep.mubr.f32.mxu1 %v120_v14  ;;  %v196_v11 = vld [vmem:[%s7914_s0 + $0x5b0] sm:$0xff] }
  0x95   :  { %1901 = vmatprep.mubr.f32.mxu0 %v122_v24  ;;  %v200_v14 = vld [vmem:[%s7914_s0 + $0x5d0] sm:$0xff]  ;;  %v202_v24 = vld [vmem:[%s7914_s0 + $0x5e0] sm:$0xff] }
  0x97   :  { %1232 = vmatmul.mubr.f32.gmra.mrb[42].mxu1 %v119_v15  ;;  %v199_v15 = vld [vmem:[%s7914_s0 + $0x5c8] sm:$0xff] }
  0x98   :  { %1902 = vmatmul.mubr.f32.gmra.mrb[42].mxu0 %v121_v16  ;;  %1236 = vmatprep.mubr.f32.mxu1 %v125_v17  ;;  %v201_v16 = vld [vmem:[%s7914_s0 + $0x5d8] sm:$0xff] }
  0x99   :  { %1906 = vmatprep.mubr.f32.mxu0 %v127_v30  ;;  %v205_v17 = vld [vmem:[%s7914_s0 + $0x5f8] sm:$0xff]  ;;  %v207_v30 = vld [vmem:[%s7914_s0 + $0x608] sm:$0xff] }
  0x9b   :  { %1237 = vmatmul.mubr.f32.gmra.mrb[44].mxu1 %v124_v19  ;;  %v204_v19 = vld [vmem:[%s7914_s0 + $0x5f0] sm:$0xff] }
  0x9c   :  { %1907 = vmatmul.mubr.f32.gmra.mrb[44].mxu0 %v126_v21  ;;  %1241 = vmatprep.mubr.f32.mxu1 %v130_v22  ;;  %v206_v21 = vld [vmem:[%s7914_s0 + $0x600] sm:$0xff] }
  0x9d   :  { %1911 = vmatprep.mubr.f32.mxu0 %v132_v36  ;;  %v210_v22 = vld [vmem:[%s7914_s0 + $0x620] sm:$0xff]  ;;  %v212_v36 = vld [vmem:[%s7914_s0 + $0x630] sm:$0xff] }
  0x9f   :  { %1242 = vmatmul.mubr.f32.gmra.mrb[46].mxu1 %v129_v23  ;;  %v209_v23 = vld [vmem:[%s7914_s0 + $0x618] sm:$0xff] }
  0xa0   :  { %1912 = vmatmul.mubr.f32.gmra.mrb[46].mxu0 %v131_v25  ;;  %1246 = vmatprep.mubr.f32.mxu1 %v135_v26  ;;  %v211_v25 = vld [vmem:[%s7914_s0 + $0x628] sm:$0xff] }
  0xa1   :  { %1916 = vmatprep.mubr.f32.mxu0 %v137_v44  ;;  %v215_v26 = vld [vmem:[%s7914_s0 + $0x648] sm:$0xff]  ;;  %v217_v44 = vld [vmem:[%s7914_s0 + $0x658] sm:$0xff] }
  0xa3   :  { %1247 = vmatmul.mubr.f32.gmra.mrb[48].mxu1 %v134_v28  ;;  %v214_v28 = vld [vmem:[%s7914_s0 + $0x640] sm:$0xff] }
  0xa4   :  { %1917 = vmatmul.mubr.f32.gmra.mrb[48].mxu0 %v136_v29  ;;  %1251 = vmatprep.mubr.f32.mxu1 %v140_v31  ;;  %v216_v29 = vld [vmem:[%s7914_s0 + $0x650] sm:$0xff] }
  0xa5   :  { %1921 = vmatprep.mubr.f32.mxu0 %v142_v50  ;;  %v220_v31 = vld [vmem:[%s7914_s0 + $0x670] sm:$0xff]  ;;  %v222_v50 = vld [vmem:[%s7914_s0 + $0x680] sm:$0xff] }
  0xa7   :  { %1252 = vmatmul.mubr.f32.gmra.mrb[50].mxu1 %v139_v32  ;;  %v219_v32 = vld [vmem:[%s7914_s0 + $0x668] sm:$0xff] }
  0xa8   :  { %1922 = vmatmul.mubr.f32.gmra.mrb[50].mxu0 %v141_v33  ;;  %1256 = vmatprep.mubr.f32.mxu1 %v145_v35  ;;  %v221_v33 = vld [vmem:[%s7914_s0 + $0x678] sm:$0xff] }
  0xa9   :  { %1926 = vmatprep.mubr.f32.mxu0 %v147_v56  ;;  %v225_v35 = vld [vmem:[%s7914_s0 + $0x698] sm:$0xff]  ;;  %v227_v56 = vld [vmem:[%s7914_s0 + $0x6a8] sm:$0xff] }
  0xab   :  { %1257 = vmatmul.mubr.f32.gmra.mrb[52].mxu1 %v144_v37  ;;  %v224_v37 = vld [vmem:[%s7914_s0 + $0x690] sm:$0xff] }
  0xac   :  { %1927 = vmatmul.mubr.f32.gmra.mrb[52].mxu0 %v146_v38  ;;  %1261 = vmatprep.mubr.f32.mxu1 %v150_v39  ;;  %v226_v38 = vld [vmem:[%s7914_s0 + $0x6a0] sm:$0xff] }
  0xad   :  { %1931 = vmatprep.mubr.f32.mxu0 %v152_v62  ;;  %v230_v39 = vld [vmem:[%s7914_s0 + $0x6c0] sm:$0xff]  ;;  %v232_v62 = vld [vmem:[%s7914_s0 + $0x6d0] sm:$0xff] }
  0xaf   :  { %1262 = vmatmul.mubr.f32.gmra.mrb[54].mxu1 %v149_v40  ;;  %v229_v40 = vld [vmem:[%s7914_s0 + $0x6b8] sm:$0xff] }
  0xb0   :  { %1932 = vmatmul.mubr.f32.gmra.mrb[54].mxu0 %v151_v42  ;;  %1266 = vmatprep.mubr.f32.mxu1 %v155_v43  ;;  %v231_v42 = vld [vmem:[%s7914_s0 + $0x6c8] sm:$0xff] }
  0xb1   :  { %1936 = vmatprep.mubr.f32.mxu0 %v157_v5  ;;  %v235_v43 = vld [vmem:[%s7914_s0 + $0x6e8] sm:$0xff]  ;;  %v237_v5 = vld [vmem:[%s7914_s0 + $0x6f8] sm:$0xff] }
  0xb3   :  { %1267 = vmatmul.mubr.f32.gmra.mrb[56].mxu1 %v154_v45  ;;  %v234_v45 = vld [vmem:[%s7914_s0 + $0x6e0] sm:$0xff] }
  0xb4   :  { %1937 = vmatmul.mubr.f32.gmra.mrb[56].mxu0 %v156_v46  ;;  %1271 = vmatprep.mubr.f32.mxu1 %v160_v47  ;;  %v236_v46 = vld [vmem:[%s7914_s0 + $0x6f0] sm:$0xff] }
  0xb5   :  { %1941 = vmatprep.mubr.f32.mxu0 %v162_v13  ;;  %v240_v47 = vld [vmem:[%s7914_s0 + $0x710] sm:$0xff]  ;;  %v242_v13 = vld [vmem:[%s7914_s0 + $0x720] sm:$0xff] }
  0xb7   :  { %1272 = vmatmul.mubr.f32.gmra.mrb[58].mxu1 %v159_v48  ;;  %v239_v48 = vld [vmem:[%s7914_s0 + $0x708] sm:$0xff] }
  0xb8   :  { %1942 = vmatmul.mubr.f32.gmra.mrb[58].mxu0 %v161_v49  ;;  %1276 = vmatprep.mubr.f32.mxu1 %v165_v51  ;;  %v241_v49 = vld [vmem:[%s7914_s0 + $0x718] sm:$0xff] }
  0xb9   :  { %1946 = vmatprep.mubr.f32.mxu0 %v167_v20  ;;  %v245_v51 = vld [vmem:[%s7914_s0 + $0x738] sm:$0xff]  ;;  %v247_v20 = vld [vmem:[%s7914_s0 + $0x748] sm:$0xff] }
  0xbb   :  { %1277 = vmatmul.mubr.f32.gmra.mrb[60].mxu1 %v164_v52  ;;  %v244_v52 = vld [vmem:[%s7914_s0 + $0x730] sm:$0xff] }
  0xbc   :  { %1947 = vmatmul.mubr.f32.gmra.mrb[60].mxu0 %v166_v53  ;;  %1281 = vmatprep.mubr.f32.mxu1 %v170_v54  ;;  %v246_v53 = vld [vmem:[%s7914_s0 + $0x740] sm:$0xff] }
  0xbd   :  { %1951 = vmatprep.mubr.f32.mxu0 %v172_v27  ;;  %v250_v54 = vld [vmem:[%s7914_s0 + $0x760] sm:$0xff]  ;;  %v252_v27 = vld [vmem:[%s7914_s0 + $0x770] sm:$0xff] }
  0xbf   :  { %1282 = vmatmul.mubr.f32.gmra.mrb[62].mxu1 %v169_v55  ;;  %v249_v55 = vld [vmem:[%s7914_s0 + $0x758] sm:$0xff] }
  0xc0   :  { %1952 = vmatmul.mubr.f32.gmra.mrb[62].mxu0 %v171_v57  ;;  %1286 = vmatprep.mubr.f32.mxu1 %v175_v58  ;;  %v251_v57 = vld [vmem:[%s7914_s0 + $0x768] sm:$0xff] }
  0xc1   :  { %1956 = vmatprep.mubr.f32.mxu0 %v177_v8  ;;  %v255_v58 = vld [vmem:[%s7914_s0 + $0x788] sm:$0xff]  ;;  %v257_v8 = vld [vmem:[%s7914_s0 + $0x798] sm:$0xff] }
  0xc3   :  { %1287 = vmatmul.mubr.f32.gmra.mrb[64].mxu1 %v174_v59  ;;  %v254_v59 = vld [vmem:[%s7914_s0 + $0x780] sm:$0xff] }
  0xc4   :  { %1957 = vmatmul.mubr.f32.gmra.mrb[64].mxu0 %v176_v60  ;;  %1291 = vmatprep.mubr.f32.mxu1 %v180_v34  ;;  %v256_v60 = vld [vmem:[%s7914_s0 + $0x790] sm:$0xff] }
  0xc5   :  { %1961 = vmatprep.mubr.f32.mxu0 %v182_v0  ;;  %v260_v34 = vld [vmem:[%s7914_s0 + $0x7b0] sm:$0xff]  ;;  %v262_v0 = vld [vmem:[%s7914_s0 + $0x7c0] sm:$0xff] }
  0xc7   :  { %1292 = vmatmul.mubr.f32.gmra.mrb[66].mxu1 %v179_v61  ;;  %v259_v61 = vld [vmem:[%s7914_s0 + $0x7a8] sm:$0xff] }
  0xc8   :  { %1962 = vmatmul.mubr.f32.gmra.mrb[66].mxu0 %v181_v63  ;;  %1296 = vmatprep.mubr.f32.mxu1 %v185_v41  ;;  %v261_v63 = vld [vmem:[%s7914_s0 + $0x7b8] sm:$0xff] }
  0xc9   :  { %1966 = vmatprep.mubr.f32.mxu0 %v187_v1  ;;  %v265_v41 = vld [vmem:[%s7914_s0 + $0x7d8] sm:$0xff]  ;;  %v267_v1 = vld [vmem:[%s7914_s0 + $0x7e8] sm:$0xff] }
  0xcb   :  { %1297 = vmatmul.mubr.f32.gmra.mrb[68].mxu1 %v184_v2  ;;  %v264_v2 = vld [vmem:[%s7914_s0 + $0x7d0] sm:$0xff] }
  0xcc   :  { %1967 = vmatmul.mubr.f32.gmra.mrb[68].mxu0 %v186_v3  ;;  %1301 = vmatprep.mubr.f32.mxu1 %v190_v12  ;;  %v266_v3 = vld [vmem:[%s7914_s0 + $0x7e0] sm:$0xff] }
  0xcd   :  { %1971 = vmatprep.mubr.f32.mxu0 %v192_v4  ;;  %v270_v12 = vld [vmem:[%s7914_s0 + $0x800] sm:$0xff]  ;;  %v272_v4 = vld [vmem:[%s7914_s0 + $0x810] sm:$0xff] }
  0xcf   :  { %1302 = vmatmul.mubr.f32.gmra.mrb[70].mxu1 %v189_v6  ;;  %v269_v6 = vld [vmem:[%s7914_s0 + $0x7f8] sm:$0xff] }
  0xd0   :  { %1972 = vmatmul.mubr.f32.gmra.mrb[70].mxu0 %v191_v7  ;;  %1306 = vmatprep.mubr.f32.mxu1 %v195_v18  ;;  %v271_v7 = vld [vmem:[%s7914_s0 + $0x808] sm:$0xff] }
  0xd1   :  { %1976 = vmatprep.mubr.f32.mxu0 %v197_v9  ;;  %v275_v18 = vld [vmem:[%s7914_s0 + $0x828] sm:$0xff]  ;;  %v277_v9 = vld [vmem:[%s7914_s0 + $0x838] sm:$0xff] }
  0xd3   :  { %1307 = vmatmul.mubr.f32.gmra.mrb[72].mxu1 %v194_v10  ;;  %v274_v10 = vld [vmem:[%s7914_s0 + $0x820] sm:$0xff] }
  0xd4   :  { %1977 = vmatmul.mubr.f32.gmra.mrb[72].mxu0 %v196_v11  ;;  %1311 = vmatprep.mubr.f32.mxu1 %v200_v14  ;;  %v276_v11 = vld [vmem:[%s7914_s0 + $0x830] sm:$0xff] }
  0xd5   :  { %1981 = vmatprep.mubr.f32.mxu0 %v202_v24  ;;  %v280_v14 = vld [vmem:[%s7914_s0 + $0x850] sm:$0xff]  ;;  %v282_v24 = vld [vmem:[%s7914_s0 + $0x860] sm:$0xff] }
  0xd7   :  { %1312 = vmatmul.mubr.f32.gmra.mrb[74].mxu1 %v199_v15  ;;  %v279_v15 = vld [vmem:[%s7914_s0 + $0x848] sm:$0xff] }
  0xd8   :  { %1982 = vmatmul.mubr.f32.gmra.mrb[74].mxu0 %v201_v16  ;;  %1316 = vmatprep.mubr.f32.mxu1 %v205_v17  ;;  %v281_v16 = vld [vmem:[%s7914_s0 + $0x858] sm:$0xff] }
  0xd9   :  { %1986 = vmatprep.mubr.f32.mxu0 %v207_v30  ;;  %v285_v17 = vld [vmem:[%s7914_s0 + $0x878] sm:$0xff] }
  0xdb   :  { %1317 = vmatmul.mubr.f32.gmra.mrb[76].mxu1 %v204_v19  ;;  %v287_v19 = vld [vmem:[%s7914_s0 + $0x888] sm:$0xff] }
  0xdc   :  { %1987 = vmatmul.mubr.f32.gmra.mrb[76].mxu0 %v206_v21  ;;  %1321 = vmatprep.mubr.f32.mxu1 %v210_v22  ;;  %v284_v22 = vld [vmem:[%s7914_s0 + $0x870] sm:$0xff] }
  0xdd   :  { %1991 = vmatprep.mubr.f32.mxu0 %v212_v36  ;;  %v286_v36 = vld [vmem:[%s7914_s0 + $0x880] sm:$0xff] }
  0xdf   :  { %1322 = vmatmul.mubr.f32.gmra.mrb[78].mxu1 %v209_v23  ;;  %v290_v23 = vld [vmem:[%s7914_s0 + $0x8a0] sm:$0xff] }
  0xe0   :  { %1992 = vmatmul.mubr.f32.gmra.mrb[78].mxu0 %v211_v25  ;;  %1326 = vmatprep.mubr.f32.mxu1 %v215_v26  ;;  %v292_v26 = vld [vmem:[%s7914_s0 + $0x8b0] sm:$0xff] }
  0xe1   :  { %1996 = vmatprep.mubr.f32.mxu0 %v217_v44 }
  0xe3   :  { %1327 = vmatmul.mubr.f32.gmra.mrb[80].mxu1 %v214_v28  ;;  %v289_v28 = vld [vmem:[%s7914_s0 + $0x898] sm:$0xff] }
  0xe4   :  { %1997 = vmatmul.mubr.f32.gmra.mrb[80].mxu0 %v216_v29  ;;  %1331 = vmatprep.mubr.f32.mxu1 %v220_v31  ;;  %v291_v29 = vld [vmem:[%s7914_s0 + $0x8a8] sm:$0xff] }
  0xe5   :  { %2001 = vmatprep.mubr.f32.mxu0 %v222_v50  ;;  %v295_v31 = vld [vmem:[%s7914_s0 + $0x8c8] sm:$0xff] }
  0xe7   :  { %1332 = vmatmul.mubr.f32.gmra.mrb[82].mxu1 %v219_v32  ;;  %v297_v32 = vld [vmem:[%s7914_s0 + $0x8d8] sm:$0xff] }
  0xe8   :  { %2002 = vmatmul.mubr.f32.gmra.mrb[82].mxu0 %v221_v33  ;;  %1336 = vmatprep.mubr.f32.mxu1 %v225_v35  ;;  %v294_v35 = vld [vmem:[%s7914_s0 + $0x8c0] sm:$0xff] }
  0xe9   :  { %2006 = vmatprep.mubr.f32.mxu0 %v227_v56  ;;  %v296_v56 = vld [vmem:[%s7914_s0 + $0x8d0] sm:$0xff] }
  0xeb   :  { %1337 = vmatmul.mubr.f32.gmra.mrb[84].mxu1 %v224_v37  ;;  %v300_v37 = vld [vmem:[%s7914_s0 + $0x8f0] sm:$0xff] }
  0xec   :  { %2007 = vmatmul.mubr.f32.gmra.mrb[84].mxu0 %v226_v38  ;;  %1341 = vmatprep.mubr.f32.mxu1 %v230_v39  ;;  %v302_v39 = vld [vmem:[%s7914_s0 + $0x900] sm:$0xff] }
  0xed   :  { %2011 = vmatprep.mubr.f32.mxu0 %v232_v62 }
  0xef   :  { %1342 = vmatmul.mubr.f32.gmra.mrb[86].mxu1 %v229_v40  ;;  %v299_v40 = vld [vmem:[%s7914_s0 + $0x8e8] sm:$0xff] }
  0xf0   :  { %2012 = vmatmul.mubr.f32.gmra.mrb[86].mxu0 %v231_v42  ;;  %1346 = vmatprep.mubr.f32.mxu1 %v235_v43  ;;  %v301_v42 = vld [vmem:[%s7914_s0 + $0x8f8] sm:$0xff] }
  0xf1   :  { %2016 = vmatprep.mubr.f32.mxu0 %v237_v5  ;;  %v305_v43 = vld [vmem:[%s7914_s0 + $0x918] sm:$0xff] }
  0xf3   :  { %1347 = vmatmul.mubr.f32.gmra.mrb[88].mxu1 %v234_v45  ;;  %v307_v45 = vld [vmem:[%s7914_s0 + $0x928] sm:$0xff] }
  0xf4   :  { %2017 = vmatmul.mubr.f32.gmra.mrb[88].mxu0 %v236_v46  ;;  %1351 = vmatprep.mubr.f32.mxu1 %v240_v47  ;;  %v304_v47 = vld [vmem:[%s7914_s0 + $0x910] sm:$0xff] }
  0xf5   :  { %2021 = vmatprep.mubr.f32.mxu0 %v242_v13  ;;  %v306_v13 = vld [vmem:[%s7914_s0 + $0x920] sm:$0xff] }
  0xf7   :  { %1352 = vmatmul.mubr.f32.gmra.mrb[90].mxu1 %v239_v48  ;;  %v310_v48 = vld [vmem:[%s7914_s0 + $0x940] sm:$0xff] }
  0xf8   :  { %2022 = vmatmul.mubr.f32.gmra.mrb[90].mxu0 %v241_v49  ;;  %1356 = vmatprep.mubr.f32.mxu1 %v245_v51  ;;  %v312_v51 = vld [vmem:[%s7914_s0 + $0x950] sm:$0xff] }
  0xf9   :  { %2026 = vmatprep.mubr.f32.mxu0 %v247_v20 }
  0xfb   :  { %1357 = vmatmul.mubr.f32.gmra.mrb[92].mxu1 %v244_v52  ;;  %v309_v52 = vld [vmem:[%s7914_s0 + $0x938] sm:$0xff] }
  0xfc   :  { %2027 = vmatmul.mubr.f32.gmra.mrb[92].mxu0 %v246_v53  ;;  %1361 = vmatprep.mubr.f32.mxu1 %v250_v54  ;;  %v311_v53 = vld [vmem:[%s7914_s0 + $0x948] sm:$0xff] }
  0xfd   :  { %2031 = vmatprep.mubr.f32.mxu0 %v252_v27  ;;  %v315_v54 = vld [vmem:[%s7914_s0 + $0x968] sm:$0xff] }
  0xff   :  { %1362 = vmatmul.mubr.f32.gmra.mrb[94].mxu1 %v249_v55  ;;  %v317_v55 = vld [vmem:[%s7914_s0 + $0x978] sm:$0xff] }
 0x100   :  { %2032 = vmatmul.mubr.f32.gmra.mrb[94].mxu0 %v251_v57  ;;  %1366 = vmatprep.mubr.f32.mxu1 %v255_v58  ;;  %v314_v58 = vld [vmem:[%s7914_s0 + $0x960] sm:$0xff] }
 0x101   :  { %2036 = vmatprep.mubr.f32.mxu0 %v257_v8  ;;  %v316_v8 = vld [vmem:[%s7914_s0 + $0x970] sm:$0xff] }
 0x103   :  { %1367 = vmatmul.mubr.f32.gmra.mrb[96].mxu1 %v254_v59  ;;  %v320_v59 = vld [vmem:[%s7914_s0 + $0x990] sm:$0xff] }
 0x104   :  { %2037 = vmatmul.mubr.f32.gmra.mrb[96].mxu0 %v256_v60  ;;  %1371 = vmatprep.mubr.f32.mxu1 %v260_v34 }
 0x105   :  { %2041 = vmatprep.mubr.f32.mxu0 %v262_v0  ;;  %v319_v0 = vld [vmem:[%s7914_s0 + $0x988] sm:$0xff] }
 0x107   :  { %1372 = vmatmul.mubr.f32.gmra.mrb[98].mxu1 %v259_v61  ;;  %v7917_v61 = vmov 0.0  }
 0x108   :  { %2042 = vmatmul.mubr.f32.gmra.mrb[98].mxu0 %v261_v63  ;;  %1376 = vmatprep.mubr.f32.mxu1 %v265_v41  ;;  %v18_v63 = vld [vmem:[%s7914_s0 + $0x20] sm:$0xff]  ;;  %v325_v41 = vld [vmem:[%s7914_s0 + $0x9b8] sm:$0xff] }
 0x109   :  { %2046 = vmatprep.mubr.f32.mxu0 %v267_v1 }
 0x10b   :  { %1377 = vmatmul.mubr.f32.gmra.mrb[100].mxu1 %v264_v2 }
 0x10c   :  { %2047 = vmatmul.mubr.f32.gmra.mrb[100].mxu0 %v266_v3  ;;  %1381 = vmatprep.mubr.f32.mxu1 %v270_v12  ;;  %v324_v3 = vld [vmem:[%s7914_s0 + $0x9b0] sm:$0xff]  ;;  %v23_v12 = vld [vmem:[%s7914_s0 + $0x48] sm:$0xff] }
 0x10d   :  { %2051 = vmatprep.mubr.f32.mxu0 %v272_v4  ;;  %v330_v4 = vld [vmem:[%s7914_s0 + $0x9e0] sm:$0xff] }
 0x10f   :  { %1382 = vmatmul.mubr.f32.gmra.mrb[102].mxu1 %v269_v6 }
 0x110   :  { %2052 = vmatmul.mubr.f32.gmra.mrb[102].mxu0 %v271_v7  ;;  %1386 = vmatprep.mubr.f32.mxu1 %v275_v18  ;;  %v329_v18 = vld [vmem:[%s7914_s0 + $0x9d8] sm:$0xff] }
 0x111   :  { %2056 = vmatprep.mubr.f32.mxu0 %v277_v9  ;;  %v28_v9 = vld [vmem:[%s7914_s0 + $0x70] sm:$0xff] }
 0x113   :  { %1387 = vmatmul.mubr.f32.gmra.mrb[104].mxu1 %v274_v10  ;;  %v335_v10 = vld [vmem:[%s7914_s0 + $0xa08] sm:$0xff] }
 0x114   :  { %2057 = vmatmul.mubr.f32.gmra.mrb[104].mxu0 %v276_v11  ;;  %1391 = vmatprep.mubr.f32.mxu1 %v280_v14 }
 0x115   :  { %2061 = vmatprep.mubr.f32.mxu0 %v282_v24  ;;  %v334_v24 = vld [vmem:[%s7914_s0 + $0xa00] sm:$0xff] }
 0x116   :  { %v5583_v30 = vpop.f32.mrb[0].mxu1 }
 0x117   :  { %1392 = vmatmul.mubr.f32.gmra.mrb[106].mxu1 %v279_v15  ;;  %v1130_v21 = vpop.f32.mrb[1].mxu1  ;;  %v33_v15 = vld [vmem:[%s7914_s0 + $0x98] sm:$0xff] }
 0x118   :  { %2062 = vmatmul.mubr.f32.gmra.mrb[106].mxu0 %v281_v16  ;;  %1396 = vmatprep.mubr.f32.mxu1 %v285_v17  ;;  %v340_v16 = vld [vmem:[%s7914_s0 + $0xa30] sm:$0xff]  ;;  %v339_v21 = vld [vmem:[%s7914_s0 + $0xa28] sm:$0xff] }
 0x119   :  { %2066 = vmatprep.mubr.f32.mxu0 %v287_v19 }
 0x11a   :  { %v5597_v25 = vpop.f32.mrb[2].mxu1 }
 0x11b   :  { %1397 = vmatmul.mubr.f32.gmra.mrb[108].mxu1 %v284_v22  ;;  %v1135_v44 = vpop.f32.mrb[3].mxu1  ;;  %v38_v22 = vld [vmem:[%s7914_s0 + $0xc0] sm:$0xff] }
 0x11c   :  { %2067 = vmatmul.mubr.f32.gmra.mrb[108].mxu0 %v286_v36  ;;  %1401 = vmatprep.mubr.f32.mxu1 %v290_v23  ;;  %v345_v36 = vld [vmem:[%s7914_s0 + $0xa58] sm:$0xff]  ;;  %v344_v44 = vld [vmem:[%s7914_s0 + $0xa50] sm:$0xff] }
 0x11d   :  { %2071 = vmatprep.mubr.f32.mxu0 %v292_v26 }
 0x11e   :  { %v5611_v50 = vpop.f32.mrb[4].mxu1 }
 0x11f   :  { %1402 = vmatmul.mubr.f32.gmra.mrb[110].mxu1 %v289_v28  ;;  %v1140_v33 = vpop.f32.mrb[5].mxu1  ;;  %v43_v28 = vld [vmem:[%s7914_s0 + $0xe8] sm:$0xff] }
 0x120   :  { %2072 = vmatmul.mubr.f32.gmra.mrb[110].mxu0 %v291_v29  ;;  %1406 = vmatprep.mubr.f32.mxu1 %v295_v31  ;;  %v350_v29 = vld [vmem:[%s7914_s0 + $0xa80] sm:$0xff]  ;;  %v349_v33 = vld [vmem:[%s7914_s0 + $0xa78] sm:$0xff] }
 0x121   :  { %2076 = vmatprep.mubr.f32.mxu0 %v297_v32 }
 0x122   :  { %v5625_v38 = vpop.f32.mrb[6].mxu1 }
 0x123   :  { %1407 = vmatmul.mubr.f32.gmra.mrb[112].mxu1 %v294_v35  ;;  %v1145_v62 = vpop.f32.mrb[7].mxu1  ;;  %v48_v35 = vld [vmem:[%s7914_s0 + $0x110] sm:$0xff] }
 0x124   :  { %2077 = vmatmul.mubr.f32.gmra.mrb[112].mxu0 %v296_v56  ;;  %1411 = vmatprep.mubr.f32.mxu1 %v300_v37  ;;  %v355_v56 = vld [vmem:[%s7914_s0 + $0xaa8] sm:$0xff]  ;;  %v354_v62 = vld [vmem:[%s7914_s0 + $0xaa0] sm:$0xff] }
 0x125   :  { %2081 = vmatprep.mubr.f32.mxu0 %v302_v39 }
 0x126   :  { %v5639_v5 = vpop.f32.mrb[8].mxu1 }
 0x127   :  { %1412 = vmatmul.mubr.f32.gmra.mrb[114].mxu1 %v299_v40  ;;  %v1150_v46 = vpop.f32.mrb[9].mxu1  ;;  %v53_v40 = vld [vmem:[%s7914_s0 + $0x138] sm:$0xff] }
 0x128   :  { %2082 = vmatmul.mubr.f32.gmra.mrb[114].mxu0 %v301_v42  ;;  %1416 = vmatprep.mubr.f32.mxu1 %v305_v43  ;;  %v360_v42 = vld [vmem:[%s7914_s0 + $0xad0] sm:$0xff]  ;;  %v359_v46 = vld [vmem:[%s7914_s0 + $0xac8] sm:$0xff] }
 0x129   :  { %2086 = vmatprep.mubr.f32.mxu0 %v307_v45 }
 0x12a   :  { %v5653_v49 = vpop.f32.mrb[10].mxu1 }
 0x12b   :  { %1417 = vmatmul.mubr.f32.gmra.mrb[116].mxu1 %v304_v47  ;;  %v1155_v20 = vpop.f32.mrb[11].mxu1  ;;  %v58_v47 = vld [vmem:[%s7914_s0 + $0x160] sm:$0xff] }
 0x12c   :  { %2087 = vmatmul.mubr.f32.gmra.mrb[116].mxu0 %v306_v13  ;;  %1421 = vmatprep.mubr.f32.mxu1 %v310_v48  ;;  %v365_v13 = vld [vmem:[%s7914_s0 + $0xaf8] sm:$0xff]  ;;  %v364_v20 = vld [vmem:[%s7914_s0 + $0xaf0] sm:$0xff] }
 0x12d   :  { %2091 = vmatprep.mubr.f32.mxu0 %v312_v51 }
 0x12e   :  { %v5667_v27 = vpop.f32.mrb[12].mxu1 }
 0x12f   :  { %1422 = vmatmul.mubr.f32.gmra.mrb[118].mxu1 %v309_v52  ;;  %v1160_v57 = vpop.f32.mrb[13].mxu1  ;;  %v63_v52 = vld [vmem:[%s7914_s0 + $0x188] sm:$0xff] }
 0x130   :  { %2092 = vmatmul.mubr.f32.gmra.mrb[118].mxu0 %v311_v53  ;;  %1426 = vmatprep.mubr.f32.mxu1 %v315_v54  ;;  %v370_v53 = vld [vmem:[%s7914_s0 + $0xb20] sm:$0xff]  ;;  %v369_v57 = vld [vmem:[%s7914_s0 + $0xb18] sm:$0xff] }
 0x131   :  { %2096 = vmatprep.mubr.f32.mxu0 %v317_v55 }
 0x132   :  { %v5681_v60 = vpop.f32.mrb[14].mxu1 }
 0x133   :  { %1427 = vmatmul.mubr.f32.gmra.mrb[120].mxu1 %v314_v58  ;;  %v1165_v34 = vpop.f32.mrb[15].mxu1  ;;  %v68_v58 = vld [vmem:[%s7914_s0 + $0x1b0] sm:$0xff] }
 0x134   :  { %2097 = vmatmul.mubr.f32.gmra.mrb[120].mxu0 %v316_v8  ;;  %1431 = vmatprep.mubr.f32.mxu1 %v320_v59  ;;  %v375_v8 = vld [vmem:[%s7914_s0 + $0xb48] sm:$0xff] }
 0x135   :  { %3585 = vmatprep.mubr.msk.f32.mxu0 %vm4578_vm0, %v7917_v61 }
 0x136   :  { %v5694_v1 = vpop.f32.mrb[16].mxu1 }
 0x137   :  { %1432 = vmatmul.mubr.f32.gmra.mrb[122].mxu1 %v319_v0  ;;  %v1170_v2 = vpop.f32.mrb[17].mxu1  ;;  %v374_v0 = vld [vmem:[%s7914_s0 + $0xb40] sm:$0xff] }
 0x138   :  { %3586 = vmatmul.mubr.msk.f32.vlgmr.msra.gmra.mrb[0].mxu0 %vm698_vm1, %v18_v63  ;;  %1436 = vmatprep.mubr.f32.mxu1 %v325_v41  ;;  %v73_v63 = vld [vmem:[%s7914_s0 + $0x1d8] sm:$0xff]  ;;  %v380_v41 = vld [vmem:[%s7914_s0 + $0xb70] sm:$0xff] }
 0x139   :  { %3588 = vmatprep.mubr.msk.f32.mxu0 %vm4578_vm0, %v7917_v61 }
 0x13a   :  { %v5708_v6 = vpop.f32.mrb[18].mxu1 }
 0x13b   :  { %1437 = vmatmul.mubr.f32.gmra.mrb[124].mxu1 %v324_v3  ;;  %v1175_v7 = vpop.f32.mrb[19].mxu1 }
 0x13c   :  { %3589 = vmatmul.mubr.msk.f32.gmra.mrb[2].mxu0 %vm698_vm1, %v23_v12  ;;  %1441 = vmatprep.mubr.f32.mxu1 %v330_v4  ;;  %v379_v12 = vld [vmem:[%s7914_s0 + $0xb68] sm:$0xff]  ;;  %v78_v4 = vld [vmem:[%s7914_s0 + $0x200] sm:$0xff]  ;;  %v385_v7 = vld [vmem:[%s7914_s0 + $0xb98] sm:$0xff] }
 0x13d   :  { %3591 = vmatprep.mubr.msk.f32.mxu0 %vm4578_vm0, %v7917_v61 }
 0x13e   :  { %v5722_v11 = vpop.f32.mrb[20].mxu1 }
 0x13f   :  { %1442 = vmatmul.mubr.f32.gmra.mrb[126].mxu1 %v329_v18  ;;  %v1180_v14 = vpop.f32.mrb[21].mxu1 }
 0x140   :  { %3592 = vmatmul.mubr.msk.f32.gmra.mrb[4].mxu0 %vm698_vm1, %v28_v9  ;;  %1446 = vmatprep.mubr.f32.mxu1 %v335_v10  ;;  %v384_v10 = vld [vmem:[%s7914_s0 + $0xb90] sm:$0xff]  ;;  %v83_v14 = vld [vmem:[%s7914_s0 + $0x228] sm:$0xff] }
 0x141   :  { %3594 = vmatprep.mubr.msk.f32.mxu0 %vm4578_vm0, %v7917_v61 }
 0x142   :  { %v5736_v17 = vpop.f32.mrb[22].mxu1 }
 0x143   :  { %1447 = vmatmul.mubr.f32.gmra.mrb[128].mxu1 %v334_v24  ;;  %v1185_v19 = vpop.f32.mrb[23].mxu1  ;;  %v390_v24 = vld [vmem:[%s7914_s0 + $0xbc0] sm:$0xff] }
 0x144   :  { %3595 = vmatmul.mubr.msk.f32.gmra.mrb[6].mxu0 %vm698_vm1, %v33_v15  ;;  %1451 = vmatprep.mubr.f32.mxu1 %v340_v16  ;;  %v389_v19 = vld [vmem:[%s7914_s0 + $0xbb8] sm:$0xff] }
 0x145   :  { %3597 = vmatprep.mubr.msk.f32.mxu0 %vm4578_vm0, %v7917_v61 }
 0x146   :  { %v5750_v23 = vpop.f32.mrb[24].mxu1 }
 0x147   :  { %1452 = vmatmul.mubr.f32.gmra.mrb[130].mxu1 %v339_v21  ;;  %v1190_v26 = vpop.f32.mrb[25].mxu1  ;;  %v88_v21 = vld [vmem:[%s7914_s0 + $0x250] sm:$0xff] }
 0x148   :  { %3598 = vmatmul.mubr.msk.f32.gmra.mrb[8].mxu0 %vm698_vm1, %v38_v22  ;;  %1456 = vmatprep.mubr.f32.mxu1 %v345_v36  ;;  %v395_v22 = vld [vmem:[%s7914_s0 + $0xbe8] sm:$0xff] }
 0x149   :  { %3600 = vmatprep.mubr.msk.f32.mxu0 %vm4578_vm0, %v7917_v61 }
 0x14a   :  { %v5764_v31 = vpop.f32.mrb[26].mxu1 }
 0x14b   :  { %1457 = vmatmul.mubr.f32.gmra.mrb[132].mxu1 %v344_v44  ;;  %v1195_v32 = vpop.f32.mrb[27].mxu1  ;;  %v394_v44 = vld [vmem:[%s7914_s0 + $0xbe0] sm:$0xff] }
 0x14c   :  { %3601 = vmatmul.mubr.msk.f32.gmra.mrb[10].mxu0 %vm698_vm1, %v43_v28  ;;  %1461 = vmatprep.mubr.f32.mxu1 %v350_v29  ;;  %v93_v28 = vld [vmem:[%s7914_s0 + $0x278] sm:$0xff]  ;;  %v400_v29 = vld [vmem:[%s7914_s0 + $0xc10] sm:$0xff] }
 0x14d   :  { %3603 = vmatprep.mubr.msk.f32.mxu0 %vm4578_vm0, %v7917_v61 }
 0x14e   :  { %v5778_v37 = vpop.f32.mrb[28].mxu1 }
 0x14f   :  { %1462 = vmatmul.mubr.f32.gmra.mrb[134].mxu1 %v349_v33  ;;  %v1200_v39 = vpop.f32.mrb[29].mxu1 }
 0x150   :  { %3604 = vmatmul.mubr.msk.f32.gmra.mrb[12].mxu0 %vm698_vm1, %v48_v35  ;;  %1466 = vmatprep.mubr.f32.mxu1 %v355_v56  ;;  %v399_v35 = vld [vmem:[%s7914_s0 + $0xc08] sm:$0xff]  ;;  %v98_v56 = vld [vmem:[%s7914_s0 + $0x2a0] sm:$0xff]  ;;  %v405_v39 = vld [vmem:[%s7914_s0 + $0xc38] sm:$0xff] }
 0x151   :  { %3606 = vmatprep.mubr.msk.f32.mxu0 %vm4578_vm0, %v7917_v61 }
 0x152   :  { %v5792_v43 = vpop.f32.mrb[30].mxu1 }
 0x153   :  { %1467 = vmatmul.mubr.f32.gmra.mrb[136].mxu1 %v354_v62  ;;  %v1205_v45 = vpop.f32.mrb[31].mxu1 }
 0x154   :  { %3607 = vmatmul.mubr.msk.f32.gmra.mrb[14].mxu0 %vm698_vm1, %v53_v40  ;;  %1471 = vmatprep.mubr.f32.mxu1 %v360_v42  ;;  %v404_v42 = vld [vmem:[%s7914_s0 + $0xc30] sm:$0xff]  ;;  %v103_v45 = vld [vmem:[%s7914_s0 + $0x2c8] sm:$0xff] }
 0x155   :  { %3609 = vmatprep.mubr.msk.f32.mxu0 %vm4578_vm0, %v7917_v61 }
 0x156   :  { %v5806_v48 = vpop.f32.mrb[32].mxu1 }
 0x157   :  { %1472 = vmatmul.mubr.f32.gmra.mrb[138].mxu1 %v359_v46  ;;  %v1210_v51 = vpop.f32.mrb[33].mxu1  ;;  %v410_v46 = vld [vmem:[%s7914_s0 + $0xc60] sm:$0xff] }
 0x158   :  { %3610 = vmatmul.mubr.msk.f32.gmra.mrb[16].mxu0 %vm698_vm1, %v58_v47  ;;  %1476 = vmatprep.mubr.f32.mxu1 %v365_v13  ;;  %v409_v51 = vld [vmem:[%s7914_s0 + $0xc58] sm:$0xff] }
 0x159   :  { %3612 = vmatprep.mubr.msk.f32.mxu0 %vm4578_vm0, %v7917_v61 }
 0x15a   :  { %v5820_v54 = vpop.f32.mrb[34].mxu1 }
 0x15b   :  { %1477 = vmatmul.mubr.f32.gmra.mrb[140].mxu1 %v364_v20  ;;  %v1215_v55 = vpop.f32.mrb[35].mxu1  ;;  %v108_v20 = vld [vmem:[%s7914_s0 + $0x2f0] sm:$0xff] }
 0x15c   :  { %3613 = vmatmul.mubr.msk.f32.gmra.mrb[18].mxu0 %vm698_vm1, %v63_v52  ;;  %1481 = vmatprep.mubr.f32.mxu1 %v370_v53  ;;  %v415_v52 = vld [vmem:[%s7914_s0 + $0xc88] sm:$0xff] }
 0x15d   :  { %3615 = vmatprep.mubr.msk.f32.mxu0 %vm4578_vm0, %v7917_v61 }
 0x15e   :  { %v5834_v59 = vpop.f32.mrb[36].mxu1 }
 0x15f   :  { %1482 = vmatmul.mubr.f32.gmra.mrb[142].mxu1 %v369_v57  ;;  %v1220_v34 = vpop.f32.mrb[37].mxu1  ;;  %v414_v57 = vld [vmem:[%s7914_s0 + $0xc80] sm:$0xff] }
 0x160   :  { %3616 = vmatmul.mubr.msk.f32.gmra.mrb[20].mxu0 %vm698_vm1, %v68_v58  ;;  %1486 = vmatprep.mubr.f32.mxu1 %v375_v8  ;;  %v113_v58 = vld [vmem:[%s7914_s0 + $0x318] sm:$0xff]  ;;  %v420_v8 = vld [vmem:[%s7914_s0 + $0xcb0] sm:$0xff] }
 0x161   :  { %3618 = vmatprep.mubr.msk.f32.mxu0 %vm4578_vm0, %v7917_v61 }
 0x162   :  { %v5848_v2 = vpop.f32.mrb[38].mxu1 }
 0x163   :  { %1487 = vmatmul.mubr.f32.gmra.mrb[144].mxu1 %v374_v0  ;;  %v1225_v3 = vpop.f32.mrb[39].mxu1 }
 0x164   :  { %3619 = vmatmul.mubr.msk.f32.gmra.mrb[22].mxu0 %vm698_vm1, %v73_v63  ;;  %1491 = vmatprep.mubr.f32.mxu1 %v380_v41  ;;  %v419_v63 = vld [vmem:[%s7914_s0 + $0xca8] sm:$0xff]  ;;  %v118_v41 = vld [vmem:[%s7914_s0 + $0x340] sm:$0xff]  ;;  %v425_v3 = vld [vmem:[%s7914_s0 + $0xcd8] sm:$0xff] }
 0x165   :  { %3621 = vmatprep.mubr.msk.f32.mxu0 %vm4578_vm0, %v7917_v61 }
 0x166   :  { %v5862_v18 = vpop.f32.mrb[40].mxu1 }
 0x167   :  { %1492 = vmatmul.mubr.f32.gmra.mrb[146].mxu1 %v379_v12  ;;  %v1230_v9 = vpop.f32.mrb[41].mxu1 }
 0x168   :  { %3622 = vmatmul.mubr.msk.f32.gmra.mrb[24].mxu0 %vm698_vm1, %v78_v4  ;;  %1496 = vmatprep.mubr.f32.mxu1 %v385_v7  ;;  %v424_v7 = vld [vmem:[%s7914_s0 + $0xcd0] sm:$0xff]  ;;  %v123_v9 = vld [vmem:[%s7914_s0 + $0x368] sm:$0xff] }
 0x169   :  { %3624 = vmatprep.mubr.msk.f32.mxu0 %vm4578_vm0, %v7917_v61 }
 0x16a   :  { %v5876_v15 = vpop.f32.mrb[42].mxu1 }
 0x16b   :  { %1497 = vmatmul.mubr.f32.gmra.mrb[148].mxu1 %v384_v10  ;;  %v1235_v16 = vpop.f32.mrb[43].mxu1  ;;  %v430_v10 = vld [vmem:[%s7914_s0 + $0xd00] sm:$0xff] }
 0x16c   :  { %3625 = vmatmul.mubr.msk.f32.gmra.mrb[26].mxu0 %vm698_vm1, %v83_v14  ;;  %1501 = vmatprep.mubr.f32.mxu1 %v390_v24  ;;  %v429_v16 = vld [vmem:[%s7914_s0 + $0xcf8] sm:$0xff] }
 0x16d   :  { %3627 = vmatprep.mubr.msk.f32.mxu0 %vm4578_vm0, %v7917_v61 }
 0x16e   :  { %v5890_v36 = vpop.f32.mrb[44].mxu1 }
 0x16f   :  { %1502 = vmatmul.mubr.f32.gmra.mrb[150].mxu1 %v389_v19  ;;  %v1240_v26 = vpop.f32.mrb[45].mxu1  ;;  %v128_v19 = vld [vmem:[%s7914_s0 + $0x390] sm:$0xff] }
 0x170   :  { %3628 = vmatmul.mubr.msk.f32.gmra.mrb[28].mxu0 %vm698_vm1, %v88_v21  ;;  %1506 = vmatprep.mubr.f32.mxu1 %v395_v22  ;;  %v435_v21 = vld [vmem:[%s7914_s0 + $0xd28] sm:$0xff] }
 0x171   :  { %3630 = vmatprep.mubr.msk.f32.mxu0 %vm4578_vm0, %v7917_v61 }
 0x172   :  { %v5904_v32 = vpop.f32.mrb[46].mxu1 }
 0x173   :  { %1507 = vmatmul.mubr.f32.gmra.mrb[152].mxu1 %v394_v44  ;;  %v1245_v33 = vpop.f32.mrb[47].mxu1  ;;  %v434_v44 = vld [vmem:[%s7914_s0 + $0xd20] sm:$0xff] }
 0x174   :  { %3631 = vmatmul.mubr.msk.f32.gmra.mrb[30].mxu0 %vm698_vm1, %v93_v28  ;;  %1511 = vmatprep.mubr.f32.mxu1 %v400_v29  ;;  %v133_v28 = vld [vmem:[%s7914_s0 + $0x3b8] sm:$0xff]  ;;  %v440_v29 = vld [vmem:[%s7914_s0 + $0xd50] sm:$0xff] }
 0x175   :  { %3633 = vmatprep.mubr.msk.f32.mxu0 %vm4578_vm0, %v7917_v61 }
 0x176   :  { %v5918_v62 = vpop.f32.mrb[48].mxu1 }
 0x177   :  { %1512 = vmatmul.mubr.f32.gmra.mrb[154].mxu1 %v399_v35  ;;  %v1250_v40 = vpop.f32.mrb[49].mxu1 }
 0x178   :  { %3634 = vmatmul.mubr.msk.f32.gmra.mrb[32].mxu0 %vm698_vm1, %v98_v56  ;;  %1516 = vmatprep.mubr.f32.mxu1 %v405_v39  ;;  %v439_v56 = vld [vmem:[%s7914_s0 + $0xd48] sm:$0xff]  ;;  %v138_v39 = vld [vmem:[%s7914_s0 + $0x3e0] sm:$0xff]  ;;  %v445_v40 = vld [vmem:[%s7914_s0 + $0xd78] sm:$0xff] }
 0x179   :  { %3636 = vmatprep.mubr.msk.f32.mxu0 %vm4578_vm0, %v7917_v61 }
 0x17a   :  { %v5932_v47 = vpop.f32.mrb[50].mxu1 }
 0x17b   :  { %1517 = vmatmul.mubr.f32.gmra.mrb[156].mxu1 %v404_v42  ;;  %v1255_v13 = vpop.f32.mrb[51].mxu1 }
 0x17c   :  { %3637 = vmatmul.mubr.msk.f32.gmra.mrb[34].mxu0 %vm698_vm1, %v103_v45  ;;  %1521 = vmatprep.mubr.f32.mxu1 %v410_v46  ;;  %v444_v46 = vld [vmem:[%s7914_s0 + $0xd70] sm:$0xff]  ;;  %v143_v13 = vld [vmem:[%s7914_s0 + $0x408] sm:$0xff] }
 0x17d   :  { %3639 = vmatprep.mubr.msk.f32.mxu0 %vm4578_vm0, %v7917_v61 }
 0x17e   :  { %v5946_v53 = vpop.f32.mrb[52].mxu1 }
 0x17f   :  { %1522 = vmatmul.mubr.f32.gmra.mrb[158].mxu1 %v409_v51  ;;  %v1260_v55 = vpop.f32.mrb[53].mxu1  ;;  %v450_v51 = vld [vmem:[%s7914_s0 + $0xda0] sm:$0xff] }
 0x180   :  { %3640 = vmatmul.mubr.msk.f32.gmra.mrb[36].mxu0 %vm698_vm1, %v108_v20  ;;  %1526 = vmatprep.mubr.f32.mxu1 %v415_v52  ;;  %v449_v55 = vld [vmem:[%s7914_s0 + $0xd98] sm:$0xff] }
 0x181   :  { %3642 = vmatprep.mubr.msk.f32.mxu0 %vm4578_vm0, %v7917_v61 }
 0x182   :  { %v5960_v34 = vpop.f32.mrb[54].mxu1 }
 0x183   :  { %1527 = vmatmul.mubr.f32.gmra.mrb[160].mxu1 %v414_v57  ;;  %v1265_v0 = vpop.f32.mrb[55].mxu1  ;;  %v148_v57 = vld [vmem:[%s7914_s0 + $0x430] sm:$0xff] }
 0x184   :  { %3643 = vmatmul.mubr.msk.f32.gmra.mrb[38].mxu0 %vm698_vm1, %v113_v58  ;;  %1531 = vmatprep.mubr.f32.mxu1 %v420_v8  ;;  %v455_v58 = vld [vmem:[%s7914_s0 + $0xdc8] sm:$0xff] }
 0x185   :  { %3645 = vmatprep.mubr.msk.f32.mxu0 %vm4578_vm0, %v7917_v61 }
 0x186   :  { %v5974_v12 = vpop.f32.mrb[56].mxu1 }
 0x187   :  { %1532 = vmatmul.mubr.f32.gmra.mrb[162].mxu1 %v419_v63  ;;  %v1270_v4 = vpop.f32.mrb[57].mxu1  ;;  %v454_v63 = vld [vmem:[%s7914_s0 + $0xdc0] sm:$0xff] }
 0x188   :  { %3646 = vmatmul.mubr.msk.f32.gmra.mrb[40].mxu0 %vm698_vm1, %v118_v41  ;;  %1536 = vmatprep.mubr.f32.mxu1 %v425_v3  ;;  %v153_v41 = vld [vmem:[%s7914_s0 + $0x458] sm:$0xff]  ;;  %v460_v3 = vld [vmem:[%s7914_s0 + $0xdf0] sm:$0xff] }
 0x189   :  { %3648 = vmatprep.mubr.msk.f32.mxu0 %vm4578_vm0, %v7917_v61 }
 0x18a   :  { %v5988_v14 = vpop.f32.mrb[58].mxu1 }
 0x18b   :  { %1537 = vmatmul.mubr.f32.gmra.mrb[164].mxu1 %v424_v7  ;;  %v1275_v24 = vpop.f32.mrb[59].mxu1 }
 0x18c   :  { %3649 = vmatmul.mubr.msk.f32.gmra.mrb[42].mxu0 %vm698_vm1, %v123_v9  ;;  %1541 = vmatprep.mubr.f32.mxu1 %v430_v10  ;;  %v459_v9 = vld [vmem:[%s7914_s0 + $0xde8] sm:$0xff]  ;;  %v158_v10 = vld [vmem:[%s7914_s0 + $0x480] sm:$0xff]  ;;  %v465_v24 = vld [vmem:[%s7914_s0 + $0xe18] sm:$0xff] }
 0x18d   :  { %3651 = vmatprep.mubr.msk.f32.mxu0 %vm4578_vm0, %v7917_v61 }
 0x18e   :  { %v6002_v22 = vpop.f32.mrb[60].mxu1 }
 0x18f   :  { %1542 = vmatmul.mubr.f32.gmra.mrb[166].mxu1 %v429_v16  ;;  %v1280_v26 = vpop.f32.mrb[61].mxu1 }
 0x190   :  { %3652 = vmatmul.mubr.msk.f32.gmra.mrb[44].mxu0 %vm698_vm1, %v128_v19  ;;  %1546 = vmatprep.mubr.f32.mxu1 %v435_v21  ;;  %v464_v21 = vld [vmem:[%s7914_s0 + $0xe10] sm:$0xff]  ;;  %v163_v26 = vld [vmem:[%s7914_s0 + $0x4a8] sm:$0xff] }
 0x191   :  { %3654 = vmatprep.mubr.msk.f32.mxu0 %vm4578_vm0, %v7917_v61 }
 0x192   :  { %v6016_v33 = vpop.f32.mrb[62].mxu1 }
 0x193   :  { %1547 = vmatmul.mubr.f32.gmra.mrb[168].mxu1 %v434_v44  ;;  %v1285_v35 = vpop.f32.mrb[63].mxu1  ;;  %v470_v44 = vld [vmem:[%s7914_s0 + $0xe40] sm:$0xff] }
 0x194   :  { %3655 = vmatmul.mubr.msk.f32.gmra.mrb[46].mxu0 %vm698_vm1, %v133_v28  ;;  %1551 = vmatprep.mubr.f32.mxu1 %v440_v29  ;;  %v469_v35 = vld [vmem:[%s7914_s0 + $0xe38] sm:$0xff] }
 0x195   :  { %3657 = vmatprep.mubr.msk.f32.mxu0 %vm4578_vm0, %v7917_v61 }
 0x196   :  { %v6030_v42 = vpop.f32.mrb[64].mxu1 }
 0x197   :  { %1552 = vmatmul.mubr.f32.gmra.mrb[170].mxu1 %v439_v56  ;;  %v1290_v45 = vpop.f32.mrb[65].mxu1  ;;  %v168_v56 = vld [vmem:[%s7914_s0 + $0x4d0] sm:$0xff] }
 0x198   :  { %3658 = vmatmul.mubr.msk.f32.gmra.mrb[48].mxu0 %vm698_vm1, %v138_v39  ;;  %1556 = vmatprep.mubr.f32.mxu1 %v445_v40  ;;  %v475_v39 = vld [vmem:[%s7914_s0 + $0xe68] sm:$0xff] }
 0x199   :  { %3660 = vmatprep.mubr.msk.f32.mxu0 %vm4578_vm0, %v7917_v61 }
 0x19a   :  { %v6044_v20 = vpop.f32.mrb[66].mxu1 }
 0x19b   :  { %1557 = vmatmul.mubr.f32.gmra.mrb[172].mxu1 %v444_v46  ;;  %v1295_v52 = vpop.f32.mrb[67].mxu1  ;;  %v474_v46 = vld [vmem:[%s7914_s0 + $0xe60] sm:$0xff] }
 0x19c   :  { %3661 = vmatmul.mubr.msk.f32.gmra.mrb[50].mxu0 %vm698_vm1, %v143_v13  ;;  %1561 = vmatprep.mubr.f32.mxu1 %v450_v51  ;;  %v173_v13 = vld [vmem:[%s7914_s0 + $0x4f8] sm:$0xff]  ;;  %v480_v51 = vld [vmem:[%s7914_s0 + $0xe90] sm:$0xff] }
 0x19d   :  { %3663 = vmatprep.mubr.msk.f32.mxu0 %vm4578_vm0, %v7917_v61 }
 0x19e   :  { %v6058_v8 = vpop.f32.mrb[68].mxu1 }
 0x19f   :  { %1562 = vmatmul.mubr.f32.gmra.mrb[174].mxu1 %v449_v55  ;;  %v1300_v0 = vpop.f32.mrb[69].mxu1 }
 0x1a0   :  { %3664 = vmatmul.mubr.msk.f32.gmra.mrb[52].mxu0 %vm698_vm1, %v148_v57  ;;  %1566 = vmatprep.mubr.f32.mxu1 %v455_v58  ;;  %v479_v57 = vld [vmem:[%s7914_s0 + $0xe88] sm:$0xff]  ;;  %v178_v58 = vld [vmem:[%s7914_s0 + $0x520] sm:$0xff]  ;;  %v485_v0 = vld [vmem:[%s7914_s0 + $0xeb8] sm:$0xff] }
 0x1a1   :  { %3666 = vmatprep.mubr.msk.f32.mxu0 %vm4578_vm0, %v7917_v61 }
 0x1a2   :  { %v6072_v4 = vpop.f32.mrb[70].mxu1 }
 0x1a3   :  { %1567 = vmatmul.mubr.f32.gmra.mrb[176].mxu1 %v454_v63  ;;  %v1305_v7 = vpop.f32.mrb[71].mxu1 }
 0x1a4   :  { %3667 = vmatmul.mubr.msk.f32.gmra.mrb[54].mxu0 %vm698_vm1, %v153_v41  ;;  %1571 = vmatprep.mubr.f32.mxu1 %v460_v3  ;;  %v484_v3 = vld [vmem:[%s7914_s0 + $0xeb0] sm:$0xff]  ;;  %v183_v7 = vld [vmem:[%s7914_s0 + $0x548] sm:$0xff] }
 0x1a5   :  { %3669 = vmatprep.mubr.msk.f32.mxu0 %vm4578_vm0, %v7917_v61 }
 0x1a6   :  { %v6086_v16 = vpop.f32.mrb[72].mxu1 }
 0x1a7   :  { %1572 = vmatmul.mubr.f32.gmra.mrb[178].mxu1 %v459_v9  ;;  %v1310_v19 = vpop.f32.mrb[73].mxu1  ;;  %v490_v9 = vld [vmem:[%s7914_s0 + $0xee0] sm:$0xff] }
 0x1a8   :  { %3670 = vmatmul.mubr.msk.f32.gmra.mrb[56].mxu0 %vm698_vm1, %v158_v10  ;;  %1576 = vmatprep.mubr.f32.mxu1 %v465_v24  ;;  %v489_v19 = vld [vmem:[%s7914_s0 + $0xed8] sm:$0xff] }
 0x1a9   :  { %3672 = vmatprep.mubr.msk.f32.mxu0 %vm4578_vm0, %v7917_v61 }
 0x1aa   :  { %v6100_v28 = vpop.f32.mrb[74].mxu1 }
 0x1ab   :  { %1577 = vmatmul.mubr.f32.gmra.mrb[180].mxu1 %v464_v21  ;;  %v1315_v29 = vpop.f32.mrb[75].mxu1  ;;  %v188_v21 = vld [vmem:[%s7914_s0 + $0x570] sm:$0xff] }
 0x1ac   :  { %3673 = vmatmul.mubr.msk.f32.gmra.mrb[58].mxu0 %vm698_vm1, %v163_v26  ;;  %1581 = vmatprep.mubr.f32.mxu1 %v470_v44  ;;  %v495_v26 = vld [vmem:[%s7914_s0 + $0xf08] sm:$0xff] }
 0x1ad   :  { %3675 = vmatprep.mubr.msk.f32.mxu0 %vm4578_vm0, %v7917_v61 }
 0x1ae   :  { %v6114_v40 = vpop.f32.mrb[76].mxu1 }
 0x1af   :  { %1582 = vmatmul.mubr.f32.gmra.mrb[182].mxu1 %v469_v35  ;;  %v1320_v45 = vpop.f32.mrb[77].mxu1  ;;  %v494_v35 = vld [vmem:[%s7914_s0 + $0xf00] sm:$0xff] }
 0x1b0   :  { %3676 = vmatmul.mubr.msk.f32.gmra.mrb[60].mxu0 %vm698_vm1, %v168_v56  ;;  %1586 = vmatprep.mubr.f32.mxu1 %v475_v39  ;;  %v193_v56 = vld [vmem:[%s7914_s0 + $0x598] sm:$0xff]  ;;  %v500_v39 = vld [vmem:[%s7914_s0 + $0xf30] sm:$0xff] }
 0x1b1   :  { %3678 = vmatprep.mubr.msk.f32.mxu0 %vm4578_vm0, %v7917_v61 }
 0x1b2   :  { %v6128_v52 = vpop.f32.mrb[78].mxu1 }
 0x1b3   :  { %1587 = vmatmul.mubr.f32.gmra.mrb[184].mxu1 %v474_v46  ;;  %v1325_v55 = vpop.f32.mrb[79].mxu1 }
 0x1b4   :  { %3679 = vmatmul.mubr.msk.f32.gmra.mrb[62].mxu0 %vm698_vm1, %v173_v13  ;;  %1591 = vmatprep.mubr.f32.mxu1 %v480_v51  ;;  %v499_v13 = vld [vmem:[%s7914_s0 + $0xf28] sm:$0xff]  ;;  %v198_v51 = vld [vmem:[%s7914_s0 + $0x5c0] sm:$0xff]  ;;  %v505_v55 = vld [vmem:[%s7914_s0 + $0xf58] sm:$0xff] }
 0x1b5   :  { %3681 = vmatprep.mubr.msk.f32.mxu0 %vm4578_vm0, %v7917_v61 }
 0x1b6   :  { %v6142_v63 = vpop.f32.mrb[80].mxu1 }
 0x1b7   :  { %1592 = vmatmul.mubr.f32.gmra.mrb[186].mxu1 %v479_v57  ;;  %v1330_v41 = vpop.f32.mrb[81].mxu1 }
 0x1b8   :  { %3682 = vmatmul.mubr.msk.f32.gmra.mrb[64].mxu0 %vm698_vm1, %v178_v58  ;;  %1596 = vmatprep.mubr.f32.mxu1 %v485_v0  ;;  %v504_v0 = vld [vmem:[%s7914_s0 + $0xf50] sm:$0xff]  ;;  %v203_v41 = vld [vmem:[%s7914_s0 + $0x5e8] sm:$0xff] }
 0x1b9   :  { %3684 = vmatprep.mubr.msk.f32.mxu0 %vm4578_vm0, %v7917_v61 }
 0x1ba   :  { %v6156_v10 = vpop.f32.mrb[82].mxu1 }
 0x1bb   :  { %1597 = vmatmul.mubr.f32.gmra.mrb[188].mxu1 %v484_v3  ;;  %v1335_v24 = vpop.f32.mrb[83].mxu1  ;;  %v510_v3 = vld [vmem:[%s7914_s0 + $0xf80] sm:$0xff] }
 0x1bc   :  { %3685 = vmatmul.mubr.msk.f32.gmra.mrb[66].mxu0 %vm698_vm1, %v183_v7  ;;  %1601 = vmatprep.mubr.f32.mxu1 %v490_v9  ;;  %v509_v24 = vld [vmem:[%s7914_s0 + $0xf78] sm:$0xff] }
 0x1bd   :  { %3687 = vmatprep.mubr.msk.f32.mxu0 %vm4578_vm0, %v7917_v61 }
 0x1be   :  { %v6170_v44 = vpop.f32.mrb[84].mxu1 }
 0x1bf   :  { %1602 = vmatmul.mubr.f32.gmra.mrb[190].mxu1 %v489_v19  ;;  %v1340_v29 = vpop.f32.mrb[85].mxu1  ;;  %v208_v19 = vld [vmem:[%s7914_s0 + $0x610] sm:$0xff] }
 0x1c0   :  { %3688 = vmatmul.mubr.msk.f32.gmra.mrb[68].mxu0 %vm698_vm1, %v188_v21  ;;  %1606 = vmatprep.mubr.f32.mxu1 %v495_v26  ;;  %v515_v21 = vld [vmem:[%s7914_s0 + $0xfa8] sm:$0xff] }
 0x1c1   :  { %3690 = vmatprep.mubr.msk.f32.mxu0 %vm4578_vm0, %v7917_v61 }
 0x1c2   :  { %v6184_v45 = vpop.f32.mrb[86].mxu1 }
 0x1c3   :  { %1607 = vmatmul.mubr.f32.gmra.mrb[192].mxu1 %v494_v35  ;;  %v1345_v46 = vpop.f32.mrb[87].mxu1  ;;  %v514_v35 = vld [vmem:[%s7914_s0 + $0xfa0] sm:$0xff] }
 0x1c4   :  { %3691 = vmatmul.mubr.msk.f32.gmra.mrb[70].mxu0 %vm698_vm1, %v193_v56  ;;  %1611 = vmatprep.mubr.f32.mxu1 %v500_v39  ;;  %v213_v56 = vld [vmem:[%s7914_s0 + $0x638] sm:$0xff]  ;;  %v520_v39 = vld [vmem:[%s7914_s0 + $0xfd0] sm:$0xff] }
 0x1c5   :  { %3693 = vmatprep.mubr.msk.f32.mxu0 %vm4578_vm0, %v7917_v61 }
 0x1c6   :  { %v6198_v57 = vpop.f32.mrb[88].mxu1 }
 0x1c7   :  { %1612 = vmatmul.mubr.f32.gmra.mrb[194].mxu1 %v499_v13  ;;  %v1350_v58 = vpop.f32.mrb[89].mxu1 }
 0x1c8   :  { %3694 = vmatmul.mubr.msk.f32.gmra.mrb[72].mxu0 %vm698_vm1, %v198_v51  ;;  %1616 = vmatprep.mubr.f32.mxu1 %v505_v55  ;;  %v519_v51 = vld [vmem:[%s7914_s0 + $0xfc8] sm:$0xff]  ;;  %v218_v55 = vld [vmem:[%s7914_s0 + $0x660] sm:$0xff]  ;;  %v525_v58 = vld [vmem:[%s7914_s0 + $0xff8] sm:$0xff] }
 0x1c9   :  { %3696 = vmatprep.mubr.msk.f32.mxu0 %vm4578_vm0, %v7917_v61 }
 0x1ca   :  { %v6212_v7 = vpop.f32.mrb[90].mxu1 }
 0x1cb   :  { %1617 = vmatmul.mubr.f32.gmra.mrb[196].mxu1 %v504_v0  ;;  %v1355_v9 = vpop.f32.mrb[91].mxu1 }
 0x1cc   :  { %3697 = vmatmul.mubr.msk.f32.gmra.mrb[74].mxu0 %vm698_vm1, %v203_v41  ;;  %1621 = vmatprep.mubr.f32.mxu1 %v510_v3  ;;  %v524_v3 = vld [vmem:[%s7914_s0 + $0xff0] sm:$0xff]  ;;  %v223_v9 = vld [vmem:[%s7914_s0 + $0x688] sm:$0xff] }
 0x1cd   :  { %3699 = vmatprep.mubr.msk.f32.mxu0 %vm4578_vm0, %v7917_v61 }
 0x1ce   :  { %v6226_v26 = vpop.f32.mrb[92].mxu1 }
 0x1cf   :  { %1622 = vmatmul.mubr.f32.gmra.mrb[198].mxu1 %v509_v24  ;;  %v1360_v29 = vpop.f32.mrb[93].mxu1  ;;  %v530_v24 = vld [vmem:[%s7914_s0 + $0x1020] sm:$0xff] }
 0x1d0   :  { %3700 = vmatmul.mubr.msk.f32.gmra.mrb[76].mxu0 %vm698_vm1, %v208_v19  ;;  %1626 = vmatprep.mubr.f32.mxu1 %v515_v21  ;;  %v529_v29 = vld [vmem:[%s7914_s0 + $0x1018] sm:$0xff] }
 0x1d1   :  { %3702 = vmatprep.mubr.msk.f32.mxu0 %vm4578_vm0, %v7917_v61 }
 0x1d2   :  { %v6240_v46 = vpop.f32.mrb[94].mxu1 }
 0x1d3   :  { %1627 = vmatmul.mubr.f32.gmra.mrb[200].mxu1 %v514_v35  ;;  %v1365_v13 = vpop.f32.mrb[95].mxu1  ;;  %v228_v35 = vld [vmem:[%s7914_s0 + $0x6b0] sm:$0xff] }
 0x1d4   :  { %3703 = vmatmul.mubr.msk.f32.gmra.mrb[78].mxu0 %vm698_vm1, %v213_v56  ;;  %1631 = vmatprep.mubr.f32.mxu1 %v520_v39  ;;  %v535_v56 = vld [vmem:[%s7914_s0 + $0x1048] sm:$0xff] }
 0x1d5   :  { %3705 = vmatprep.mubr.msk.f32.mxu0 %vm4578_vm0, %v7917_v61 }
 0x1d6   :  { %v6254_v0 = vpop.f32.mrb[96].mxu1 }
 0x1d7   :  { %1632 = vmatmul.mubr.f32.gmra.mrb[202].mxu1 %v519_v51  ;;  %v1370_v41 = vpop.f32.mrb[97].mxu1  ;;  %v534_v51 = vld [vmem:[%s7914_s0 + $0x1040] sm:$0xff] }
 0x1d8   :  { %3706 = vmatmul.mubr.msk.f32.gmra.mrb[80].mxu0 %vm698_vm1, %v218_v55  ;;  %1636 = vmatprep.mubr.f32.mxu1 %v525_v58  ;;  %v233_v55 = vld [vmem:[%s7914_s0 + $0x6d8] sm:$0xff]  ;;  %v540_v58 = vld [vmem:[%s7914_s0 + $0x1070] sm:$0xff] }
 0x1d9   :  { %3708 = vmatprep.mubr.msk.f32.mxu0 %vm4578_vm0, %v7917_v61 }
 0x1da   :  { %v6268_v19 = vpop.f32.mrb[98].mxu1 }
 0x1db   :  { %1637 = vmatmul.mubr.f32.gmra.mrb[204].mxu1 %v524_v3  ;;  %v1375_v21 = vpop.f32.mrb[99].mxu1 }
 0x1dc   :  { %3709 = vmatmul.mubr.msk.f32.gmra.mrb[82].mxu0 %vm698_vm1, %v223_v9  ;;  %1641 = vmatprep.mubr.f32.mxu1 %v530_v24  ;;  %v539_v9 = vld [vmem:[%s7914_s0 + $0x1068] sm:$0xff]  ;;  %v238_v24 = vld [vmem:[%s7914_s0 + $0x700] sm:$0xff]  ;;  %v545_v21 = vld [vmem:[%s7914_s0 + $0x1098] sm:$0xff] }
 0x1dd   :  { %3711 = vmatprep.mubr.msk.f32.mxu0 %vm4578_vm0, %v7917_v61 }
 0x1de   :  { %v6282_v39 = vpop.f32.mrb[100].mxu1 }
 0x1df   :  { %1642 = vmatmul.mubr.f32.gmra.mrb[206].mxu1 %v529_v29  ;;  %v1380_v13 = vpop.f32.mrb[101].mxu1 }
 0x1e0   :  { %3712 = vmatmul.mubr.msk.f32.gmra.mrb[84].mxu0 %vm698_vm1, %v228_v35  ;;  %1646 = vmatprep.mubr.f32.mxu1 %v535_v56  ;;  %v544_v56 = vld [vmem:[%s7914_s0 + $0x1090] sm:$0xff]  ;;  %v243_v13 = vld [vmem:[%s7914_s0 + $0x728] sm:$0xff] }
 0x1e1   :  { %3714 = vmatprep.mubr.msk.f32.mxu0 %vm4578_vm0, %v7917_v61 }
 0x1e2   :  { %v6296_v41 = vpop.f32.mrb[102].mxu1 }
 0x1e3   :  { %1647 = vmatmul.mubr.f32.gmra.mrb[208].mxu1 %v534_v51  ;;  %v1385_v3 = vpop.f32.mrb[103].mxu1  ;;  %v550_v51 = vld [vmem:[%s7914_s0 + $0x10c0] sm:$0xff] }
 0x1e4   :  { %3715 = vmatmul.mubr.msk.f32.gmra.mrb[86].mxu0 %vm698_vm1, %v233_v55  ;;  %1651 = vmatprep.mubr.f32.mxu1 %v540_v58  ;;  %v549_v3 = vld [vmem:[%s7914_s0 + $0x10b8] sm:$0xff] }
 0x1e5   :  { %3717 = vmatprep.mubr.msk.f32.mxu0 %vm4578_vm0, %v7917_v61 }
 0x1e6   :  { %v6310_v29 = vpop.f32.mrb[104].mxu1 }
 0x1e7   :  { %1652 = vmatmul.mubr.f32.gmra.mrb[210].mxu1 %v539_v9  ;;  %v1390_v35 = vpop.f32.mrb[105].mxu1  ;;  %v248_v9 = vld [vmem:[%s7914_s0 + $0x750] sm:$0xff] }
 0x1e8   :  { %3718 = vmatmul.mubr.msk.f32.gmra.mrb[88].mxu0 %vm698_vm1, %v238_v24  ;;  %1656 = vmatprep.mubr.f32.mxu1 %v545_v21  ;;  %v555_v24 = vld [vmem:[%s7914_s0 + $0x10e8] sm:$0xff] }
 0x1e9   :  { %3720 = vmatprep.mubr.msk.f32.mxu0 %vm4578_vm0, %v7917_v61 }
 0x1ea   :  { %v6324_v55 = vpop.f32.mrb[106].mxu1 }
 0x1eb   :  { %7919 = vst [vmem:[#allocation2_spill] sm:$0xff] %v6324_v55  ;;  %1657 = vmatmul.mubr.f32.gmra.mrb[212].mxu1 %v544_v56  ;;  %v1395_v58 = vpop.f32.mrb[107].mxu1  ;;  %v554_v56 = vld [vmem:[%s7914_s0 + $0x10e0] sm:$0xff]  ;;  %v288_v55 = vld [vmem:[%s7914_s0 + $0x890] sm:$0xff] }
 0x1ec   :  { %3721 = vmatmul.mubr.msk.f32.gmra.mrb[90].mxu0 %vm698_vm1, %v243_v13  ;;  %1661 = vmatprep.mubr.f32.mxu1 %v550_v51  ;;  %v253_v13 = vld [vmem:[%s7914_s0 + $0x778] sm:$0xff]  ;;  %v560_v51 = vld [vmem:[%s7914_s0 + $0x1110] sm:$0xff] }
 0x1ed   :  { %3723 = vmatprep.mubr.msk.f32.mxu0 %vm4578_vm0, %v7917_v61 }
 0x1ee   :  { %v6338_v21 = vpop.f32.mrb[108].mxu1 }
 0x1ef   :  { %7920 = vst [vmem:[#allocation3_spill] sm:$0xff] %v6338_v21  ;;  %1662 = vmatmul.mubr.f32.gmra.mrb[214].mxu1 %v549_v3  ;;  %v1400_v35 = vpop.f32.mrb[109].mxu1  ;;  %v7927_v21 = vmov 0.0  }
 0x1f0   :  { %3724 = vmatmul.mubr.msk.f32.gmra.mrb[92].mxu0 %vm698_vm1, %v248_v9  ;;  %1666 = vmatprep.mubr.f32.mxu1 %v555_v24  ;;  %v559_v9 = vld [vmem:[%s7914_s0 + $0x1108] sm:$0xff]  ;;  %v258_v24 = vld [vmem:[%s7914_s0 + $0x7a0] sm:$0xff]  ;;  %v565_v35 = vld [vmem:[%s7914_s0 + $0x1138] sm:$0xff] }
 0x1f1   :  { %3726 = vmatprep.mubr.msk.f32.mxu0 %vm4578_vm0, %v7917_v61 }
 0x1f2   :  { %v6352_v58 = vpop.f32.mrb[110].mxu1 }
 0x1f3   :  { %7921 = vst [vmem:[#allocation4_spill] sm:$0xff] %v6352_v58  ;;  %1667 = vmatmul.mubr.f32.gmra.mrb[216].mxu1 %v554_v56  ;;  %v1405_v3 = vpop.f32.mrb[111].mxu1  ;;  %v590_v58 = vld [vmem:[%s7914_s0 + $0x1200] sm:$0xff] }
 0x1f4   :  { %3727 = vmatmul.mubr.msk.f32.gmra.mrb[94].mxu0 %vm698_vm1, %v253_v13  ;;  %1671 = vmatprep.mubr.f32.mxu1 %v560_v51  ;;  %v564_v51 = vld [vmem:[%s7914_s0 + $0x1130] sm:$0xff]  ;;  %v263_v3 = vld [vmem:[%s7914_s0 + $0x7c8] sm:$0xff] }
 0x1f5   :  { %3729 = vmatprep.mubr.msk.f32.mxu0 %vm4578_vm0, %v7917_v61 }
 0x1f6   :  { %v6366_v56 = vpop.f32.mrb[112].mxu1 }
 0x1f7   :  { %7922 = vst [vmem:[#allocation5_spill] sm:$0xff] %v6366_v56  ;;  %1672 = vmatmul.mubr.f32.gmra.mrb[218].mxu1 %v559_v9  ;;  %v1410_v13 = vpop.f32.mrb[113].mxu1  ;;  %v570_v56 = vld [vmem:[%s7914_s0 + $0x1160] sm:$0xff] }
 0x1f8   :  { %3730 = vmatmul.mubr.msk.f32.gmra.mrb[96].mxu0 %vm698_vm1, %v258_v24  ;;  %1676 = vmatprep.mubr.f32.mxu1 %v565_v35  ;;  %v569_v35 = vld [vmem:[%s7914_s0 + $0x1158] sm:$0xff]  ;;  %v268_v13 = vld [vmem:[%s7914_s0 + $0x7f0] sm:$0xff] }
 0x1f9   :  { %3732 = vmatprep.mubr.msk.f32.mxu0 %vm4578_vm0, %v7917_v61 }
 0x1fa   :  { %v6380_v9 = vpop.f32.mrb[114].mxu1 }
 0x1fb   :  { %7923 = vst [vmem:[#allocation6_spill] sm:$0xff] %v6380_v9  ;;  %1677 = vmatmul.mubr.f32.gmra.mrb[220].mxu1 %v564_v51  ;;  %v1415_v24 = vpop.f32.mrb[115].mxu1  ;;  %v575_v9 = vld [vmem:[%s7914_s0 + $0x1188] sm:$0xff] }
 0x1fc   :  { %3733 = vmatmul.mubr.msk.f32.gmra.mrb[98].mxu0 %vm698_vm1, %v263_v3  ;;  %1681 = vmatprep.mubr.f32.mxu1 %v570_v56  ;;  %v574_v56 = vld [vmem:[%s7914_s0 + $0x1180] sm:$0xff]  ;;  %v273_v24 = vld [vmem:[%s7914_s0 + $0x818] sm:$0xff] }
 0x1fd   :  { %3735 = vmatprep.mubr.msk.f32.mxu0 %vm4578_vm0, %v7917_v61 }
 0x1fe   :  { %v6394_v51 = vpop.f32.mrb[116].mxu1 }
 0x1ff   :  { %7924 = vst [vmem:[#allocation7_spill] sm:$0xff] %v6394_v51  ;;  %1682 = vmatmul.mubr.f32.gmra.mrb[222].mxu1 %v569_v35  ;;  %v1420_v3 = vpop.f32.mrb[117].mxu1  ;;  %v580_v51 = vld [vmem:[%s7914_s0 + $0x11b0] sm:$0xff] }
 0x200   :  { %3736 = vmatmul.mubr.msk.f32.gmra.mrb[100].mxu0 %vm698_vm1, %v268_v13  ;;  %1686 = vmatprep.mubr.f32.mxu1 %v575_v9  ;;  %v579_v9 = vld [vmem:[%s7914_s0 + $0x11a8] sm:$0xff]  ;;  %v278_v3 = vld [vmem:[%s7914_s0 + $0x840] sm:$0xff] }
 0x201   :  { %3738 = vmatprep.mubr.msk.f32.mxu0 %vm4578_vm0, %v7917_v61 }
 0x202   :  { %v6408_v35 = vpop.f32.mrb[118].mxu1 }
 0x203   :  { %7925 = vst [vmem:[#allocation8_spill] sm:$0xff] %v6408_v35  ;;  %1687 = vmatmul.mubr.f32.gmra.mrb[224].mxu1 %v574_v56  ;;  %v1425_v13 = vpop.f32.mrb[119].mxu1  ;;  %v585_v35 = vld [vmem:[%s7914_s0 + $0x11d8] sm:$0xff] }
 0x204   :  { %3739 = vmatmul.mubr.msk.f32.gmra.mrb[102].mxu0 %vm698_vm1, %v273_v24  ;;  %1691 = vmatprep.mubr.f32.mxu1 %v580_v51  ;;  %v6427_v51 = vld [vmem:[%s7915_s2] ss:$0 sm:$0xff]  ;;  %v584_v13 = vld [vmem:[%s7914_s0 + $0x11d0] sm:$0xff] }
 0x205   :  { %3741 = vmatprep.mubr.msk.f32.mxu0 %vm4578_vm0, %v7917_v61 }
 0x206   :  { %v6422_v56 = vpop.f32.mrb[120].mxu1 }
 0x207   :  { %7926 = vst [vmem:[#allocation9_spill] sm:$0xff] %v6422_v56  ;;  %1692 = vmatmul.mubr.f32.gmra.mrb[226].mxu1 %v579_v9  ;;  %v1430_v24 = vpop.f32.mrb[121].mxu1  ;;  %v283_v56 = vld [vmem:[%s7914_s0 + $0x868] sm:$0xff]  ;;  %v1129_v9 = vadd.f32 %v6427_v51, %v5583_v30 }
 0x208   :  { %3742 = vmatmul.mubr.msk.f32.gmra.mrb[104].mxu0 %vm698_vm1, %v278_v3  ;;  %1696 = vmatprep.mubr.f32.mxu1 %v585_v35  ;;  %v595_v30 = vld [vmem:[%s7914_s0 + $0x1228] sm:$0xff] }
 0x209   :  { %3744 = vmatprep.mubr.msk.f32.mxu0 %vm4578_vm0, %v7917_v61  ;;  %v589_v61 = vld [vmem:[%s7914_s0 + $0x11f8] sm:$0xff] }
 0x20b   :  { %v2468_v3 = vpop.f32.mrb[0].mxu0  ;;  %1697 = vmatmul.mubr.f32.gmra.mrb[228].mxu1 %v584_v13  ;;  %v1134_v13 = vadd.f32 %v6427_v51, %v5597_v25  ;;  %v293_v25 = vld [vmem:[%s7914_s0 + $0x8b8] sm:$0xff] }
 0x20c   :  { %v4089_v35 = vadd.f32 %v2468_v3, %v1129_v9  ;;  %v3587_v24 = vpop.f32.mrb[1].mxu0  ;;  %3745 = vmatmul.mubr.msk.f32.gmra.mrb[106].mxu0 %vm698_vm1, %v283_v56  ;;  %1701 = vmatprep.mubr.f32.mxu1 %v590_v58 }
 0x20d   :  { %3747 = vmatprep.mubr.msk.f32.mxu0 %vm4578_vm0, %v7927_v21  ;;  %v594_v24 = vld [vmem:[%s7914_s0 + $0x1220] sm:$0xff] }
 0x20e   :  { %v3072_v56 = vmax.f32 %v4089_v35, 0.0  ;;  %v1139_v35 = vadd.f32 %v6427_v51, %v5611_v50  ;;  %v298_v50 = vld [vmem:[%s7914_s0 + $0x8e0] sm:$0xff] }
 0x20f   :  { %v2473_v58 = vpop.f32.mrb[2].mxu0  ;;  %1702 = vmatmul.mubr.f32.gmra.mrb[230].mxu1 %v589_v61  ;;  %v600_v61 = vld [vmem:[%s7914_s0 + $0x1250] sm:$0xff] }
 0x210   :  { %3193 = vst.msk [vmem:[%s7916_s3] sm:$0xff] %vm698_vm1, %v3072_v56  ;;  %v4091_v9 = vadd.f32 %v2473_v58, %v1134_v13  ;;  %v3590_v3 = vpop.f32.mrb[3].mxu0  ;;  %3748 = vmatmul.mubr.msk.f32.gmra.mrb[108].mxu0 %vm698_vm1, %v288_v55  ;;  %1706 = vmatprep.mubr.f32.mxu1 %v595_v30  ;;  %v599_v58 = vld [vmem:[%s7914_s0 + $0x1248] sm:$0xff] }
 0x211   :  { %3750 = vmatprep.mubr.msk.f32.mxu0 %vm4578_vm0, %v7927_v21  ;;  %v1144_v3 = vadd.f32 %v6427_v51, %v5625_v38  ;;  %v303_v38 = vld [vmem:[%s7914_s0 + $0x908] sm:$0xff] }
 0x212   :  { %v3073_v55 = vmax.f32 %v4091_v9, 0.0  ;;  %v605_v9 = vld [vmem:[%s7914_s0 + $0x1278] sm:$0xff] }
 0x213   :  { %v2478_v30 = vpop.f32.mrb[4].mxu0  ;;  %1707 = vmatmul.mubr.f32.gmra.mrb[232].mxu1 %v594_v24 }
 0x214   :  { %3194 = vst.msk [vmem:[%s7916_s3 + $0x8] sm:$0xff] %vm698_vm1, %v3073_v55  ;;  %v4093_v13 = vadd.f32 %v2478_v30, %v1139_v35  ;;  %v3593_v56 = vpop.f32.mrb[5].mxu0  ;;  %3751 = vmatmul.mubr.msk.f32.gmra.mrb[110].mxu0 %vm698_vm1, %v293_v25  ;;  %1711 = vmatprep.mubr.f32.mxu1 %v600_v61  ;;  %v604_v55 = vld [vmem:[%s7914_s0 + $0x1270] sm:$0xff]  ;;  %v610_v30 = vld [vmem:[%s7914_s0 + $0x12a0] sm:$0xff] }
 0x215   :  { %3753 = vmatprep.mubr.msk.f32.mxu0 %vm4578_vm0, %v7927_v21 }
 0x216   :  { %v3074_v24 = vmax.f32 %v4093_v13, 0.0  ;;  %v1149_v13 = vadd.f32 %v6427_v51, %v5639_v5  ;;  %v308_v5 = vld [vmem:[%s7914_s0 + $0x930] sm:$0xff] }
 0x217   :  { %v2483_v25 = vpop.f32.mrb[6].mxu0  ;;  %1712 = vmatmul.mubr.f32.gmra.mrb[234].mxu1 %v599_v58 }
 0x218   :  { %3195 = vst.msk [vmem:[%s7916_s3 + $0x10] sm:$0xff] %vm698_vm1, %v3074_v24  ;;  %v4095_v61 = vadd.f32 %v2483_v25, %v1144_v3  ;;  %v3596_v35 = vpop.f32.mrb[7].mxu0  ;;  %3754 = vmatmul.mubr.msk.f32.gmra.mrb[112].mxu0 %vm698_vm1, %v298_v50  ;;  %1716 = vmatprep.mubr.f32.mxu1 %v605_v9  ;;  %v609_v3 = vld [vmem:[%s7914_s0 + $0x1298] sm:$0xff]  ;;  %v615_v24 = vld [vmem:[%s7914_s0 + $0x12c8] sm:$0xff]  ;;  %v1154_v25 = vadd.f32 %v6427_v51, %v5653_v49 }
 0x219   :  { %3756 = vmatprep.mubr.msk.f32.mxu0 %vm4578_vm0, %v7927_v21  ;;  %v313_v49 = vld [vmem:[%s7914_s0 + $0x958] sm:$0xff] }
 0x21a   :  { %v3075_v56 = vmax.f32 %v4095_v61, 0.0 }
 0x21b   :  { %v2488_v58 = vpop.f32.mrb[8].mxu0  ;;  %1717 = vmatmul.mubr.f32.gmra.mrb[236].mxu1 %v604_v55 }
 0x21c   :  { %3196 = vst.msk [vmem:[%s7916_s3 + $0x18] sm:$0xff] %vm698_vm1, %v3075_v56  ;;  %v4097_v50 = vadd.f32 %v2488_v58, %v1149_v13  ;;  %v3599_v9 = vpop.f32.mrb[9].mxu0  ;;  %3757 = vmatmul.mubr.msk.f32.gmra.mrb[114].mxu0 %vm698_vm1, %v303_v38  ;;  %1721 = vmatprep.mubr.f32.mxu1 %v610_v30  ;;  %v614_v30 = vld [vmem:[%s7914_s0 + $0x12c0] sm:$0xff]  ;;  %v1159_v56 = vadd.f32 %v6427_v51, %v5667_v27 }
 0x21d   :  { %3759 = vmatprep.mubr.msk.f32.mxu0 %vm4578_vm0, %v7927_v21  ;;  %v322_v13 = vld [vmem:[%s7914_s0 + $0x9a0] sm:$0xff] }
 0x21e   :  { %v3076_v61 = vmax.f32 %v4097_v50, 0.0  ;;  %v318_v27 = vld [vmem:[%s7914_s0 + $0x980] sm:$0xff] }
 0x21f   :  { %v2493_v35 = vpop.f32.mrb[10].mxu0  ;;  %1722 = vmatmul.mubr.f32.gmra.mrb[238].mxu1 %v609_v3 }
 0x220   :  { %3197 = vst.msk [vmem:[%s7916_s3 + $0x20] sm:$0xff] %vm698_vm1, %v3076_v61  ;;  %v4099_v55 = vadd.f32 %v2493_v35, %v1154_v25  ;;  %v3602_v38 = vpop.f32.mrb[11].mxu0  ;;  %3760 = vmatmul.mubr.msk.f32.gmra.mrb[116].mxu0 %vm698_vm1, %v308_v5  ;;  %1726 = vmatprep.mubr.f32.mxu1 %v615_v24  ;;  %v321_v5 = vld [vmem:[%s7914_s0 + $0x998] sm:$0xff]  ;;  %v327_v24 = vld [vmem:[%s7914_s0 + $0x9c8] sm:$0xff]  ;;  %v1164_v25 = vadd.f32 %v6427_v51, %v5681_v60 }
 0x221   :  { %3762 = vmatprep.mubr.msk.f32.mxu0 %vm4578_vm0, %v7927_v21  ;;  %v323_v60 = vld [vmem:[%s7914_s0 + $0x9a8] sm:$0xff] }
 0x222   :  { %v3077_v58 = vmax.f32 %v4099_v55, 0.0 }
 0x223   :  { %v2498_v50 = vpop.f32.mrb[12].mxu0  ;;  %1727 = vmatmul.mubr.f32.gmra.mrb[240].mxu1 %v614_v30  ;;  %v326_v30 = vld [vmem:[%s7914_s0 + $0x9c0] sm:$0xff] }
 0x224   :  { %3198 = vst.msk [vmem:[%s7916_s3 + $0x28] sm:$0xff] %vm698_vm1, %v3077_v58  ;;  %v4101_v9 = vadd.f32 %v2498_v50, %v1159_v56  ;;  %v3605_v3 = vpop.f32.mrb[13].mxu0  ;;  %3763 = vmatmul.mubr.msk.f32.gmra.mrb[118].mxu0 %vm698_vm1, %v313_v49  ;;  %2101 = vmatprep.mubr.f32.mxu1 %v322_v13  ;;  %v332_v49 = vld [vmem:[%s7914_s0 + $0x9f0] sm:$0xff]  ;;  %v1169_v13 = vadd.f32 %v6427_v51, %v5694_v1 }
 0x225   :  { %3765 = vmatprep.mubr.msk.f32.mxu0 %vm4578_vm0, %v7927_v21  ;;  %v331_v3 = vld [vmem:[%s7914_s0 + $0x9e8] sm:$0xff]  ;;  %v328_v1 = vld [vmem:[%s7914_s0 + $0x9d0] sm:$0xff] }
 0x226   :  { %v3078_v61 = vmax.f32 %v4101_v9, 0.0 }
 0x227   :  { %v2503_v35 = vpop.f32.mrb[14].mxu0  ;;  %2102 = vmatmul.mubr.f32.vlgmr.msra.gmra.mrb[122].mxu1 %v321_v5  ;;  %v337_v5 = vld [vmem:[%s7914_s0 + $0xa18] sm:$0xff] }
 0x228   :  { %3199 = vst.msk [vmem:[%s7916_s3 + $0x30] sm:$0xff] %vm698_vm1, %v3078_v61  ;;  %v4103_v55 = vadd.f32 %v2503_v35, %v1164_v25  ;;  %v3608_v38 = vpop.f32.mrb[15].mxu0  ;;  %3766 = vmatmul.mubr.msk.f32.gmra.mrb[120].mxu0 %vm698_vm1, %v318_v27  ;;  %2106 = vmatprep.mubr.f32.mxu1 %v327_v24  ;;  %v1174_v27 = vadd.f32 %v6427_v51, %v5708_v6  ;;  %v333_v6 = vld [vmem:[%s7914_s0 + $0x9f8] sm:$0xff] }
 0x229   :  { %3768 = vmatprep.mubr.msk.f32.mxu0 %vm4578_vm0, %v7927_v21  ;;  %v342_v38 = vld [vmem:[%s7914_s0 + $0xa40] sm:$0xff] }
 0x22a   :  { %v3079_v56 = vmax.f32 %v4103_v55, 0.0  ;;  %v336_v55 = vld [vmem:[%s7914_s0 + $0xa10] sm:$0xff] }
 0x22b   :  { %v2508_v58 = vpop.f32.mrb[16].mxu0  ;;  %2107 = vmatmul.mubr.f32.gmra.mrb[124].mxu1 %v326_v30  ;;  %v1179_v30 = vadd.f32 %v6427_v51, %v5722_v11  ;;  %v338_v11 = vld [vmem:[%s7914_s0 + $0xa20] sm:$0xff] }
 0x22c   :  { %3200 = vst.msk [vmem:[%s7916_s3 + $0x38] sm:$0xff] %vm698_vm1, %v3079_v56  ;;  %v4105_v50 = vadd.f32 %v2508_v58, %v1169_v13  ;;  %v3611_v9 = vpop.f32.mrb[17].mxu0  ;;  %3769 = vmatmul.mubr.msk.f32.gmra.mrb[122].mxu0 %vm698_vm1, %v323_v60  ;;  %2111 = vmatprep.mubr.f32.mxu1 %v332_v49  ;;  %v341_v58 = vld [vmem:[%s7914_s0 + $0xa38] sm:$0xff] }
 0x22d   :  { %3771 = vmatprep.mubr.msk.f32.mxu0 %vm4578_vm0, %v7927_v21  ;;  %v1184_v9 = vadd.f32 %v6427_v51, %v5736_v17  ;;  %v343_v17 = vld [vmem:[%s7914_s0 + $0xa48] sm:$0xff] }
 0x22e   :  { %v3080_v24 = vmax.f32 %v4105_v50, 0.0  ;;  %v347_v50 = vld [vmem:[%s7914_s0 + $0xa68] sm:$0xff] }
 0x22f   :  { %v2513_v25 = vpop.f32.mrb[18].mxu0  ;;  %2112 = vmatmul.mubr.f32.gmra.mrb[126].mxu1 %v331_v3 }
 0x230   :  { %3201 = vst.msk [vmem:[%s7916_s3 + $0x40] sm:$0xff] %vm698_vm1, %v3080_v24  ;;  %v4107_v61 = vadd.f32 %v2513_v25, %v1174_v27  ;;  %v3614_v35 = vpop.f32.mrb[19].mxu0  ;;  %3772 = vmatmul.mubr.msk.f32.gmra.mrb[124].mxu0 %vm698_vm1, %v328_v1  ;;  %2116 = vmatprep.mubr.f32.mxu1 %v337_v5  ;;  %v346_v24 = vld [vmem:[%s7914_s0 + $0xa60] sm:$0xff]  ;;  %v352_v25 = vld [vmem:[%s7914_s0 + $0xa90] sm:$0xff] }
 0x231   :  { %3774 = vmatprep.mubr.msk.f32.mxu0 %vm4578_vm0, %v7927_v21 }
 0x232   :  { %v3081_v60 = vmax.f32 %v4107_v61, 0.0  ;;  %v1189_v61 = vadd.f32 %v6427_v51, %v5750_v23  ;;  %v348_v23 = vld [vmem:[%s7914_s0 + $0xa70] sm:$0xff] }
 0x233   :  { %v2518_v49 = vpop.f32.mrb[20].mxu0  ;;  %2117 = vmatmul.mubr.f32.gmra.mrb[128].mxu1 %v336_v55 }
 0x234   :  { %3202 = vst.msk [vmem:[%s7916_s3 + $0x48] sm:$0xff] %vm698_vm1, %v3081_v60  ;;  %v4109_v13 = vadd.f32 %v2518_v49, %v1179_v30  ;;  %v3617_v56 = vpop.f32.mrb[21].mxu0  ;;  %3775 = vmatmul.mubr.msk.f32.gmra.mrb[126].mxu0 %vm698_vm1, %v333_v6  ;;  %2121 = vmatprep.mubr.f32.mxu1 %v342_v38  ;;  %v351_v30 = vld [vmem:[%s7914_s0 + $0xa88] sm:$0xff]  ;;  %v357_v60 = vld [vmem:[%s7914_s0 + $0xab8] sm:$0xff]  ;;  %v1194_v49 = vadd.f32 %v6427_v51, %v5764_v31 }
 0x235   :  { %3777 = vmatprep.mubr.msk.f32.mxu0 %vm4578_vm0, %v7927_v21  ;;  %v353_v31 = vld [vmem:[%s7914_s0 + $0xa98] sm:$0xff] }
 0x236   :  { %v3082_v3 = vmax.f32 %v4109_v13, 0.0 }
 0x237   :  { %v2523_v1 = vpop.f32.mrb[22].mxu0  ;;  %2122 = vmatmul.mubr.f32.gmra.mrb[130].mxu1 %v341_v58 }
 0x238   :  { %3203 = vst.msk [vmem:[%s7916_s3 + $0x50] sm:$0xff] %vm698_vm1, %v3082_v3  ;;  %v4111_v5 = vadd.f32 %v2523_v1, %v1184_v9  ;;  %v3620_v27 = vpop.f32.mrb[23].mxu0  ;;  %3778 = vmatmul.mubr.msk.f32.gmra.mrb[128].mxu0 %vm698_vm1, %v338_v11  ;;  %2126 = vmatprep.mubr.f32.mxu1 %v347_v50  ;;  %v356_v50 = vld [vmem:[%s7914_s0 + $0xab0] sm:$0xff]  ;;  %v362_v9 = vld [vmem:[%s7914_s0 + $0xae0] sm:$0xff]  ;;  %v1199_v3 = vadd.f32 %v6427_v51, %v5778_v37 }
 0x239   :  { %3780 = vmatprep.mubr.msk.f32.mxu0 %vm4578_vm0, %v7927_v21  ;;  %v358_v37 = vld [vmem:[%s7914_s0 + $0xac0] sm:$0xff] }
 0x23a   :  { %v3083_v35 = vmax.f32 %v4111_v5, 0.0 }
 0x23b   :  { %v2528_v55 = vpop.f32.mrb[24].mxu0  ;;  %2127 = vmatmul.mubr.f32.gmra.mrb[132].mxu1 %v346_v24 }
 0x23c   :  { %3204 = vst.msk [vmem:[%s7916_s3 + $0x58] sm:$0xff] %vm698_vm1, %v3083_v35  ;;  %v4113_v6 = vadd.f32 %v2528_v55, %v1189_v61  ;;  %v3623_v38 = vpop.f32.mrb[25].mxu0  ;;  %3781 = vmatmul.mubr.msk.f32.gmra.mrb[130].mxu0 %vm698_vm1, %v343_v17  ;;  %2131 = vmatprep.mubr.f32.mxu1 %v352_v25  ;;  %v361_v17 = vld [vmem:[%s7914_s0 + $0xad8] sm:$0xff]  ;;  %v367_v25 = vld [vmem:[%s7914_s0 + $0xb08] sm:$0xff]  ;;  %v1204_v61 = vadd.f32 %v6427_v51, %v5792_v43 }
 0x23d   :  { %3783 = vmatprep.mubr.msk.f32.mxu0 %vm4578_vm0, %v7927_v21  ;;  %v363_v43 = vld [vmem:[%s7914_s0 + $0xae8] sm:$0xff] }
 0x23e   :  { %v3084_v13 = vmax.f32 %v4113_v6, 0.0 }
 0x23f   :  { %v2533_v56 = vpop.f32.mrb[26].mxu0  ;;  %2132 = vmatmul.mubr.f32.gmra.mrb[134].mxu1 %v351_v30  ;;  %v366_v30 = vld [vmem:[%s7914_s0 + $0xb00] sm:$0xff] }
 0x240   :  { %3205 = vst.msk [vmem:[%s7916_s3 + $0x60] sm:$0xff] %vm698_vm1, %v3084_v13  ;;  %v4115_v58 = vadd.f32 %v2533_v56, %v1194_v49  ;;  %v3626_v11 = vpop.f32.mrb[27].mxu0  ;;  %3784 = vmatmul.mubr.msk.f32.gmra.mrb[132].mxu0 %vm698_vm1, %v348_v23  ;;  %2136 = vmatprep.mubr.f32.mxu1 %v357_v60  ;;  %v372_v23 = vld [vmem:[%s7914_s0 + $0xb30] sm:$0xff]  ;;  %v1209_v60 = vadd.f32 %v6427_v51, %v5806_v48 }
 0x241   :  { %3786 = vmatprep.mubr.msk.f32.mxu0 %vm4578_vm0, %v7927_v21  ;;  %v371_v11 = vld [vmem:[%s7914_s0 + $0xb28] sm:$0xff]  ;;  %v368_v48 = vld [vmem:[%s7914_s0 + $0xb10] sm:$0xff] }
 0x242   :  { %v3085_v1 = vmax.f32 %v4115_v58, 0.0 }
 0x243   :  { %v2538_v5 = vpop.f32.mrb[28].mxu0  ;;  %2137 = vmatmul.mubr.f32.gmra.mrb[136].mxu1 %v356_v50  ;;  %v377_v50 = vld [vmem:[%s7914_s0 + $0xb58] sm:$0xff] }
 0x244   :  { %3206 = vst.msk [vmem:[%s7916_s3 + $0x68] sm:$0xff] %vm698_vm1, %v3085_v1  ;;  %v4117_v27 = vadd.f32 %v2538_v5, %v1199_v3  ;;  %v3629_v24 = vpop.f32.mrb[29].mxu0  ;;  %3787 = vmatmul.mubr.msk.f32.gmra.mrb[134].mxu0 %vm698_vm1, %v353_v31  ;;  %2141 = vmatprep.mubr.f32.mxu1 %v362_v9  ;;  %v1214_v31 = vadd.f32 %v6427_v51, %v5820_v54  ;;  %v373_v54 = vld [vmem:[%s7914_s0 + $0xb38] sm:$0xff] }
 0x245   :  { %3789 = vmatprep.mubr.msk.f32.mxu0 %vm4578_vm0, %v7927_v21  ;;  %v382_v24 = vld [vmem:[%s7914_s0 + $0xb80] sm:$0xff] }
 0x246   :  { %v3086_v35 = vmax.f32 %v4117_v27, 0.0  ;;  %v376_v27 = vld [vmem:[%s7914_s0 + $0xb50] sm:$0xff] }
 0x247   :  { %v2543_v55 = vpop.f32.mrb[30].mxu0  ;;  %2142 = vmatmul.mubr.f32.gmra.mrb[138].mxu1 %v361_v17  ;;  %v1219_v17 = vadd.f32 %v6427_v51, %v5834_v59  ;;  %v378_v59 = vld [vmem:[%s7914_s0 + $0xb60] sm:$0xff] }
 0x248   :  { %3207 = vst.msk [vmem:[%s7916_s3 + $0x70] sm:$0xff] %vm698_vm1, %v3086_v35  ;;  %v4119_v6 = vadd.f32 %v2543_v55, %v1204_v61  ;;  %v3632_v38 = vpop.f32.mrb[31].mxu0  ;;  %3790 = vmatmul.mubr.msk.f32.gmra.mrb[136].mxu0 %vm698_vm1, %v358_v37  ;;  %2146 = vmatprep.mubr.f32.mxu1 %v367_v25  ;;  %v381_v55 = vld [vmem:[%s7914_s0 + $0xb78] sm:$0xff] }
 0x249   :  { %3792 = vmatprep.mubr.msk.f32.mxu0 %vm4578_vm0, %v7927_v21  ;;  %v1224_v38 = vadd.f32 %v6427_v51, %v5848_v2  ;;  %v383_v2 = vld [vmem:[%s7914_s0 + $0xb88] sm:$0xff] }
 0x24a   :  { %v3087_v49 = vmax.f32 %v4119_v6, 0.0  ;;  %v387_v6 = vld [vmem:[%s7914_s0 + $0xba8] sm:$0xff] }
 0x24b   :  { %v2548_v13 = vpop.f32.mrb[32].mxu0  ;;  %2147 = vmatmul.mubr.f32.gmra.mrb[140].mxu1 %v366_v30 }
 0x24c   :  { %3208 = vst.msk [vmem:[%s7916_s3 + $0x78] sm:$0xff] %vm698_vm1, %v3087_v49  ;;  %v4121_v56 = vadd.f32 %v2548_v13, %v1209_v60  ;;  %v3635_v58 = vpop.f32.mrb[33].mxu0  ;;  %3793 = vmatmul.mubr.msk.f32.gmra.mrb[138].mxu0 %vm698_vm1, %v363_v43  ;;  %2151 = vmatprep.mubr.f32.mxu1 %v372_v23  ;;  %v386_v49 = vld [vmem:[%s7914_s0 + $0xba0] sm:$0xff]  ;;  %v392_v13 = vld [vmem:[%s7914_s0 + $0xbd0] sm:$0xff] }
 0x24d   :  { %3795 = vmatprep.mubr.msk.f32.mxu0 %vm4578_vm0, %v7927_v21 }
 0x24e   :  { %v3088_v9 = vmax.f32 %v4121_v56, 0.0  ;;  %v1229_v56 = vadd.f32 %v6427_v51, %v5862_v18  ;;  %v388_v18 = vld [vmem:[%s7914_s0 + $0xbb0] sm:$0xff] }
 0x24f   :  { %v2553_v3 = vpop.f32.mrb[34].mxu0  ;;  %2152 = vmatmul.mubr.f32.gmra.mrb[142].mxu1 %v371_v11 }
 0x250   :  { %3209 = vst.msk [vmem:[%s7916_s3 + $0x80] sm:$0xff] %vm698_vm1, %v3088_v9  ;;  %v4123_v1 = vadd.f32 %v2553_v3, %v1214_v31  ;;  %v3638_v5 = vpop.f32.mrb[35].mxu0  ;;  %3796 = vmatmul.mubr.msk.f32.gmra.mrb[140].mxu0 %vm698_vm1, %v368_v48  ;;  %2156 = vmatprep.mubr.f32.mxu1 %v377_v50  ;;  %v391_v31 = vld [vmem:[%s7914_s0 + $0xbc8] sm:$0xff]  ;;  %v397_v9 = vld [vmem:[%s7914_s0 + $0xbf8] sm:$0xff]  ;;  %v1234_v3 = vadd.f32 %v6427_v51, %v5876_v15 }
 0x251   :  { %3798 = vmatprep.mubr.msk.f32.mxu0 %vm4578_vm0, %v7927_v21  ;;  %v393_v15 = vld [vmem:[%s7914_s0 + $0xbd8] sm:$0xff] }
 0x252   :  { %v3089_v37 = vmax.f32 %v4123_v1, 0.0 }
 0x253   :  { %v2558_v25 = vpop.f32.mrb[36].mxu0  ;;  %2157 = vmatmul.mubr.f32.gmra.mrb[144].mxu1 %v376_v27 }
 0x254   :  { %3210 = vst.msk [vmem:[%s7916_s3 + $0x88] sm:$0xff] %vm698_vm1, %v3089_v37  ;;  %v4125_v61 = vadd.f32 %v2558_v25, %v1219_v17  ;;  %v3641_v35 = vpop.f32.mrb[37].mxu0  ;;  %3799 = vmatmul.mubr.msk.f32.gmra.mrb[142].mxu0 %vm698_vm1, %v373_v54  ;;  %2161 = vmatprep.mubr.f32.mxu1 %v382_v24  ;;  %v396_v24 = vld [vmem:[%s7914_s0 + $0xbf0] sm:$0xff]  ;;  %v402_v17 = vld [vmem:[%s7914_s0 + $0xc20] sm:$0xff]  ;;  %v1239_v37 = vadd.f32 %v6427_v51, %v5890_v36 }
 0x255   :  { %3801 = vmatprep.mubr.msk.f32.mxu0 %vm4578_vm0, %v7927_v21  ;;  %v398_v36 = vld [vmem:[%s7914_s0 + $0xc00] sm:$0xff] }
 0x256   :  { %v3090_v30 = vmax.f32 %v4125_v61, 0.0 }
 0x257   :  { %v2563_v43 = vpop.f32.mrb[38].mxu0  ;;  %2162 = vmatmul.mubr.f32.gmra.mrb[146].mxu1 %v381_v55 }
 0x258   :  { %3211 = vst.msk [vmem:[%s7916_s3 + $0x90] sm:$0xff] %vm698_vm1, %v3090_v30  ;;  %v4127_v23 = vadd.f32 %v2563_v43, %v1224_v38  ;;  %v3644_v60 = vpop.f32.mrb[39].mxu0  ;;  %3802 = vmatmul.mubr.msk.f32.gmra.mrb[144].mxu0 %vm698_vm1, %v378_v59  ;;  %2166 = vmatprep.mubr.f32.mxu1 %v387_v6  ;;  %v401_v59 = vld [vmem:[%s7914_s0 + $0xc18] sm:$0xff]  ;;  %v407_v6 = vld [vmem:[%s7914_s0 + $0xc48] sm:$0xff]  ;;  %v1244_v38 = vadd.f32 %v6427_v51, %v5904_v32 }
 0x259   :  { %3804 = vmatprep.mubr.msk.f32.mxu0 %vm4578_vm0, %v7927_v21  ;;  %v403_v32 = vld [vmem:[%s7914_s0 + $0xc28] sm:$0xff] }
 0x25a   :  { %v3091_v58 = vmax.f32 %v4127_v23, 0.0 }
 0x25b   :  { %v2568_v11 = vpop.f32.mrb[40].mxu0  ;;  %2167 = vmatmul.mubr.f32.gmra.mrb[148].mxu1 %v386_v49  ;;  %v406_v49 = vld [vmem:[%s7914_s0 + $0xc40] sm:$0xff] }
 0x25c   :  { %3212 = vst.msk [vmem:[%s7916_s3 + $0x98] sm:$0xff] %vm698_vm1, %v3091_v58  ;;  %v4129_v48 = vadd.f32 %v2568_v11, %v1229_v56  ;;  %v3647_v50 = vpop.f32.mrb[41].mxu0  ;;  %3805 = vmatmul.mubr.msk.f32.gmra.mrb[146].mxu0 %vm698_vm1, %v383_v2  ;;  %2171 = vmatprep.mubr.f32.mxu1 %v392_v13  ;;  %v412_v2 = vld [vmem:[%s7914_s0 + $0xc70] sm:$0xff]  ;;  %v1249_v13 = vadd.f32 %v6427_v51, %v5918_v62 }
 0x25d   :  { %3807 = vmatprep.mubr.msk.f32.mxu0 %vm4578_vm0, %v7927_v21  ;;  %v411_v50 = vld [vmem:[%s7914_s0 + $0xc68] sm:$0xff]  ;;  %v408_v62 = vld [vmem:[%s7914_s0 + $0xc50] sm:$0xff] }
 0x25e   :  { %v3092_v1 = vmax.f32 %v4129_v48, 0.0 }
 0x25f   :  { %v2573_v5 = vpop.f32.mrb[42].mxu0  ;;  %2172 = vmatmul.mubr.f32.gmra.mrb[150].mxu1 %v391_v31  ;;  %v417_v31 = vld [vmem:[%s7914_s0 + $0xc98] sm:$0xff] }
 0x260   :  { %3213 = vst.msk [vmem:[%s7916_s3 + $0xa0] sm:$0xff] %vm698_vm1, %v3092_v1  ;;  %v4131_v27 = vadd.f32 %v2573_v5, %v1234_v3  ;;  %v3650_v54 = vpop.f32.mrb[43].mxu0  ;;  %3808 = vmatmul.mubr.msk.f32.gmra.mrb[148].mxu0 %vm698_vm1, %v388_v18  ;;  %2176 = vmatprep.mubr.f32.mxu1 %v397_v9  ;;  %v1254_v18 = vadd.f32 %v6427_v51, %v5932_v47  ;;  %v413_v47 = vld [vmem:[%s7914_s0 + $0xc78] sm:$0xff] }
 0x261   :  { %3810 = vmatprep.mubr.msk.f32.mxu0 %vm4578_vm0, %v7927_v21  ;;  %v422_v54 = vld [vmem:[%s7914_s0 + $0xcc0] sm:$0xff] }
 0x262   :  { %v3093_v25 = vmax.f32 %v4131_v27, 0.0  ;;  %v416_v27 = vld [vmem:[%s7914_s0 + $0xc90] sm:$0xff] }
 0x263   :  { %v2578_v61 = vpop.f32.mrb[44].mxu0  ;;  %2177 = vmatmul.mubr.f32.gmra.mrb[152].mxu1 %v396_v24  ;;  %v1259_v24 = vadd.f32 %v6427_v51, %v5946_v53  ;;  %v418_v53 = vld [vmem:[%s7914_s0 + $0xca0] sm:$0xff] }
 0x264   :  { %3214 = vst.msk [vmem:[%s7916_s3 + $0xa8] sm:$0xff] %vm698_vm1, %v3093_v25  ;;  %v4133_v35 = vadd.f32 %v2578_v61, %v1239_v37  ;;  %v3653_v55 = vpop.f32.mrb[45].mxu0  ;;  %3811 = vmatmul.mubr.msk.f32.gmra.mrb[150].mxu0 %vm698_vm1, %v393_v15  ;;  %2181 = vmatprep.mubr.f32.mxu1 %v402_v17  ;;  %v421_v61 = vld [vmem:[%s7914_s0 + $0xcb8] sm:$0xff] }
 0x265   :  { %3813 = vmatprep.mubr.msk.f32.mxu0 %vm4578_vm0, %v7927_v21  ;;  %v1264_v55 = vadd.f32 %v6427_v51, %v5960_v34  ;;  %v423_v34 = vld [vmem:[%s7914_s0 + $0xcc8] sm:$0xff] }
 0x266   :  { %v3094_v30 = vmax.f32 %v4133_v35, 0.0  ;;  %v427_v35 = vld [vmem:[%s7914_s0 + $0xce8] sm:$0xff] }
 0x267   :  { %v2583_v43 = vpop.f32.mrb[46].mxu0  ;;  %2182 = vmatmul.mubr.f32.gmra.mrb[154].mxu1 %v401_v59 }
 0x268   :  { %3215 = vst.msk [vmem:[%s7916_s3 + $0xb0] sm:$0xff] %vm698_vm1, %v3094_v30  ;;  %v4135_v23 = vadd.f32 %v2583_v43, %v1244_v38  ;;  %v3656_v60 = vpop.f32.mrb[47].mxu0  ;;  %3814 = vmatmul.mubr.msk.f32.gmra.mrb[152].mxu0 %vm698_vm1, %v398_v36  ;;  %2186 = vmatprep.mubr.f32.mxu1 %v407_v6  ;;  %v426_v30 = vld [vmem:[%s7914_s0 + $0xce0] sm:$0xff]  ;;  %v432_v43 = vld [vmem:[%s7914_s0 + $0xd10] sm:$0xff] }
 0x269   :  { %3816 = vmatprep.mubr.msk.f32.mxu0 %vm4578_vm0, %v7927_v21 }
 0x26a   :  { %v3095_v56 = vmax.f32 %v4135_v23, 0.0  ;;  %v1269_v23 = vadd.f32 %v6427_v51, %v5974_v12  ;;  %v428_v12 = vld [vmem:[%s7914_s0 + $0xcf0] sm:$0xff] }
 0x26b   :  { %v2588_v58 = vpop.f32.mrb[48].mxu0  ;;  %2187 = vmatmul.mubr.f32.gmra.mrb[156].mxu1 %v406_v49 }
 0x26c   :  { %3216 = vst.msk [vmem:[%s7916_s3 + $0xb8] sm:$0xff] %vm698_vm1, %v3095_v56  ;;  %v4137_v11 = vadd.f32 %v2588_v58, %v1249_v13  ;;  %v3659_v48 = vpop.f32.mrb[49].mxu0  ;;  %3817 = vmatmul.mubr.msk.f32.gmra.mrb[154].mxu0 %vm698_vm1, %v403_v32  ;;  %2191 = vmatprep.mubr.f32.mxu1 %v412_v2  ;;  %v431_v13 = vld [vmem:[%s7914_s0 + $0xd08] sm:$0xff]  ;;  %v437_v56 = vld [vmem:[%s7914_s0 + $0xd38] sm:$0xff]  ;;  %v1274_v58 = vadd.f32 %v6427_v51, %v5988_v14 }
 0x26d   :  { %3819 = vmatprep.mubr.msk.f32.mxu0 %vm4578_vm0, %v7927_v21  ;;  %v433_v14 = vld [vmem:[%s7914_s0 + $0xd18] sm:$0xff] }
 0x26e   :  { %v3096_v9 = vmax.f32 %v4137_v11, 0.0 }
 0x26f   :  { %v2593_v3 = vpop.f32.mrb[50].mxu0  ;;  %2192 = vmatmul.mubr.f32.gmra.mrb[158].mxu1 %v411_v50 }
 0x270   :  { %3217 = vst.msk [vmem:[%s7916_s3 + $0xc0] sm:$0xff] %vm698_vm1, %v3096_v9  ;;  %v4139_v1 = vadd.f32 %v2593_v3, %v1254_v18  ;;  %v3662_v5 = vpop.f32.mrb[51].mxu0  ;;  %3820 = vmatmul.mubr.msk.f32.gmra.mrb[156].mxu0 %vm698_vm1, %v408_v62  ;;  %2196 = vmatprep.mubr.f32.mxu1 %v417_v31  ;;  %v436_v31 = vld [vmem:[%s7914_s0 + $0xd30] sm:$0xff]  ;;  %v442_v18 = vld [vmem:[%s7914_s0 + $0xd60] sm:$0xff]  ;;  %v1279_v9 = vadd.f32 %v6427_v51, %v6002_v22 }
 0x271   :  { %3822 = vmatprep.mubr.msk.f32.mxu0 %vm4578_vm0, %v7927_v21  ;;  %v438_v22 = vld [vmem:[%s7914_s0 + $0xd40] sm:$0xff] }
 0x272   :  { %v3097_v15 = vmax.f32 %v4139_v1, 0.0 }
 0x273   :  { %v2598_v17 = vpop.f32.mrb[52].mxu0  ;;  %2197 = vmatmul.mubr.f32.gmra.mrb[160].mxu1 %v416_v27 }
 0x274   :  { %3218 = vst.msk [vmem:[%s7916_s3 + $0xc8] sm:$0xff] %vm698_vm1, %v3097_v15  ;;  %v4141_v37 = vadd.f32 %v2598_v17, %v1259_v24  ;;  %v3665_v25 = vpop.f32.mrb[53].mxu0  ;;  %3823 = vmatmul.mubr.msk.f32.gmra.mrb[158].mxu0 %vm698_vm1, %v413_v47  ;;  %2201 = vmatprep.mubr.f32.mxu1 %v422_v54  ;;  %v441_v47 = vld [vmem:[%s7914_s0 + $0xd58] sm:$0xff]  ;;  %v447_v54 = vld [vmem:[%s7914_s0 + $0xd88] sm:$0xff]  ;;  %v1284_v24 = vadd.f32 %v6427_v51, %v6016_v33 }
 0x275   :  { %3825 = vmatprep.mubr.msk.f32.mxu0 %vm4578_vm0, %v7927_v21  ;;  %v443_v33 = vld [vmem:[%s7914_s0 + $0xd68] sm:$0xff] }
 0x276   :  { %v3098_v59 = vmax.f32 %v4141_v37, 0.0 }
 0x277   :  { %v2603_v36 = vpop.f32.mrb[54].mxu0  ;;  %2202 = vmatmul.mubr.f32.gmra.mrb[162].mxu1 %v421_v61  ;;  %v446_v61 = vld [vmem:[%s7914_s0 + $0xd80] sm:$0xff] }
 0x278   :  { %3219 = vst.msk [vmem:[%s7916_s3 + $0xd0] sm:$0xff] %vm698_vm1, %v3098_v59  ;;  %v4143_v6 = vadd.f32 %v2603_v36, %v1264_v55  ;;  %v3668_v38 = vpop.f32.mrb[55].mxu0  ;;  %3826 = vmatmul.mubr.msk.f32.gmra.mrb[160].mxu0 %vm698_vm1, %v418_v53  ;;  %2206 = vmatprep.mubr.f32.mxu1 %v427_v35  ;;  %v452_v53 = vld [vmem:[%s7914_s0 + $0xdb0] sm:$0xff]  ;;  %v1289_v35 = vadd.f32 %v6427_v51, %v6030_v42 }
 0x279   :  { %3828 = vmatprep.mubr.msk.f32.mxu0 %vm4578_vm0, %v7927_v21  ;;  %v451_v38 = vld [vmem:[%s7914_s0 + $0xda8] sm:$0xff]  ;;  %v448_v42 = vld [vmem:[%s7914_s0 + $0xd90] sm:$0xff] }
 0x27a   :  { %v3099_v60 = vmax.f32 %v4143_v6, 0.0 }
 0x27b   :  { %v2608_v49 = vpop.f32.mrb[56].mxu0  ;;  %2207 = vmatmul.mubr.f32.gmra.mrb[164].mxu1 %v426_v30  ;;  %v457_v30 = vld [vmem:[%s7914_s0 + $0xdd8] sm:$0xff] }
 0x27c   :  { %3220 = vst.msk [vmem:[%s7916_s3 + $0xd8] sm:$0xff] %vm698_vm1, %v3099_v60  ;;  %v4145_v32 = vadd.f32 %v2608_v49, %v1269_v23  ;;  %v3671_v2 = vpop.f32.mrb[57].mxu0  ;;  %3829 = vmatmul.mubr.msk.f32.gmra.mrb[162].mxu0 %vm698_vm1, %v423_v34  ;;  %2211 = vmatprep.mubr.f32.mxu1 %v432_v43  ;;  %v1294_v34 = vadd.f32 %v6427_v51, %v6044_v20  ;;  %v453_v20 = vld [vmem:[%s7914_s0 + $0xdb8] sm:$0xff] }
 0x27d   :  { %3831 = vmatprep.mubr.msk.f32.mxu0 %vm4578_vm0, %v7927_v21  ;;  %v462_v2 = vld [vmem:[%s7914_s0 + $0xe00] sm:$0xff] }
 0x27e   :  { %v3100_v11 = vmax.f32 %v4145_v32, 0.0  ;;  %v456_v32 = vld [vmem:[%s7914_s0 + $0xdd0] sm:$0xff] }
 0x27f   :  { %v2613_v48 = vpop.f32.mrb[58].mxu0  ;;  %2212 = vmatmul.mubr.f32.gmra.mrb[166].mxu1 %v431_v13  ;;  %v1299_v13 = vadd.f32 %v6427_v51, %v6058_v8  ;;  %v458_v8 = vld [vmem:[%s7914_s0 + $0xde0] sm:$0xff] }
 0x280   :  { %3221 = vst.msk [vmem:[%s7916_s3 + $0xe0] sm:$0xff] %vm698_vm1, %v3100_v11  ;;  %v4147_v50 = vadd.f32 %v2613_v48, %v1274_v58  ;;  %v3674_v62 = vpop.f32.mrb[59].mxu0  ;;  %3832 = vmatmul.mubr.msk.f32.gmra.mrb[164].mxu0 %vm698_vm1, %v428_v12  ;;  %2216 = vmatprep.mubr.f32.mxu1 %v437_v56  ;;  %v461_v48 = vld [vmem:[%s7914_s0 + $0xdf8] sm:$0xff] }
 0x281   :  { %3834 = vmatprep.mubr.msk.f32.mxu0 %vm4578_vm0, %v7927_v21  ;;  %v1304_v62 = vadd.f32 %v6427_v51, %v6072_v4  ;;  %v463_v4 = vld [vmem:[%s7914_s0 + $0xe08] sm:$0xff] }
 0x282   :  { %v3101_v3 = vmax.f32 %v4147_v50, 0.0  ;;  %v467_v50 = vld [vmem:[%s7914_s0 + $0xe28] sm:$0xff] }
 0x283   :  { %v2618_v1 = vpop.f32.mrb[60].mxu0  ;;  %2217 = vmatmul.mubr.f32.gmra.mrb[168].mxu1 %v436_v31 }
 0x284   :  { %3222 = vst.msk [vmem:[%s7916_s3 + $0xe8] sm:$0xff] %vm698_vm1, %v3101_v3  ;;  %v4149_v5 = vadd.f32 %v2618_v1, %v1279_v9  ;;  %v3677_v27 = vpop.f32.mrb[61].mxu0  ;;  %3835 = vmatmul.mubr.msk.f32.gmra.mrb[166].mxu0 %vm698_vm1, %v433_v14  ;;  %2221 = vmatprep.mubr.f32.mxu1 %v442_v18  ;;  %v466_v3 = vld [vmem:[%s7914_s0 + $0xe20] sm:$0xff]  ;;  %v472_v1 = vld [vmem:[%s7914_s0 + $0xe50] sm:$0xff] }
 0x285   :  { %3837 = vmatprep.mubr.msk.f32.mxu0 %vm4578_vm0, %v7927_v21 }
 0x286   :  { %v3102_v15 = vmax.f32 %v4149_v5, 0.0  ;;  %v1309_v5 = vadd.f32 %v6427_v51, %v6086_v16  ;;  %v468_v16 = vld [vmem:[%s7914_s0 + $0xe30] sm:$0xff] }
 0x287   :  { %v2623_v17 = vpop.f32.mrb[62].mxu0  ;;  %2222 = vmatmul.mubr.f32.gmra.mrb[170].mxu1 %v441_v47 }
 0x288   :  { %3223 = vst.msk [vmem:[%s7916_s3 + $0xf0] sm:$0xff] %vm698_vm1, %v3102_v15  ;;  %v4151_v37 = vadd.f32 %v2623_v17, %v1284_v24  ;;  %v3680_v25 = vpop.f32.mrb[63].mxu0  ;;  %3838 = vmatmul.mubr.msk.f32.gmra.mrb[168].mxu0 %vm698_vm1, %v438_v22  ;;  %2226 = vmatprep.mubr.f32.mxu1 %v447_v54  ;;  %v471_v24 = vld [vmem:[%s7914_s0 + $0xe48] sm:$0xff]  ;;  %v477_v15 = vld [vmem:[%s7914_s0 + $0xe78] sm:$0xff]  ;;  %v1314_v17 = vadd.f32 %v6427_v51, %v6100_v28 }
 0x289   :  { %3840 = vmatprep.mubr.msk.f32.mxu0 %vm4578_vm0, %v7927_v21  ;;  %v473_v28 = vld [vmem:[%s7914_s0 + $0xe58] sm:$0xff] }
 0x28a   :  { %v3103_v55 = vmax.f32 %v4151_v37, 0.0 }
 0x28b   :  { %v2628_v59 = vpop.f32.mrb[64].mxu0  ;;  %2227 = vmatmul.mubr.f32.gmra.mrb[172].mxu1 %v446_v61 }
 0x28c   :  { %3224 = vst.msk [vmem:[%s7916_s3 + $0xf8] sm:$0xff] %vm698_vm1, %v3103_v55  ;;  %v4153_v36 = vadd.f32 %v2628_v59, %v1289_v35  ;;  %v3683_v6 = vpop.f32.mrb[65].mxu0  ;;  %3841 = vmatmul.mubr.msk.f32.gmra.mrb[170].mxu0 %vm698_vm1, %v443_v33  ;;  %2231 = vmatprep.mubr.f32.mxu1 %v452_v53  ;;  %v476_v53 = vld [vmem:[%s7914_s0 + $0xe70] sm:$0xff]  ;;  %v482_v35 = vld [vmem:[%s7914_s0 + $0xea0] sm:$0xff]  ;;  %v1319_v55 = vadd.f32 %v6427_v51, %v6114_v40  ;;  %v487_v51 = vld [vmem:[%s7914_s0 + $0xec8] sm:$0xff] }
 0x28d   :  { %3843 = vmatprep.mubr.msk.f32.mxu0 %vm4578_vm0, %v7927_v21  ;;  %v478_v40 = vld [vmem:[%s7914_s0 + $0xe80] sm:$0xff] }
 0x28e   :  { %v3104_v43 = vmax.f32 %v4153_v36, 0.0 }
 0x28f   :  { %v2633_v23 = vpop.f32.mrb[66].mxu0  ;;  %2232 = vmatmul.mubr.f32.gmra.mrb[174].mxu1 %v451_v38 }
 0x290   :  { %3225 = vst.msk [vmem:[%s7916_s3 + $0x100] sm:$0xff] %vm698_vm1, %v3104_v43  ;;  %v4155_v60 = vadd.f32 %v2633_v23, %v1294_v34  ;;  %v3686_v49 = vpop.f32.mrb[67].mxu0  ;;  %3844 = vmatmul.mubr.msk.f32.gmra.mrb[172].mxu0 %vm698_vm1, %v448_v42  ;;  %2236 = vmatprep.mubr.f32.mxu1 %v457_v30  ;;  %v481_v42 = vld [vmem:[%s7914_s0 + $0xe98] sm:$0xff]  ;;  %v7142_v30 = vld [vmem:[%s7915_s2] ss:$0 sm:$0xff] }
 0x291   :  { %3846 = vmatprep.mubr.msk.f32.mxu0 %vm4578_vm0, %v7927_v21  ;;  %v1324_v34 = vadd.f32 %v7142_v30, %v6128_v52  ;;  %v483_v52 = vld [vmem:[%s7914_s0 + $0xea8] sm:$0xff] }
 0x292   :  { %v3105_v12 = vmax.f32 %v4155_v60, 0.0 }
 0x293   :  { %v2638_v56 = vpop.f32.mrb[68].mxu0  ;;  %2237 = vmatmul.mubr.f32.gmra.mrb[176].mxu1 %v456_v32  ;;  %v486_v32 = vld [vmem:[%s7914_s0 + $0xec0] sm:$0xff] }
 0x294   :  { %3226 = vst.msk [vmem:[%s7916_s3 + $0x108] sm:$0xff] %vm698_vm1, %v3105_v12  ;;  %v4157_v58 = vadd.f32 %v2638_v56, %v1299_v13  ;;  %v3689_v11 = vpop.f32.mrb[69].mxu0  ;;  %3847 = vmatmul.mubr.msk.f32.gmra.mrb[174].mxu0 %vm698_vm1, %v453_v20  ;;  %2241 = vmatprep.mubr.f32.mxu1 %v462_v2  ;;  %v492_v20 = vld [vmem:[%s7914_s0 + $0xef0] sm:$0xff]  ;;  %v1329_v2 = vadd.f32 %v7142_v30, %v6142_v63 }
 0x295   :  { %3849 = vmatprep.mubr.msk.f32.mxu0 %vm4578_vm0, %v7927_v21  ;;  %v491_v11 = vld [vmem:[%s7914_s0 + $0xee8] sm:$0xff]  ;;  %v488_v63 = vld [vmem:[%s7914_s0 + $0xed0] sm:$0xff] }
 0x296   :  { %v3106_v31 = vmax.f32 %v4157_v58, 0.0 }
 0x297   :  { %v2643_v14 = vpop.f32.mrb[70].mxu0  ;;  %2242 = vmatmul.mubr.f32.gmra.mrb[178].mxu1 %v461_v48  ;;  %v497_v48 = vld [vmem:[%s7914_s0 + $0xf18] sm:$0xff] }
 0x298   :  { %3227 = vst.msk [vmem:[%s7916_s3 + $0x110] sm:$0xff] %vm698_vm1, %v3106_v31  ;;  %v4159_v18 = vadd.f32 %v2643_v14, %v1304_v62  ;;  %v3692_v9 = vpop.f32.mrb[71].mxu0  ;;  %3850 = vmatmul.mubr.msk.f32.gmra.mrb[176].mxu0 %vm698_vm1, %v458_v8  ;;  %2246 = vmatprep.mubr.f32.mxu1 %v467_v50  ;;  %v1334_v8 = vadd.f32 %v7142_v30, %v6156_v10  ;;  %v493_v10 = vld [vmem:[%s7914_s0 + $0xef8] sm:$0xff] }
 0x299   :  { %3852 = vmatprep.mubr.msk.f32.mxu0 %vm4578_vm0, %v7927_v21  ;;  %v502_v9 = vld [vmem:[%s7914_s0 + $0xf40] sm:$0xff] }
 0x29a   :  { %v3107_v27 = vmax.f32 %v4159_v18, 0.0  ;;  %v496_v18 = vld [vmem:[%s7914_s0 + $0xf10] sm:$0xff] }
 0x29b   :  { %v2648_v47 = vpop.f32.mrb[72].mxu0  ;;  %2247 = vmatmul.mubr.f32.gmra.mrb[180].mxu1 %v466_v3  ;;  %v1339_v3 = vadd.f32 %v7142_v30, %v6170_v44  ;;  %v498_v44 = vld [vmem:[%s7914_s0 + $0xf20] sm:$0xff] }
 0x29c   :  { %3228 = vst.msk [vmem:[%s7916_s3 + $0x118] sm:$0xff] %vm698_vm1, %v3107_v27  ;;  %v4161_v22 = vadd.f32 %v2648_v47, %v1309_v5  ;;  %v3695_v54 = vpop.f32.mrb[73].mxu0  ;;  %3853 = vmatmul.mubr.msk.f32.gmra.mrb[178].mxu0 %vm698_vm1, %v463_v4  ;;  %2251 = vmatprep.mubr.f32.mxu1 %v472_v1  ;;  %v501_v47 = vld [vmem:[%s7914_s0 + $0xf38] sm:$0xff] }
 0x29d   :  { %3855 = vmatprep.mubr.msk.f32.mxu0 %vm4578_vm0, %v7927_v21  ;;  %v1344_v54 = vadd.f32 %v7142_v30, %v6184_v45  ;;  %v503_v45 = vld [vmem:[%s7914_s0 + $0xf48] sm:$0xff] }
 0x29e   :  { %v3108_v37 = vmax.f32 %v4161_v22, 0.0  ;;  %v507_v22 = vld [vmem:[%s7914_s0 + $0xf68] sm:$0xff] }
 0x29f   :  { %v2653_v25 = vpop.f32.mrb[74].mxu0  ;;  %2252 = vmatmul.mubr.f32.gmra.mrb[182].mxu1 %v471_v24 }
 0x2a0   :  { %3229 = vst.msk [vmem:[%s7916_s3 + $0x120] sm:$0xff] %vm698_vm1, %v3108_v37  ;;  %v4163_v61 = vadd.f32 %v2653_v25, %v1314_v17  ;;  %v3698_v33 = vpop.f32.mrb[75].mxu0  ;;  %3856 = vmatmul.mubr.msk.f32.gmra.mrb[180].mxu0 %vm698_vm1, %v468_v16  ;;  %2256 = vmatprep.mubr.f32.mxu1 %v477_v15  ;;  %v506_v37 = vld [vmem:[%s7914_s0 + $0xf60] sm:$0xff]  ;;  %v512_v25 = vld [vmem:[%s7914_s0 + $0xf90] sm:$0xff] }
 0x2a1   :  { %3858 = vmatprep.mubr.msk.f32.mxu0 %vm4578_vm0, %v7927_v21 }
 0x2a2   :  { %v3109_v59 = vmax.f32 %v4163_v61, 0.0  ;;  %v1349_v61 = vadd.f32 %v7142_v30, %v6198_v57  ;;  %v508_v57 = vld [vmem:[%s7914_s0 + $0xf70] sm:$0xff] }
 0x2a3   :  { %v2658_v36 = vpop.f32.mrb[76].mxu0  ;;  %2257 = vmatmul.mubr.f32.gmra.mrb[184].mxu1 %v476_v53 }
 0x2a4   :  { %3230 = vst.msk [vmem:[%s7916_s3 + $0x128] sm:$0xff] %vm698_vm1, %v3109_v59  ;;  %v4165_v6 = vadd.f32 %v2658_v36, %v1319_v55  ;;  %v3701_v38 = vpop.f32.mrb[77].mxu0  ;;  %3859 = vmatmul.mubr.msk.f32.gmra.mrb[182].mxu0 %vm698_vm1, %v473_v28  ;;  %2261 = vmatprep.mubr.f32.mxu1 %v482_v35  ;;  %v511_v55 = vld [vmem:[%s7914_s0 + $0xf88] sm:$0xff]  ;;  %v517_v59 = vld [vmem:[%s7914_s0 + $0xfb8] sm:$0xff]  ;;  %v1354_v36 = vadd.f32 %v7142_v30, %v6212_v7 }
 0x2a5   :  { %3861 = vmatprep.mubr.msk.f32.mxu0 %vm4578_vm0, %v7927_v21  ;;  %v513_v7 = vld [vmem:[%s7914_s0 + $0xf98] sm:$0xff] }
 0x2a6   :  { %v3110_v43 = vmax.f32 %v4165_v6, 0.0 }
 0x2a7   :  { %v2663_v23 = vpop.f32.mrb[78].mxu0  ;;  %2262 = vmatmul.mubr.f32.gmra.mrb[186].mxu1 %v481_v42 }
 0x2a8   :  { %3231 = vst.msk [vmem:[%s7916_s3 + $0x130] sm:$0xff] %vm698_vm1, %v3110_v43  ;;  %v4167_v60 = vadd.f32 %v2663_v23, %v1324_v34  ;;  %v3704_v49 = vpop.f32.mrb[79].mxu0  ;;  %3862 = vmatmul.mubr.msk.f32.gmra.mrb[184].mxu0 %vm698_vm1, %v478_v40  ;;  %2266 = vmatprep.mubr.f32.mxu1 %v487_v51  ;;  %v516_v51 = vld [vmem:[%s7914_s0 + $0xfb0] sm:$0xff]  ;;  %v522_v34 = vld [vmem:[%s7914_s0 + $0xfe0] sm:$0xff]  ;;  %v1359_v43 = vadd.f32 %v7142_v30, %v6226_v26 }
 0x2a9   :  { %3864 = vmatprep.mubr.msk.f32.mxu0 %vm4578_vm0, %v7927_v21  ;;  %v518_v26 = vld [vmem:[%s7914_s0 + $0xfc0] sm:$0xff] }
 0x2aa   :  { %v3111_v13 = vmax.f32 %v4167_v60, 0.0 }
 0x2ab   :  { %v2668_v12 = vpop.f32.mrb[80].mxu0  ;;  %2267 = vmatmul.mubr.f32.gmra.mrb[188].mxu1 %v486_v32 }
 0x2ac   :  { %3232 = vst.msk [vmem:[%s7916_s3 + $0x138] sm:$0xff] %vm698_vm1, %v3111_v13  ;;  %v4169_v56 = vadd.f32 %v2668_v12, %v1329_v2  ;;  %v3707_v58 = vpop.f32.mrb[81].mxu0  ;;  %3865 = vmatmul.mubr.msk.f32.gmra.mrb[186].mxu0 %vm698_vm1, %v483_v52  ;;  %2271 = vmatprep.mubr.f32.mxu1 %v492_v20  ;;  %v521_v52 = vld [vmem:[%s7914_s0 + $0xfd8] sm:$0xff]  ;;  %v527_v20 = vld [vmem:[%s7914_s0 + $0x1008] sm:$0xff]  ;;  %v1364_v2 = vadd.f32 %v7142_v30, %v6240_v46 }
 0x2ad   :  { %3867 = vmatprep.mubr.msk.f32.mxu0 %vm4578_vm0, %v7927_v21  ;;  %v523_v46 = vld [vmem:[%s7914_s0 + $0xfe8] sm:$0xff] }
 0x2ae   :  { %v3112_v50 = vmax.f32 %v4169_v56, 0.0 }
 0x2af   :  { %v2673_v62 = vpop.f32.mrb[82].mxu0  ;;  %2272 = vmatmul.mubr.f32.gmra.mrb[190].mxu1 %v491_v11  ;;  %v526_v11 = vld [vmem:[%s7914_s0 + $0x1000] sm:$0xff] }
 0x2b0   :  { %3233 = vst.msk [vmem:[%s7916_s3 + $0x140] sm:$0xff] %vm698_vm1, %v3112_v50  ;;  %v4171_v31 = vadd.f32 %v2673_v62, %v1334_v8  ;;  %v3710_v14 = vpop.f32.mrb[83].mxu0  ;;  %3868 = vmatmul.mubr.msk.f32.gmra.mrb[188].mxu0 %vm698_vm1, %v488_v63  ;;  %2276 = vmatprep.mubr.f32.mxu1 %v497_v48  ;;  %v532_v63 = vld [vmem:[%s7914_s0 + $0x1030] sm:$0xff]  ;;  %v1369_v48 = vadd.f32 %v7142_v30, %v6254_v0 }
 0x2b1   :  { %3870 = vmatprep.mubr.msk.f32.mxu0 %vm4578_vm0, %v7927_v21  ;;  %v531_v14 = vld [vmem:[%s7914_s0 + $0x1028] sm:$0xff]  ;;  %v528_v0 = vld [vmem:[%s7914_s0 + $0x1010] sm:$0xff] }
 0x2b2   :  { %v3113_v4 = vmax.f32 %v4171_v31, 0.0 }
 0x2b3   :  { %v2678_v1 = vpop.f32.mrb[84].mxu0  ;;  %2277 = vmatmul.mubr.f32.gmra.mrb[192].mxu1 %v496_v18  ;;  %v537_v18 = vld [vmem:[%s7914_s0 + $0x1058] sm:$0xff] }
 0x2b4   :  { %3234 = vst.msk [vmem:[%s7916_s3 + $0x148] sm:$0xff] %vm698_vm1, %v3113_v4  ;;  %v4173_v5 = vadd.f32 %v2678_v1, %v1339_v3  ;;  %v3713_v27 = vpop.f32.mrb[85].mxu0  ;;  %3871 = vmatmul.mubr.msk.f32.gmra.mrb[190].mxu0 %vm698_vm1, %v493_v10  ;;  %2281 = vmatprep.mubr.f32.mxu1 %v502_v9  ;;  %v1374_v10 = vadd.f32 %v7142_v30, %v6268_v19  ;;  %v533_v19 = vld [vmem:[%s7914_s0 + $0x1038] sm:$0xff] }
 0x2b5   :  { %3873 = vmatprep.mubr.msk.f32.mxu0 %vm4578_vm0, %v7927_v21  ;;  %v542_v27 = vld [vmem:[%s7914_s0 + $0x1080] sm:$0xff] }
 0x2b6   :  { %v3114_v24 = vmax.f32 %v4173_v5, 0.0  ;;  %v536_v5 = vld [vmem:[%s7914_s0 + $0x1050] sm:$0xff] }
 0x2b7   :  { %v2683_v16 = vpop.f32.mrb[86].mxu0  ;;  %2282 = vmatmul.mubr.f32.gmra.mrb[194].mxu1 %v501_v47  ;;  %v1379_v47 = vadd.f32 %v7142_v30, %v6282_v39  ;;  %v538_v39 = vld [vmem:[%s7914_s0 + $0x1060] sm:$0xff] }
 0x2b8   :  { %3235 = vst.msk [vmem:[%s7916_s3 + $0x150] sm:$0xff] %vm698_vm1, %v3114_v24  ;;  %v4175_v15 = vadd.f32 %v2683_v16, %v1344_v54  ;;  %v3716_v17 = vpop.f32.mrb[87].mxu0  ;;  %3874 = vmatmul.mubr.msk.f32.gmra.mrb[192].mxu0 %vm698_vm1, %v498_v44  ;;  %2286 = vmatprep.mubr.f32.mxu1 %v507_v22  ;;  %v541_v16 = vld [vmem:[%s7914_s0 + $0x1078] sm:$0xff] }
 0x2b9   :  { %3876 = vmatprep.mubr.msk.f32.mxu0 %vm4578_vm0, %v7927_v21  ;;  %v1384_v17 = vadd.f32 %v7142_v30, %v6296_v41  ;;  %v543_v41 = vld [vmem:[%s7914_s0 + $0x1088] sm:$0xff] }
 0x2ba   :  { %v3115_v33 = vmax.f32 %v4175_v15, 0.0  ;;  %v547_v15 = vld [vmem:[%s7914_s0 + $0x10a8] sm:$0xff] }
 0x2bb   :  { %v2688_v53 = vpop.f32.mrb[88].mxu0  ;;  %2287 = vmatmul.mubr.f32.gmra.mrb[196].mxu1 %v506_v37 }
 0x2bc   :  { %3236 = vst.msk [vmem:[%s7916_s3 + $0x158] sm:$0xff] %vm698_vm1, %v3115_v33  ;;  %v4177_v28 = vadd.f32 %v2688_v53, %v1349_v61  ;;  %v3719_v35 = vpop.f32.mrb[89].mxu0  ;;  %3877 = vmatmul.mubr.msk.f32.gmra.mrb[194].mxu0 %vm698_vm1, %v503_v45  ;;  %2291 = vmatprep.mubr.f32.mxu1 %v512_v25  ;;  %v546_v33 = vld [vmem:[%s7914_s0 + $0x10a0] sm:$0xff]  ;;  %v552_v53 = vld [vmem:[%s7914_s0 + $0x10d0] sm:$0xff] }
 0x2bd   :  { %3879 = vmatprep.mubr.msk.f32.mxu0 %vm4578_vm0, %v7927_v21 }
 0x2be   :  { %v3116_v6 = vmax.f32 %v4177_v28, 0.0  ;;  %v1389_v28 = vadd.f32 %v7142_v30, %v6310_v29  ;;  %v548_v29 = vld [vmem:[%s7914_s0 + $0x10b0] sm:$0xff] }
 0x2bf   :  { %v2693_v38 = vpop.f32.mrb[90].mxu0  ;;  %2292 = vmatmul.mubr.f32.gmra.mrb[198].mxu1 %v511_v55 }
 0x2c0   :  { %3237 = vst.msk [vmem:[%s7916_s3 + $0x160] sm:$0xff] %vm698_vm1, %v3116_v6  ;;  %v4179_v42 = vadd.f32 %v2693_v38, %v1354_v36  ;;  %v3722_v40 = vpop.f32.mrb[91].mxu0  ;;  %3880 = vmatmul.mubr.msk.f32.gmra.mrb[196].mxu0 %vm698_vm1, %v508_v57  ;;  %2296 = vmatprep.mubr.f32.mxu1 %v517_v59  ;;  %v551_v36 = vld [vmem:[%s7914_s0 + $0x10c8] sm:$0xff]  ;;  %v557_v6 = vld [vmem:[%s7914_s0 + $0x10f8] sm:$0xff]  ;;  %v7928_v38 = vld [vmem:[#allocation2_spill] sm:$0xff] }
 0x2c1   :  { %3882 = vmatprep.mubr.msk.f32.mxu0 %vm4578_vm0, %v7927_v21 }
 0x2c2   :  { %v3117_v23 = vmax.f32 %v4179_v42, 0.0  ;;  %v1394_v42 = vadd.f32 %v7142_v30, %v7928_v38  ;;  %v592_v38 = vld [vmem:[%s7914_s0 + $0x1210] sm:$0xff] }
 0x2c3   :  { %v2698_v60 = vpop.f32.mrb[92].mxu0  ;;  %2297 = vmatmul.mubr.f32.gmra.mrb[200].mxu1 %v516_v51 }
 0x2c4   :  { %3238 = vst.msk [vmem:[%s7916_s3 + $0x168] sm:$0xff] %vm698_vm1, %v3117_v23  ;;  %v4181_v49 = vadd.f32 %v2698_v60, %v1359_v43  ;;  %v3725_v32 = vpop.f32.mrb[93].mxu0  ;;  %3883 = vmatmul.mubr.msk.f32.gmra.mrb[198].mxu0 %vm698_vm1, %v513_v7  ;;  %2301 = vmatprep.mubr.f32.mxu1 %v522_v34  ;;  %v556_v43 = vld [vmem:[%s7914_s0 + $0x10f0] sm:$0xff]  ;;  %v553_v23 = vld [vmem:[%s7914_s0 + $0x10d8] sm:$0xff]  ;;  %v562_v60 = vld [vmem:[%s7914_s0 + $0x1120] sm:$0xff] }
 0x2c5   :  { %3885 = vmatprep.mubr.msk.f32.mxu0 %vm4578_vm0, %v7927_v21 }
 0x2c6   :  { %v3118_v13 = vmax.f32 %v4181_v49, 0.0  ;;  %v7929_v49 = vld [vmem:[#allocation3_spill] sm:$0xff] }
 0x2c7   :  { %v2703_v12 = vpop.f32.mrb[94].mxu0  ;;  %2302 = vmatmul.mubr.f32.gmra.mrb[202].mxu1 %v521_v52  ;;  %v1399_v32 = vadd.f32 %v7142_v30, %v7929_v49  ;;  %v591_v49 = vld [vmem:[%s7914_s0 + $0x1208] sm:$0xff] }
 0x2c8   :  { %3239 = vst.msk [vmem:[%s7916_s3 + $0x170] sm:$0xff] %vm698_vm1, %v3118_v13  ;;  %v4183_v56 = vadd.f32 %v2703_v12, %v1364_v2  ;;  %v3728_v58 = vpop.f32.mrb[95].mxu0  ;;  %3886 = vmatmul.mubr.msk.f32.gmra.mrb[200].mxu0 %vm698_vm1, %v518_v26  ;;  %2306 = vmatprep.mubr.f32.mxu1 %v527_v20  ;;  %v561_v13 = vld [vmem:[%s7914_s0 + $0x1118] sm:$0xff]  ;;  %v558_v12 = vld [vmem:[%s7914_s0 + $0x1100] sm:$0xff] }
 0x2c9   :  { %3888 = vmatprep.mubr.msk.f32.mxu0 %vm4578_vm0, %v7927_v21  ;;  %v7930_v58 = vld [vmem:[#allocation4_spill] sm:$0xff] }
 0x2ca   :  { %v3119_v8 = vmax.f32 %v4183_v56, 0.0  ;;  %v567_v56 = vld [vmem:[%s7914_s0 + $0x1148] sm:$0xff] }
 0x2cb   :  { %v2708_v50 = vpop.f32.mrb[96].mxu0  ;;  %2307 = vmatmul.mubr.f32.gmra.mrb[204].mxu1 %v526_v11  ;;  %v1404_v11 = vadd.f32 %v7142_v30, %v7930_v58 }
 0x2cc   :  { %3240 = vst.msk [vmem:[%s7916_s3 + $0x178] sm:$0xff] %vm698_vm1, %v3119_v8  ;;  %v4185_v62 = vadd.f32 %v2708_v50, %v1369_v48  ;;  %v3731_v31 = vpop.f32.mrb[97].mxu0  ;;  %3889 = vmatmul.mubr.msk.f32.gmra.mrb[202].mxu0 %vm698_vm1, %v523_v46  ;;  %2311 = vmatprep.mubr.f32.mxu1 %v532_v63  ;;  %v566_v50 = vld [vmem:[%s7914_s0 + $0x1140] sm:$0xff] }
 0x2cd   :  { %3891 = vmatprep.mubr.msk.f32.mxu0 %vm4578_vm0, %v7927_v21  ;;  %v572_v31 = vld [vmem:[%s7914_s0 + $0x1170] sm:$0xff] }
 0x2ce   :  { %v3120_v9 = vmax.f32 %v4185_v62, 0.0  ;;  %v563_v62 = vld [vmem:[%s7914_s0 + $0x1128] sm:$0xff] }
 0x2cf   :  { %v2713_v3 = vpop.f32.mrb[98].mxu0  ;;  %2312 = vmatmul.mubr.f32.gmra.mrb[206].mxu1 %v531_v14  ;;  %v7931_v14 = vld [vmem:[#allocation5_spill] sm:$0xff] }
 0x2d0   :  { %3241 = vst.msk [vmem:[%s7916_s3 + $0x180] sm:$0xff] %vm698_vm1, %v3120_v9  ;;  %v4187_v4 = vadd.f32 %v2713_v3, %v1374_v10  ;;  %v3734_v1 = vpop.f32.mrb[99].mxu0  ;;  %3892 = vmatmul.mubr.msk.f32.gmra.mrb[204].mxu0 %vm698_vm1, %v528_v0  ;;  %2316 = vmatprep.mubr.f32.mxu1 %v537_v18  ;;  %v1409_v0 = vadd.f32 %v7142_v30, %v7931_v14 }
 0x2d1   :  { %3894 = vmatprep.mubr.msk.f32.mxu0 %vm4578_vm0, %v7927_v21  ;;  %v568_v1 = vld [vmem:[%s7914_s0 + $0x1150] sm:$0xff] }
 0x2d2   :  { %v3121_v44 = vmax.f32 %v4187_v4, 0.0  ;;  %v571_v4 = vld [vmem:[%s7914_s0 + $0x1168] sm:$0xff] }
 0x2d3   :  { %v2718_v22 = vpop.f32.mrb[100].mxu0  ;;  %2317 = vmatmul.mubr.f32.gmra.mrb[208].mxu1 %v536_v5  ;;  %v577_v5 = vld [vmem:[%s7914_s0 + $0x1198] sm:$0xff] }
 0x2d4   :  { %3242 = vst.msk [vmem:[%s7916_s3 + $0x188] sm:$0xff] %vm698_vm1, %v3121_v44  ;;  %v4189_v54 = vadd.f32 %v2718_v22, %v1379_v47  ;;  %v3737_v24 = vpop.f32.mrb[101].mxu0  ;;  %3895 = vmatmul.mubr.msk.f32.gmra.mrb[206].mxu0 %vm698_vm1, %v533_v19  ;;  %2321 = vmatprep.mubr.f32.mxu1 %v542_v27  ;;  %v7932_v19 = vld [vmem:[#allocation6_spill] sm:$0xff] }
 0x2d5   :  { %3897 = vmatprep.mubr.msk.f32.mxu0 %vm4578_vm0, %v7927_v21  ;;  %v1414_v27 = vadd.f32 %v7142_v30, %v7932_v19  ;;  %v576_v24 = vld [vmem:[%s7914_s0 + $0x1190] sm:$0xff] }
 0x2d6   :  { %v3122_v37 = vmax.f32 %v4189_v54, 0.0 }
 0x2d7   :  { %v2723_v45 = vpop.f32.mrb[102].mxu0  ;;  %2322 = vmatmul.mubr.f32.gmra.mrb[210].mxu1 %v541_v16  ;;  %v573_v16 = vld [vmem:[%s7914_s0 + $0x1178] sm:$0xff] }
 0x2d8   :  { %3243 = vst.msk [vmem:[%s7916_s3 + $0x190] sm:$0xff] %vm698_vm1, %v3122_v37  ;;  %v4191_v25 = vadd.f32 %v2723_v45, %v1384_v17  ;;  %v3740_v61 = vpop.f32.mrb[103].mxu0  ;;  %3898 = vmatmul.mubr.msk.f32.gmra.mrb[208].mxu0 %vm698_vm1, %v538_v39  ;;  %2326 = vmatprep.mubr.f32.mxu1 %v547_v15  ;;  %v582_v39 = vld [vmem:[%s7914_s0 + $0x11c0] sm:$0xff]  ;;  %v7933_v15 = vld [vmem:[#allocation7_spill] sm:$0xff] }
 0x2d9   :  { %3900 = vmatprep.mubr.msk.f32.mxu0 %vm4578_vm0, %v7927_v21  ;;  %v1419_v17 = vadd.f32 %v7142_v30, %v7933_v15 }
 0x2da   :  { %v3123_v35 = vmax.f32 %v4191_v25, 0.0 }
 0x2db   :  { %v2728_v55 = vpop.f32.mrb[104].mxu0  ;;  %2327 = vmatmul.mubr.f32.gmra.mrb[212].mxu1 %v546_v33  ;;  %v581_v33 = vld [vmem:[%s7914_s0 + $0x11b8] sm:$0xff] }
 0x2dc   :  { %3244 = vst.msk [vmem:[%s7916_s3 + $0x198] sm:$0xff] %vm698_vm1, %v3123_v35  ;;  %v4193_v57 = vadd.f32 %v2728_v55, %v1389_v28  ;;  %v3743_v59 = vpop.f32.mrb[105].mxu0  ;;  %3901 = vmatmul.mubr.msk.f32.gmra.mrb[210].mxu0 %vm698_vm1, %v543_v41  ;;  %2331 = vmatprep.mubr.f32.mxu1 %v552_v53  ;;  %v578_v41 = vld [vmem:[%s7914_s0 + $0x11a0] sm:$0xff]  ;;  %v587_v53 = vld [vmem:[%s7914_s0 + $0x11e8] sm:$0xff]  ;;  %v7934_v28 = vld [vmem:[#allocation8_spill] sm:$0xff] }
 0x2dd   :  { %3903 = vmatprep.mubr.msk.f32.mxu0 %vm4578_vm0, %v7927_v21  ;;  %v1424_v35 = vadd.f32 %v7142_v30, %v7934_v28 }
 0x2de   :  { %v3124_v40 = vmax.f32 %v4193_v57, 0.0 }
 0x2df   :  { %v2733_v51 = vpop.f32.mrb[106].mxu0  ;;  %2332 = vmatmul.mubr.f32.gmra.mrb[214].mxu1 %v551_v36 }
 0x2e0   :  { %3245 = vst.msk [vmem:[%s7916_s3 + $0x1a0] sm:$0xff] %vm698_vm1, %v3124_v40  ;;  %v4195_v7 = vadd.f32 %v2733_v51, %v1394_v42  ;;  %v3746_v34 = vpop.f32.mrb[107].mxu0  ;;  %3904 = vmatmul.mubr.msk.f32.gmra.mrb[212].mxu0 %vm698_vm1, %v548_v29  ;;  %2336 = vmatprep.mubr.f32.mxu1 %v557_v6  ;;  %v586_v29 = vld [vmem:[%s7914_s0 + $0x11e0] sm:$0xff]  ;;  %v583_v6 = vld [vmem:[%s7914_s0 + $0x11c8] sm:$0xff]  ;;  %v7935_v42 = vld [vmem:[#allocation9_spill] sm:$0xff] }
 0x2e1   :  { %3906 = vmatprep.mubr.msk.f32.mxu0 %vm4578_vm0, %v7927_v21  ;;  %v1429_v40 = vadd.f32 %v7142_v30, %v7935_v42 }
 0x2e2   :  { %v3125_v52 = vmax.f32 %v4195_v7, 0.0 }
 0x2e3   :  { %v2738_v26 = vpop.f32.mrb[108].mxu0  ;;  %2337 = vmatmul.mubr.f32.gmra.mrb[216].mxu1 %v556_v43 }
 0x2e4   :  { %3246 = vst.msk [vmem:[%s7916_s3 + $0x1a8] sm:$0xff] %vm698_vm1, %v3125_v52  ;;  %v4197_v20 = vadd.f32 %v2738_v26, %v1399_v32  ;;  %v3749_v2 = vpop.f32.mrb[109].mxu0  ;;  %3907 = vmatmul.mubr.msk.f32.gmra.mrb[214].mxu0 %vm698_vm1, %v553_v23  ;;  %2341 = vmatprep.mubr.f32.mxu1 %v562_v60  ;;  %v588_v32 = vld [vmem:[%s7914_s0 + $0x11f0] sm:$0xff]  ;;  %v597_v52 = vld [vmem:[%s7914_s0 + $0x1238] sm:$0xff] }
 0x2e5   :  { %3909 = vmatprep.mubr.msk.f32.mxu0 %vm4578_vm0, %v7927_v21 }
 0x2e6   :  { %v3126_v46 = vmax.f32 %v4197_v20, 0.0 }
 0x2e7   :  { %v2743_v63 = vpop.f32.mrb[110].mxu0  ;;  %2342 = vmatmul.mubr.f32.gmra.mrb[218].mxu1 %v561_v13 }
 0x2e8   :  { %3247 = vst.msk [vmem:[%s7916_s3 + $0x1b0] sm:$0xff] %vm698_vm1, %v3126_v46  ;;  %v4199_v48 = vadd.f32 %v2743_v63, %v1404_v11  ;;  %v3752_v8 = vpop.f32.mrb[111].mxu0  ;;  %3910 = vmatmul.mubr.msk.f32.gmra.mrb[216].mxu0 %vm698_vm1, %v558_v12  ;;  %2346 = vmatprep.mubr.f32.mxu1 %v567_v56  ;;  %v596_v11 = vld [vmem:[%s7914_s0 + $0x1230] sm:$0xff]  ;;  %v593_v46 = vld [vmem:[%s7914_s0 + $0x1218] sm:$0xff]  ;;  %v602_v63 = vld [vmem:[%s7914_s0 + $0x1260] sm:$0xff] }
 0x2e9   :  { %3912 = vmatprep.mubr.msk.f32.mxu0 %vm4578_vm0, %v7927_v21 }
 0x2ea   :  { %v3127_v18 = vmax.f32 %v4199_v48, 0.0 }
 0x2eb   :  { %v2748_v10 = vpop.f32.mrb[112].mxu0  ;;  %2347 = vmatmul.mubr.f32.gmra.mrb[220].mxu1 %v566_v50 }
 0x2ec   :  { %3248 = vst.msk [vmem:[%s7916_s3 + $0x1b8] sm:$0xff] %vm698_vm1, %v3127_v18  ;;  %v4201_v9 = vadd.f32 %v2748_v10, %v1409_v0  ;;  %v3755_v3 = vpop.f32.mrb[113].mxu0  ;;  %3913 = vmatmul.mubr.msk.f32.gmra.mrb[218].mxu0 %vm698_vm1, %v563_v62  ;;  %2351 = vmatprep.mubr.f32.mxu1 %v572_v31  ;;  %v601_v18 = vld [vmem:[%s7914_s0 + $0x1258] sm:$0xff]  ;;  %v598_v10 = vld [vmem:[%s7914_s0 + $0x1240] sm:$0xff] }
 0x2ed   :  { %3915 = vmatprep.mubr.msk.f32.mxu0 %vm4578_vm0, %v7927_v21 }
 0x2ee   :  { %v3128_v47 = vmax.f32 %v4201_v9, 0.0  ;;  %v607_v9 = vld [vmem:[%s7914_s0 + $0x1288] sm:$0xff] }
 0x2ef   :  { %v2753_v44 = vpop.f32.mrb[114].mxu0  ;;  %2352 = vmatmul.mubr.f32.gmra.mrb[222].mxu1 %v571_v4 }
 0x2f0   :  { %3249 = vst.msk [vmem:[%s7916_s3 + $0x1c0] sm:$0xff] %vm698_vm1, %v3128_v47  ;;  %v4203_v22 = vadd.f32 %v2753_v44, %v1414_v27  ;;  %v3758_v54 = vpop.f32.mrb[115].mxu0  ;;  %3916 = vmatmul.mubr.msk.f32.gmra.mrb[220].mxu0 %vm698_vm1, %v568_v1  ;;  %2356 = vmatprep.mubr.f32.mxu1 %v577_v5  ;;  %v606_v44 = vld [vmem:[%s7914_s0 + $0x1280] sm:$0xff] }
 0x2f1   :  { %3918 = vmatprep.mubr.msk.f32.mxu0 %vm4578_vm0, %v7927_v21  ;;  %v612_v54 = vld [vmem:[%s7914_s0 + $0x12b0] sm:$0xff] }
 0x2f2   :  { %v3129_v37 = vmax.f32 %v4203_v22, 0.0  ;;  %v603_v22 = vld [vmem:[%s7914_s0 + $0x1268] sm:$0xff] }
 0x2f3   :  { %v2758_v45 = vpop.f32.mrb[116].mxu0  ;;  %2357 = vmatmul.mubr.f32.gmra.mrb[224].mxu1 %v576_v24 }
 0x2f4   :  { %3250 = vst.msk [vmem:[%s7916_s3 + $0x1c8] sm:$0xff] %vm698_vm1, %v3129_v37  ;;  %v4205_v25 = vadd.f32 %v2758_v45, %v1419_v17  ;;  %v3761_v61 = vpop.f32.mrb[117].mxu0  ;;  %3919 = vmatmul.mubr.msk.f32.gmra.mrb[222].mxu0 %vm698_vm1, %v573_v16  ;;  %2361 = vmatprep.mubr.f32.mxu1 %v582_v39 }
 0x2f5   :  { %3921 = vmatprep.mubr.msk.f32.mxu0 %vm4578_vm0, %v7927_v21  ;;  %v608_v61 = vld [vmem:[%s7914_s0 + $0x1290] sm:$0xff] }
 0x2f6   :  { %v3130_v55 = vmax.f32 %v4205_v25, 0.0  ;;  %v611_v25 = vld [vmem:[%s7914_s0 + $0x12a8] sm:$0xff] }
 0x2f7   :  { %v2763_v57 = vpop.f32.mrb[118].mxu0  ;;  %2362 = vmatmul.mubr.f32.gmra.mrb[226].mxu1 %v581_v33  ;;  %v617_v33 = vld [vmem:[%s7914_s0 + $0x12d8] sm:$0xff] }
 0x2f8   :  { %3251 = vst.msk [vmem:[%s7916_s3 + $0x1d0] sm:$0xff] %vm698_vm1, %v3130_v55  ;;  %v4207_v59 = vadd.f32 %v2763_v57, %v1424_v35  ;;  %v3764_v36 = vpop.f32.mrb[119].mxu0  ;;  %3922 = vmatmul.mubr.msk.f32.gmra.mrb[224].mxu0 %vm698_vm1, %v578_v41  ;;  %2366 = vmatprep.mubr.f32.mxu1 %v587_v53 }
 0x2f9   :  { %3924 = vmatprep.mubr.msk.f32.mxu0 %vm4578_vm0, %v7927_v21  ;;  %v616_v36 = vld [vmem:[%s7914_s0 + $0x12d0] sm:$0xff] }
 0x2fa   :  { %v3131_v51 = vmax.f32 %v4207_v59, 0.0  ;;  %v2103_v7 = vpop.f32.mrb[122].mxu1 }
 0x2fb   :  { %v2768_v34 = vpop.f32.mrb[120].mxu0  ;;  %v2105_v43 = vpop.f32.mrb[123].mxu1  ;;  %2367 = vmatmul.mubr.f32.gmra.mrb[228].mxu1 %v586_v29  ;;  %v4210_v26 = vadd.f32 %v7142_v30, %v2103_v7  ;;  %v613_v29 = vld [vmem:[%s7914_s0 + $0x12b8] sm:$0xff] }
 0x2fc   :  { %3252 = vst.msk [vmem:[%s7916_s3 + $0x1d8] sm:$0xff] %vm698_vm1, %v3131_v51  ;;  %v4209_v23 = vadd.f32 %v2768_v34, %v1429_v40  ;;  %v3767_v60 = vpop.f32.mrb[121].mxu0  ;;  %3925 = vmatmul.mubr.msk.f32.gmra.mrb[226].mxu0 %vm698_vm1, %v583_v6  ;;  %2371 = vmatprep.mubr.f32.mxu1 %v592_v38  ;;  %v618_v43 = vld [vmem:[%s7914_s0 + $0x12e0] sm:$0xff] }
 0x2fd   :  { %3927 = vmatprep.mubr.msk.f32.mxu0 %vm4578_vm0, %v7927_v21 }
 0x2fe   :  { %v3132_v20 = vmax.f32 %v4209_v23, 0.0  ;;  %v2108_v2 = vpop.f32.mrb[124].mxu1 }
 0x2ff   :  { %v2773_v13 = vpop.f32.mrb[122].mxu0  ;;  %v2110_v12 = vpop.f32.mrb[125].mxu1  ;;  %2372 = vmatmul.mubr.f32.gmra.mrb[230].mxu1 %v591_v49  ;;  %v4212_v48 = vadd.f32 %v7142_v30, %v2108_v2 }
 0x300   :  { %3253 = vst.msk [vmem:[%s7916_s3 + $0x1e0] sm:$0xff] %vm698_vm1, %v3132_v20  ;;  %v4211_v56 = vadd.f32 %v4210_v26, %v2773_v13  ;;  %v3770_v58 = vpop.f32.mrb[123].mxu0  ;;  %3928 = vmatmul.mubr.msk.f32.gmra.mrb[228].mxu0 %vm698_vm1, %v588_v32  ;;  %2376 = vmatprep.mubr.f32.mxu1 %v597_v52 }
 0x301   :  { %3930 = vmatprep.mubr.msk.f32.mxu0 %vm4578_vm0, %v7927_v21 }
 0x302   :  { %v3133_v8 = vmax.f32 %v4211_v56, 0.0  ;;  %v2113_v50 = vpop.f32.mrb[126].mxu1 }
 0x303   :  { %v2778_v62 = vpop.f32.mrb[124].mxu0  ;;  %v2115_v31 = vpop.f32.mrb[127].mxu1  ;;  %2377 = vmatmul.mubr.f32.gmra.mrb[232].mxu1 %v596_v11  ;;  %v4214_v3 = vadd.f32 %v7142_v30, %v2113_v50 }
 0x304   :  { %3254 = vst.msk [vmem:[%s7916_s3 + $0x1e8] sm:$0xff] %vm698_vm1, %v3133_v8  ;;  %v4213_v14 = vadd.f32 %v4212_v48, %v2778_v62  ;;  %v3773_v0 = vpop.f32.mrb[125].mxu0  ;;  %3931 = vmatmul.mubr.msk.f32.gmra.mrb[230].mxu0 %vm698_vm1, %v593_v46  ;;  %2381 = vmatprep.mubr.f32.mxu1 %v602_v63 }
 0x305   :  { %3933 = vmatprep.mubr.msk.f32.mxu0 %vm4578_vm0, %v7927_v21 }
 0x306   :  { %v3134_v4 = vmax.f32 %v4213_v14, 0.0  ;;  %v2118_v1 = vpop.f32.mrb[128].mxu1 }
 0x307   :  { %v2783_v5 = vpop.f32.mrb[126].mxu0  ;;  %v2120_v19 = vpop.f32.mrb[129].mxu1  ;;  %2382 = vmatmul.mubr.f32.gmra.mrb[234].mxu1 %v601_v18  ;;  %v4216_v24 = vadd.f32 %v7142_v30, %v2118_v1 }
 0x308   :  { %3255 = vst.msk [vmem:[%s7916_s3 + $0x1f0] sm:$0xff] %vm698_vm1, %v3134_v4  ;;  %v4215_v27 = vadd.f32 %v4214_v3, %v2783_v5  ;;  %v3776_v47 = vpop.f32.mrb[127].mxu0  ;;  %3934 = vmatmul.mubr.msk.f32.gmra.mrb[232].mxu0 %vm698_vm1, %v598_v10  ;;  %2386 = vmatprep.mubr.f32.mxu1 %v607_v9 }
 0x309   :  { %3936 = vmatprep.mubr.msk.f32.mxu0 %vm4578_vm0, %v7927_v21 }
 0x30a   :  { %v3135_v16 = vmax.f32 %v4215_v27, 0.0  ;;  %v2123_v39 = vpop.f32.mrb[130].mxu1 }
 0x30b   :  { %v2788_v15 = vpop.f32.mrb[128].mxu0  ;;  %v2125_v17 = vpop.f32.mrb[131].mxu1  ;;  %2387 = vmatmul.mubr.f32.gmra.mrb[236].mxu1 %v606_v44  ;;  %v4218_v41 = vadd.f32 %v7142_v30, %v2123_v39 }
 0x30c   :  { %3256 = vst.msk [vmem:[%s7916_s3 + $0x1f8] sm:$0xff] %vm698_vm1, %v3135_v16  ;;  %v4217_v37 = vadd.f32 %v4216_v24, %v2788_v15  ;;  %v3779_v45 = vpop.f32.mrb[129].mxu0  ;;  %3937 = vmatmul.mubr.msk.f32.gmra.mrb[234].mxu0 %vm698_vm1, %v603_v22  ;;  %2391 = vmatprep.mubr.f32.mxu1 %v612_v54 }
 0x30d   :  { %3939 = vmatprep.mubr.msk.f32.mxu0 %vm4578_vm0, %v7927_v21 }
 0x30e   :  { %v3136_v53 = vmax.f32 %v4217_v37, 0.0  ;;  %v2128_v28 = vpop.f32.mrb[132].mxu1 }
 0x30f   :  { %v2793_v35 = vpop.f32.mrb[130].mxu0  ;;  %v2130_v55 = vpop.f32.mrb[133].mxu1  ;;  %2392 = vmatmul.mubr.f32.gmra.mrb[238].mxu1 %v611_v25  ;;  %v4220_v6 = vadd.f32 %v7142_v30, %v2128_v28 }
 0x310   :  { %3257 = vst.msk [vmem:[%s7916_s3 + $0x200] sm:$0xff] %vm698_vm1, %v3136_v53  ;;  %v4219_v57 = vadd.f32 %v4218_v41, %v2793_v35  ;;  %v3782_v59 = vpop.f32.mrb[131].mxu0  ;;  %3940 = vmatmul.mubr.msk.f32.gmra.mrb[236].mxu0 %vm698_vm1, %v608_v61  ;;  %2396 = vmatprep.mubr.f32.mxu1 %v617_v33 }
 0x311   :  { %3942 = vmatprep.mubr.msk.f32.mxu0 %vm4578_vm0, %v7927_v21 }
 0x312   :  { %v3137_v38 = vmax.f32 %v4219_v57, 0.0  ;;  %v2133_v42 = vpop.f32.mrb[134].mxu1 }
 0x313   :  { %v2798_v40 = vpop.f32.mrb[132].mxu0  ;;  %v2135_v51 = vpop.f32.mrb[135].mxu1  ;;  %2397 = vmatmul.mubr.f32.gmra.mrb[240].mxu1 %v616_v36  ;;  %v4222_v23 = vadd.f32 %v7142_v30, %v2133_v42 }
 0x314   :  { %3258 = vst.msk [vmem:[%s7916_s3 + $0x208] sm:$0xff] %vm698_vm1, %v3137_v38  ;;  %v4221_v7 = vadd.f32 %v4220_v6, %v2798_v40  ;;  %v3785_v34 = vpop.f32.mrb[133].mxu0  ;;  %3943 = vmatmul.mubr.msk.f32.gmra.mrb[238].mxu0 %vm698_vm1, %v613_v29 }
 0x315   :  { %3945 = vmatprep.mubr.msk.f32.mxu0 %vm4578_vm0, %v7927_v21 }
 0x316   :  { %v3138_v60 = vmax.f32 %v4221_v7, 0.0  ;;  %v2138_v49 = vpop.f32.mrb[136].mxu1 }
 0x317   :  { %v2803_v32 = vpop.f32.mrb[134].mxu0  ;;  %v2140_v52 = vpop.f32.mrb[137].mxu1  ;;  %v4224_v21 = vadd.f32 %v7142_v30, %v2138_v49 }
 0x318   :  { %3259 = vst.msk [vmem:[%s7916_s3 + $0x210] sm:$0xff] %vm698_vm1, %v3138_v60  ;;  %v4223_v26 = vadd.f32 %v4222_v23, %v2803_v32  ;;  %v3788_v20 = vpop.f32.mrb[135].mxu0  ;;  %3946 = vmatmul.mubr.msk.f32.gmra.mrb[240].mxu0 %vm698_vm1, %v618_v43 }
 0x31a   :  { %v3139_v2 = vmax.f32 %v4223_v26, 0.0  ;;  %v2143_v13 = vpop.f32.mrb[138].mxu1 }
 0x31b   :  { %v2808_v12 = vpop.f32.mrb[136].mxu0  ;;  %v2145_v56 = vpop.f32.mrb[139].mxu1  ;;  %v4226_v46 = vadd.f32 %v7142_v30, %v2143_v13 }
 0x31c   :  { %3260 = vst.msk [vmem:[%s7916_s3 + $0x218] sm:$0xff] %vm698_vm1, %v3139_v2  ;;  %v4225_v58 = vadd.f32 %v4224_v21, %v2808_v12  ;;  %v3791_v11 = vpop.f32.mrb[137].mxu0 }
 0x31e   :  { %v3140_v63 = vmax.f32 %v4225_v58, 0.0  ;;  %v2148_v48 = vpop.f32.mrb[140].mxu1 }
 0x31f   :  { %v2813_v8 = vpop.f32.mrb[138].mxu0  ;;  %v2150_v50 = vpop.f32.mrb[141].mxu1  ;;  %v4228_v14 = vadd.f32 %v7142_v30, %v2148_v48 }
 0x320   :  { %3261 = vst.msk [vmem:[%s7916_s3 + $0x220] sm:$0xff] %vm698_vm1, %v3140_v63  ;;  %v4227_v62 = vadd.f32 %v4226_v46, %v2813_v8  ;;  %v3794_v31 = vpop.f32.mrb[139].mxu0 }
 0x322   :  { %v3141_v0 = vmax.f32 %v4227_v62, 0.0  ;;  %v2153_v18 = vpop.f32.mrb[142].mxu1 }
 0x323   :  { %v2818_v10 = vpop.f32.mrb[140].mxu0  ;;  %v2155_v9 = vpop.f32.mrb[143].mxu1  ;;  %v4230_v1 = vadd.f32 %v7142_v30, %v2153_v18 }
 0x324   :  { %3262 = vst.msk [vmem:[%s7916_s3 + $0x228] sm:$0xff] %vm698_vm1, %v3141_v0  ;;  %v4229_v3 = vadd.f32 %v4228_v14, %v2818_v10  ;;  %v3797_v4 = vpop.f32.mrb[141].mxu0 }
 0x326   :  { %v3142_v5 = vmax.f32 %v4229_v3, 0.0  ;;  %v2158_v19 = vpop.f32.mrb[144].mxu1 }
 0x327   :  { %v2823_v27 = vpop.f32.mrb[142].mxu0  ;;  %v2160_v47 = vpop.f32.mrb[145].mxu1  ;;  %v4232_v54 = vadd.f32 %v7142_v30, %v2158_v19 }
 0x328   :  { %3263 = vst.msk [vmem:[%s7916_s3 + $0x230] sm:$0xff] %vm698_vm1, %v3142_v5  ;;  %v4231_v44 = vadd.f32 %v4230_v1, %v2823_v27  ;;  %v3800_v22 = vpop.f32.mrb[143].mxu0 }
 0x32a   :  { %v3143_v24 = vmax.f32 %v4231_v44, 0.0  ;;  %v2163_v16 = vpop.f32.mrb[146].mxu1 }
 0x32b   :  { %v2828_v39 = vpop.f32.mrb[144].mxu0  ;;  %v2165_v15 = vpop.f32.mrb[147].mxu1  ;;  %v4234_v45 = vadd.f32 %v7142_v30, %v2163_v16 }
 0x32c   :  { %3264 = vst.msk [vmem:[%s7916_s3 + $0x238] sm:$0xff] %vm698_vm1, %v3143_v24  ;;  %v4233_v17 = vadd.f32 %v4232_v54, %v2828_v39  ;;  %v3803_v37 = vpop.f32.mrb[145].mxu0 }
 0x32e   :  { %v3144_v25 = vmax.f32 %v4233_v17, 0.0  ;;  %v2168_v61 = vpop.f32.mrb[148].mxu1 }
 0x32f   :  { %v2833_v33 = vpop.f32.mrb[146].mxu0  ;;  %v2170_v41 = vpop.f32.mrb[149].mxu1  ;;  %v4236_v35 = vadd.f32 %v7142_v30, %v2168_v61 }
 0x330   :  { %3265 = vst.msk [vmem:[%s7916_s3 + $0x240] sm:$0xff] %vm698_vm1, %v3144_v25  ;;  %v4235_v53 = vadd.f32 %v4234_v45, %v2833_v33  ;;  %v3806_v28 = vpop.f32.mrb[147].mxu0 }
 0x332   :  { %v3145_v55 = vmax.f32 %v4235_v53, 0.0  ;;  %v2173_v57 = vpop.f32.mrb[150].mxu1 }
 0x333   :  { %v2838_v59 = vpop.f32.mrb[148].mxu0  ;;  %v2175_v36 = vpop.f32.mrb[151].mxu1  ;;  %v4238_v38 = vadd.f32 %v7142_v30, %v2173_v57 }
 0x334   :  { %3266 = vst.msk [vmem:[%s7916_s3 + $0x248] sm:$0xff] %vm698_vm1, %v3145_v55  ;;  %v4237_v29 = vadd.f32 %v4236_v35, %v2838_v59  ;;  %v3809_v6 = vpop.f32.mrb[149].mxu0 }
 0x336   :  { %v3146_v42 = vmax.f32 %v4237_v29, 0.0  ;;  %v2178_v40 = vpop.f32.mrb[152].mxu1 }
 0x337   :  { %v2843_v51 = vpop.f32.mrb[150].mxu0  ;;  %v2180_v7 = vpop.f32.mrb[153].mxu1  ;;  %v4240_v23 = vadd.f32 %v7142_v30, %v2178_v40 }
 0x338   :  { %3267 = vst.msk [vmem:[%s7916_s3 + $0x250] sm:$0xff] %vm698_vm1, %v3146_v42  ;;  %v4239_v34 = vadd.f32 %v4238_v38, %v2843_v51  ;;  %v3812_v43 = vpop.f32.mrb[151].mxu0 }
 0x33a   :  { %v3147_v60 = vmax.f32 %v4239_v34, 0.0  ;;  %v2183_v49 = vpop.f32.mrb[154].mxu1 }
 0x33b   :  { %v2848_v32 = vpop.f32.mrb[152].mxu0  ;;  %v2185_v52 = vpop.f32.mrb[155].mxu1  ;;  %v4242_v21 = vadd.f32 %v7142_v30, %v2183_v49 }
 0x33c   :  { %3268 = vst.msk [vmem:[%s7916_s3 + $0x258] sm:$0xff] %vm698_vm1, %v3147_v60  ;;  %v4241_v26 = vadd.f32 %v4240_v23, %v2848_v32  ;;  %v3815_v20 = vpop.f32.mrb[153].mxu0  ;;  %v7727_v23 = vld [vmem:[%s7915_s2] ss:$0 sm:$0xff] }
 0x33e   :  { %v3148_v2 = vmax.f32 %v4241_v26, 0.0  ;;  %v2188_v13 = vpop.f32.mrb[156].mxu1 }
 0x33f   :  { %v2853_v12 = vpop.f32.mrb[154].mxu0  ;;  %v2190_v56 = vpop.f32.mrb[157].mxu1  ;;  %v4244_v46 = vadd.f32 %v7142_v30, %v2188_v13 }
 0x340   :  { %3269 = vst.msk [vmem:[%s7916_s3 + $0x260] sm:$0xff] %vm698_vm1, %v3148_v2  ;;  %v4243_v58 = vadd.f32 %v4242_v21, %v2853_v12  ;;  %v3818_v11 = vpop.f32.mrb[155].mxu0 }
 0x342   :  { %v3149_v63 = vmax.f32 %v4243_v58, 0.0  ;;  %v2193_v48 = vpop.f32.mrb[158].mxu1 }
 0x343   :  { %v2858_v8 = vpop.f32.mrb[156].mxu0  ;;  %v2195_v50 = vpop.f32.mrb[159].mxu1  ;;  %v4246_v14 = vadd.f32 %v7142_v30, %v2193_v48 }
 0x344   :  { %3270 = vst.msk [vmem:[%s7916_s3 + $0x268] sm:$0xff] %vm698_vm1, %v3149_v63  ;;  %v4245_v62 = vadd.f32 %v4244_v46, %v2858_v8  ;;  %v3821_v31 = vpop.f32.mrb[157].mxu0 }
 0x346   :  { %v3150_v0 = vmax.f32 %v4245_v62, 0.0  ;;  %v2198_v18 = vpop.f32.mrb[160].mxu1 }
 0x347   :  { %v2863_v10 = vpop.f32.mrb[158].mxu0  ;;  %v2200_v9 = vpop.f32.mrb[161].mxu1  ;;  %v4248_v1 = vadd.f32 %v7142_v30, %v2198_v18 }
 0x348   :  { %3271 = vst.msk [vmem:[%s7916_s3 + $0x270] sm:$0xff] %vm698_vm1, %v3150_v0  ;;  %v4247_v3 = vadd.f32 %v4246_v14, %v2863_v10  ;;  %v3824_v4 = vpop.f32.mrb[159].mxu0 }
 0x34a   :  { %v3151_v5 = vmax.f32 %v4247_v3, 0.0  ;;  %v2203_v19 = vpop.f32.mrb[162].mxu1 }
 0x34b   :  { %v2868_v27 = vpop.f32.mrb[160].mxu0  ;;  %v2205_v47 = vpop.f32.mrb[163].mxu1  ;;  %v4250_v54 = vadd.f32 %v7142_v30, %v2203_v19 }
 0x34c   :  { %3272 = vst.msk [vmem:[%s7916_s3 + $0x278] sm:$0xff] %vm698_vm1, %v3151_v5  ;;  %v4249_v44 = vadd.f32 %v4248_v1, %v2868_v27  ;;  %v3827_v22 = vpop.f32.mrb[161].mxu0 }
 0x34e   :  { %v3152_v24 = vmax.f32 %v4249_v44, 0.0  ;;  %v2208_v16 = vpop.f32.mrb[164].mxu1 }
 0x34f   :  { %v2873_v39 = vpop.f32.mrb[162].mxu0  ;;  %v2210_v15 = vpop.f32.mrb[165].mxu1  ;;  %v4252_v45 = vadd.f32 %v7142_v30, %v2208_v16 }
 0x350   :  { %3273 = vst.msk [vmem:[%s7916_s3 + $0x280] sm:$0xff] %vm698_vm1, %v3152_v24  ;;  %v4251_v17 = vadd.f32 %v4250_v54, %v2873_v39  ;;  %v3830_v37 = vpop.f32.mrb[163].mxu0 }
 0x352   :  { %v3153_v25 = vmax.f32 %v4251_v17, 0.0  ;;  %v2213_v61 = vpop.f32.mrb[166].mxu1 }
 0x353   :  { %v2878_v33 = vpop.f32.mrb[164].mxu0  ;;  %v2215_v41 = vpop.f32.mrb[167].mxu1  ;;  %v4254_v35 = vadd.f32 %v7142_v30, %v2213_v61 }
 0x354   :  { %3274 = vst.msk [vmem:[%s7916_s3 + $0x288] sm:$0xff] %vm698_vm1, %v3153_v25  ;;  %v4253_v53 = vadd.f32 %v4252_v45, %v2878_v33  ;;  %v3833_v28 = vpop.f32.mrb[165].mxu0 }
 0x356   :  { %v3154_v55 = vmax.f32 %v4253_v53, 0.0  ;;  %v2218_v57 = vpop.f32.mrb[168].mxu1 }
 0x357   :  { %v2883_v59 = vpop.f32.mrb[166].mxu0  ;;  %v2220_v36 = vpop.f32.mrb[169].mxu1  ;;  %v4256_v38 = vadd.f32 %v7142_v30, %v2218_v57 }
 0x358   :  { %3275 = vst.msk [vmem:[%s7916_s3 + $0x290] sm:$0xff] %vm698_vm1, %v3154_v55  ;;  %v4255_v29 = vadd.f32 %v4254_v35, %v2883_v59  ;;  %v3836_v6 = vpop.f32.mrb[167].mxu0 }
 0x35a   :  { %v3155_v42 = vmax.f32 %v4255_v29, 0.0  ;;  %v2223_v40 = vpop.f32.mrb[170].mxu1 }
 0x35b   :  { %v2888_v51 = vpop.f32.mrb[168].mxu0  ;;  %v2225_v7 = vpop.f32.mrb[171].mxu1  ;;  %v4258_v60 = vadd.f32 %v7727_v23, %v2223_v40 }
 0x35c   :  { %3276 = vst.msk [vmem:[%s7916_s3 + $0x298] sm:$0xff] %vm698_vm1, %v3155_v42  ;;  %v4257_v34 = vadd.f32 %v4256_v38, %v2888_v51  ;;  %v3839_v43 = vpop.f32.mrb[169].mxu0 }
 0x35e   :  { %v3156_v49 = vmax.f32 %v4257_v34, 0.0  ;;  %v2228_v30 = vpop.f32.mrb[172].mxu1 }
 0x35f   :  { %v2893_v32 = vpop.f32.mrb[170].mxu0  ;;  %v2230_v52 = vpop.f32.mrb[173].mxu1  ;;  %v4260_v21 = vadd.f32 %v7727_v23, %v2228_v30 }
 0x360   :  { %3277 = vst.msk [vmem:[%s7916_s3 + $0x2a0] sm:$0xff] %vm698_vm1, %v3156_v49  ;;  %v4259_v26 = vadd.f32 %v4258_v60, %v2893_v32  ;;  %v3842_v20 = vpop.f32.mrb[171].mxu0 }
 0x362   :  { %v3157_v2 = vmax.f32 %v4259_v26, 0.0  ;;  %v2233_v13 = vpop.f32.mrb[174].mxu1 }
 0x363   :  { %v2898_v12 = vpop.f32.mrb[172].mxu0  ;;  %v2235_v56 = vpop.f32.mrb[175].mxu1  ;;  %v4262_v46 = vadd.f32 %v7727_v23, %v2233_v13 }
 0x364   :  { %3278 = vst.msk [vmem:[%s7916_s3 + $0x2a8] sm:$0xff] %vm698_vm1, %v3157_v2  ;;  %v4261_v58 = vadd.f32 %v4260_v21, %v2898_v12  ;;  %v3845_v11 = vpop.f32.mrb[173].mxu0 }
 0x366   :  { %v3158_v63 = vmax.f32 %v4261_v58, 0.0  ;;  %v2238_v48 = vpop.f32.mrb[176].mxu1 }
 0x367   :  { %v2903_v8 = vpop.f32.mrb[174].mxu0  ;;  %v2240_v50 = vpop.f32.mrb[177].mxu1  ;;  %v4264_v14 = vadd.f32 %v7727_v23, %v2238_v48 }
 0x368   :  { %3279 = vst.msk [vmem:[%s7916_s3 + $0x2b0] sm:$0xff] %vm698_vm1, %v3158_v63  ;;  %v4263_v62 = vadd.f32 %v4262_v46, %v2903_v8  ;;  %v3848_v31 = vpop.f32.mrb[175].mxu0 }
 0x36a   :  { %v3159_v0 = vmax.f32 %v4263_v62, 0.0  ;;  %v2243_v18 = vpop.f32.mrb[178].mxu1 }
 0x36b   :  { %v2908_v10 = vpop.f32.mrb[176].mxu0  ;;  %v2245_v9 = vpop.f32.mrb[179].mxu1  ;;  %v4266_v1 = vadd.f32 %v7727_v23, %v2243_v18 }
 0x36c   :  { %3280 = vst.msk [vmem:[%s7916_s3 + $0x2b8] sm:$0xff] %vm698_vm1, %v3159_v0  ;;  %v4265_v3 = vadd.f32 %v4264_v14, %v2908_v10  ;;  %v3851_v4 = vpop.f32.mrb[177].mxu0 }
 0x36e   :  { %v3160_v5 = vmax.f32 %v4265_v3, 0.0  ;;  %v2248_v19 = vpop.f32.mrb[180].mxu1 }
 0x36f   :  { %v2913_v27 = vpop.f32.mrb[178].mxu0  ;;  %v2250_v47 = vpop.f32.mrb[181].mxu1  ;;  %v4268_v54 = vadd.f32 %v7727_v23, %v2248_v19 }
 0x370   :  { %3281 = vst.msk [vmem:[%s7916_s3 + $0x2c0] sm:$0xff] %vm698_vm1, %v3160_v5  ;;  %v4267_v44 = vadd.f32 %v4266_v1, %v2913_v27  ;;  %v3854_v22 = vpop.f32.mrb[179].mxu0 }
 0x372   :  { %v3161_v24 = vmax.f32 %v4267_v44, 0.0  ;;  %v2253_v16 = vpop.f32.mrb[182].mxu1 }
 0x373   :  { %v2918_v39 = vpop.f32.mrb[180].mxu0  ;;  %v2255_v15 = vpop.f32.mrb[183].mxu1  ;;  %v4270_v45 = vadd.f32 %v7727_v23, %v2253_v16 }
 0x374   :  { %3282 = vst.msk [vmem:[%s7916_s3 + $0x2c8] sm:$0xff] %vm698_vm1, %v3161_v24  ;;  %v4269_v17 = vadd.f32 %v4268_v54, %v2918_v39  ;;  %v3857_v37 = vpop.f32.mrb[181].mxu0 }
 0x376   :  { %v3162_v25 = vmax.f32 %v4269_v17, 0.0  ;;  %v2258_v61 = vpop.f32.mrb[184].mxu1 }
 0x377   :  { %v2923_v33 = vpop.f32.mrb[182].mxu0  ;;  %v2260_v41 = vpop.f32.mrb[185].mxu1  ;;  %v4272_v35 = vadd.f32 %v7727_v23, %v2258_v61 }
 0x378   :  { %3283 = vst.msk [vmem:[%s7916_s3 + $0x2d0] sm:$0xff] %vm698_vm1, %v3162_v25  ;;  %v4271_v53 = vadd.f32 %v4270_v45, %v2923_v33  ;;  %v3860_v28 = vpop.f32.mrb[183].mxu0 }
 0x37a   :  { %v3163_v55 = vmax.f32 %v4271_v53, 0.0  ;;  %v2263_v57 = vpop.f32.mrb[186].mxu1 }
 0x37b   :  { %v2928_v59 = vpop.f32.mrb[184].mxu0  ;;  %v2265_v36 = vpop.f32.mrb[187].mxu1  ;;  %v4274_v38 = vadd.f32 %v7727_v23, %v2263_v57 }
 0x37c   :  { %3284 = vst.msk [vmem:[%s7916_s3 + $0x2d8] sm:$0xff] %vm698_vm1, %v3163_v55  ;;  %v4273_v29 = vadd.f32 %v4272_v35, %v2928_v59  ;;  %v3863_v6 = vpop.f32.mrb[185].mxu0 }
 0x37e   :  { %v3164_v42 = vmax.f32 %v4273_v29, 0.0  ;;  %v2268_v40 = vpop.f32.mrb[188].mxu1 }
 0x37f   :  { %v2933_v51 = vpop.f32.mrb[186].mxu0  ;;  %v2270_v7 = vpop.f32.mrb[189].mxu1  ;;  %v4276_v60 = vadd.f32 %v7727_v23, %v2268_v40 }
 0x380   :  { %3285 = vst.msk [vmem:[%s7916_s3 + $0x2e0] sm:$0xff] %vm698_vm1, %v3164_v42  ;;  %v4275_v34 = vadd.f32 %v4274_v38, %v2933_v51  ;;  %v3866_v43 = vpop.f32.mrb[187].mxu0 }
 0x382   :  { %v3165_v49 = vmax.f32 %v4275_v34, 0.0  ;;  %v2273_v30 = vpop.f32.mrb[190].mxu1 }
 0x383   :  { %v2938_v32 = vpop.f32.mrb[188].mxu0  ;;  %v2275_v52 = vpop.f32.mrb[191].mxu1  ;;  %v4278_v21 = vadd.f32 %v7727_v23, %v2273_v30 }
 0x384   :  { %3286 = vst.msk [vmem:[%s7916_s3 + $0x2e8] sm:$0xff] %vm698_vm1, %v3165_v49  ;;  %v4277_v26 = vadd.f32 %v4276_v60, %v2938_v32  ;;  %v3869_v20 = vpop.f32.mrb[189].mxu0 }
 0x386   :  { %v3166_v2 = vmax.f32 %v4277_v26, 0.0  ;;  %v2278_v13 = vpop.f32.mrb[192].mxu1 }
 0x387   :  { %v2943_v12 = vpop.f32.mrb[190].mxu0  ;;  %v2280_v56 = vpop.f32.mrb[193].mxu1  ;;  %v4280_v46 = vadd.f32 %v7727_v23, %v2278_v13 }
 0x388   :  { %3287 = vst.msk [vmem:[%s7916_s3 + $0x2f0] sm:$0xff] %vm698_vm1, %v3166_v2  ;;  %v4279_v58 = vadd.f32 %v4278_v21, %v2943_v12  ;;  %v3872_v11 = vpop.f32.mrb[191].mxu0 }
 0x38a   :  { %v3167_v63 = vmax.f32 %v4279_v58, 0.0  ;;  %v2283_v48 = vpop.f32.mrb[194].mxu1 }
 0x38b   :  { %v2948_v8 = vpop.f32.mrb[192].mxu0  ;;  %v2285_v50 = vpop.f32.mrb[195].mxu1  ;;  %v4282_v14 = vadd.f32 %v7727_v23, %v2283_v48 }
 0x38c   :  { %3288 = vst.msk [vmem:[%s7916_s3 + $0x2f8] sm:$0xff] %vm698_vm1, %v3167_v63  ;;  %v4281_v62 = vadd.f32 %v4280_v46, %v2948_v8  ;;  %v3875_v31 = vpop.f32.mrb[193].mxu0 }
 0x38e   :  { %v3168_v0 = vmax.f32 %v4281_v62, 0.0  ;;  %v2288_v18 = vpop.f32.mrb[196].mxu1 }
 0x38f   :  { %v2953_v10 = vpop.f32.mrb[194].mxu0  ;;  %v2290_v9 = vpop.f32.mrb[197].mxu1  ;;  %v4284_v1 = vadd.f32 %v7727_v23, %v2288_v18 }
 0x390   :  { %3289 = vst.msk [vmem:[%s7916_s3 + $0x300] sm:$0xff] %vm698_vm1, %v3168_v0  ;;  %v4283_v3 = vadd.f32 %v4282_v14, %v2953_v10  ;;  %v3878_v4 = vpop.f32.mrb[195].mxu0 }
 0x392   :  { %v3169_v5 = vmax.f32 %v4283_v3, 0.0  ;;  %v2293_v19 = vpop.f32.mrb[198].mxu1 }
 0x393   :  { %v2958_v27 = vpop.f32.mrb[196].mxu0  ;;  %v2295_v47 = vpop.f32.mrb[199].mxu1  ;;  %v4286_v54 = vadd.f32 %v7727_v23, %v2293_v19 }
 0x394   :  { %3290 = vst.msk [vmem:[%s7916_s3 + $0x308] sm:$0xff] %vm698_vm1, %v3169_v5  ;;  %v4285_v44 = vadd.f32 %v4284_v1, %v2958_v27  ;;  %v3881_v22 = vpop.f32.mrb[197].mxu0 }
 0x396   :  { %v3170_v24 = vmax.f32 %v4285_v44, 0.0  ;;  %v2298_v16 = vpop.f32.mrb[200].mxu1 }
 0x397   :  { %v2963_v39 = vpop.f32.mrb[198].mxu0  ;;  %v2300_v15 = vpop.f32.mrb[201].mxu1  ;;  %v4288_v45 = vadd.f32 %v7727_v23, %v2298_v16 }
 0x398   :  { %3291 = vst.msk [vmem:[%s7916_s3 + $0x310] sm:$0xff] %vm698_vm1, %v3170_v24  ;;  %v4287_v17 = vadd.f32 %v4286_v54, %v2963_v39  ;;  %v3884_v37 = vpop.f32.mrb[199].mxu0 }
 0x39a   :  { %v3171_v25 = vmax.f32 %v4287_v17, 0.0  ;;  %v2303_v61 = vpop.f32.mrb[202].mxu1 }
 0x39b   :  { %v2968_v33 = vpop.f32.mrb[200].mxu0  ;;  %v2305_v41 = vpop.f32.mrb[203].mxu1  ;;  %v4290_v35 = vadd.f32 %v7727_v23, %v2303_v61 }
 0x39c   :  { %3292 = vst.msk [vmem:[%s7916_s3 + $0x318] sm:$0xff] %vm698_vm1, %v3171_v25  ;;  %v4289_v53 = vadd.f32 %v4288_v45, %v2968_v33  ;;  %v3887_v28 = vpop.f32.mrb[201].mxu0 }
 0x39e   :  { %v3172_v55 = vmax.f32 %v4289_v53, 0.0  ;;  %v2308_v57 = vpop.f32.mrb[204].mxu1 }
 0x39f   :  { %v2973_v59 = vpop.f32.mrb[202].mxu0  ;;  %v2310_v36 = vpop.f32.mrb[205].mxu1  ;;  %v4292_v38 = vadd.f32 %v7727_v23, %v2308_v57 }
 0x3a0   :  { %3293 = vst.msk [vmem:[%s7916_s3 + $0x320] sm:$0xff] %vm698_vm1, %v3172_v55  ;;  %v4291_v29 = vadd.f32 %v4290_v35, %v2973_v59  ;;  %v3890_v6 = vpop.f32.mrb[203].mxu0 }
 0x3a2   :  { %v3173_v42 = vmax.f32 %v4291_v29, 0.0  ;;  %v2313_v40 = vpop.f32.mrb[206].mxu1 }
 0x3a3   :  { %v2978_v51 = vpop.f32.mrb[204].mxu0  ;;  %v2315_v7 = vpop.f32.mrb[207].mxu1  ;;  %v4294_v60 = vadd.f32 %v7727_v23, %v2313_v40 }
 0x3a4   :  { %3294 = vst.msk [vmem:[%s7916_s3 + $0x328] sm:$0xff] %vm698_vm1, %v3173_v42  ;;  %v4293_v34 = vadd.f32 %v4292_v38, %v2978_v51  ;;  %v3893_v43 = vpop.f32.mrb[205].mxu0 }
 0x3a6   :  { %v3174_v49 = vmax.f32 %v4293_v34, 0.0  ;;  %v2318_v30 = vpop.f32.mrb[208].mxu1 }
 0x3a7   :  { %v2983_v32 = vpop.f32.mrb[206].mxu0  ;;  %v2320_v52 = vpop.f32.mrb[209].mxu1  ;;  %v4296_v21 = vadd.f32 %v7727_v23, %v2318_v30 }
 0x3a8   :  { %3295 = vst.msk [vmem:[%s7916_s3 + $0x330] sm:$0xff] %vm698_vm1, %v3174_v49  ;;  %v4295_v26 = vadd.f32 %v4294_v60, %v2983_v32  ;;  %v3896_v20 = vpop.f32.mrb[207].mxu0 }
 0x3aa   :  { %v3175_v2 = vmax.f32 %v4295_v26, 0.0  ;;  %v2323_v13 = vpop.f32.mrb[210].mxu1 }
 0x3ab   :  { %v2988_v12 = vpop.f32.mrb[208].mxu0  ;;  %v2325_v56 = vpop.f32.mrb[211].mxu1  ;;  %v4298_v46 = vadd.f32 %v7727_v23, %v2323_v13 }
 0x3ac   :  { %3296 = vst.msk [vmem:[%s7916_s3 + $0x338] sm:$0xff] %vm698_vm1, %v3175_v2  ;;  %v4297_v58 = vadd.f32 %v4296_v21, %v2988_v12  ;;  %v3899_v11 = vpop.f32.mrb[209].mxu0 }
 0x3ae   :  { %v3176_v63 = vmax.f32 %v4297_v58, 0.0  ;;  %v2328_v48 = vpop.f32.mrb[212].mxu1 }
 0x3af   :  { %v2993_v8 = vpop.f32.mrb[210].mxu0  ;;  %v2330_v50 = vpop.f32.mrb[213].mxu1  ;;  %v4300_v14 = vadd.f32 %v7727_v23, %v2328_v48 }
 0x3b0   :  { %3297 = vst.msk [vmem:[%s7916_s3 + $0x340] sm:$0xff] %vm698_vm1, %v3176_v63  ;;  %v4299_v62 = vadd.f32 %v4298_v46, %v2993_v8  ;;  %v3902_v31 = vpop.f32.mrb[211].mxu0 }
 0x3b2   :  { %v3177_v0 = vmax.f32 %v4299_v62, 0.0  ;;  %v2333_v18 = vpop.f32.mrb[214].mxu1 }
 0x3b3   :  { %v2998_v10 = vpop.f32.mrb[212].mxu0  ;;  %v2335_v9 = vpop.f32.mrb[215].mxu1  ;;  %v4302_v1 = vadd.f32 %v7727_v23, %v2333_v18 }
 0x3b4   :  { %3298 = vst.msk [vmem:[%s7916_s3 + $0x348] sm:$0xff] %vm698_vm1, %v3177_v0  ;;  %v4301_v3 = vadd.f32 %v4300_v14, %v2998_v10  ;;  %v3905_v4 = vpop.f32.mrb[213].mxu0 }
 0x3b6   :  { %v3178_v5 = vmax.f32 %v4301_v3, 0.0  ;;  %v2338_v19 = vpop.f32.mrb[216].mxu1 }
 0x3b7   :  { %v3003_v27 = vpop.f32.mrb[214].mxu0  ;;  %v2340_v47 = vpop.f32.mrb[217].mxu1  ;;  %v4304_v54 = vadd.f32 %v7727_v23, %v2338_v19 }
 0x3b8   :  { %3299 = vst.msk [vmem:[%s7916_s3 + $0x350] sm:$0xff] %vm698_vm1, %v3178_v5  ;;  %v4303_v44 = vadd.f32 %v4302_v1, %v3003_v27  ;;  %v3908_v22 = vpop.f32.mrb[215].mxu0 }
 0x3ba   :  { %v3179_v24 = vmax.f32 %v4303_v44, 0.0  ;;  %v2343_v16 = vpop.f32.mrb[218].mxu1 }
 0x3bb   :  { %v3008_v39 = vpop.f32.mrb[216].mxu0  ;;  %v2345_v15 = vpop.f32.mrb[219].mxu1  ;;  %v4306_v45 = vadd.f32 %v7727_v23, %v2343_v16 }
 0x3bc   :  { %3300 = vst.msk [vmem:[%s7916_s3 + $0x358] sm:$0xff] %vm698_vm1, %v3179_v24  ;;  %v4305_v17 = vadd.f32 %v4304_v54, %v3008_v39  ;;  %v3911_v37 = vpop.f32.mrb[217].mxu0 }
 0x3be   :  { %v3180_v25 = vmax.f32 %v4305_v17, 0.0  ;;  %v2348_v61 = vpop.f32.mrb[220].mxu1 }
 0x3bf   :  { %v3013_v33 = vpop.f32.mrb[218].mxu0  ;;  %v2350_v41 = vpop.f32.mrb[221].mxu1  ;;  %v4308_v35 = vadd.f32 %v7727_v23, %v2348_v61 }
 0x3c0   :  { %3301 = vst.msk [vmem:[%s7916_s3 + $0x360] sm:$0xff] %vm698_vm1, %v3180_v25  ;;  %v4307_v53 = vadd.f32 %v4306_v45, %v3013_v33  ;;  %v3914_v28 = vpop.f32.mrb[219].mxu0 }
 0x3c2   :  { %v3181_v55 = vmax.f32 %v4307_v53, 0.0  ;;  %v2353_v57 = vpop.f32.mrb[222].mxu1 }
 0x3c3   :  { %v3018_v59 = vpop.f32.mrb[220].mxu0  ;;  %v2355_v36 = vpop.f32.mrb[223].mxu1  ;;  %v4310_v38 = vadd.f32 %v7727_v23, %v2353_v57 }
 0x3c4   :  { %3302 = vst.msk [vmem:[%s7916_s3 + $0x368] sm:$0xff] %vm698_vm1, %v3181_v55  ;;  %v4309_v29 = vadd.f32 %v4308_v35, %v3018_v59  ;;  %v3917_v6 = vpop.f32.mrb[221].mxu0 }
 0x3c6   :  { %v3182_v42 = vmax.f32 %v4309_v29, 0.0  ;;  %v2358_v40 = vpop.f32.mrb[224].mxu1 }
 0x3c7   :  { %v3023_v51 = vpop.f32.mrb[222].mxu0  ;;  %v2360_v7 = vpop.f32.mrb[225].mxu1  ;;  %v4312_v60 = vadd.f32 %v7727_v23, %v2358_v40 }
 0x3c8   :  { %3303 = vst.msk [vmem:[%s7916_s3 + $0x370] sm:$0xff] %vm698_vm1, %v3182_v42  ;;  %v4311_v34 = vadd.f32 %v4310_v38, %v3023_v51  ;;  %v3920_v43 = vpop.f32.mrb[223].mxu0 }
 0x3ca   :  { %v3183_v49 = vmax.f32 %v4311_v34, 0.0  ;;  %v2363_v30 = vpop.f32.mrb[226].mxu1 }
 0x3cb   :  { %v3028_v32 = vpop.f32.mrb[224].mxu0  ;;  %v2365_v52 = vpop.f32.mrb[227].mxu1  ;;  %v4314_v21 = vadd.f32 %v7727_v23, %v2363_v30 }
 0x3cc   :  { %3304 = vst.msk [vmem:[%s7916_s3 + $0x378] sm:$0xff] %vm698_vm1, %v3183_v49  ;;  %v4313_v26 = vadd.f32 %v4312_v60, %v3028_v32  ;;  %v3923_v20 = vpop.f32.mrb[225].mxu0 }
 0x3ce   :  { %v3184_v2 = vmax.f32 %v4313_v26, 0.0  ;;  %v2368_v13 = vpop.f32.mrb[228].mxu1 }
 0x3cf   :  { %v3033_v12 = vpop.f32.mrb[226].mxu0  ;;  %v2370_v56 = vpop.f32.mrb[229].mxu1  ;;  %v4316_v46 = vadd.f32 %v7727_v23, %v2368_v13 }
 0x3d0   :  { %3305 = vst.msk [vmem:[%s7916_s3 + $0x380] sm:$0xff] %vm698_vm1, %v3184_v2  ;;  %v4315_v58 = vadd.f32 %v4314_v21, %v3033_v12  ;;  %v3926_v11 = vpop.f32.mrb[227].mxu0 }
 0x3d2   :  { %v3185_v63 = vmax.f32 %v4315_v58, 0.0  ;;  %v2373_v48 = vpop.f32.mrb[230].mxu1 }
 0x3d3   :  { %v3038_v8 = vpop.f32.mrb[228].mxu0  ;;  %v2375_v50 = vpop.f32.mrb[231].mxu1  ;;  %v4318_v14 = vadd.f32 %v7727_v23, %v2373_v48 }
 0x3d4   :  { %3306 = vst.msk [vmem:[%s7916_s3 + $0x388] sm:$0xff] %vm698_vm1, %v3185_v63  ;;  %v4317_v62 = vadd.f32 %v4316_v46, %v3038_v8  ;;  %v3929_v31 = vpop.f32.mrb[229].mxu0 }
 0x3d6   :  { %v3186_v0 = vmax.f32 %v4317_v62, 0.0  ;;  %v2378_v18 = vpop.f32.mrb[232].mxu1 }
 0x3d7   :  { %v3043_v10 = vpop.f32.mrb[230].mxu0  ;;  %v2380_v9 = vpop.f32.mrb[233].mxu1  ;;  %v4320_v1 = vadd.f32 %v7727_v23, %v2378_v18 }
 0x3d8   :  { %3307 = vst.msk [vmem:[%s7916_s3 + $0x390] sm:$0xff] %vm698_vm1, %v3186_v0  ;;  %v4319_v3 = vadd.f32 %v4318_v14, %v3043_v10  ;;  %v3932_v4 = vpop.f32.mrb[231].mxu0 }
 0x3da   :  { %v3187_v5 = vmax.f32 %v4319_v3, 0.0  ;;  %v2383_v19 = vpop.f32.mrb[234].mxu1 }
 0x3db   :  { %v3048_v27 = vpop.f32.mrb[232].mxu0  ;;  %v2385_v47 = vpop.f32.mrb[235].mxu1  ;;  %v4322_v54 = vadd.f32 %v7727_v23, %v2383_v19 }
 0x3dc   :  { %3308 = vst.msk [vmem:[%s7916_s3 + $0x398] sm:$0xff] %vm698_vm1, %v3187_v5  ;;  %v4321_v44 = vadd.f32 %v4320_v1, %v3048_v27  ;;  %v3935_v22 = vpop.f32.mrb[233].mxu0 }
 0x3de   :  { %v3188_v24 = vmax.f32 %v4321_v44, 0.0  ;;  %v2388_v16 = vpop.f32.mrb[236].mxu1 }
 0x3df   :  { %v3053_v39 = vpop.f32.mrb[234].mxu0  ;;  %v2390_v15 = vpop.f32.mrb[237].mxu1  ;;  %v4324_v45 = vadd.f32 %v7727_v23, %v2388_v16 }
 0x3e0   :  { %3309 = vst.msk [vmem:[%s7916_s3 + $0x3a0] sm:$0xff] %vm698_vm1, %v3188_v24  ;;  %v4323_v17 = vadd.f32 %v4322_v54, %v3053_v39  ;;  %v3938_v37 = vpop.f32.mrb[235].mxu0 }
 0x3e2   :  { %v3189_v25 = vmax.f32 %v4323_v17, 0.0  ;;  %v2393_v61 = vpop.f32.mrb[238].mxu1 }
 0x3e3   :  { %v3058_v33 = vpop.f32.mrb[236].mxu0  ;;  %v2395_v41 = vpop.f32.mrb[239].mxu1  ;;  %v4326_v35 = vadd.f32 %v7727_v23, %v2393_v61 }
 0x3e4   :  { %3310 = vst.msk [vmem:[%s7916_s3 + $0x3a8] sm:$0xff] %vm698_vm1, %v3189_v25  ;;  %v4325_v53 = vadd.f32 %v4324_v45, %v3058_v33  ;;  %v3941_v28 = vpop.f32.mrb[237].mxu0 }
 0x3e6   :  { %v3190_v55 = vmax.f32 %v4325_v53, 0.0  ;;  %v2398_v57 = vpop.f32.mrb[240].mxu1 }
 0x3e7   :  { %v3063_v59 = vpop.f32.mrb[238].mxu0  ;;  %v2400_v36 = vpop.f32.mrb[241].mxu1  ;;  %v4328_v38 = vadd.f32 %v7727_v23, %v2398_v57 }
 0x3e8   :  { %3311 = vst.msk [vmem:[%s7916_s3 + $0x3b0] sm:$0xff] %vm698_vm1, %v3190_v55  ;;  %v4327_v29 = vadd.f32 %v4326_v35, %v3063_v59  ;;  %v3944_v6 = vpop.f32.mrb[239].mxu0 }
 0x3ea   :  { %v3191_v42 = vmax.f32 %v4327_v29, 0.0 }
 0x3eb   :  { %v3068_v40 = vpop.f32.mrb[240].mxu0 }
 0x3ec   :  { %3312 = vst.msk [vmem:[%s7916_s3 + $0x3b8] sm:$0xff] %vm698_vm1, %v3191_v42  ;;  %v4329_v51 = vadd.f32 %v4328_v38, %v3068_v40  ;;  %v3947_v7 = vpop.f32.mrb[241].mxu0 }
 0x3ee   :  { %v3192_v34 = vmax.f32 %v4329_v51, 0.0 }
 0x3f0   :  { %3313 = vst.msk [vmem:[%s7916_s3 + $0x3c0] sm:$0xff] %vm698_vm1, %v3192_v34 }

// kernel: image_classifier_forward.7
= control target key start
LH: loop header
LB: loop body
LE: loop exit
PB: predicated region body
PF: predicated region fallthrough
CT: control target
= control target key end

     0   :  { %s2164_s12 = smov 0   ;;  %s2571_s0 = inlined_call_operand.vmem [shape: f32[8,30976], index: 0, kind: input, shape index: {}]   ;;  %s2572_s1 = inlined_call_operand.vmem [shape: f32[30976,10], index: 1, kind: input, shape index: {}]   ;;  %s2573_s2 = inlined_call_operand.vmem [shape: f32[1,10], index: 2, kind: input, shape index: {}]   ;;  %s2574_s3 = inlined_call_operand.vmem [shape: f32[8,10], index: 3, kind: output, shape index: {}]  }
   0x1 LB: > { %s1381_s13 = sadd.s32 4294967295, %s2142_s12   ;;  %p1384_p0 = scmp.ge.s32.totalorder %s2142_s12, 1  ;;  %s2142_s12 = sphi %s2164_s12, %s13_s12  }
   0x2   : > { %p144_p1 = scmp.lt.s32.totalorder %s2142_s12, 12 }
   0x4   : > { %p145_p2 = pnand %p1384_p0, %p144_p1 }
   0x5   : > { %s168_s14 = smul.u32 (!%p145_p2), 22, %s1381_s13  ;;  %p1387_p5 = scmp.ne.s32.totalorder (!%p145_p2), %s1381_s13, 0 }
   0x6   : > { %148 = sbr.rel (%p145_p2) target bundleno = 439 (0x1b7), region = 32 }
   0x7   : > { %s174_s15 = smul.u32 (!%p145_p2), 352, %s1381_s13  ;;  %p169_p3 = scmp.lt.s32.totalorder (!%p145_p2), %s168_s14, 241 }
   0x9   : > { %p175_p4 = scmp.lt.s32.totalorder (!%p145_p2), %s174_s15, 3871 }
   0xd   : > { %s2576_s14 = smov (!%p169_p3, %s168_s14), 241  ;;  %s2578_s15 = smov (!%p175_p4, %s174_s15), 3871 }
   0xe   : > { %s1385_s16 = sshll.u32 %s2576_s14, 3  ;;  %s1386_s20 = sshll.u32 %s2578_s15, 3  ;;  %v1388_v0 = vld [vmem:[%s2573_s2] ss:$0 sm:$0xff] (!%p1387_p5)  ;;  %vm191_vm0 = vcmask (!%p1387_p5), 80896  }
   0xf   : > { %s2175_s19 = scalar_lea.vmem %s2571_s0, %s1385_s16  ;;  %s2180_s23 = scalar_lea.vmem %s2572_s1, %s1386_s20  ;;  %192 = vst.msk [vmem:[%s2574_s3] sm:$0xff] (!%p1387_p5), %vm191_vm0, %v1388_v0 }
  0x10   : > { %183 = sbr.rel (%p1387_p5) target bundleno = 23 (0x17), region = 36 }
  0x17 PF: > { %v232_v1 = vld [vmem:[%s2180_s23 + $0x80] sm:$0xff]  ;;  %v233_v2 = vld [vmem:[%s2180_s23 + $0x88] sm:$0xff]  ;;  %v234_v12 = vld [vmem:[%s2180_s23 + $0x90] sm:$0xff]  ;;  %vm1339_vm1 = vcmask 80896  }
  0x18   : > { %v264_v3 = vld [vmem:[%s2180_s23 + $0x180] sm:$0xff]  ;;  %v1776_v4 = vpack.c.bf16 %v233_v2, %v232_v1  ;;  %v265_v5 = vld [vmem:[%s2180_s23 + $0x188] sm:$0xff]  ;;  %v235_v14 = vld [vmem:[%s2180_s23 + $0x98] sm:$0xff] }
  0x19   : > { %v216_v6 = vld [vmem:[%s2180_s23] sm:$0xff]  ;;  %v217_v7 = vld [vmem:[%s2180_s23 + $0x8] sm:$0xff]  ;;  %v1808_v8 = vpack.c.bf16 %v265_v5, %v264_v3  ;;  %v266_v15 = vld [vmem:[%s2180_s23 + $0x190] sm:$0xff]  ;;  %v1780_v17 = vpack.c.bf16 %v235_v14, %v234_v12 }
  0x1a   : > { %v1778_v9 = vpack.c.bf16 %v217_v7, %v216_v6  ;;  %v248_v10 = vld [vmem:[%s2180_s23 + $0x100] sm:$0xff]  ;;  %v249_v11 = vld [vmem:[%s2180_s23 + $0x108] sm:$0xff]  ;;  %1777 = vmatprep.subr.bf16.mxu0 %v1776_v4  ;;  %v267_v16 = vld [vmem:[%s2180_s23 + $0x198] sm:$0xff] }
  0x1b   : > { %v1810_v13 = vpack.c.bf16 %v249_v11, %v248_v10  ;;  %1809 = vmatprep.subr.bf16.mxu1 %v1808_v8  ;;  %v1812_v18 = vpack.c.bf16 %v267_v16, %v266_v15  ;;  %v218_v19 = vld [vmem:[%s2180_s23 + $0x10] sm:$0xff]  ;;  %v219_v20 = vld [vmem:[%s2180_s23 + $0x18] sm:$0xff]  ;;  %v236_v24 = vld [vmem:[%s2180_s23 + $0xa0] sm:$0xff] }
  0x1c   : > { %1779 = vmatpush3.bf16.msra.mxu0 %v1778_v9  ;;  %v250_v21 = vld [vmem:[%s2180_s23 + $0x110] sm:$0xff]  ;;  %v1782_v22 = vpack.c.bf16 %v219_v20, %v218_v19  ;;  %v251_v23 = vld [vmem:[%s2180_s23 + $0x118] sm:$0xff]  ;;  %v237_v25 = vld [vmem:[%s2180_s23 + $0xa8] sm:$0xff] }
  0x1d   : > { %1811 = vmatpush3.bf16.msra.mxu1 %v1810_v13  ;;  %1781 = vmatprep.subr.bf16.mxu0 %v1780_v17  ;;  %v1814_v26 = vpack.c.bf16 %v251_v23, %v250_v21  ;;  %v1784_v27 = vpack.c.bf16 %v237_v25, %v236_v24  ;;  %v268_v28 = vld [vmem:[%s2180_s23 + $0x1a0] sm:$0xff]  ;;  %v269_v29 = vld [vmem:[%s2180_s23 + $0x1a8] sm:$0xff]  ;;  %v238_v36 = vld [vmem:[%s2180_s23 + $0xb0] sm:$0xff] }
  0x1e   : > { %1813 = vmatprep.subr.bf16.mxu1 %v1812_v18  ;;  %v220_v30 = vld [vmem:[%s2180_s23 + $0x20] sm:$0xff]  ;;  %v1816_v31 = vpack.c.bf16 %v269_v29, %v268_v28  ;;  %v221_v32 = vld [vmem:[%s2180_s23 + $0x28] sm:$0xff]  ;;  %v239_v37 = vld [vmem:[%s2180_s23 + $0xb8] sm:$0xff] }
  0x1f   : > { %v252_v33 = vld [vmem:[%s2180_s23 + $0x120] sm:$0xff]  ;;  %v253_v34 = vld [vmem:[%s2180_s23 + $0x128] sm:$0xff]  ;;  %v1786_v35 = vpack.c.bf16 %v221_v32, %v220_v30  ;;  %v270_v38 = vld [vmem:[%s2180_s23 + $0x1b0] sm:$0xff]  ;;  %v1788_v40 = vpack.c.bf16 %v239_v37, %v238_v36 }
  0x20   : > { %1783 = vmatpush3.bf16.msra.mxu0 %v1782_v22  ;;  %v1818_v39 = vpack.c.bf16 %v253_v34, %v252_v33  ;;  %v271_v41 = vld [vmem:[%s2180_s23 + $0x1b8] sm:$0xff]  ;;  %v222_v42 = vld [vmem:[%s2180_s23 + $0x30] sm:$0xff]  ;;  %v240_v47 = vld [vmem:[%s2180_s23 + $0xc0] sm:$0xff] }
  0x21   : > { %1815 = vmatpush3.bf16.msra.mxu1 %v1814_v26  ;;  %1785 = vmatprep.subr.bf16.mxu0 %v1784_v27  ;;  %v223_v43 = vld [vmem:[%s2180_s23 + $0x38] sm:$0xff]  ;;  %v1820_v44 = vpack.c.bf16 %v271_v41, %v270_v38  ;;  %v254_v45 = vld [vmem:[%s2180_s23 + $0x130] sm:$0xff]  ;;  %v241_v48 = vld [vmem:[%s2180_s23 + $0xc8] sm:$0xff] }
  0x22   : > { %1817 = vmatprep.subr.bf16.mxu1 %v1816_v31  ;;  %v255_v46 = vld [vmem:[%s2180_s23 + $0x138] sm:$0xff]  ;;  %v272_v49 = vld [vmem:[%s2180_s23 + $0x1c0] sm:$0xff]  ;;  %v273_v50 = vld [vmem:[%s2180_s23 + $0x1c8] sm:$0xff]  ;;  %v1790_v51 = vpack.c.bf16 %v223_v43, %v222_v42  ;;  %v1792_v53 = vpack.c.bf16 %v241_v48, %v240_v47 }
  0x23   : > { %v1822_v52 = vpack.c.bf16 %v255_v46, %v254_v45  ;;  %v224_v54 = vld [vmem:[%s2180_s23 + $0x40] sm:$0xff]  ;;  %v225_v55 = vld [vmem:[%s2180_s23 + $0x48] sm:$0xff]  ;;  %v1824_v57 = vpack.c.bf16 %v273_v50, %v272_v49  ;;  %v242_v59 = vld [vmem:[%s2180_s23 + $0xd0] sm:$0xff] }
  0x24   : > { %1787 = vmatpush3.bf16.msra.mxu0 %v1786_v35  ;;  %v256_v56 = vld [vmem:[%s2180_s23 + $0x140] sm:$0xff]  ;;  %v257_v58 = vld [vmem:[%s2180_s23 + $0x148] sm:$0xff]  ;;  %v243_v60 = vld [vmem:[%s2180_s23 + $0xd8] sm:$0xff]  ;;  %v1794_v63 = vpack.c.bf16 %v225_v55, %v224_v54 }
  0x25   : > { %1819 = vmatpush3.bf16.msra.mxu1 %v1818_v39  ;;  %1789 = vmatprep.subr.bf16.mxu0 %v1788_v40  ;;  %v274_v61 = vld [vmem:[%s2180_s23 + $0x1d0] sm:$0xff]  ;;  %v275_v62 = vld [vmem:[%s2180_s23 + $0x1d8] sm:$0xff]  ;;  %v1826_v0 = vpack.c.bf16 %v257_v58, %v256_v56  ;;  %v1796_v1 = vpack.c.bf16 %v243_v60, %v242_v59  ;;  %v244_v7 = vld [vmem:[%s2180_s23 + $0xe0] sm:$0xff] }
  0x26   : > { %1821 = vmatprep.subr.bf16.mxu1 %v1820_v44  ;;  %v226_v2 = vld [vmem:[%s2180_s23 + $0x50] sm:$0xff]  ;;  %v227_v3 = vld [vmem:[%s2180_s23 + $0x58] sm:$0xff]  ;;  %v1828_v5 = vpack.c.bf16 %v275_v62, %v274_v61  ;;  %v245_v8 = vld [vmem:[%s2180_s23 + $0xe8] sm:$0xff] }
  0x27   : > { %v258_v4 = vld [vmem:[%s2180_s23 + $0x150] sm:$0xff]  ;;  %v259_v6 = vld [vmem:[%s2180_s23 + $0x158] sm:$0xff]  ;;  %v276_v9 = vld [vmem:[%s2180_s23 + $0x1e0] sm:$0xff]  ;;  %v1798_v11 = vpack.c.bf16 %v227_v3, %v226_v2  ;;  %v1800_v15 = vpack.c.bf16 %v245_v8, %v244_v7 }
  0x28   : > { %1791 = vmatpush3.bf16.msra.mxu0 %v1790_v51  ;;  %v277_v10 = vld [vmem:[%s2180_s23 + $0x1e8] sm:$0xff]  ;;  %v228_v12 = vld [vmem:[%s2180_s23 + $0x60] sm:$0xff]  ;;  %v1830_v14 = vpack.c.bf16 %v259_v6, %v258_v4  ;;  %v197_v18 = vld [vmem:[%s2175_s19 + $0x18] sm:$0xff] }
  0x29   : > { %1823 = vmatpush3.bf16.msra.mxu1 %v1822_v52  ;;  %1793 = vmatprep.subr.bf16.mxu0 %v1792_v53  ;;  %v229_v13 = vld [vmem:[%s2180_s23 + $0x68] sm:$0xff]  ;;  %v260_v16 = vld [vmem:[%s2180_s23 + $0x160] sm:$0xff]  ;;  %v1832_v19 = vpack.c.bf16 %v277_v10, %v276_v9  ;;  %v246_v21 = vld [vmem:[%s2180_s23 + $0xf0] sm:$0xff] }
  0x2a   : > { %1825 = vmatprep.subr.bf16.mxu1 %v1824_v57  ;;  %v195_v17 = vld [vmem:[%s2175_s19 + $0x8] sm:$0xff]  ;;  %v247_v22 = vld [vmem:[%s2180_s23 + $0xf8] sm:$0xff]  ;;  %v278_v23 = vld [vmem:[%s2180_s23 + $0x1f0] sm:$0xff]  ;;  %702 = vmatprep.mubr.f32.mxu1 %v197_v18  ;;  %v1802_v25 = vpack.c.bf16 %v229_v13, %v228_v12 }
  0x2b   : > { %v261_v20 = vld [vmem:[%s2180_s23 + $0x168] sm:$0xff]  ;;  %632 = vmatprep.mubr.f32.mxu0 %v195_v17  ;;  %v279_v24 = vld [vmem:[%s2180_s23 + $0x1f8] sm:$0xff]  ;;  %v1804_v27 = vpack.c.bf16 %v247_v22, %v246_v21  ;;  %v230_v28 = vld [vmem:[%s2180_s23 + $0x70] sm:$0xff] }
  0x2c   : > { %1795 = vmatpush3.bf16.msra.mxu0 %v1794_v63  ;;  %v1834_v26 = vpack.c.bf16 %v261_v20, %v260_v16  ;;  %v231_v29 = vld [vmem:[%s2180_s23 + $0x78] sm:$0xff]  ;;  %v262_v30 = vld [vmem:[%s2180_s23 + $0x170] sm:$0xff]  ;;  %v1836_v31 = vpack.c.bf16 %v279_v24, %v278_v23  ;;  %v296_v33 = vld [vmem:[%s2180_s23 + $0x280] sm:$0xff] }
  0x2d   : > { %1827 = vmatpush3.bf16.msra.mxu1 %v1826_v0  ;;  %1797 = vmatprep.subr.bf16.mxu0 %v1796_v1  ;;  %v263_v32 = vld [vmem:[%s2180_s23 + $0x178] sm:$0xff]  ;;  %v297_v34 = vld [vmem:[%s2180_s23 + $0x288] sm:$0xff]  ;;  %v328_v35 = vld [vmem:[%s2180_s23 + $0x380] sm:$0xff]  ;;  %v1806_v37 = vpack.c.bf16 %v231_v29, %v230_v28 }
  0x2e   : > { %1829 = vmatprep.subr.bf16.mxu1 %v1828_v5  ;;  %v329_v36 = vld [vmem:[%s2180_s23 + $0x388] sm:$0xff]  ;;  %v1838_v38 = vpack.c.bf16 %v263_v32, %v262_v30  ;;  %v1840_v39 = vpack.c.bf16 %v297_v34, %v296_v33  ;;  %v280_v40 = vld [vmem:[%s2180_s23 + $0x200] sm:$0xff]  ;;  %v298_v45 = vld [vmem:[%s2180_s23 + $0x290] sm:$0xff] }
  0x2f   : > { %v281_v41 = vld [vmem:[%s2180_s23 + $0x208] sm:$0xff]  ;;  %v312_v42 = vld [vmem:[%s2180_s23 + $0x300] sm:$0xff]  ;;  %v1872_v43 = vpack.c.bf16 %v329_v36, %v328_v35  ;;  %v299_v46 = vld [vmem:[%s2180_s23 + $0x298] sm:$0xff] }
  0x30   : > { %1799 = vmatpush3.bf16.msra.mxu0 %v1798_v11  ;;  %v313_v44 = vld [vmem:[%s2180_s23 + $0x308] sm:$0xff]  ;;  %v330_v47 = vld [vmem:[%s2180_s23 + $0x390] sm:$0xff]  ;;  %v331_v48 = vld [vmem:[%s2180_s23 + $0x398] sm:$0xff]  ;;  %v1842_v51 = vpack.c.bf16 %v281_v41, %v280_v40  ;;  %v1844_v53 = vpack.c.bf16 %v299_v46, %v298_v45 }
  0x31   : > { %1831 = vmatpush3.bf16.msra.mxu1 %v1830_v14  ;;  %1801 = vmatprep.subr.bf16.mxu0 %v1800_v15  ;;  %v194_v49 = vld [vmem:[%s2175_s19] sm:$0xff]  ;;  %v196_v50 = vld [vmem:[%s2175_s19 + $0x10] sm:$0xff]  ;;  %v1874_v52 = vpack.c.bf16 %v313_v44, %v312_v42  ;;  %v283_v55 = vld [vmem:[%s2180_s23 + $0x218] sm:$0xff]  ;;  %v1876_v57 = vpack.c.bf16 %v331_v48, %v330_v47 }
  0x32   : > { %1833 = vmatprep.subr.bf16.mxu1 %v1832_v19  ;;  %v282_v54 = vld [vmem:[%s2180_s23 + $0x210] sm:$0xff]  ;;  %v315_v58 = vld [vmem:[%s2180_s23 + $0x318] sm:$0xff]  ;;  %v300_v59 = vld [vmem:[%s2180_s23 + $0x2a0] sm:$0xff] }
  0x33   : > { %v314_v56 = vld [vmem:[%s2180_s23 + $0x310] sm:$0xff]  ;;  %v301_v60 = vld [vmem:[%s2180_s23 + $0x2a8] sm:$0xff]  ;;  %v332_v61 = vld [vmem:[%s2180_s23 + $0x3a0] sm:$0xff]  ;;  %v1846_v63 = vpack.c.bf16 %v283_v55, %v282_v54 }
  0x34   : > { %1803 = vmatpush3.bf16.msra.mxu0 %v1802_v25  ;;  %v333_v62 = vld [vmem:[%s2180_s23 + $0x3a8] sm:$0xff]  ;;  %v1878_v0 = vpack.c.bf16 %v315_v58, %v314_v56  ;;  %v1848_v1 = vpack.c.bf16 %v301_v60, %v300_v59  ;;  %v284_v2 = vld [vmem:[%s2180_s23 + $0x220] sm:$0xff]  ;;  %v302_v7 = vld [vmem:[%s2180_s23 + $0x2b0] sm:$0xff] }
  0x35   : > { %1835 = vmatpush3.bf16.msra.mxu1 %v1834_v26  ;;  %1805 = vmatprep.subr.bf16.mxu0 %v1804_v27  ;;  %v285_v3 = vld [vmem:[%s2180_s23 + $0x228] sm:$0xff]  ;;  %v316_v4 = vld [vmem:[%s2180_s23 + $0x320] sm:$0xff]  ;;  %v1880_v5 = vpack.c.bf16 %v333_v62, %v332_v61  ;;  %v303_v8 = vld [vmem:[%s2180_s23 + $0x2b8] sm:$0xff] }
  0x36   : > { %1837 = vmatprep.subr.bf16.mxu1 %v1836_v31  ;;  %v317_v6 = vld [vmem:[%s2180_s23 + $0x328] sm:$0xff]  ;;  %v334_v9 = vld [vmem:[%s2180_s23 + $0x3b0] sm:$0xff]  ;;  %v335_v10 = vld [vmem:[%s2180_s23 + $0x3b8] sm:$0xff]  ;;  %v1850_v11 = vpack.c.bf16 %v285_v3, %v284_v2  ;;  %v1852_v13 = vpack.c.bf16 %v303_v8, %v302_v7 }
  0x37   : > { %v1882_v12 = vpack.c.bf16 %v317_v6, %v316_v4  ;;  %v286_v14 = vld [vmem:[%s2180_s23 + $0x230] sm:$0xff]  ;;  %v287_v15 = vld [vmem:[%s2180_s23 + $0x238] sm:$0xff]  ;;  %v1884_v17 = vpack.c.bf16 %v335_v10, %v334_v9  ;;  %v304_v19 = vld [vmem:[%s2180_s23 + $0x2c0] sm:$0xff] }
  0x38   : > { %1807 = vmatpush3.bf16.msra.mxu0 %v1806_v37  ;;  %v318_v16 = vld [vmem:[%s2180_s23 + $0x330] sm:$0xff]  ;;  %v319_v18 = vld [vmem:[%s2180_s23 + $0x338] sm:$0xff]  ;;  %v305_v20 = vld [vmem:[%s2180_s23 + $0x2c8] sm:$0xff]  ;;  %v1854_v24 = vpack.c.bf16 %v287_v15, %v286_v14 }
  0x39   : > { %1839 = vmatpush3.bf16.msra.mxu1 %v1838_v38  ;;  %1841 = vmatprep.subr.bf16.mxu0 %v1840_v39  ;;  %v336_v21 = vld [vmem:[%s2180_s23 + $0x3c0] sm:$0xff]  ;;  %v337_v22 = vld [vmem:[%s2180_s23 + $0x3c8] sm:$0xff]  ;;  %v1886_v26 = vpack.c.bf16 %v319_v18, %v318_v16  ;;  %v1856_v27 = vpack.c.bf16 %v305_v20, %v304_v19  ;;  %v201_v30 = vld [vmem:[%s2175_s19 + $0x38] sm:$0xff] }
  0x3a   : > { %1873 = vmatprep.subr.bf16.mxu1 %v1872_v43  ;;  %v199_v23 = vld [vmem:[%s2175_s19 + $0x28] sm:$0xff]  ;;  %v288_v25 = vld [vmem:[%s2180_s23 + $0x240] sm:$0xff]  ;;  %v1888_v31 = vpack.c.bf16 %v337_v22, %v336_v21  ;;  %v306_v33 = vld [vmem:[%s2180_s23 + $0x2d0] sm:$0xff] }
  0x3b   : > { %633 = vmatmul.mubr.f32.vlgmr.msra.gmra.mrb[0].mxu0 %v194_v49  ;;  %v289_v28 = vld [vmem:[%s2180_s23 + $0x248] sm:$0xff]  ;;  %v320_v29 = vld [vmem:[%s2180_s23 + $0x340] sm:$0xff]  ;;  %v307_v34 = vld [vmem:[%s2180_s23 + $0x2d8] sm:$0xff] }
  0x3c   : > { %703 = vmatmul.mubr.f32.vlgmr.msra.gmra.mrb[0].mxu1 %v196_v50  ;;  %1843 = vmatpush3.bf16.msra.mxu0 %v1842_v51  ;;  %v321_v32 = vld [vmem:[%s2180_s23 + $0x348] sm:$0xff]  ;;  %v338_v35 = vld [vmem:[%s2180_s23 + $0x3d0] sm:$0xff]  ;;  %v339_v36 = vld [vmem:[%s2180_s23 + $0x3d8] sm:$0xff]  ;;  %v1858_v37 = vpack.c.bf16 %v289_v28, %v288_v25  ;;  %v1860_v39 = vpack.c.bf16 %v307_v34, %v306_v33 }
  0x3d   : > { %1875 = vmatpush3.bf16.msra.mxu1 %v1874_v52  ;;  %1845 = vmatprep.subr.bf16.mxu0 %v1844_v53  ;;  %v1890_v38 = vpack.c.bf16 %v321_v32, %v320_v29  ;;  %v290_v40 = vld [vmem:[%s2180_s23 + $0x250] sm:$0xff]  ;;  %v291_v41 = vld [vmem:[%s2180_s23 + $0x258] sm:$0xff]  ;;  %v1892_v43 = vpack.c.bf16 %v339_v36, %v338_v35  ;;  %v308_v45 = vld [vmem:[%s2180_s23 + $0x2e0] sm:$0xff] }
  0x3e   : > { %1877 = vmatprep.subr.bf16.mxu1 %v1876_v57  ;;  %772 = vmatprep.mubr.f32.mxu0 %v199_v23  ;;  %v322_v42 = vld [vmem:[%s2180_s23 + $0x350] sm:$0xff]  ;;  %v323_v44 = vld [vmem:[%s2180_s23 + $0x358] sm:$0xff]  ;;  %v309_v46 = vld [vmem:[%s2180_s23 + $0x2e8] sm:$0xff]  ;;  %v1862_v49 = vpack.c.bf16 %v291_v41, %v290_v40 }
  0x3f   : > { %842 = vmatprep.mubr.f32.mxu1 %v201_v30  ;;  %v340_v47 = vld [vmem:[%s2180_s23 + $0x3e0] sm:$0xff]  ;;  %v341_v48 = vld [vmem:[%s2180_s23 + $0x3e8] sm:$0xff]  ;;  %v1894_v50 = vpack.c.bf16 %v323_v44, %v322_v42  ;;  %v1864_v51 = vpack.c.bf16 %v309_v46, %v308_v45  ;;  %v310_v57 = vld [vmem:[%s2180_s23 + $0x2f0] sm:$0xff] }
  0x40   : > { %1847 = vmatpush3.bf16.msra.mxu0 %v1846_v63  ;;  %v292_v52 = vld [vmem:[%s2180_s23 + $0x260] sm:$0xff]  ;;  %v293_v53 = vld [vmem:[%s2180_s23 + $0x268] sm:$0xff]  ;;  %v1896_v55 = vpack.c.bf16 %v341_v48, %v340_v47  ;;  %v311_v58 = vld [vmem:[%s2180_s23 + $0x2f8] sm:$0xff] }
  0x41   : > { %1879 = vmatpush3.bf16.msra.mxu1 %v1878_v0  ;;  %1849 = vmatprep.subr.bf16.mxu0 %v1848_v1  ;;  %v324_v54 = vld [vmem:[%s2180_s23 + $0x360] sm:$0xff]  ;;  %v325_v56 = vld [vmem:[%s2180_s23 + $0x368] sm:$0xff]  ;;  %v342_v59 = vld [vmem:[%s2180_s23 + $0x3f0] sm:$0xff]  ;;  %v1866_v61 = vpack.c.bf16 %v293_v53, %v292_v52  ;;  %v1868_v63 = vpack.c.bf16 %v311_v58, %v310_v57 }
  0x42   : > { %1881 = vmatprep.subr.bf16.mxu1 %v1880_v5  ;;  %v343_v60 = vld [vmem:[%s2180_s23 + $0x3f8] sm:$0xff]  ;;  %v1898_v62 = vpack.c.bf16 %v325_v56, %v324_v54  ;;  %v294_v0 = vld [vmem:[%s2180_s23 + $0x270] sm:$0xff]  ;;  %v360_v5 = vld [vmem:[%s2180_s23 + $0x480] sm:$0xff] }
  0x43   : > { %v295_v1 = vld [vmem:[%s2180_s23 + $0x278] sm:$0xff]  ;;  %v326_v2 = vld [vmem:[%s2180_s23 + $0x370] sm:$0xff]  ;;  %v1900_v3 = vpack.c.bf16 %v343_v60, %v342_v59  ;;  %v361_v6 = vld [vmem:[%s2180_s23 + $0x488] sm:$0xff] }
  0x44   : > { %1851 = vmatpush3.bf16.msra.mxu0 %v1850_v11  ;;  %v327_v4 = vld [vmem:[%s2180_s23 + $0x378] sm:$0xff]  ;;  %v392_v7 = vld [vmem:[%s2180_s23 + $0x580] sm:$0xff]  ;;  %v393_v8 = vld [vmem:[%s2180_s23 + $0x588] sm:$0xff]  ;;  %v1870_v9 = vpack.c.bf16 %v295_v1, %v294_v0  ;;  %v1904_v11 = vpack.c.bf16 %v361_v6, %v360_v5 }
  0x45   : > { %1883 = vmatpush3.bf16.msra.mxu1 %v1882_v12  ;;  %1853 = vmatprep.subr.bf16.mxu0 %v1852_v13  ;;  %v1902_v10 = vpack.c.bf16 %v327_v4, %v326_v2  ;;  %v344_v12 = vld [vmem:[%s2180_s23 + $0x400] sm:$0xff]  ;;  %v345_v13 = vld [vmem:[%s2180_s23 + $0x408] sm:$0xff]  ;;  %v1936_v15 = vpack.c.bf16 %v393_v8, %v392_v7  ;;  %v363_v18 = vld [vmem:[%s2180_s23 + $0x498] sm:$0xff] }
  0x46   : > { %1885 = vmatprep.subr.bf16.mxu1 %v1884_v17  ;;  %v376_v14 = vld [vmem:[%s2180_s23 + $0x500] sm:$0xff]  ;;  %v377_v16 = vld [vmem:[%s2180_s23 + $0x508] sm:$0xff]  ;;  %v362_v17 = vld [vmem:[%s2180_s23 + $0x490] sm:$0xff]  ;;  %v1906_v22 = vpack.c.bf16 %v345_v13, %v344_v12 }
  0x47   : > { %v394_v19 = vld [vmem:[%s2180_s23 + $0x590] sm:$0xff]  ;;  %v395_v20 = vld [vmem:[%s2180_s23 + $0x598] sm:$0xff]  ;;  %v198_v21 = vld [vmem:[%s2175_s19 + $0x20] sm:$0xff]  ;;  %v1908_v25 = vpack.c.bf16 %v363_v18, %v362_v17 }
  0x48   : > { %1855 = vmatpush3.bf16.msra.mxu0 %v1854_v24  ;;  %v200_v23 = vld [vmem:[%s2175_s19 + $0x30] sm:$0xff]  ;;  %v1938_v24 = vpack.c.bf16 %v377_v16, %v376_v14  ;;  %v1940_v29 = vpack.c.bf16 %v395_v20, %v394_v19  ;;  %v379_v30 = vld [vmem:[%s2180_s23 + $0x518] sm:$0xff]  ;;  %v365_v32 = vld [vmem:[%s2180_s23 + $0x4a8] sm:$0xff] }
  0x49   : > { %1887 = vmatpush3.bf16.msra.mxu1 %v1886_v26  ;;  %1857 = vmatprep.subr.bf16.mxu0 %v1856_v27  ;;  %v346_v26 = vld [vmem:[%s2180_s23 + $0x410] sm:$0xff]  ;;  %v347_v27 = vld [vmem:[%s2180_s23 + $0x418] sm:$0xff]  ;;  %v396_v33 = vld [vmem:[%s2180_s23 + $0x5a0] sm:$0xff] }
  0x4a   : > { %1889 = vmatprep.subr.bf16.mxu1 %v1888_v31  ;;  %v378_v28 = vld [vmem:[%s2180_s23 + $0x510] sm:$0xff]  ;;  %v364_v31 = vld [vmem:[%s2180_s23 + $0x4a0] sm:$0xff]  ;;  %v397_v34 = vld [vmem:[%s2180_s23 + $0x5a8] sm:$0xff]  ;;  %v1910_v36 = vpack.c.bf16 %v347_v27, %v346_v26 }
  0x4b   : > { %v203_v35 = vld [vmem:[%s2175_s19 + $0x48] sm:$0xff]  ;;  %v348_v40 = vld [vmem:[%s2180_s23 + $0x420] sm:$0xff]  ;;  %v366_v45 = vld [vmem:[%s2180_s23 + $0x4b0] sm:$0xff] }
  0x4c   : > { %1859 = vmatpush3.bf16.msra.mxu0 %v1858_v37  ;;  %v205_v37 = vld [vmem:[%s2175_s19 + $0x58] sm:$0xff]  ;;  %v349_v41 = vld [vmem:[%s2180_s23 + $0x428] sm:$0xff]  ;;  %v380_v42 = vld [vmem:[%s2180_s23 + $0x520] sm:$0xff] }
  0x4d   : > { %1891 = vmatpush3.bf16.msra.mxu1 %v1890_v38  ;;  %1861 = vmatprep.subr.bf16.mxu0 %v1860_v39  ;;  %v1942_v38 = vpack.c.bf16 %v379_v30, %v378_v28  ;;  %v1912_v39 = vpack.c.bf16 %v365_v32, %v364_v31  ;;  %v381_v44 = vld [vmem:[%s2180_s23 + $0x528] sm:$0xff]  ;;  %v367_v46 = vld [vmem:[%s2180_s23 + $0x4b8] sm:$0xff]  ;;  %v398_v47 = vld [vmem:[%s2180_s23 + $0x5b0] sm:$0xff] }
  0x4e   : > { %1893 = vmatprep.subr.bf16.mxu1 %v1892_v43  ;;  %v1944_v43 = vpack.c.bf16 %v397_v34, %v396_v33  ;;  %v399_v48 = vld [vmem:[%s2180_s23 + $0x5b8] sm:$0xff]  ;;  %v350_v52 = vld [vmem:[%s2180_s23 + $0x430] sm:$0xff]  ;;  %v368_v57 = vld [vmem:[%s2180_s23 + $0x4c0] sm:$0xff] }
  0x4f   : > { %v351_v53 = vld [vmem:[%s2180_s23 + $0x438] sm:$0xff]  ;;  %v382_v54 = vld [vmem:[%s2180_s23 + $0x530] sm:$0xff]  ;;  %v369_v58 = vld [vmem:[%s2180_s23 + $0x4c8] sm:$0xff] }
  0x50   : > { %1863 = vmatpush3.bf16.msra.mxu0 %v1862_v49  ;;  %v1914_v49 = vpack.c.bf16 %v349_v41, %v348_v40  ;;  %v383_v56 = vld [vmem:[%s2180_s23 + $0x538] sm:$0xff]  ;;  %v400_v59 = vld [vmem:[%s2180_s23 + $0x5c0] sm:$0xff]  ;;  %v401_v60 = vld [vmem:[%s2180_s23 + $0x5c8] sm:$0xff] }
  0x51   : > { %1895 = vmatpush3.bf16.msra.mxu1 %v1894_v50  ;;  %1865 = vmatprep.subr.bf16.mxu0 %v1864_v51  ;;  %v1946_v50 = vpack.c.bf16 %v381_v44, %v380_v42  ;;  %v1916_v51 = vpack.c.bf16 %v367_v46, %v366_v45  ;;  %v352_v0 = vld [vmem:[%s2180_s23 + $0x440] sm:$0xff]  ;;  %v353_v1 = vld [vmem:[%s2180_s23 + $0x448] sm:$0xff]  ;;  %v370_v5 = vld [vmem:[%s2180_s23 + $0x4d0] sm:$0xff] }
  0x52   : > { %1897 = vmatprep.subr.bf16.mxu1 %v1896_v55  ;;  %v1948_v55 = vpack.c.bf16 %v399_v48, %v398_v47  ;;  %v384_v2 = vld [vmem:[%s2180_s23 + $0x540] sm:$0xff]  ;;  %v385_v4 = vld [vmem:[%s2180_s23 + $0x548] sm:$0xff]  ;;  %v371_v6 = vld [vmem:[%s2180_s23 + $0x4d8] sm:$0xff] }
  0x53   : > { %v402_v7 = vld [vmem:[%s2180_s23 + $0x5d0] sm:$0xff]  ;;  %v403_v8 = vld [vmem:[%s2180_s23 + $0x5d8] sm:$0xff]  ;;  %v372_v17 = vld [vmem:[%s2180_s23 + $0x4e0] sm:$0xff] }
  0x54   : > { %1867 = vmatpush3.bf16.msra.mxu0 %v1866_v61  ;;  %v1918_v61 = vpack.c.bf16 %v351_v53, %v350_v52  ;;  %v354_v12 = vld [vmem:[%s2180_s23 + $0x450] sm:$0xff]  ;;  %v355_v13 = vld [vmem:[%s2180_s23 + $0x458] sm:$0xff]  ;;  %v373_v18 = vld [vmem:[%s2180_s23 + $0x4e8] sm:$0xff] }
  0x55   : > { %1899 = vmatpush3.bf16.msra.mxu1 %v1898_v62  ;;  %1869 = vmatprep.subr.bf16.mxu0 %v1868_v63  ;;  %v1950_v62 = vpack.c.bf16 %v383_v56, %v382_v54  ;;  %v1920_v63 = vpack.c.bf16 %v369_v58, %v368_v57  ;;  %v386_v14 = vld [vmem:[%s2180_s23 + $0x550] sm:$0xff]  ;;  %v387_v16 = vld [vmem:[%s2180_s23 + $0x558] sm:$0xff]  ;;  %v404_v19 = vld [vmem:[%s2180_s23 + $0x5e0] sm:$0xff] }
  0x56   : > { %1901 = vmatprep.subr.bf16.mxu1 %v1900_v3  ;;  %v1952_v3 = vpack.c.bf16 %v401_v60, %v400_v59  ;;  %v405_v20 = vld [vmem:[%s2180_s23 + $0x5e8] sm:$0xff]  ;;  %v388_v26 = vld [vmem:[%s2180_s23 + $0x560] sm:$0xff]  ;;  %v375_v30 = vld [vmem:[%s2180_s23 + $0x4f8] sm:$0xff] }
  0x57   : > { %v1960_v27 = vpack.c.bf16 %v405_v20, %v404_v19  ;;  %v389_v28 = vld [vmem:[%s2180_s23 + $0x568] sm:$0xff]  ;;  %v406_v31 = vld [vmem:[%s2180_s23 + $0x5f0] sm:$0xff]  ;;  %v407_v32 = vld [vmem:[%s2180_s23 + $0x5f8] sm:$0xff] }
  0x58   : > { %1871 = vmatpush3.bf16.msra.mxu0 %v1870_v9  ;;  %v1922_v9 = vpack.c.bf16 %v353_v1, %v352_v0  ;;  %v1962_v34 = vpack.c.bf16 %v389_v28, %v388_v26  ;;  %v391_v40 = vld [vmem:[%s2180_s23 + $0x578] sm:$0xff]  ;;  %v424_v41 = vld [vmem:[%s2180_s23 + $0x680] sm:$0xff]  ;;  %v425_v42 = vld [vmem:[%s2180_s23 + $0x688] sm:$0xff] }
  0x59   : > { %1903 = vmatpush3.bf16.msra.mxu1 %v1902_v10  ;;  %1905 = vmatprep.subr.bf16.mxu0 %v1904_v11  ;;  %v1954_v10 = vpack.c.bf16 %v385_v4, %v384_v2  ;;  %v1924_v11 = vpack.c.bf16 %v371_v6, %v370_v5  ;;  %v457_v44 = vld [vmem:[%s2180_s23 + $0x788] sm:$0xff]  ;;  %v1968_v47 = vpack.c.bf16 %v425_v42, %v424_v41  ;;  %v408_v48 = vld [vmem:[%s2180_s23 + $0x600] sm:$0xff]  ;;  %v426_v53 = vld [vmem:[%s2180_s23 + $0x690] sm:$0xff] }
  0x5a   : > { %1937 = vmatprep.subr.bf16.mxu1 %v1936_v15  ;;  %v1956_v15 = vpack.c.bf16 %v403_v8, %v402_v7  ;;  %v441_v52 = vld [vmem:[%s2180_s23 + $0x708] sm:$0xff]  ;;  %v427_v54 = vld [vmem:[%s2180_s23 + $0x698] sm:$0xff]  ;;  %v202_v57 = vld [vmem:[%s2175_s19 + $0x40] sm:$0xff] }
  0x5b   : > { %773 = vmatmul.mubr.f32.vlgmr.msra.gmra.mrb[2].mxu0 %v198_v21  ;;  %v1926_v21 = vpack.c.bf16 %v355_v13, %v354_v12  ;;  %v459_v56 = vld [vmem:[%s2180_s23 + $0x798] sm:$0xff]  ;;  %v204_v59 = vld [vmem:[%s2175_s19 + $0x50] sm:$0xff]  ;;  %v429_v4 = vld [vmem:[%s2180_s23 + $0x6a8] sm:$0xff] }
  0x5c   : > { %1907 = vmatpush3.bf16.msra.mxu0 %v1906_v22  ;;  %843 = vmatmul.mubr.f32.vlgmr.msra.gmra.mrb[2].mxu1 %v200_v23  ;;  %v1958_v22 = vpack.c.bf16 %v387_v16, %v386_v14  ;;  %v1928_v23 = vpack.c.bf16 %v373_v18, %v372_v17  ;;  %v442_v0 = vld [vmem:[%s2180_s23 + $0x710] sm:$0xff]  ;;  %v443_v2 = vld [vmem:[%s2180_s23 + $0x718] sm:$0xff]  ;;  %v460_v5 = vld [vmem:[%s2180_s23 + $0x7a0] sm:$0xff] }
  0x5d   : > { %1939 = vmatpush3.bf16.msra.mxu1 %v1938_v24  ;;  %1909 = vmatprep.subr.bf16.mxu0 %v1908_v25  ;;  %v356_v24 = vld [vmem:[%s2180_s23 + $0x460] sm:$0xff]  ;;  %v357_v25 = vld [vmem:[%s2180_s23 + $0x468] sm:$0xff]  ;;  %v430_v17 = vld [vmem:[%s2180_s23 + $0x6b0] sm:$0xff] }
  0x5e   : > { %1941 = vmatprep.subr.bf16.mxu1 %v1940_v29  ;;  %912 = vmatprep.mubr.f32.mxu0 %v203_v35  ;;  %v374_v29 = vld [vmem:[%s2180_s23 + $0x4f0] sm:$0xff]  ;;  %v1930_v33 = vpack.c.bf16 %v357_v25, %v356_v24  ;;  %v461_v6 = vld [vmem:[%s2180_s23 + $0x7a8] sm:$0xff]  ;;  %v412_v12 = vld [vmem:[%s2180_s23 + $0x620] sm:$0xff] }
  0x5f   : > { %982 = vmatprep.mubr.f32.mxu1 %v205_v37  ;;  %v1932_v35 = vpack.c.bf16 %v375_v30, %v374_v29  ;;  %v359_v37 = vld [vmem:[%s2180_s23 + $0x478] sm:$0xff]  ;;  %v207_v7 = vld [vmem:[%s2175_s19 + $0x68] sm:$0xff]  ;;  %v444_v14 = vld [vmem:[%s2180_s23 + $0x720] sm:$0xff] }
  0x60   : > { %1911 = vmatpush3.bf16.msra.mxu0 %v1910_v36  ;;  %v358_v36 = vld [vmem:[%s2180_s23 + $0x470] sm:$0xff]  ;;  %v413_v13 = vld [vmem:[%s2180_s23 + $0x628] sm:$0xff]  ;;  %v431_v18 = vld [vmem:[%s2180_s23 + $0x6b8] sm:$0xff] }
  0x61   : > { %1943 = vmatpush3.bf16.msra.mxu1 %v1942_v38  ;;  %1913 = vmatprep.subr.bf16.mxu0 %v1912_v39  ;;  %v390_v38 = vld [vmem:[%s2180_s23 + $0x570] sm:$0xff]  ;;  %v1964_v39 = vpack.c.bf16 %v407_v32, %v406_v31  ;;  %v1934_v45 = vpack.c.bf16 %v359_v37, %v358_v36  ;;  %v445_v16 = vld [vmem:[%s2180_s23 + $0x728] sm:$0xff]  ;;  %v463_v20 = vld [vmem:[%s2180_s23 + $0x7b8] sm:$0xff] }
  0x62   : > { %1945 = vmatprep.subr.bf16.mxu1 %v1944_v43  ;;  %v456_v43 = vld [vmem:[%s2180_s23 + $0x780] sm:$0xff]  ;;  %v1966_v46 = vpack.c.bf16 %v391_v40, %v390_v38  ;;  %v462_v19 = vld [vmem:[%s2180_s23 + $0x7b0] sm:$0xff]  ;;  %v415_v25 = vld [vmem:[%s2180_s23 + $0x638] sm:$0xff] }
  0x63   : > { %v414_v24 = vld [vmem:[%s2180_s23 + $0x630] sm:$0xff]  ;;  %v447_v28 = vld [vmem:[%s2180_s23 + $0x738] sm:$0xff]  ;;  %v432_v29 = vld [vmem:[%s2180_s23 + $0x6c0] sm:$0xff] }
  0x64   : > { %1915 = vmatpush3.bf16.msra.mxu0 %v1914_v49  ;;  %v409_v49 = vld [vmem:[%s2180_s23 + $0x608] sm:$0xff]  ;;  %v446_v26 = vld [vmem:[%s2180_s23 + $0x730] sm:$0xff]  ;;  %v464_v31 = vld [vmem:[%s2180_s23 + $0x7c0] sm:$0xff] }
  0x65   : > { %1947 = vmatpush3.bf16.msra.mxu1 %v1946_v50  ;;  %1917 = vmatprep.subr.bf16.mxu0 %v1916_v51  ;;  %v440_v50 = vld [vmem:[%s2180_s23 + $0x700] sm:$0xff]  ;;  %v2000_v51 = vpack.c.bf16 %v457_v44, %v456_v43  ;;  %v1970_v58 = vpack.c.bf16 %v409_v49, %v408_v48  ;;  %v433_v30 = vld [vmem:[%s2180_s23 + $0x6c8] sm:$0xff]  ;;  %v434_v41 = vld [vmem:[%s2180_s23 + $0x6d0] sm:$0xff] }
  0x66   : > { %1949 = vmatprep.subr.bf16.mxu1 %v1948_v55  ;;  %v458_v55 = vld [vmem:[%s2180_s23 + $0x790] sm:$0xff]  ;;  %v2002_v60 = vpack.c.bf16 %v441_v52, %v440_v50  ;;  %v465_v32 = vld [vmem:[%s2180_s23 + $0x7c8] sm:$0xff]  ;;  %v416_v36 = vld [vmem:[%s2180_s23 + $0x640] sm:$0xff] }
  0x67   : > { %v2004_v1 = vpack.c.bf16 %v459_v56, %v458_v55  ;;  %v417_v37 = vld [vmem:[%s2180_s23 + $0x648] sm:$0xff]  ;;  %v448_v38 = vld [vmem:[%s2180_s23 + $0x740] sm:$0xff]  ;;  %v435_v42 = vld [vmem:[%s2180_s23 + $0x6d8] sm:$0xff] }
  0x68   : > { %1919 = vmatpush3.bf16.msra.mxu0 %v1918_v61  ;;  %v1972_v61 = vpack.c.bf16 %v427_v54, %v426_v53  ;;  %v449_v40 = vld [vmem:[%s2180_s23 + $0x748] sm:$0xff]  ;;  %v466_v43 = vld [vmem:[%s2180_s23 + $0x7d0] sm:$0xff]  ;;  %v467_v44 = vld [vmem:[%s2180_s23 + $0x7d8] sm:$0xff] }
  0x69   : > { %1951 = vmatpush3.bf16.msra.mxu1 %v1950_v62  ;;  %1921 = vmatprep.subr.bf16.mxu0 %v1920_v63  ;;  %v410_v62 = vld [vmem:[%s2180_s23 + $0x610] sm:$0xff]  ;;  %v411_v63 = vld [vmem:[%s2180_s23 + $0x618] sm:$0xff]  ;;  %v436_v53 = vld [vmem:[%s2180_s23 + $0x6e0] sm:$0xff] }
  0x6a   : > { %1953 = vmatprep.subr.bf16.mxu1 %v1952_v3  ;;  %v428_v3 = vld [vmem:[%s2180_s23 + $0x6a0] sm:$0xff]  ;;  %v1974_v8 = vpack.c.bf16 %v411_v63, %v410_v62  ;;  %v418_v48 = vld [vmem:[%s2180_s23 + $0x650] sm:$0xff]  ;;  %v419_v49 = vld [vmem:[%s2180_s23 + $0x658] sm:$0xff] }
  0x6b   : > { %v450_v50 = vld [vmem:[%s2180_s23 + $0x750] sm:$0xff]  ;;  %v451_v52 = vld [vmem:[%s2180_s23 + $0x758] sm:$0xff]  ;;  %v437_v54 = vld [vmem:[%s2180_s23 + $0x6e8] sm:$0xff] }
  0x6c   : > { %1923 = vmatpush3.bf16.msra.mxu0 %v1922_v9  ;;  %v209_v9 = vld [vmem:[%s2175_s19 + $0x78] sm:$0xff]  ;;  %v468_v55 = vld [vmem:[%s2180_s23 + $0x7e0] sm:$0xff]  ;;  %v469_v56 = vld [vmem:[%s2180_s23 + $0x7e8] sm:$0xff] }
  0x6d   : > { %1955 = vmatpush3.bf16.msra.mxu1 %v1954_v10  ;;  %1925 = vmatprep.subr.bf16.mxu0 %v1924_v11  ;;  %v2006_v10 = vpack.c.bf16 %v443_v2, %v442_v0  ;;  %v1976_v11 = vpack.c.bf16 %v429_v4, %v428_v3  ;;  %v452_v62 = vld [vmem:[%s2180_s23 + $0x760] sm:$0xff]  ;;  %v2024_v63 = vpack.c.bf16 %v469_v56, %v468_v55  ;;  %v453_v0 = vld [vmem:[%s2180_s23 + $0x768] sm:$0xff]  ;;  %v439_v2 = vld [vmem:[%s2180_s23 + $0x6f8] sm:$0xff] }
  0x6e   : > { %1957 = vmatprep.subr.bf16.mxu1 %v1956_v15  ;;  %v2008_v15 = vpack.c.bf16 %v461_v6, %v460_v5  ;;  %v470_v3 = vld [vmem:[%s2180_s23 + $0x7f0] sm:$0xff]  ;;  %v471_v4 = vld [vmem:[%s2180_s23 + $0x7f8] sm:$0xff]  ;;  %v2026_v6 = vpack.c.bf16 %v453_v0, %v452_v62 }
  0x6f   : > { %v526_v55 = vld [vmem:[%s2180_s23 + $0x9b0] sm:$0xff]  ;;  %v527_v56 = vld [vmem:[%s2180_s23 + $0x9b8] sm:$0xff] }
  0x70   : > { %1927 = vmatpush3.bf16.msra.mxu0 %v1926_v21  ;;  %v1978_v21 = vpack.c.bf16 %v413_v13, %v412_v12  ;;  %v455_v12 = vld [vmem:[%s2180_s23 + $0x778] sm:$0xff]  ;;  %v488_v13 = vld [vmem:[%s2180_s23 + $0x880] sm:$0xff]  ;;  %v510_v62 = vld [vmem:[%s2180_s23 + $0x930] sm:$0xff] }
  0x71   : > { %1959 = vmatpush3.bf16.msra.mxu1 %v1958_v22  ;;  %1929 = vmatprep.subr.bf16.mxu0 %v1928_v23  ;;  %v2010_v22 = vpack.c.bf16 %v445_v16, %v444_v14  ;;  %v1980_v23 = vpack.c.bf16 %v431_v18, %v430_v17  ;;  %v489_v14 = vld [vmem:[%s2180_s23 + $0x888] sm:$0xff]  ;;  %v511_v0 = vld [vmem:[%s2180_s23 + $0x938] sm:$0xff] }
  0x72   : > { %1961 = vmatprep.subr.bf16.mxu1 %v1960_v27  ;;  %v2012_v27 = vpack.c.bf16 %v463_v20, %v462_v19  ;;  %v521_v16 = vld [vmem:[%s2180_s23 + $0x988] sm:$0xff]  ;;  %v2032_v19 = vpack.c.bf16 %v489_v14, %v488_v13  ;;  %v472_v20 = vld [vmem:[%s2180_s23 + $0x800] sm:$0xff]  ;;  %v498_v13 = vld [vmem:[%s2180_s23 + $0x8d0] sm:$0xff] }
  0x73   : > { %v499_v14 = vld [vmem:[%s2180_s23 + $0x8d8] sm:$0xff] }
  0x74   : > { %1931 = vmatpush3.bf16.msra.mxu0 %v1930_v33  ;;  %v1982_v33 = vpack.c.bf16 %v415_v25, %v414_v24  ;;  %v505_v24 = vld [vmem:[%s2180_s23 + $0x908] sm:$0xff]  ;;  %v490_v25 = vld [vmem:[%s2180_s23 + $0x890] sm:$0xff] }
  0x75   : > { %1963 = vmatpush3.bf16.msra.mxu1 %v1962_v34  ;;  %1933 = vmatprep.subr.bf16.mxu0 %v1932_v35  ;;  %v2014_v34 = vpack.c.bf16 %v447_v28, %v446_v26  ;;  %v1984_v35 = vpack.c.bf16 %v433_v30, %v432_v29  ;;  %v491_v26 = vld [vmem:[%s2180_s23 + $0x898] sm:$0xff]  ;;  %v206_v29 = vld [vmem:[%s2175_s19 + $0x60] sm:$0xff] }
  0x76   : > { %1965 = vmatprep.subr.bf16.mxu1 %v1964_v39  ;;  %v2016_v39 = vpack.c.bf16 %v465_v32, %v464_v31  ;;  %v523_v28 = vld [vmem:[%s2180_s23 + $0x998] sm:$0xff]  ;;  %v208_v31 = vld [vmem:[%s2175_s19 + $0x70] sm:$0xff] }
  0x78   : > { %1935 = vmatpush3.bf16.msra.mxu0 %v1934_v45  ;;  %v1986_v45 = vpack.c.bf16 %v417_v37, %v416_v36  ;;  %v506_v36 = vld [vmem:[%s2180_s23 + $0x910] sm:$0xff] }
  0x79   : > { %1967 = vmatpush3.bf16.msra.mxu1 %v1966_v46  ;;  %1969 = vmatprep.subr.bf16.mxu0 %v1968_v47  ;;  %v2018_v46 = vpack.c.bf16 %v449_v40, %v448_v38  ;;  %v1988_v47 = vpack.c.bf16 %v435_v42, %v434_v41  ;;  %v507_v38 = vld [vmem:[%s2180_s23 + $0x918] sm:$0xff]  ;;  %v493_v40 = vld [vmem:[%s2180_s23 + $0x8a8] sm:$0xff]  ;;  %v524_v41 = vld [vmem:[%s2180_s23 + $0x9a0] sm:$0xff] }
  0x7a   : > { %2001 = vmatprep.subr.bf16.mxu1 %v2000_v51  ;;  %v2020_v51 = vpack.c.bf16 %v467_v44, %v466_v43  ;;  %v525_v42 = vld [vmem:[%s2180_s23 + $0x9a8] sm:$0xff] }
  0x7b   : > { %913 = vmatmul.mubr.f32.vlgmr.msra.gmra.mrb[4].mxu0 %v202_v57  ;;  %v1990_v57 = vpack.c.bf16 %v419_v49, %v418_v48  ;;  %v211_v43 = vld [vmem:[%s2175_s19 + $0x88] sm:$0xff]  ;;  %v476_v48 = vld [vmem:[%s2180_s23 + $0x820] sm:$0xff] }
  0x7c   : > { %1971 = vmatpush3.bf16.msra.mxu0 %v1970_v58  ;;  %983 = vmatmul.mubr.f32.vlgmr.msra.gmra.mrb[4].mxu1 %v204_v59  ;;  %v2022_v58 = vpack.c.bf16 %v451_v52, %v450_v50  ;;  %v1992_v59 = vpack.c.bf16 %v437_v54, %v436_v53  ;;  %v477_v49 = vld [vmem:[%s2180_s23 + $0x828] sm:$0xff]  ;;  %v508_v50 = vld [vmem:[%s2180_s23 + $0x920] sm:$0xff]  ;;  %v494_v53 = vld [vmem:[%s2180_s23 + $0x8b0] sm:$0xff] }
  0x7d   : > { %2003 = vmatpush3.bf16.msra.mxu1 %v2002_v60  ;;  %1973 = vmatprep.subr.bf16.mxu0 %v1972_v61  ;;  %v420_v60 = vld [vmem:[%s2180_s23 + $0x660] sm:$0xff]  ;;  %v421_v61 = vld [vmem:[%s2180_s23 + $0x668] sm:$0xff]  ;;  %v495_v54 = vld [vmem:[%s2180_s23 + $0x8b8] sm:$0xff] }
  0x7e   : > { %2005 = vmatprep.subr.bf16.mxu1 %v2004_v1  ;;  %1052 = vmatprep.mubr.f32.mxu0 %v207_v7  ;;  %v438_v1 = vld [vmem:[%s2180_s23 + $0x6f0] sm:$0xff]  ;;  %v1994_v5 = vpack.c.bf16 %v421_v61, %v420_v60  ;;  %v509_v52 = vld [vmem:[%s2180_s23 + $0x928] sm:$0xff]  ;;  %v479_v61 = vld [vmem:[%s2180_s23 + $0x838] sm:$0xff] }
  0x7f   : > { %1122 = vmatprep.mubr.f32.mxu1 %v209_v9  ;;  %v1996_v7 = vpack.c.bf16 %v439_v2, %v438_v1  ;;  %v423_v9 = vld [vmem:[%s2180_s23 + $0x678] sm:$0xff]  ;;  %v478_v60 = vld [vmem:[%s2180_s23 + $0x830] sm:$0xff]  ;;  %v496_v1 = vld [vmem:[%s2180_s23 + $0x8c0] sm:$0xff] }
  0x80   : > { %1975 = vmatpush3.bf16.msra.mxu0 %v1974_v8  ;;  %v422_v8 = vld [vmem:[%s2180_s23 + $0x670] sm:$0xff]  ;;  %v497_v2 = vld [vmem:[%s2180_s23 + $0x8c8] sm:$0xff] }
  0x81   : > { %2007 = vmatpush3.bf16.msra.mxu1 %v2006_v10  ;;  %1977 = vmatprep.subr.bf16.mxu0 %v1976_v11  ;;  %v454_v10 = vld [vmem:[%s2180_s23 + $0x770] sm:$0xff]  ;;  %v2028_v11 = vpack.c.bf16 %v471_v4, %v470_v3  ;;  %v1998_v17 = vpack.c.bf16 %v423_v9, %v422_v8  ;;  %v528_v3 = vld [vmem:[%s2180_s23 + $0x9c0] sm:$0xff]  ;;  %v529_v4 = vld [vmem:[%s2180_s23 + $0x9c8] sm:$0xff] }
  0x82   : > { %2009 = vmatprep.subr.bf16.mxu1 %v2008_v15  ;;  %v520_v15 = vld [vmem:[%s2180_s23 + $0x980] sm:$0xff]  ;;  %v2030_v18 = vpack.c.bf16 %v455_v12, %v454_v10  ;;  %v481_v9 = vld [vmem:[%s2180_s23 + $0x848] sm:$0xff] }
  0x83   : > { %v480_v8 = vld [vmem:[%s2180_s23 + $0x840] sm:$0xff]  ;;  %v513_v12 = vld [vmem:[%s2180_s23 + $0x948] sm:$0xff] }
  0x84   : > { %1979 = vmatpush3.bf16.msra.mxu0 %v1978_v21  ;;  %v473_v21 = vld [vmem:[%s2180_s23 + $0x808] sm:$0xff]  ;;  %v512_v10 = vld [vmem:[%s2180_s23 + $0x940] sm:$0xff] }
  0x85   : > { %2011 = vmatpush3.bf16.msra.mxu1 %v2010_v22  ;;  %1981 = vmatprep.subr.bf16.mxu0 %v1980_v23  ;;  %v504_v22 = vld [vmem:[%s2180_s23 + $0x900] sm:$0xff]  ;;  %v2064_v23 = vpack.c.bf16 %v521_v16, %v520_v15  ;;  %v2034_v30 = vpack.c.bf16 %v473_v21, %v472_v20  ;;  %v530_v15 = vld [vmem:[%s2180_s23 + $0x9d0] sm:$0xff]  ;;  %v531_v16 = vld [vmem:[%s2180_s23 + $0x9d8] sm:$0xff] }
  0x86   : > { %2013 = vmatprep.subr.bf16.mxu1 %v2012_v27  ;;  %v522_v27 = vld [vmem:[%s2180_s23 + $0x990] sm:$0xff]  ;;  %v2066_v32 = vpack.c.bf16 %v505_v24, %v504_v22  ;;  %v483_v21 = vld [vmem:[%s2180_s23 + $0x858] sm:$0xff] }
  0x87   : > { %v2068_v37 = vpack.c.bf16 %v523_v28, %v522_v27  ;;  %v482_v20 = vld [vmem:[%s2180_s23 + $0x850] sm:$0xff]  ;;  %v515_v24 = vld [vmem:[%s2180_s23 + $0x958] sm:$0xff]  ;;  %v532_v27 = vld [vmem:[%s2180_s23 + $0x9e0] sm:$0xff] }
  0x88   : > { %1983 = vmatpush3.bf16.msra.mxu0 %v1982_v33  ;;  %v2036_v33 = vpack.c.bf16 %v491_v26, %v490_v25  ;;  %v514_v22 = vld [vmem:[%s2180_s23 + $0x950] sm:$0xff]  ;;  %v500_v25 = vld [vmem:[%s2180_s23 + $0x8e0] sm:$0xff]  ;;  %v501_v26 = vld [vmem:[%s2180_s23 + $0x8e8] sm:$0xff] }
  0x89   : > { %2015 = vmatpush3.bf16.msra.mxu1 %v2014_v34  ;;  %1985 = vmatprep.subr.bf16.mxu0 %v1984_v35  ;;  %v474_v34 = vld [vmem:[%s2180_s23 + $0x810] sm:$0xff]  ;;  %v475_v35 = vld [vmem:[%s2180_s23 + $0x818] sm:$0xff]  ;;  %v533_v28 = vld [vmem:[%s2180_s23 + $0x9e8] sm:$0xff] }
  0x8a   : > { %2017 = vmatprep.subr.bf16.mxu1 %v2016_v39  ;;  %v492_v39 = vld [vmem:[%s2180_s23 + $0x8a0] sm:$0xff]  ;;  %v2038_v44 = vpack.c.bf16 %v475_v35, %v474_v34  ;;  %v2088_v35 = vpack.c.bf16 %v533_v28, %v532_v27 }
  0x8b   : > { %v516_v34 = vld [vmem:[%s2180_s23 + $0x960] sm:$0xff] }
  0x8c   : > { %1987 = vmatpush3.bf16.msra.mxu0 %v1986_v45  ;;  %v213_v45 = vld [vmem:[%s2175_s19 + $0x98] sm:$0xff] }
  0x8d   : > { %2019 = vmatpush3.bf16.msra.mxu1 %v2018_v46  ;;  %1989 = vmatprep.subr.bf16.mxu0 %v1988_v47  ;;  %v2070_v46 = vpack.c.bf16 %v507_v38, %v506_v36  ;;  %v2040_v47 = vpack.c.bf16 %v493_v40, %v492_v39  ;;  %v517_v36 = vld [vmem:[%s2180_s23 + $0x968] sm:$0xff]  ;;  %v503_v38 = vld [vmem:[%s2180_s23 + $0x8f8] sm:$0xff]  ;;  %v534_v39 = vld [vmem:[%s2180_s23 + $0x9f0] sm:$0xff] }
  0x8e   : > { %2021 = vmatprep.subr.bf16.mxu1 %v2020_v51  ;;  %v2072_v51 = vpack.c.bf16 %v525_v42, %v524_v41  ;;  %v535_v40 = vld [vmem:[%s2180_s23 + $0x9f8] sm:$0xff]  ;;  %v2090_v42 = vpack.c.bf16 %v517_v36, %v516_v34 }
  0x8f   : > { %v551_v36 = vld [vmem:[%s2180_s23 + $0xa78] sm:$0xff] }
  0x90   : > { %1991 = vmatpush3.bf16.msra.mxu0 %v1990_v57  ;;  %v2042_v57 = vpack.c.bf16 %v477_v49, %v476_v48  ;;  %v519_v48 = vld [vmem:[%s2180_s23 + $0x978] sm:$0xff]  ;;  %v552_v49 = vld [vmem:[%s2180_s23 + $0xa80] sm:$0xff] }
  0x91   : > { %2023 = vmatpush3.bf16.msra.mxu1 %v2022_v58  ;;  %1993 = vmatprep.subr.bf16.mxu0 %v1992_v59  ;;  %v2074_v58 = vpack.c.bf16 %v509_v52, %v508_v50  ;;  %v2044_v59 = vpack.c.bf16 %v495_v54, %v494_v53  ;;  %v553_v50 = vld [vmem:[%s2180_s23 + $0xa88] sm:$0xff]  ;;  %v536_v54 = vld [vmem:[%s2180_s23 + $0xa00] sm:$0xff] }
  0x92   : > { %2025 = vmatprep.subr.bf16.mxu1 %v2024_v63  ;;  %v2076_v63 = vpack.c.bf16 %v527_v56, %v526_v55  ;;  %v2096_v53 = vpack.c.bf16 %v553_v50, %v552_v49  ;;  %v537_v55 = vld [vmem:[%s2180_s23 + $0xa08] sm:$0xff]  ;;  %v554_v56 = vld [vmem:[%s2180_s23 + $0xa90] sm:$0xff] }
  0x94   : > { %1995 = vmatpush3.bf16.msra.mxu0 %v1994_v5  ;;  %v2046_v5 = vpack.c.bf16 %v479_v61, %v478_v60  ;;  %v212_v60 = vld [vmem:[%s2175_s19 + $0x90] sm:$0xff] }
  0x95   : > { %2027 = vmatpush3.bf16.msra.mxu1 %v2026_v6  ;;  %1997 = vmatprep.subr.bf16.mxu0 %v1996_v7  ;;  %v2078_v6 = vpack.c.bf16 %v511_v0, %v510_v62  ;;  %v2048_v7 = vpack.c.bf16 %v497_v2, %v496_v1  ;;  %v538_v62 = vld [vmem:[%s2180_s23 + $0xa10] sm:$0xff]  ;;  %v556_v0 = vld [vmem:[%s2180_s23 + $0xaa0] sm:$0xff]  ;;  %v557_v1 = vld [vmem:[%s2180_s23 + $0xaa8] sm:$0xff] }
  0x96   : > { %2029 = vmatprep.subr.bf16.mxu1 %v2028_v11  ;;  %v2080_v11 = vpack.c.bf16 %v529_v4, %v528_v3  ;;  %v215_v2 = vld [vmem:[%s2175_s19 + $0xa8] sm:$0xff]  ;;  %v2104_v4 = vpack.c.bf16 %v557_v1, %v556_v0 }
  0x98   : > { %1999 = vmatpush3.bf16.msra.mxu0 %v1998_v17  ;;  %v2050_v17 = vpack.c.bf16 %v481_v9, %v480_v8  ;;  %v559_v8 = vld [vmem:[%s2180_s23 + $0xab8] sm:$0xff] }
  0x99   : > { %2031 = vmatpush3.bf16.msra.mxu1 %v2030_v18  ;;  %2033 = vmatprep.subr.bf16.mxu0 %v2032_v19  ;;  %v2082_v18 = vpack.c.bf16 %v513_v12, %v512_v10  ;;  %v2052_v19 = vpack.c.bf16 %v499_v14, %v498_v13  ;;  %v543_v12 = vld [vmem:[%s2180_s23 + $0xa38] sm:$0xff]  ;;  %v560_v13 = vld [vmem:[%s2180_s23 + $0xac0] sm:$0xff]  ;;  %v561_v14 = vld [vmem:[%s2180_s23 + $0xac8] sm:$0xff] }
  0x9a   : > { %2065 = vmatprep.subr.bf16.mxu1 %v2064_v23  ;;  %v2084_v23 = vpack.c.bf16 %v531_v16, %v530_v15  ;;  %v2112_v16 = vpack.c.bf16 %v561_v14, %v560_v13 }
  0x9b   : > { %1053 = vmatmul.mubr.f32.vlgmr.msra.gmra.mrb[6].mxu0 %v206_v29  ;;  %v2054_v29 = vpack.c.bf16 %v483_v21, %v482_v20  ;;  %v563_v20 = vld [vmem:[%s2180_s23 + $0xad8] sm:$0xff] }
  0x9c   : > { %2035 = vmatpush3.bf16.msra.mxu0 %v2034_v30  ;;  %1123 = vmatmul.mubr.f32.vlgmr.msra.gmra.mrb[6].mxu1 %v208_v31  ;;  %v2086_v30 = vpack.c.bf16 %v515_v24, %v514_v22  ;;  %v2056_v31 = vpack.c.bf16 %v501_v26, %v500_v25  ;;  %v547_v24 = vld [vmem:[%s2180_s23 + $0xa58] sm:$0xff]  ;;  %v564_v25 = vld [vmem:[%s2180_s23 + $0xae0] sm:$0xff]  ;;  %v565_v26 = vld [vmem:[%s2180_s23 + $0xae8] sm:$0xff] }
  0x9d   : > { %2067 = vmatpush3.bf16.msra.mxu1 %v2066_v32  ;;  %2037 = vmatprep.subr.bf16.mxu0 %v2036_v33  ;;  %v484_v32 = vld [vmem:[%s2180_s23 + $0x860] sm:$0xff]  ;;  %v485_v33 = vld [vmem:[%s2180_s23 + $0x868] sm:$0xff]  ;;  %v2120_v28 = vpack.c.bf16 %v565_v26, %v564_v25 }
  0x9e   : > { %2069 = vmatprep.subr.bf16.mxu1 %v2068_v37  ;;  %1192 = vmatprep.mubr.f32.mxu0 %v211_v43  ;;  %v502_v37 = vld [vmem:[%s2180_s23 + $0x8f0] sm:$0xff]  ;;  %v2058_v41 = vpack.c.bf16 %v485_v33, %v484_v32  ;;  %v567_v32 = vld [vmem:[%s2180_s23 + $0xaf8] sm:$0xff] }
  0x9f   : > { %1262 = vmatprep.mubr.f32.mxu1 %v213_v45  ;;  %v2060_v43 = vpack.c.bf16 %v503_v38, %v502_v37  ;;  %v487_v45 = vld [vmem:[%s2180_s23 + $0x878] sm:$0xff]  ;;  %v214_v38 = vld [vmem:[%s2175_s19 + $0xa0] sm:$0xff] }
  0xa0   : > { %2039 = vmatpush3.bf16.msra.mxu0 %v2038_v44  ;;  %v486_v44 = vld [vmem:[%s2180_s23 + $0x870] sm:$0xff] }
  0xa1   : > { %2071 = vmatpush3.bf16.msra.mxu1 %v2070_v46  ;;  %2041 = vmatprep.subr.bf16.mxu0 %v2040_v47  ;;  %v518_v46 = vld [vmem:[%s2180_s23 + $0x970] sm:$0xff]  ;;  %v2092_v47 = vpack.c.bf16 %v535_v40, %v534_v39 }
  0xa2   : > { %2073 = vmatprep.subr.bf16.mxu1 %v2072_v51  ;;  %v2062_v51 = vpack.c.bf16 %v487_v45, %v486_v44  ;;  %v2094_v52 = vpack.c.bf16 %v519_v48, %v518_v46 }
  0xa4   : > { %2043 = vmatpush3.bf16.msra.mxu0 %v2042_v57  ;;  %v555_v57 = vld [vmem:[%s2180_s23 + $0xa98] sm:$0xff] }
  0xa5   : > { %2075 = vmatpush3.bf16.msra.mxu1 %v2074_v58  ;;  %2045 = vmatprep.subr.bf16.mxu0 %v2044_v59  ;;  %v210_v58 = vld [vmem:[%s2175_s19 + $0x80] sm:$0xff]  ;;  %v2098_v59 = vpack.c.bf16 %v537_v55, %v536_v54  ;;  %v2100_v61 = vpack.c.bf16 %v555_v57, %v554_v56 }
  0xa6   : > { %2077 = vmatprep.subr.bf16.mxu1 %v2076_v63  ;;  %v539_v63 = vld [vmem:[%s2180_s23 + $0xa18] sm:$0xff] }
  0xa7   : > { %v2102_v3 = vpack.c.bf16 %v539_v63, %v538_v62 }
  0xa8   : > { %2047 = vmatpush3.bf16.msra.mxu0 %v2046_v5  ;;  %v540_v5 = vld [vmem:[%s2180_s23 + $0xa20] sm:$0xff] }
  0xa9   : > { %2079 = vmatpush3.bf16.msra.mxu1 %v2078_v6  ;;  %2049 = vmatprep.subr.bf16.mxu0 %v2048_v7  ;;  %v541_v6 = vld [vmem:[%s2180_s23 + $0xa28] sm:$0xff]  ;;  %v558_v7 = vld [vmem:[%s2180_s23 + $0xab0] sm:$0xff] }
  0xaa   : > { %2081 = vmatprep.subr.bf16.mxu1 %v2080_v11  ;;  %v2106_v9 = vpack.c.bf16 %v541_v6, %v540_v5  ;;  %v2108_v10 = vpack.c.bf16 %v559_v8, %v558_v7  ;;  %v542_v11 = vld [vmem:[%s2180_s23 + $0xa30] sm:$0xff] }
  0xab   : > { %v2110_v15 = vpack.c.bf16 %v543_v12, %v542_v11 }
  0xac   : > { %2051 = vmatpush3.bf16.msra.mxu0 %v2050_v17  ;;  %v544_v17 = vld [vmem:[%s2180_s23 + $0xa40] sm:$0xff] }
  0xad   : > { %2083 = vmatpush3.bf16.msra.mxu1 %v2082_v18  ;;  %2053 = vmatprep.subr.bf16.mxu0 %v2052_v19  ;;  %v545_v18 = vld [vmem:[%s2180_s23 + $0xa48] sm:$0xff]  ;;  %v562_v19 = vld [vmem:[%s2180_s23 + $0xad0] sm:$0xff] }
  0xae   : > { %2085 = vmatprep.subr.bf16.mxu1 %v2084_v23  ;;  %v2114_v21 = vpack.c.bf16 %v545_v18, %v544_v17  ;;  %v2116_v22 = vpack.c.bf16 %v563_v20, %v562_v19  ;;  %v546_v23 = vld [vmem:[%s2180_s23 + $0xa50] sm:$0xff]  ;;  %v193_v17 = vld [vmem:[%s2574_s3] sm:$0xff] }
  0xaf   : > { %v2118_v27 = vpack.c.bf16 %v547_v24, %v546_v23 }
  0xb0   : > { %2055 = vmatpush3.bf16.msra.mxu0 %v2054_v29  ;;  %v548_v29 = vld [vmem:[%s2180_s23 + $0xa60] sm:$0xff] }
  0xb1   : > { %2087 = vmatpush3.bf16.msra.mxu1 %v2086_v30  ;;  %2057 = vmatprep.subr.bf16.mxu0 %v2056_v31  ;;  %v549_v30 = vld [vmem:[%s2180_s23 + $0xa68] sm:$0xff]  ;;  %v566_v31 = vld [vmem:[%s2180_s23 + $0xaf0] sm:$0xff] }
  0xb2   : > { %2089 = vmatprep.subr.bf16.mxu1 %v2088_v35  ;;  %v2122_v33 = vpack.c.bf16 %v549_v30, %v548_v29  ;;  %v2124_v34 = vpack.c.bf16 %v567_v32, %v566_v31  ;;  %v550_v35 = vld [vmem:[%s2180_s23 + $0xa70] sm:$0xff] }
  0xb3   : > { %v2126_v37 = vpack.c.bf16 %v551_v36, %v550_v35 }
  0xb4   : > { %2059 = vmatpush3.bf16.msra.mxu0 %v2058_v41 }
  0xb5   : > { %2091 = vmatpush3.bf16.msra.mxu1 %v2090_v42  ;;  %2061 = vmatprep.subr.bf16.mxu0 %v2060_v43 }
  0xb6   : > { %2093 = vmatprep.subr.bf16.mxu1 %v2092_v47 }
  0xb8   : > { %2063 = vmatpush3.bf16.msra.mxu0 %v2062_v51 }
  0xb9   : > { %2095 = vmatpush3.bf16.msra.mxu1 %v2094_v52  ;;  %2097 = vmatprep.subr.bf16.mxu0 %v2096_v53 }
  0xbb   : > { %1193 = vmatmul.mubr.f32.vlgmr.msra.gmra.mrb[8].mxu0 %v210_v58 }
  0xbc   : > { %2099 = vmatpush3.bf16.msra.mxu0 %v2098_v59  ;;  %1263 = vmatmul.mubr.f32.vlgmr.msra.gmra.mrb[8].mxu1 %v212_v60 }
  0xbd   : > { %2101 = vmatprep.subr.bf16.mxu0 %v2100_v61  ;;  %1332 = vmatprep.mubr.f32.mxu0 %v215_v2 }
  0xc0   : > { %2103 = vmatpush3.bf16.msra.mxu0 %v2102_v3 }
  0xc1   : > { %2105 = vmatprep.subr.bf16.mxu0 %v2104_v4 }
  0xc4   : > { %2107 = vmatpush3.bf16.msra.mxu0 %v2106_v9 }
  0xc5   : > { %2109 = vmatprep.subr.bf16.mxu0 %v2108_v10 }
  0xc8   : > { %2111 = vmatpush3.bf16.msra.mxu0 %v2110_v15 }
  0xc9   : > { %2113 = vmatprep.subr.bf16.mxu0 %v2112_v16 }
  0xcc   : > { %2115 = vmatpush3.bf16.msra.mxu0 %v2114_v21 }
  0xcd   : > { %2117 = vmatprep.subr.bf16.mxu0 %v2116_v22 }
  0xd0   : > { %2119 = vmatpush3.bf16.msra.mxu0 %v2118_v27 }
  0xd1   : > { %2121 = vmatprep.subr.bf16.mxu0 %v2120_v28 }
  0xd4   : > { %2123 = vmatpush3.bf16.msra.mxu0 %v2122_v33 }
  0xd5   : > { %2125 = vmatprep.subr.bf16.mxu0 %v2124_v34 }
  0xd8   : > { %2127 = vmatpush3.bf16.msra.mxu0 %v2126_v37 }
  0xdb   : > { %1333 = vmatmul.mubr.f32.vlgmr.msra.gmra.mrb[10].mxu0 %v214_v38 }
 0x10e   : > { %v1423_v39 = vpop.f32.mrb[0].mxu0 }
 0x10f   : > { %v1458_v40 = vpop.f32.mrb[0].mxu1  ;;  %v1424_v41 = vpop.f32.mrb[1].mxu0 }
 0x110   : > { %v1425_v42 = vadd.f32 %v1424_v41, %v1423_v39  ;;  %v1459_v43 = vpop.f32.mrb[1].mxu1 }
 0x111   : > { %v1460_v44 = vadd.f32 %v1459_v43, %v1458_v40 }
 0x113   : > { %v705_v45 = vadd.f32 %v1460_v44, %v1425_v42 }
 0x12e   : > { %v1493_v46 = vpop.f32.mrb[2].mxu0 }
 0x12f   : > { %v1494_v47 = vpop.f32.mrb[3].mxu0  ;;  %v1528_v48 = vpop.f32.mrb[2].mxu1 }
 0x130   : > { %v1495_v49 = vadd.f32 %v1494_v47, %v1493_v46  ;;  %v1529_v50 = vpop.f32.mrb[3].mxu1 }
 0x131   : > { %v1530_v51 = vadd.f32 %v1529_v50, %v1528_v48 }
 0x132   : > { %v775_v52 = vadd.f32 %v1495_v49, %v705_v45 }
 0x134   : > { %v845_v53 = vadd.f32 %v1530_v51, %v775_v52 }
 0x14e   : > { %v1563_v54 = vpop.f32.mrb[4].mxu0 }
 0x14f   : > { %v1564_v55 = vpop.f32.mrb[5].mxu0  ;;  %v1598_v56 = vpop.f32.mrb[4].mxu1 }
 0x150   : > { %v1565_v57 = vadd.f32 %v1564_v55, %v1563_v54  ;;  %v1599_v58 = vpop.f32.mrb[5].mxu1 }
 0x151   : > { %v1600_v59 = vadd.f32 %v1599_v58, %v1598_v56 }
 0x152   : > { %v915_v60 = vadd.f32 %v1565_v57, %v845_v53 }
 0x154   : > { %v985_v61 = vadd.f32 %v1600_v59, %v915_v60 }
 0x16e   : > { %v1633_v62 = vpop.f32.mrb[6].mxu0 }
 0x16f   : > { %v1634_v63 = vpop.f32.mrb[7].mxu0  ;;  %v1668_v0 = vpop.f32.mrb[6].mxu1 }
 0x170   : > { %v1635_v1 = vadd.f32 %v1634_v63, %v1633_v62  ;;  %v1669_v2 = vpop.f32.mrb[7].mxu1 }
 0x171   : > { %v1670_v3 = vadd.f32 %v1669_v2, %v1668_v0 }
 0x172   : > { %v1055_v4 = vadd.f32 %v1635_v1, %v985_v61 }
 0x174   : > { %v1125_v5 = vadd.f32 %v1670_v3, %v1055_v4 }
 0x18e   : > { %v1703_v6 = vpop.f32.mrb[8].mxu0 }
 0x18f   : > { %v1704_v7 = vpop.f32.mrb[9].mxu0  ;;  %v1738_v8 = vpop.f32.mrb[8].mxu1 }
 0x190   : > { %v1705_v9 = vadd.f32 %v1704_v7, %v1703_v6  ;;  %v1739_v10 = vpop.f32.mrb[9].mxu1 }
 0x191   : > { %v1740_v11 = vadd.f32 %v1739_v10, %v1738_v8 }
 0x192   : > { %v1195_v12 = vadd.f32 %v1705_v9, %v1125_v5 }
 0x194   : > { %v1265_v13 = vadd.f32 %v1740_v11, %v1195_v12 }
 0x1ae   : > { %v1773_v14 = vpop.f32.mrb[10].mxu0 }
 0x1af   : > { %v1774_v15 = vpop.f32.mrb[11].mxu0 }
 0x1b0   : > { %v1775_v16 = vadd.f32 %v1774_v15, %v1773_v14 }
 0x1b2   : > { %v1335_v18 = vadd.f32 %v1775_v16, %v1265_v13 }
 0x1b4   : > { %v1338_v19 = vadd.f32 %v1335_v18, %v193_v17 }
 0x1b6   : > { %1340 = vst.msk [vmem:[%s2574_s3] sm:$0xff] %vm1339_vm1, %v1338_v19 }
 0x1b7 PF: > { %s13_s12 = sadd.s32 1, %s2142_s12  }
 0x1b8   : > { %p10_p6 = scmp.ge.s32.totalorder %s13_s12, 13  }
 0x1ba   :  { %12 = sbr.rel (!%p10_p6) target bundleno = 1 (0x1), region = 65 }

</bundles_post_ra>
